<compile_context>
chip_gen: v6e
topology: v6e:2x2x1
jax: 0.10.0
libtpu: 0.0.40
codegen_flags: <defaults>
</compile_context>

<pallas_src>
import jax
import jax.numpy as jnp
from jax import lax
from jax.experimental import pallas as pl
from jax.experimental.pallas import tpu as pltpu

IN_CH = 1
EEG_CH = 22          # spatial "height" of the input
T_IN = 1000          # module's native temporal length (gives 768 flat features)
C1 = 8               # conv1 output channels
C2 = 32              # conv2 / conv3 channels
K1 = 32              # conv1 temporal kernel
K3 = 16              # conv3 temporal kernel
POOL = 6
FC1_OUT, FC2_OUT, OUT_DIM = 64, 32, 4
BN_EPS = 1e-5


def _elu(v):
    return jnp.where(v > 0, v, jnp.exp(v) - 1.0)


def _conv_dims(T):
    T1 = T - (K1 - 1)            # time after fused conv1+conv2   (969)
    L1 = T1 // POOL              # after pool1                    (161)
    T2 = L1 - (K3 - 1)           # after conv3                    (146)
    L2 = T2 // POOL              # after pool2                    (24)
    return T1, L1, T2, L2


# --------------------------------- kernel ------------------------------------

def _ultimate_convnet_kernel(x2_ref, wf_ref, bf_ref, p1_ref, w3_ref, b3_ref,
                             p2_ref, w1_ref, b1_ref, w2_ref, b2_ref,
                             w3fc_ref, b3fc_ref, out_ref):
    """Whole forward pass for one sample; grid=(B,) is 'parallel'."""
    T2 = p2_ref.shape[1]              # 146
    L2 = p2_ref.shape[0]              # 24
    n_tap3 = w3_ref.shape[0] // C2    # 16

    # conv1 + BN1 + conv2 + BN2 fused: ONE high-K bf16 matmul on the im2col LHS.
    acc = jnp.dot(x2_ref[...], wf_ref[...],
                  preferred_element_type=jnp.float32)            # (969, 32) f32
    a1 = _elu(acc + bf_ref[...])

    # AvgPool1 as a 0/1 sum-pool matmul (1/6 folded into conv3 weights).
    p1 = jnp.dot(p1_ref[...], a1.astype(jnp.bfloat16),
                 preferred_element_type=jnp.float32)             # (161, 32)

    # conv3 + BN3 (+ pool1's 1/6): in-kernel im2col (taps concatenated on the
    # lane axis) -> single (146, 512) @ (512, 32) dot.
    p1b = p1.astype(jnp.bfloat16)
    x3 = jnp.concatenate([p1b[k:k + T2, :] for k in range(n_tap3)], axis=1)
    a3 = _elu(jnp.dot(x3, w3_ref[...],
                      preferred_element_type=jnp.float32) + b3_ref[...])  # (146, 32)

    # AvgPool2 as a sum-pool matmul (1/6 folded into the FC1 weight).
    p2 = jnp.dot(p2_ref[...], a3.astype(jnp.bfloat16),
                 preferred_element_type=jnp.float32)             # (24, 32)

    # Flatten (torch channel-major order folded into W1fc) + FC1: one K=768 dot.
    row = jnp.concatenate([p2[t:t + 1, :] for t in range(L2)], axis=1)   # (1, 768)
    h = _elu(jnp.dot(row, w1_ref[...], preferred_element_type=jnp.float32)
             + b1_ref[...])                                      # (1, 64)

    # FC2 (BN4 folded into weights/bias), FC3 (BN5 folded).
    h = _elu(jnp.dot(h, w2_ref[...], preferred_element_type=jnp.float32)
             + b2_ref[...])                                      # (1, 32)
    out_ref[...] = (jnp.dot(h, w3fc_ref[...], preferred_element_type=jnp.float32)
                    + b3fc_ref[...])                             # (1, 4)


# -------------------------------- wrapper -------------------------------------

def _const_spec(a):
    nd = a.ndim
    return pl.BlockSpec(a.shape, lambda b, _n=nd: (0,) * _n)


@jax.jit
def ultimate_convnet_forward(kp, x):
    """x: (B, 1, 22, T) float32 -> (B, 4) float32 (eval-mode forward)."""
    B, _, n_ch, t_len = x.shape
    T1 = t_len - (K1 - 1)

    # Wrapper-side im2col for the fused conv1/conv2 window (bf16, ~1.4 MB/sample):
    #   X2[b, t, k*22 + h] = x[b, 0, h, t + k]
    xb = x[:, 0, :, :].astype(jnp.bfloat16)                         # (B, 22, T)
    cols = jnp.stack([xb[:, :, k:k + T1] for k in range(K1)], axis=1)   # (B,K1,22,T1)
    x2 = jnp.transpose(cols, (0, 3, 1, 2)).reshape(B, T1, K1 * n_ch)    # (B,T1,704)

    out = pl.pallas_call(
        _ultimate_convnet_kernel,
        out_shape=jax.ShapeDtypeStruct((B, 1, OUT_DIM), jnp.float32),
        grid=(B,),
        in_specs=[
            pl.BlockSpec((None, T1, K1 * n_ch), lambda b: (b, 0, 0)),
            _const_spec(kp["Wf"]), _const_spec(kp["bf"]),
            _const_spec(kp["P1"]),
            _const_spec(kp["W3f"]), _const_spec(kp["b3f"]),
            _const_spec(kp["P2"]),
            _const_spec(kp["W1fc"]), _const_spec(kp["b1fc"]),
            _const_spec(kp["W2fc"]), _const_spec(kp["b2fc"]),
            _const_spec(kp["W3fc"]), _const_spec(kp["b3fc"]),
        ],
        out_specs=pl.BlockSpec((None, 1, OUT_DIM), lambda b: (b, 0, 0)),
        compiler_params=pltpu.CompilerParams(
            dimension_semantics=("parallel",),
            vmem_limit_bytes=32 * 1024 * 1024),
    )(x2, kp["Wf"], kp["bf"], kp["P1"], kp["W3f"], kp["b3f"], kp["P2"],
      kp["W1fc"], kp["b1fc"], kp["W2fc"], kp["b2fc"], kp["W3fc"], kp["b3fc"])
    return out.reshape(B, OUT_DIM)


# ------------------------- parameter init / folding ---------------------------

def init_raw_params(key, T):
    """PyTorch-shaped parameters (conv/linear weights, biases, BN stats)."""
    _, _, _, L2 = _conv_dims(T)
    feat = C2 * L2                       # 768 for T=1000

    def nrm(k, shape, fan):
        return ((2.0 / fan) ** 0.5) * jax.random.normal(k, shape, jnp.float32)

    def bn(k, n):
        k1, k2, k3, k4 = jax.random.split(k, 4)
        return (jax.random.uniform(k1, (n,), jnp.float32, 0.8, 1.2),   # gamma
                0.1 * jax.random.normal(k2, (n,), jnp.float32),        # beta
                0.1 * jax.random.normal(k3, (n,), jnp.float32),        # run_mean
                jax.random.uniform(k4, (n,), jnp.float32, 0.5, 1.5))   # run_var

    ks = jax.random.split(key, 17)
    return {
        "w1": nrm(ks[0], (C1, IN_CH, 1, K1), IN_CH * K1),
        "b1": 0.05 * jax.random.normal(ks[1], (C1,), jnp.float32),
        "bn1": bn(ks[2], C1),
        "w2": nrm(ks[3], (C2, C1, EEG_CH, 1), C1 * EEG_CH),
        "b2": 0.05 * jax.random.normal(ks[4], (C2,), jnp.float32),
        "bn2": bn(ks[5], C2),
        "w3": nrm(ks[6], (C2, C2, 1, K3), C2 * K3),
        "b3": 0.05 * jax.random.normal(ks[7], (C2,), jnp.float32),
        "bn3": bn(ks[8], C2),
        "wfc1": nrm(ks[9], (FC1_OUT, feat), feat),
        "bfc1": 0.05 * jax.random.normal(ks[10], (FC1_OUT,), jnp.float32),
        "bn4": bn(ks[11], FC1_OUT),
        "wfc2": nrm(ks[12], (FC2_OUT, FC1_OUT), FC1_OUT),
        "bfc2": 0.05 * jax.random.normal(ks[13], (FC2_OUT,), jnp.float32),
        "bn5": bn(ks[14], FC2_OUT),
        "wfc3": nrm(ks[15], (OUT_DIM, FC2_OUT), FC2_OUT),
        "bfc3": 0.05 * jax.random.normal(ks[16], (OUT_DIM,), jnp.float32),
    }


def _bn_fold(p):
    g, b, m, v = p
    s = g / jnp.sqrt(v + BN_EPS)
    return s, b - m * s


def prepare_kernel_params(raw, T):
    """Fold eval-mode BNs, pooling scales and flatten ordering into weights."""
    hp = lax.Precision.HIGHEST
    T1, L1, T2, L2 = _conv_dims(T)

    s1, sh1 = _bn_fold(raw["bn1"])
    s2, sh2 = _bn_fold(raw["bn2"])
    s3, sh3 = _bn_fold(raw["bn3"])
    s4, sh4 = _bn_fold(raw["bn4"])
    s5, sh5 = _bn_fold(raw["bn5"])

    # conv1 (+BN1) fused into conv2 (+BN2): effective (K1, 22, 32) window,
    # flattened to (704, 32) with row index k*22 + h (matches X2 columns).
    w1 = raw["w1"][:, 0, 0, :] * s1[:, None]                 # (8, K1)
    b1e = s1 * raw["b1"] + sh1                               # (8,)
    w2 = raw["w2"][:, :, :, 0]                               # (32, 8, 22)
    Wf = jnp.einsum("o,och,ck->kho", s2, w2, w1, precision=hp)      # (K1, 22, 32)
    bf = (jnp.einsum("o,och,c->o", s2, w2, b1e, precision=hp)
          + s2 * raw["b2"] + sh2)                            # (32,)
    Wf_flat = Wf.reshape(K1 * EEG_CH, C2).astype(jnp.bfloat16)

    # conv3 (+BN3) with pool1's 1/6 folded in; rows k*32 + c (matches x3 concat).
    W3eff = jnp.einsum("o,ock->kco", s3, raw["w3"][:, :, 0, :],
                       precision=hp) / POOL                  # (K3, 32, 32)
    W3_flat = W3eff.reshape(K3 * C2, C2).astype(jnp.bfloat16)
    b3f = s3 * raw["b3"] + sh3

    # 0/1 sum-pool matrices (exact in bf16); the 1/6 lives in W3_flat / W1fc.
    def pool_sum_mat(n_out, n_in):
        rows = jnp.arange(n_out)[:, None]
        cols = jnp.arange(n_in)[None, :]
        return (cols // POOL == rows).astype(jnp.bfloat16)

    P1 = pool_sum_mat(L1, T1)                                # (161, 969)
    P2 = pool_sum_mat(L2, T2)                                # (24, 146)

    # FC1: torch channel-major flatten + pool2's 1/6 folded in.
    #   W1fc[t*32 + c, j] = wfc1[j, c*L2 + t] / 6
    W1fc = (raw["wfc1"].reshape(FC1_OUT, C2, L2).transpose(2, 1, 0) / POOL
            ).reshape(L2 * C2, FC1_OUT)                      # (768, 64) f32

    # FC2 with BN4 folded, FC3 with BN5 folded (BN applied to the FC input).
    W2fc = (raw["wfc2"] * s4[None, :]).T                     # (64, 32)
    b2fc = jnp.dot(raw["wfc2"], sh4, precision=hp) + raw["bfc2"]    # (32,)
    W3fc = (raw["wfc3"] * s5[None, :]).T                     # (32, 4)
    b3fc = jnp.dot(raw["wfc3"], sh5, precision=hp) + raw["bfc3"]    # (4,)

    return {
        "Wf": Wf_flat, "bf": bf[None, :].astype(jnp.float32), "P1": P1,
        "W3f": W3_flat, "b3f": b3f[None, :].astype(jnp.float32), "P2": P2,
        "W1fc": W1fc.astype(jnp.float32), "b1fc": raw["bfc1"][None, :],
        "W2fc": W2fc.astype(jnp.float32), "b2fc": b2fc[None, :],
        "W3fc": W3fc.astype(jnp.float32), "b3fc": b3fc[None, :],
    }


# -------------------------------- reference -----------------------------------

def reference_forward(raw, x):
    """Pure-JAX (XLA) eval-mode f32 reference of the original torch module."""
    hp = lax.Precision.HIGHEST
    dn = ("NCHW", "OIHW", "NCHW")

    def bn(y, p, axis):
        g, b, m, v = p
        s = g / jnp.sqrt(v + BN_EPS)
        shape = [1] * y.ndim
        shape[axis] = -1
        return y * s.reshape(shape) + (b - m * s).reshape(shape)

    def conv(y, w, b):
        y = lax.conv_general_dilated(y, w, (1, 1), "VALID",
                                     dimension_numbers=dn, precision=hp)
        return y + b.reshape(1, -1, 1, 1)

    def pool_w(y):   # AvgPool2d((1, 6), stride (1, 6))
        B, C, H, W = y.shape
        n = W // POOL
        return y[..., :n * POOL].reshape(B, C, H, n, POOL).mean(-1)

    y = conv(x, raw["w1"], raw["b1"])
    y = bn(y, raw["bn1"], 1)
    y = conv(y, raw["w2"], raw["b2"])
    y = _elu(bn(y, raw["bn2"], 1))
    y = pool_w(y)                              # Dropout: identity (eval)
    y = conv(y, raw["w3"], raw["b3"])
    y = _elu(bn(y, raw["bn3"], 1))
    y = pool_w(y)
    y = y.reshape(y.shape[0], -1)              # Flatten (channel-major)

    h = jnp.dot(y, raw["wfc1"].T, precision=hp) + raw["bfc1"]
    h = bn(_elu(h), raw["bn4"], 1)
    h = jnp.dot(h, raw["wfc2"].T, precision=hp) + raw["bfc2"]
    h = bn(_elu(h), raw["bn5"], 1)
    return jnp.dot(h, raw["wfc3"].T, precision=hp) + raw["bfc3"]


# ---------------------------------- main ---------------------------------------

if __name__ == "__main__":
    key = jax.random.PRNGKey(0)
    pkey, xkey = jax.random.split(key)

    B, T = 2, T_IN                              # (2, 1, 22, 1000): module's shape
    raw = init_raw_params(pkey, T)
    kp = prepare_kernel_params(raw, T)
    x = jax.random.normal(xkey, (B, IN_CH, EEG_CH, T), dtype=jnp.float32)

    out = jax.block_until_ready(ultimate_convnet_forward(kp, x))
    assert out.shape == (B, OUT_DIM), out.shape

    ref = jax.block_until_ready(reference_forward(raw, x))
    # bf16 MXU operands -> tolerance loosened vs. the pure-f32 reference.
    assert jnp.allclose(out, ref, atol=5e-2, rtol=5e-2), (out, ref)

    print("KERNEL_OK")
</pallas_src>

<mosaic_0001>
module attributes {stable_mosaic.version = 11 : i64} {
  func.func @_ultimate_convnet_kernel(%arg0: i32, %arg1: memref<1x969x704xbf16, #tpu.memory_space<vmem>>, %arg2: memref<704x32xbf16, #tpu.memory_space<vmem>>, %arg3: memref<1x32xf32, #tpu.memory_space<vmem>>, %arg4: memref<161x969xbf16, #tpu.memory_space<vmem>>, %arg5: memref<512x32xbf16, #tpu.memory_space<vmem>>, %arg6: memref<1x32xf32, #tpu.memory_space<vmem>>, %arg7: memref<24x146xbf16, #tpu.memory_space<vmem>>, %arg8: memref<768x64xf32, #tpu.memory_space<vmem>>, %arg9: memref<1x64xf32, #tpu.memory_space<vmem>>, %arg10: memref<64x32xf32, #tpu.memory_space<vmem>>, %arg11: memref<1x32xf32, #tpu.memory_space<vmem>>, %arg12: memref<32x4xf32, #tpu.memory_space<vmem>>, %arg13: memref<1x4xf32, #tpu.memory_space<vmem>>, %arg14: memref<1x1x4xf32, #tpu.memory_space<vmem>>) attributes {dimension_semantics = [#tpu.dimension_semantics<parallel>], iteration_bounds = array<i64: 2>, scalar_prefetch = 0 : i64, scratch_operands = 0 : i64, tpu.core_type = #tpu.core_type<tc>, window_params = [{transform_indices = @transform_0, window_bounds = array<i64: 1, 969, 704>}, {pipeline_mode = #tpu.pipeline_mode<synchronous>, transform_indices = @transform_1, window_bounds = array<i64: 704, 32>}, {pipeline_mode = #tpu.pipeline_mode<synchronous>, transform_indices = @transform_2, window_bounds = array<i64: 1, 32>}, {pipeline_mode = #tpu.pipeline_mode<synchronous>, transform_indices = @transform_3, window_bounds = array<i64: 161, 969>}, {pipeline_mode = #tpu.pipeline_mode<synchronous>, transform_indices = @transform_4, window_bounds = array<i64: 512, 32>}, {pipeline_mode = #tpu.pipeline_mode<synchronous>, transform_indices = @transform_5, window_bounds = array<i64: 1, 32>}, {pipeline_mode = #tpu.pipeline_mode<synchronous>, transform_indices = @transform_6, window_bounds = array<i64: 24, 146>}, {pipeline_mode = #tpu.pipeline_mode<synchronous>, transform_indices = @transform_7, window_bounds = array<i64: 768, 64>}, {pipeline_mode = #tpu.pipeline_mode<synchronous>, transform_indices = @transform_8, window_bounds = array<i64: 1, 64>}, {pipeline_mode = #tpu.pipeline_mode<synchronous>, transform_indices = @transform_9, window_bounds = array<i64: 64, 32>}, {pipeline_mode = #tpu.pipeline_mode<synchronous>, transform_indices = @transform_10, window_bounds = array<i64: 1, 32>}, {pipeline_mode = #tpu.pipeline_mode<synchronous>, transform_indices = @transform_11, window_bounds = array<i64: 32, 4>}, {pipeline_mode = #tpu.pipeline_mode<synchronous>, transform_indices = @transform_12, window_bounds = array<i64: 1, 4>}, {transform_indices = @transform_13, window_bounds = array<i64: 1, 1, 4>}]} {
    %c0 = arith.constant 0 : index
    %c0_0 = arith.constant 0 : index
    %c0_1 = arith.constant 0 : index
    %0 = vector.load %arg1[%c0, %c0_0, %c0_1] : memref<1x969x704xbf16, #tpu.memory_space<vmem>>, vector<1x969x704xbf16>
    %1 = vector.shape_cast %0 : vector<1x969x704xbf16> to vector<969x704xbf16>
    %c0_2 = arith.constant 0 : index
    %c0_3 = arith.constant 0 : index
    %2 = vector.load %arg2[%c0_2, %c0_3] : memref<704x32xbf16, #tpu.memory_space<vmem>>, vector<704x32xbf16>
    %cst = arith.constant dense<0.000000e+00> : vector<969x32xf32>
    %3 = tpu.matmul %1, %2, %cst {dimension_numbers = #tpu.dot_dimension_numbers<[1], [0], [0], [1], [0, 0, 1, 1], [], []>} : vector<969x704xbf16>, vector<704x32xbf16>, vector<969x32xf32> -> vector<969x32xf32>
    %c0_4 = arith.constant 0 : index
    %c0_5 = arith.constant 0 : index
    %4 = vector.load %arg3[%c0_4, %c0_5] : memref<1x32xf32, #tpu.memory_space<vmem>>, vector<1x32xf32>
    %5 = vector.broadcast %4 : vector<1x32xf32> to vector<969x32xf32>
    %6 = arith.addf %3, %5 : vector<969x32xf32>
    %cst_6 = arith.constant 0.000000e+00 : f32
    %7 = vector.broadcast %cst_6 : f32 to vector<969x32xf32>
    %8 = arith.cmpf ogt, %6, %7 : vector<969x32xf32>
    %9 = math.exp %6 : vector<969x32xf32>
    %cst_7 = arith.constant 1.000000e+00 : f32
    %10 = vector.broadcast %cst_7 : f32 to vector<969x32xf32>
    %11 = arith.subf %9, %10 : vector<969x32xf32>
    %12 = arith.select %8, %6, %11 : vector<969x32xi1>, vector<969x32xf32>
    %c0_8 = arith.constant 0 : index
    %c0_9 = arith.constant 0 : index
    %13 = vector.load %arg4[%c0_8, %c0_9] : memref<161x969xbf16, #tpu.memory_space<vmem>>, vector<161x969xbf16>
    %14 = arith.truncf %12 : vector<969x32xf32> to vector<969x32xbf16>
    %cst_10 = arith.constant dense<0.000000e+00> : vector<161x32xf32>
    %15 = tpu.matmul %13, %14, %cst_10 {dimension_numbers = #tpu.dot_dimension_numbers<[1], [0], [0], [1], [0, 0, 1, 1], [], []>} : vector<161x969xbf16>, vector<969x32xbf16>, vector<161x32xf32> -> vector<161x32xf32>
    %16 = arith.truncf %15 : vector<161x32xf32> to vector<161x32xbf16>
    %17 = vector.extract_strided_slice %16 {offsets = [0, 0], sizes = [146, 32], strides = [1, 1]} : vector<161x32xbf16> to vector<146x32xbf16>
    %18 = vector.extract_strided_slice %16 {offsets = [1, 0], sizes = [146, 32], strides = [1, 1]} : vector<161x32xbf16> to vector<146x32xbf16>
    %19 = vector.extract_strided_slice %16 {offsets = [2, 0], sizes = [146, 32], strides = [1, 1]} : vector<161x32xbf16> to vector<146x32xbf16>
    %20 = vector.extract_strided_slice %16 {offsets = [3, 0], sizes = [146, 32], strides = [1, 1]} : vector<161x32xbf16> to vector<146x32xbf16>
    %21 = vector.extract_strided_slice %16 {offsets = [4, 0], sizes = [146, 32], strides = [1, 1]} : vector<161x32xbf16> to vector<146x32xbf16>
    %22 = vector.extract_strided_slice %16 {offsets = [5, 0], sizes = [146, 32], strides = [1, 1]} : vector<161x32xbf16> to vector<146x32xbf16>
    %23 = vector.extract_strided_slice %16 {offsets = [6, 0], sizes = [146, 32], strides = [1, 1]} : vector<161x32xbf16> to vector<146x32xbf16>
    %24 = vector.extract_strided_slice %16 {offsets = [7, 0], sizes = [146, 32], strides = [1, 1]} : vector<161x32xbf16> to vector<146x32xbf16>
    %25 = vector.extract_strided_slice %16 {offsets = [8, 0], sizes = [146, 32], strides = [1, 1]} : vector<161x32xbf16> to vector<146x32xbf16>
    %26 = vector.extract_strided_slice %16 {offsets = [9, 0], sizes = [146, 32], strides = [1, 1]} : vector<161x32xbf16> to vector<146x32xbf16>
    %27 = vector.extract_strided_slice %16 {offsets = [10, 0], sizes = [146, 32], strides = [1, 1]} : vector<161x32xbf16> to vector<146x32xbf16>
    %28 = vector.extract_strided_slice %16 {offsets = [11, 0], sizes = [146, 32], strides = [1, 1]} : vector<161x32xbf16> to vector<146x32xbf16>
    %29 = vector.extract_strided_slice %16 {offsets = [12, 0], sizes = [146, 32], strides = [1, 1]} : vector<161x32xbf16> to vector<146x32xbf16>
    %30 = vector.extract_strided_slice %16 {offsets = [13, 0], sizes = [146, 32], strides = [1, 1]} : vector<161x32xbf16> to vector<146x32xbf16>
    %31 = vector.extract_strided_slice %16 {offsets = [14, 0], sizes = [146, 32], strides = [1, 1]} : vector<161x32xbf16> to vector<146x32xbf16>
    %32 = vector.extract_strided_slice %16 {offsets = [15, 0], sizes = [146, 32], strides = [1, 1]} : vector<161x32xbf16> to vector<146x32xbf16>
    %33 = tpu.concatenate %17, %18, %19, %20, %21, %22, %23, %24, %25, %26, %27, %28, %29, %30, %31, %32 in 1 : vector<146x32xbf16>, vector<146x32xbf16>, vector<146x32xbf16>, vector<146x32xbf16>, vector<146x32xbf16>, vector<146x32xbf16>, vector<146x32xbf16>, vector<146x32xbf16>, vector<146x32xbf16>, vector<146x32xbf16>, vector<146x32xbf16>, vector<146x32xbf16>, vector<146x32xbf16>, vector<146x32xbf16>, vector<146x32xbf16>, vector<146x32xbf16> -> vector<146x512xbf16>
    %c0_11 = arith.constant 0 : index
    %c0_12 = arith.constant 0 : index
    %34 = vector.load %arg5[%c0_11, %c0_12] : memref<512x32xbf16, #tpu.memory_space<vmem>>, vector<512x32xbf16>
    %cst_13 = arith.constant dense<0.000000e+00> : vector<146x32xf32>
    %35 = tpu.matmul %33, %34, %cst_13 {dimension_numbers = #tpu.dot_dimension_numbers<[1], [0], [0], [1], [0, 0, 1, 1], [], []>} : vector<146x512xbf16>, vector<512x32xbf16>, vector<146x32xf32> -> vector<146x32xf32>
    %c0_14 = arith.constant 0 : index
    %c0_15 = arith.constant 0 : index
    %36 = vector.load %arg6[%c0_14, %c0_15] : memref<1x32xf32, #tpu.memory_space<vmem>>, vector<1x32xf32>
    %37 = vector.broadcast %36 : vector<1x32xf32> to vector<146x32xf32>
    %38 = arith.addf %35, %37 : vector<146x32xf32>
    %cst_16 = arith.constant 0.000000e+00 : f32
    %39 = vector.broadcast %cst_16 : f32 to vector<146x32xf32>
    %40 = arith.cmpf ogt, %38, %39 : vector<146x32xf32>
    %41 = math.exp %38 : vector<146x32xf32>
    %cst_17 = arith.constant 1.000000e+00 : f32
    %42 = vector.broadcast %cst_17 : f32 to vector<146x32xf32>
    %43 = arith.subf %41, %42 : vector<146x32xf32>
    %44 = arith.select %40, %38, %43 : vector<146x32xi1>, vector<146x32xf32>
    %c0_18 = arith.constant 0 : index
    %c0_19 = arith.constant 0 : index
    %45 = vector.load %arg7[%c0_18, %c0_19] : memref<24x146xbf16, #tpu.memory_space<vmem>>, vector<24x146xbf16>
    %46 = arith.truncf %44 : vector<146x32xf32> to vector<146x32xbf16>
    %cst_20 = arith.constant dense<0.000000e+00> : vector<24x32xf32>
    %47 = tpu.matmul %45, %46, %cst_20 {dimension_numbers = #tpu.dot_dimension_numbers<[1], [0], [0], [1], [0, 0, 1, 1], [], []>} : vector<24x146xbf16>, vector<146x32xbf16>, vector<24x32xf32> -> vector<24x32xf32>
    %48 = vector.extract_strided_slice %47 {offsets = [0, 0], sizes = [1, 32], strides = [1, 1]} : vector<24x32xf32> to vector<1x32xf32>
    %49 = vector.extract_strided_slice %47 {offsets = [1, 0], sizes = [1, 32], strides = [1, 1]} : vector<24x32xf32> to vector<1x32xf32>
    %50 = vector.extract_strided_slice %47 {offsets = [2, 0], sizes = [1, 32], strides = [1, 1]} : vector<24x32xf32> to vector<1x32xf32>
    %51 = vector.extract_strided_slice %47 {offsets = [3, 0], sizes = [1, 32], strides = [1, 1]} : vector<24x32xf32> to vector<1x32xf32>
    %52 = vector.extract_strided_slice %47 {offsets = [4, 0], sizes = [1, 32], strides = [1, 1]} : vector<24x32xf32> to vector<1x32xf32>
    %53 = vector.extract_strided_slice %47 {offsets = [5, 0], sizes = [1, 32], strides = [1, 1]} : vector<24x32xf32> to vector<1x32xf32>
    %54 = vector.extract_strided_slice %47 {offsets = [6, 0], sizes = [1, 32], strides = [1, 1]} : vector<24x32xf32> to vector<1x32xf32>
    %55 = vector.extract_strided_slice %47 {offsets = [7, 0], sizes = [1, 32], strides = [1, 1]} : vector<24x32xf32> to vector<1x32xf32>
    %56 = vector.extract_strided_slice %47 {offsets = [8, 0], sizes = [1, 32], strides = [1, 1]} : vector<24x32xf32> to vector<1x32xf32>
    %57 = vector.extract_strided_slice %47 {offsets = [9, 0], sizes = [1, 32], strides = [1, 1]} : vector<24x32xf32> to vector<1x32xf32>
    %58 = vector.extract_strided_slice %47 {offsets = [10, 0], sizes = [1, 32], strides = [1, 1]} : vector<24x32xf32> to vector<1x32xf32>
    %59 = vector.extract_strided_slice %47 {offsets = [11, 0], sizes = [1, 32], strides = [1, 1]} : vector<24x32xf32> to vector<1x32xf32>
    %60 = vector.extract_strided_slice %47 {offsets = [12, 0], sizes = [1, 32], strides = [1, 1]} : vector<24x32xf32> to vector<1x32xf32>
    %61 = vector.extract_strided_slice %47 {offsets = [13, 0], sizes = [1, 32], strides = [1, 1]} : vector<24x32xf32> to vector<1x32xf32>
    %62 = vector.extract_strided_slice %47 {offsets = [14, 0], sizes = [1, 32], strides = [1, 1]} : vector<24x32xf32> to vector<1x32xf32>
    %63 = vector.extract_strided_slice %47 {offsets = [15, 0], sizes = [1, 32], strides = [1, 1]} : vector<24x32xf32> to vector<1x32xf32>
    %64 = vector.extract_strided_slice %47 {offsets = [16, 0], sizes = [1, 32], strides = [1, 1]} : vector<24x32xf32> to vector<1x32xf32>
    %65 = vector.extract_strided_slice %47 {offsets = [17, 0], sizes = [1, 32], strides = [1, 1]} : vector<24x32xf32> to vector<1x32xf32>
    %66 = vector.extract_strided_slice %47 {offsets = [18, 0], sizes = [1, 32], strides = [1, 1]} : vector<24x32xf32> to vector<1x32xf32>
    %67 = vector.extract_strided_slice %47 {offsets = [19, 0], sizes = [1, 32], strides = [1, 1]} : vector<24x32xf32> to vector<1x32xf32>
    %68 = vector.extract_strided_slice %47 {offsets = [20, 0], sizes = [1, 32], strides = [1, 1]} : vector<24x32xf32> to vector<1x32xf32>
    %69 = vector.extract_strided_slice %47 {offsets = [21, 0], sizes = [1, 32], strides = [1, 1]} : vector<24x32xf32> to vector<1x32xf32>
    %70 = vector.extract_strided_slice %47 {offsets = [22, 0], sizes = [1, 32], strides = [1, 1]} : vector<24x32xf32> to vector<1x32xf32>
    %71 = vector.extract_strided_slice %47 {offsets = [23, 0], sizes = [1, 32], strides = [1, 1]} : vector<24x32xf32> to vector<1x32xf32>
    %72 = tpu.concatenate %48, %49, %50, %51, %52, %53, %54, %55, %56, %57, %58, %59, %60, %61, %62, %63 in 1 : vector<1x32xf32>, vector<1x32xf32>, vector<1x32xf32>, vector<1x32xf32>, vector<1x32xf32>, vector<1x32xf32>, vector<1x32xf32>, vector<1x32xf32>, vector<1x32xf32>, vector<1x32xf32>, vector<1x32xf32>, vector<1x32xf32>, vector<1x32xf32>, vector<1x32xf32>, vector<1x32xf32>, vector<1x32xf32> -> vector<1x512xf32>
    %73 = tpu.concatenate %64, %65, %66, %67, %68, %69, %70, %71 in 1 : vector<1x32xf32>, vector<1x32xf32>, vector<1x32xf32>, vector<1x32xf32>, vector<1x32xf32>, vector<1x32xf32>, vector<1x32xf32>, vector<1x32xf32> -> vector<1x256xf32>
    %74 = tpu.concatenate %72, %73 in 1 : vector<1x512xf32>, vector<1x256xf32> -> vector<1x768xf32>
    %c0_21 = arith.constant 0 : index
    %c0_22 = arith.constant 0 : index
    %75 = vector.load %arg8[%c0_21, %c0_22] : memref<768x64xf32, #tpu.memory_space<vmem>>, vector<768x64xf32>
    %cst_23 = arith.constant dense<0.000000e+00> : vector<1x64xf32>
    %76 = tpu.matmul %74, %75, %cst_23 {dimension_numbers = #tpu.dot_dimension_numbers<[1], [0], [0], [1], [0, 0, 1, 1], [], []>} : vector<1x768xf32>, vector<768x64xf32>, vector<1x64xf32> -> vector<1x64xf32>
    %c0_24 = arith.constant 0 : index
    %c0_25 = arith.constant 0 : index
    %77 = vector.load %arg9[%c0_24, %c0_25] : memref<1x64xf32, #tpu.memory_space<vmem>>, vector<1x64xf32>
    %78 = arith.addf %76, %77 : vector<1x64xf32>
    %cst_26 = arith.constant 0.000000e+00 : f32
    %79 = vector.broadcast %cst_26 : f32 to vector<1x64xf32>
    %80 = arith.cmpf ogt, %78, %79 : vector<1x64xf32>
    %81 = math.exp %78 : vector<1x64xf32>
    %cst_27 = arith.constant 1.000000e+00 : f32
    %82 = vector.broadcast %cst_27 : f32 to vector<1x64xf32>
    %83 = arith.subf %81, %82 : vector<1x64xf32>
    %84 = arith.select %80, %78, %83 : vector<1x64xi1>, vector<1x64xf32>
    %c0_28 = arith.constant 0 : index
    %c0_29 = arith.constant 0 : index
    %85 = vector.load %arg10[%c0_28, %c0_29] : memref<64x32xf32, #tpu.memory_space<vmem>>, vector<64x32xf32>
    %cst_30 = arith.constant dense<0.000000e+00> : vector<1x32xf32>
    %86 = tpu.matmul %84, %85, %cst_30 {dimension_numbers = #tpu.dot_dimension_numbers<[1], [0], [0], [1], [0, 0, 1, 1], [], []>} : vector<1x64xf32>, vector<64x32xf32>, vector<1x32xf32> -> vector<1x32xf32>
    %c0_31 = arith.constant 0 : index
    %c0_32 = arith.constant 0 : index
    %87 = vector.load %arg11[%c0_31, %c0_32] : memref<1x32xf32, #tpu.memory_space<vmem>>, vector<1x32xf32>
    %88 = arith.addf %86, %87 : vector<1x32xf32>
    %cst_33 = arith.constant 0.000000e+00 : f32
    %89 = vector.broadcast %cst_33 : f32 to vector<1x32xf32>
    %90 = arith.cmpf ogt, %88, %89 : vector<1x32xf32>
    %91 = math.exp %88 : vector<1x32xf32>
    %cst_34 = arith.constant 1.000000e+00 : f32
    %92 = vector.broadcast %cst_34 : f32 to vector<1x32xf32>
    %93 = arith.subf %91, %92 : vector<1x32xf32>
    %94 = arith.select %90, %88, %93 : vector<1x32xi1>, vector<1x32xf32>
    %c0_35 = arith.constant 0 : index
    %c0_36 = arith.constant 0 : index
    %95 = vector.load %arg12[%c0_35, %c0_36] : memref<32x4xf32, #tpu.memory_space<vmem>>, vector<32x4xf32>
    %cst_37 = arith.constant dense<0.000000e+00> : vector<1x4xf32>
    %96 = tpu.matmul %94, %95, %cst_37 {dimension_numbers = #tpu.dot_dimension_numbers<[1], [0], [0], [1], [0, 0, 1, 1], [], []>} : vector<1x32xf32>, vector<32x4xf32>, vector<1x4xf32> -> vector<1x4xf32>
    %c0_38 = arith.constant 0 : index
    %c0_39 = arith.constant 0 : index
    %97 = vector.load %arg13[%c0_38, %c0_39] : memref<1x4xf32, #tpu.memory_space<vmem>>, vector<1x4xf32>
    %98 = arith.addf %96, %97 : vector<1x4xf32>
    %c0_40 = arith.constant 0 : index
    %c0_41 = arith.constant 0 : index
    %c0_42 = arith.constant 0 : index
    %99 = vector.load %arg14[%c0_40, %c0_41, %c0_42] : memref<1x1x4xf32, #tpu.memory_space<vmem>>, vector<1x1x4xf32>
    %100 = vector.shape_cast %99 : vector<1x1x4xf32> to vector<1x4xf32>
    %101 = vector.shape_cast %98 : vector<1x4xf32> to vector<1x1x4xf32>
    tpu.vector_store %arg14[%c0_40, %c0_41, %c0_42], %101 {strides = array<i32>} : memref<1x1x4xf32, #tpu.memory_space<vmem>>, vector<1x1x4xf32>,
    return
  }
  func.func @transform_0(%arg0: i32) -> (i32, i32, i32) {
    %c0_i32 = arith.constant 0 : i32
    %c0_i32_0 = arith.constant 0 : i32
    %c0_i32_1 = arith.constant 0 : i32
    return %arg0, %c0_i32, %c0_i32_0 : i32, i32, i32
  }
  func.func @transform_1(%arg0: i32) -> (i32, i32) {
    %c0_i32 = arith.constant 0 : i32
    %c0_i32_0 = arith.constant 0 : i32
    %c0_i32_1 = arith.constant 0 : i32
    return %c0_i32, %c0_i32_0 : i32, i32
  }
  func.func @transform_2(%arg0: i32) -> (i32, i32) {
    %c0_i32 = arith.constant 0 : i32
    %c0_i32_0 = arith.constant 0 : i32
    %c0_i32_1 = arith.constant 0 : i32
    return %c0_i32, %c0_i32_0 : i32, i32
  }
  func.func @transform_3(%arg0: i32) -> (i32, i32) {
    %c0_i32 = arith.constant 0 : i32
    %c0_i32_0 = arith.constant 0 : i32
    %c0_i32_1 = arith.constant 0 : i32
    return %c0_i32, %c0_i32_0 : i32, i32
  }
  func.func @transform_4(%arg0: i32) -> (i32, i32) {
    %c0_i32 = arith.constant 0 : i32
    %c0_i32_0 = arith.constant 0 : i32
    %c0_i32_1 = arith.constant 0 : i32
    return %c0_i32, %c0_i32_0 : i32, i32
  }
  func.func @transform_5(%arg0: i32) -> (i32, i32) {
    %c0_i32 = arith.constant 0 : i32
    %c0_i32_0 = arith.constant 0 : i32
    %c0_i32_1 = arith.constant 0 : i32
    return %c0_i32, %c0_i32_0 : i32, i32
  }
  func.func @transform_6(%arg0: i32) -> (i32, i32) {
    %c0_i32 = arith.constant 0 : i32
    %c0_i32_0 = arith.constant 0 : i32
    %c0_i32_1 = arith.constant 0 : i32
    return %c0_i32, %c0_i32_0 : i32, i32
  }
  func.func @transform_7(%arg0: i32) -> (i32, i32) {
    %c0_i32 = arith.constant 0 : i32
    %c0_i32_0 = arith.constant 0 : i32
    %c0_i32_1 = arith.constant 0 : i32
    return %c0_i32, %c0_i32_0 : i32, i32
  }
  func.func @transform_8(%arg0: i32) -> (i32, i32) {
    %c0_i32 = arith.constant 0 : i32
    %c0_i32_0 = arith.constant 0 : i32
    %c0_i32_1 = arith.constant 0 : i32
    return %c0_i32, %c0_i32_0 : i32, i32
  }
  func.func @transform_9(%arg0: i32) -> (i32, i32) {
    %c0_i32 = arith.constant 0 : i32
    %c0_i32_0 = arith.constant 0 : i32
    %c0_i32_1 = arith.constant 0 : i32
    return %c0_i32, %c0_i32_0 : i32, i32
  }
  func.func @transform_10(%arg0: i32) -> (i32, i32) {
    %c0_i32 = arith.constant 0 : i32
    %c0_i32_0 = arith.constant 0 : i32
    %c0_i32_1 = arith.constant 0 : i32
    return %c0_i32, %c0_i32_0 : i32, i32
  }
  func.func @transform_11(%arg0: i32) -> (i32, i32) {
    %c0_i32 = arith.constant 0 : i32
    %c0_i32_0 = arith.constant 0 : i32
    %c0_i32_1 = arith.constant 0 : i32
    return %c0_i32, %c0_i32_0 : i32, i32
  }
  func.func @transform_12(%arg0: i32) -> (i32, i32) {
    %c0_i32 = arith.constant 0 : i32
    %c0_i32_0 = arith.constant 0 : i32
    %c0_i32_1 = arith.constant 0 : i32
    return %c0_i32, %c0_i32_0 : i32, i32
  }
  func.func @transform_13(%arg0: i32) -> (i32, i32, i32) {
    %c0_i32 = arith.constant 0 : i32
    %c0_i32_0 = arith.constant 0 : i32
    %c0_i32_1 = arith.constant 0 : i32
    return %arg0, %c0_i32, %c0_i32_0 : i32, i32, i32
  }
}

</mosaic_0001>

<bundles_post_ra>
// kernel: ultimate_convnet_forward.1
= control target key start
LH: loop header
LB: loop body
LE: loop exit
PB: predicated region body
PF: predicated region fallthrough
CT: control target
= control target key end

     0   :  { %s15610_s0 = inlined_call_operand.vmem [shape: bf16[2,969,704], index: 0, kind: input, shape index: {}]   ;;  %s15611_s1 = inlined_call_operand.vmem [shape: bf16[704,32], index: 1, kind: input, shape index: {}]   ;;  %s15612_s2 = inlined_call_operand.vmem [shape: f32[1,32], index: 2, kind: input, shape index: {}]   ;;  %s15613_s3 = inlined_call_operand.vmem [shape: bf16[161,969], index: 3, kind: input, shape index: {}]   ;;  %s15614_s4 = inlined_call_operand.vmem [shape: bf16[512,32], index: 4, kind: input, shape index: {}]   ;;  %s15615_s5 = inlined_call_operand.vmem [shape: f32[1,32], index: 5, kind: input, shape index: {}]   ;;  %s15616_s6 = inlined_call_operand.vmem [shape: bf16[24,146], index: 6, kind: input, shape index: {}]   ;;  %s15617_s7 = inlined_call_operand.vmem [shape: f32[768,64], index: 7, kind: input, shape index: {}]   ;;  %s15618_s8 = inlined_call_operand.vmem [shape: f32[1,64], index: 8, kind: input, shape index: {}]   ;;  %s15619_s9 = inlined_call_operand.vmem [shape: f32[64,32], index: 9, kind: input, shape index: {}]   ;;  %s15620_s10 = inlined_call_operand.vmem [shape: f32[1,32], index: 10, kind: input, shape index: {}]   ;;  %s15621_s11 = inlined_call_operand.vmem [shape: f32[32,4], index: 11, kind: input, shape index: {}]   ;;  %s15622_s12 = inlined_call_operand.vmem [shape: f32[1,4], index: 12, kind: input, shape index: {}]   ;;  %s15623_s13 = inlined_call_operand.hbm [shape: f32[2,1,4], index: 13, kind: output, shape index: {}]  }
   0x1   :  { %15638 = sst [smem:[#allocation83_spill]] %s15610_s0 }
   0x2   :  { %15639 = sst [smem:[#allocation84_spill]] %s15611_s1 }
   0x3   :  { %18 = vsyncpa [#allocation3], 0 }
   0x4   :  { %20 = vsyncpa [#allocation3 + $0x1], 0  ;;  %s11222_s25 = smov 0   ;;  %s11224_s26 = smov 0  }
   0x5   :  { %s11226_s27 = smov 0   ;;  %s11228_s28 = smov 0  }
   0x6 LB: > { %s11243_s29 = sadd.s32 4294967295, %s11142_s28   ;;  %s8754_s30 = sadd.s32 4294967294, %s11142_s28   ;;  %s11142_s28 = sphi %s11228_s28, %s15882_s28   ;;  %s11138_s27 = sphi %s11226_s27, %s15881_s27   ;;  %s11134_s26 = sphi %s11224_s26, %s15880_s26   ;;  %s11130_s25 = sphi %s11222_s25, %s15879_s25  }
   0x7   : > { %s11247_s14 = sadd.s32 1, %s11142_s28   ;;  %s311_s15 = sadd.s32 1, %s11138_s27 }
   0x8   : > { %s308_s16 = ssub.s32 %s11142_s28, %s11247_s14  ;;  %p321_p0 = scmp.ne.s32.totalorder %s11138_s27, %s11134_s26 }
   0x9   : > { %p309_p1 = scmp.eq.s32.totalorder %s308_s16, 0  ;;  %p322_p2 = scmp.eq.s32.totalorder %s11243_s29, 1 }
   0xa   : > { %p327_p3 = scmp.ne.s32.totalorder %s11134_s26, %s11130_s25  ;;  %p328_p4 = scmp.eq.s32.totalorder %s8754_s30, 1 }
   0xb   : > { %s11258_s17 = scalar_select %p309_p1, %s11138_s27, %s311_s15  }
   0xc   : > { %p11260_p5 = por %p322_p2, %p321_p0  ;;  %p11264_p6 = por %p328_p4, %p327_p3 }
   0xd   : > { %15640 = sst [smem:[#allocation5_spill]] %s11258_s17  ;;  %p8757_p7 = scmp.ge.s32.totalorder %s11142_s28, 1 }
   0xe   : > { %p390_p8 = scmp.lt.s32.totalorder %s11142_s28, 3 }
  0x10   : > { %p391_p9 = pnand %p8757_p7, %p390_p8 }
  0x12   : > { %394 = sbr.rel (%p391_p9) target bundleno = 3099 (0xc1b), region = 72 }
  0x17   : > { %s15643_s1 = sld [smem:[#allocation84_spill]]  ;;  %v15624_v1 = vmov 0   ;;  %p433_p10 = scmp.lt.s32.totalorder %s11243_s29, 1  ;;  %vm2933_vm0 = vcmask 523264  }
  0x18   : > { %3117 = vmatprep.subr.bf16.mxu0 %v15624_v1  ;;  %3638 = vmatprep.subr.bf16.mxu1 %v15624_v1  ;;  %s15644_s0 = sld [smem:[#allocation83_spill]]  ;;  %s15634_s17 = smov 64  }
  0x19   : > { %s434_s20 = scalar_select %p433_p10, %s11243_s29, 1 }
  0x1a   : > { %s15632_s22 = smov 96   ;;  %s15877_s21 = smov 96  }
  0x1b   : > { %s10064_s30 = smul.u32 2928, %s434_s20 }
  0x1d   : > { %v10156_v0 = vld [vmem:[%s15643_s1 + $0x38] sm:$0xff]   ;;  %v10158_v3 = vld [vmem:[%s15643_s1 + $0x30] sm:$0xff]   ;;  %v10160_v5 = vld [vmem:[%s15643_s1 + $0x28] sm:$0xff]  }
  0x1e   : > { %v10157_v2 = vld [vmem:[%s15643_s1 + $0xb8] sm:$0xff]   ;;  %3118 = vmatpush1.bf16.msra.mxu0 %v10156_v0  ;;  %v10159_v4 = vld [vmem:[%s15643_s1 + $0xb0] sm:$0xff]   ;;  %v10161_v6 = vld [vmem:[%s15643_s1 + $0xa8] sm:$0xff]   ;;  %s11339_s24 = scalar_lea.vmem %s15644_s0, %s10064_s30  ;;  %s15636_s30 = smov 32  }
  0x1f   : > { %3639 = vmatpush1.bf16.msra.mxu1 %v10157_v2  ;;  %3119 = vmatprep.subr.bf16.mxu0 %v15624_v1  ;;  %v10162_v7 = vld [vmem:[%s15643_s1 + $0x20] sm:$0xff]   ;;  %v10164_v9 = vld [vmem:[%s15643_s1 + $0x18] sm:$0xff]   ;;  %v10166_v11 = vld [vmem:[%s15643_s1 + $0x10] sm:$0xff]  }
  0x20   : > { %3640 = vmatprep.subr.bf16.mxu1 %v15624_v1  ;;  %v10163_v8 = vld [vmem:[%s15643_s1 + $0xa0] sm:$0xff]   ;;  %v10165_v10 = vld [vmem:[%s15643_s1 + $0x98] sm:$0xff]   ;;  %v10167_v12 = vld [vmem:[%s15643_s1 + $0x90] sm:$0xff]  }
  0x21   : > { %v10168_v13 = vld [vmem:[%s15643_s1 + $0x8] sm:$0xff]   ;;  %v10170_v15 = vld [vmem:[%s15643_s1] sm:$0xff]   ;;  %v10172_v17 = vld [vmem:[%s15643_s1 + $0x78] sm:$0xff]  }
  0x22   : > { %3120 = vmatpush1.bf16.msra.mxu0 %v10158_v3  ;;  %v10169_v14 = vld [vmem:[%s15643_s1 + $0x88] sm:$0xff]   ;;  %v10171_v16 = vld [vmem:[%s15643_s1 + $0x80] sm:$0xff]   ;;  %v10173_v18 = vld [vmem:[%s15643_s1 + $0xf8] sm:$0xff]  }
  0x23   : > { %3641 = vmatpush1.bf16.msra.mxu1 %v10159_v4  ;;  %3121 = vmatprep.subr.bf16.mxu0 %v15624_v1  ;;  %v10189_v19 = vld [vmem:[%s11339_s24 + $0x4] ss:$24 sps:$4 sm:$0xff]   ;;  %v10174_v20 = vld [vmem:[%s15643_s1 + $0x70] sm:$0xff]   ;;  %v10176_v23 = vld [vmem:[%s15643_s1 + $0x68] sm:$0xff]  }
  0x24   : > { %3642 = vmatprep.subr.bf16.mxu1 %v15624_v1  ;;  %3149 = vmatprep.mubr.bf16.mxu0 %v10189_v19  ;;  %v10193_v21 = vld [vmem:[%s11339_s24 + $0xc] ss:$24 sps:$4 sm:$0xff]   ;;  %v10175_v22 = vld [vmem:[%s15643_s1 + $0xf0] sm:$0xff]   ;;  %v10180_v27 = vld [vmem:[%s15643_s1 + $0x58] sm:$0xff]  }
  0x25   : > { %3670 = vmatprep.mubr.bf16.mxu1 %v10193_v21  ;;  %v10177_v24 = vld [vmem:[%s15643_s1 + $0xe8] sm:$0xff]   ;;  %v10178_v25 = vld [vmem:[%s15643_s1 + $0x60] sm:$0xff]   ;;  %v10181_v28 = vld [vmem:[%s15643_s1 + $0xd8] sm:$0xff]  }
  0x26   : > { %3122 = vmatpush1.bf16.msra.mxu0 %v10160_v5  ;;  %v10179_v26 = vld [vmem:[%s15643_s1 + $0xe0] sm:$0xff]   ;;  %v10182_v29 = vld [vmem:[%s15643_s1 + $0x50] sm:$0xff]   ;;  %v10184_v31 = vld [vmem:[%s15643_s1 + $0x48] sm:$0xff]  }
  0x27   : > { %3643 = vmatpush1.bf16.msra.mxu1 %v10161_v6  ;;  %3123 = vmatprep.subr.bf16.mxu0 %v15624_v1  ;;  %v10183_v30 = vld [vmem:[%s15643_s1 + $0xd0] sm:$0xff]   ;;  %v10185_v32 = vld [vmem:[%s15643_s1 + $0xc8] sm:$0xff]   ;;  %v10186_v33 = vld [vmem:[%s15643_s1 + $0x40] sm:$0xff]  }
  0x28   : > { %3644 = vmatprep.subr.bf16.mxu1 %v15624_v1  ;;  %v10190_v34 = vld [vmem:[%s15643_s1 + $0xc0] sm:$0xff]   ;;  %v10194_v37 = vld [vmem:[%s11339_s24 + $0x34] ss:$24 sps:$4 sm:$0xff]   ;;  %v10196_v39 = vld [vmem:[%s11339_s24 + $0x30] ss:$24 sps:$4 sm:$0xff]  }
  0x29   : > { %v10187_v35 = vld [vmem:[%s11339_s24] ss:$24 sps:$4 sm:$0xff]   ;;  %v10197_v38 = vld [vmem:[%s11339_s24 + $0x3c] ss:$24 sps:$4 sm:$0xff]   ;;  %v10203_v42 = vld [vmem:[%s11339_s24 + $0x6c] ss:$24 sps:$4 sm:$0xff]  }
  0x2a   : > { %3124 = vmatpush1.bf16.msra.mxu0 %v10162_v7  ;;  %v10191_v36 = vld [vmem:[%s11339_s24 + $0x8] ss:$24 sps:$4 sm:$0xff]   ;;  %v10199_v40 = vld [vmem:[%s11339_s24 + $0x38] ss:$24 sps:$4 sm:$0xff]   ;;  %v10200_v41 = vld [vmem:[%s11339_s24 + $0x64] ss:$24 sps:$4 sm:$0xff]  }
  0x2b   : > { %3645 = vmatpush1.bf16.msra.mxu1 %v10163_v8  ;;  %3125 = vmatprep.subr.bf16.mxu0 %v15624_v1  ;;  %v10202_v43 = vld [vmem:[%s11339_s24 + $0x60] ss:$24 sps:$4 sm:$0xff]   ;;  %v10206_v45 = vld [vmem:[%s11339_s24 + $0x94] ss:$24 sps:$4 sm:$0xff]   ;;  %v10208_v47 = vld [vmem:[%s11339_s24 + $0x90] ss:$24 sps:$4 sm:$0xff]  }
  0x2c   : > { %3646 = vmatprep.subr.bf16.mxu1 %v15624_v1  ;;  %v10205_v44 = vld [vmem:[%s11339_s24 + $0x68] ss:$24 sps:$4 sm:$0xff]   ;;  %v10209_v46 = vld [vmem:[%s11339_s24 + $0x9c] ss:$24 sps:$4 sm:$0xff]   ;;  %v10211_v48 = vld [vmem:[%s11339_s24 + $0x98] ss:$24 sps:$4 sm:$0xff]  }
  0x2d   : > { %v10212_v49 = vld [vmem:[%s11339_s24 + $0xc4] ss:$24 sps:$4 sm:$0xff]   ;;  %v10214_v51 = vld [vmem:[%s11339_s24 + $0xc0] ss:$24 sps:$4 sm:$0xff]   ;;  %v10218_v53 = vld [vmem:[%s11339_s24 + $0xf4] ss:$24 sps:$4 sm:$0xff]  }
  0x2e   : > { %3126 = vmatpush1.bf16.msra.mxu0 %v10164_v9  ;;  %v10215_v50 = vld [vmem:[%s11339_s24 + $0xcc] ss:$24 sps:$4 sm:$0xff]   ;;  %v10217_v52 = vld [vmem:[%s11339_s24 + $0xc8] ss:$24 sps:$4 sm:$0xff]   ;;  %v10221_v54 = vld [vmem:[%s11339_s24 + $0xfc] ss:$24 sps:$4 sm:$0xff]  }
  0x2f   : > { %3647 = vmatpush1.bf16.msra.mxu1 %v10165_v10  ;;  %3127 = vmatprep.subr.bf16.mxu0 %v15624_v1  ;;  %v10220_v55 = vld [vmem:[%s11339_s24 + $0xf0] ss:$24 sps:$4 sm:$0xff]   ;;  %v10224_v57 = vld [vmem:[%s11339_s24 + $0x124] ss:$24 sps:$4 sm:$0xff]   ;;  %v10226_v59 = vld [vmem:[%s11339_s24 + $0x120] ss:$24 sps:$4 sm:$0xff]  }
  0x30   : > { %3648 = vmatprep.subr.bf16.mxu1 %v15624_v1  ;;  %v10223_v56 = vld [vmem:[%s11339_s24 + $0xf8] ss:$24 sps:$4 sm:$0xff]   ;;  %v10227_v58 = vld [vmem:[%s11339_s24 + $0x12c] ss:$24 sps:$4 sm:$0xff]   ;;  %v10229_v60 = vld [vmem:[%s11339_s24 + $0x128] ss:$24 sps:$4 sm:$0xff]  }
  0x31   : > { %v10230_v61 = vld [vmem:[%s11339_s24 + $0x154] ss:$24 sps:$4 sm:$0xff]   ;;  %v10232_v63 = vld [vmem:[%s11339_s24 + $0x150] ss:$24 sps:$4 sm:$0xff]   ;;  %v10236_v2 = vld [vmem:[%s11339_s24 + $0x184] ss:$24 sps:$4 sm:$0xff]  }
  0x32   : > { %3128 = vmatpush1.bf16.msra.mxu0 %v10166_v11  ;;  %v10233_v62 = vld [vmem:[%s11339_s24 + $0x15c] ss:$24 sps:$4 sm:$0xff]   ;;  %v10235_v0 = vld [vmem:[%s11339_s24 + $0x158] ss:$24 sps:$4 sm:$0xff]   ;;  %v10239_v3 = vld [vmem:[%s11339_s24 + $0x18c] ss:$24 sps:$4 sm:$0xff]  }
  0x33   : > { %3649 = vmatpush1.bf16.msra.mxu1 %v10167_v12  ;;  %3129 = vmatprep.subr.bf16.mxu0 %v15624_v1  ;;  %v10238_v4 = vld [vmem:[%s11339_s24 + $0x180] ss:$24 sps:$4 sm:$0xff]   ;;  %v10242_v6 = vld [vmem:[%s11339_s24 + $0x1b4] ss:$24 sps:$4 sm:$0xff]   ;;  %v10244_v8 = vld [vmem:[%s11339_s24 + $0x1b0] ss:$24 sps:$4 sm:$0xff]  }
  0x34   : > { %3650 = vmatprep.subr.bf16.mxu1 %v15624_v1  ;;  %v10241_v5 = vld [vmem:[%s11339_s24 + $0x188] ss:$24 sps:$4 sm:$0xff]   ;;  %v10245_v7 = vld [vmem:[%s11339_s24 + $0x1bc] ss:$24 sps:$4 sm:$0xff]   ;;  %v10247_v9 = vld [vmem:[%s11339_s24 + $0x1b8] ss:$24 sps:$4 sm:$0xff]  }
  0x35   : > { %v10248_v10 = vld [vmem:[%s11339_s24 + $0x1e4] ss:$24 sps:$4 sm:$0xff]   ;;  %v10250_v12 = vld [vmem:[%s11339_s24 + $0x1e0] ss:$24 sps:$4 sm:$0xff]  }
  0x36   : > { %3130 = vmatpush1.bf16.msra.mxu0 %v10168_v13  ;;  %v10251_v11 = vld [vmem:[%s11339_s24 + $0x1ec] ss:$24 sps:$4 sm:$0xff]   ;;  %v10253_v13 = vld [vmem:[%s11339_s24 + $0x1e8] ss:$24 sps:$4 sm:$0xff]  }
  0x37   : > { %3651 = vmatpush1.bf16.msra.mxu1 %v10169_v14  ;;  %3131 = vmatprep.subr.bf16.mxu0 %v15624_v1  ;;  %v10254_v14 = vld [vmem:[%s11339_s24 + $0x214] ss:$24 sps:$4 sm:$0xff]   ;;  %v10265_v21 = vld [vmem:[%s11339_s24 + $0x248] ss:$24 sps:$4 sm:$0xff]  }
  0x38   : > { %3652 = vmatprep.subr.bf16.mxu1 %v15624_v1  ;;  %v10263_v19 = vld [vmem:[%s11339_s24 + $0x24c] ss:$24 sps:$4 sm:$0xff]  }
  0x3a   : > { %3132 = vmatpush1.bf16.msra.mxu0 %v10170_v15  ;;  %v10257_v15 = vld [vmem:[%s11339_s24 + $0x21c] ss:$24 sps:$4 sm:$0xff]  }
  0x3b   : > { %3653 = vmatpush1.bf16.msra.mxu1 %v10171_v16  ;;  %3133 = vmatprep.subr.bf16.mxu0 %v15624_v1  ;;  %v10256_v16 = vld [vmem:[%s11339_s24 + $0x210] ss:$24 sps:$4 sm:$0xff]  }
  0x3c   : > { %3654 = vmatprep.subr.bf16.mxu1 %v15624_v1 }
  0x3e   : > { %3134 = vmatpush2.bf16.msra.mxu0 %v10172_v17  ;;  %v10259_v17 = vld [vmem:[%s11339_s24 + $0x218] ss:$24 sps:$4 sm:$0xff]  }
  0x3f   : > { %3655 = vmatpush2.bf16.msra.mxu1 %v10173_v18  ;;  %3135 = vmatprep.subr.bf16.mxu0 %v15624_v1  ;;  %v10260_v18 = vld [vmem:[%s11339_s24 + $0x244] ss:$24 sps:$4 sm:$0xff]  }
  0x40   : > { %3656 = vmatprep.subr.bf16.mxu1 %v15624_v1 }
  0x42   : > { %3136 = vmatpush2.bf16.msra.mxu0 %v10174_v20  ;;  %v10262_v20 = vld [vmem:[%s11339_s24 + $0x240] ss:$24 sps:$4 sm:$0xff]  }
  0x43   : > { %3657 = vmatpush2.bf16.msra.mxu1 %v10175_v22  ;;  %3137 = vmatprep.subr.bf16.mxu0 %v15624_v1  ;;  %v10266_v22 = vld [vmem:[%s11339_s24 + $0x274] ss:$24 sps:$4 sm:$0xff]  }
  0x44   : > { %3658 = vmatprep.subr.bf16.mxu1 %v15624_v1 }
  0x46   : > { %3138 = vmatpush2.bf16.msra.mxu0 %v10176_v23  ;;  %v10269_v23 = vld [vmem:[%s11339_s24 + $0x27c] ss:$24 sps:$4 sm:$0xff]  }
  0x47   : > { %3659 = vmatpush2.bf16.msra.mxu1 %v10177_v24  ;;  %3139 = vmatprep.subr.bf16.mxu0 %v15624_v1  ;;  %v10268_v24 = vld [vmem:[%s11339_s24 + $0x270] ss:$24 sps:$4 sm:$0xff]  }
  0x48   : > { %3660 = vmatprep.subr.bf16.mxu1 %v15624_v1 }
  0x4a   : > { %3140 = vmatpush2.bf16.msra.mxu0 %v10178_v25  ;;  %v10271_v25 = vld [vmem:[%s11339_s24 + $0x278] ss:$24 sps:$4 sm:$0xff]  }
  0x4b   : > { %3661 = vmatpush2.bf16.msra.mxu1 %v10179_v26  ;;  %3141 = vmatprep.subr.bf16.mxu0 %v15624_v1  ;;  %v10272_v26 = vld [vmem:[%s11339_s24 + $0x2a4] ss:$24 sps:$4 sm:$0xff]  }
  0x4c   : > { %3662 = vmatprep.subr.bf16.mxu1 %v15624_v1 }
  0x4e   : > { %3142 = vmatpush2.bf16.msra.mxu0 %v10180_v27  ;;  %v10275_v27 = vld [vmem:[%s11339_s24 + $0x2ac] ss:$24 sps:$4 sm:$0xff]  }
  0x4f   : > { %3663 = vmatpush2.bf16.msra.mxu1 %v10181_v28  ;;  %3143 = vmatprep.subr.bf16.mxu0 %v15624_v1  ;;  %v10274_v28 = vld [vmem:[%s11339_s24 + $0x2a0] ss:$24 sps:$4 sm:$0xff]  }
  0x50   : > { %3664 = vmatprep.subr.bf16.mxu1 %v15624_v1 }
  0x52   : > { %3144 = vmatpush2.bf16.msra.mxu0 %v10182_v29  ;;  %v10277_v29 = vld [vmem:[%s11339_s24 + $0x2a8] ss:$24 sps:$4 sm:$0xff]  }
  0x53   : > { %3665 = vmatpush2.bf16.msra.mxu1 %v10183_v30  ;;  %3145 = vmatprep.subr.bf16.mxu0 %v15624_v1  ;;  %v10278_v30 = vld [vmem:[%s11339_s24 + $0x2d4] ss:$24 sps:$4 sm:$0xff]  }
  0x54   : > { %3666 = vmatprep.subr.bf16.mxu1 %v15624_v1 }
  0x56   : > { %3146 = vmatpush2.bf16.msra.mxu0 %v10184_v31  ;;  %v10281_v31 = vld [vmem:[%s11339_s24 + $0x2dc] ss:$24 sps:$4 sm:$0xff]  }
  0x57   : > { %3667 = vmatpush2.bf16.msra.mxu1 %v10185_v32  ;;  %3147 = vmatprep.subr.bf16.mxu0 %v15624_v1  ;;  %v10280_v32 = vld [vmem:[%s11339_s24 + $0x2d0] ss:$24 sps:$4 sm:$0xff]  }
  0x58   : > { %3668 = vmatprep.subr.bf16.mxu1 %v15624_v1 }
  0x5a   : > { %3148 = vmatpush2.bf16.msra.mxu0 %v10186_v33  ;;  %v10283_v33 = vld [vmem:[%s11339_s24 + $0x2d8] ss:$24 sps:$4 sm:$0xff]  }
  0x5b   : > { %3669 = vmatpush2.bf16.msra.mxu1 %v10190_v34  ;;  %4159 = vmatprep.subr.bf16.mxu0 %v15624_v1  ;;  %v10284_v34 = vld [vmem:[%s11339_s24 + $0x304] ss:$24 sps:$4 sm:$0xff]  }
  0x5d   : > { %3150 = vmatmul.mubr.bf16.vlgmr.msra.gmra.mxu0 %v10187_v35  ;;  %v10287_v35 = vld [vmem:[%s11339_s24 + $0x30c] ss:$24 sps:$4 sm:$0xff]  }
  0x5e   : > { %3671 = vmatmul.mubr.bf16.vlgmr.msra.gmra.mxu1 %v10191_v36  ;;  %3157 = vmatprep.mubr.bf16.mxu0 %v10194_v37  ;;  %v10286_v36 = vld [vmem:[%s11339_s24 + $0x300] ss:$24 sps:$4 sm:$0xff]  }
  0x5f   : > { %3678 = vmatprep.mubr.bf16.mxu1 %v10197_v38  ;;  %v10289_v37 = vld [vmem:[%s11339_s24 + $0x308] ss:$24 sps:$4 sm:$0xff]   ;;  %v10290_v38 = vld [vmem:[%s11339_s24 + $0x334] ss:$24 sps:$4 sm:$0xff]  }
  0x65   : > { %3158 = vmatmul.mubr.bf16.gmra.mxu0 %v10196_v39  ;;  %v10293_v39 = vld [vmem:[%s11339_s24 + $0x33c] ss:$24 sps:$4 sm:$0xff]  }
  0x66   : > { %3679 = vmatmul.mubr.bf16.gmra.mxu1 %v10199_v40  ;;  %3165 = vmatprep.mubr.bf16.mxu0 %v10200_v41  ;;  %v10292_v40 = vld [vmem:[%s11339_s24 + $0x330] ss:$24 sps:$4 sm:$0xff]  }
  0x67   : > { %3686 = vmatprep.mubr.bf16.mxu1 %v10203_v42  ;;  %v10295_v41 = vld [vmem:[%s11339_s24 + $0x338] ss:$24 sps:$4 sm:$0xff]   ;;  %v10296_v42 = vld [vmem:[%s11339_s24 + $0x364] ss:$24 sps:$4 sm:$0xff]  }
  0x6d   : > { %3166 = vmatmul.mubr.bf16.gmra.mxu0 %v10202_v43  ;;  %v10299_v43 = vld [vmem:[%s11339_s24 + $0x36c] ss:$24 sps:$4 sm:$0xff]  }
  0x6e   : > { %3687 = vmatmul.mubr.bf16.gmra.mxu1 %v10205_v44  ;;  %3173 = vmatprep.mubr.bf16.mxu0 %v10206_v45  ;;  %v10298_v44 = vld [vmem:[%s11339_s24 + $0x360] ss:$24 sps:$4 sm:$0xff]  }
  0x6f   : > { %3694 = vmatprep.mubr.bf16.mxu1 %v10209_v46  ;;  %v10301_v45 = vld [vmem:[%s11339_s24 + $0x368] ss:$24 sps:$4 sm:$0xff]   ;;  %v10302_v46 = vld [vmem:[%s11339_s24 + $0x394] ss:$24 sps:$4 sm:$0xff]  }
  0x75   : > { %3174 = vmatmul.mubr.bf16.gmra.mxu0 %v10208_v47  ;;  %v10305_v47 = vld [vmem:[%s11339_s24 + $0x39c] ss:$24 sps:$4 sm:$0xff]  }
  0x76   : > { %3695 = vmatmul.mubr.bf16.gmra.mxu1 %v10211_v48  ;;  %3181 = vmatprep.mubr.bf16.mxu0 %v10212_v49  ;;  %v10304_v48 = vld [vmem:[%s11339_s24 + $0x390] ss:$24 sps:$4 sm:$0xff]  }
  0x77   : > { %3702 = vmatprep.mubr.bf16.mxu1 %v10215_v50  ;;  %v10307_v49 = vld [vmem:[%s11339_s24 + $0x398] ss:$24 sps:$4 sm:$0xff]   ;;  %v10308_v50 = vld [vmem:[%s11339_s24 + $0x3c4] ss:$24 sps:$4 sm:$0xff]  }
  0x7d   : > { %3182 = vmatmul.mubr.bf16.gmra.mxu0 %v10214_v51  ;;  %v10311_v51 = vld [vmem:[%s11339_s24 + $0x3cc] ss:$24 sps:$4 sm:$0xff]  }
  0x7e   : > { %3703 = vmatmul.mubr.bf16.gmra.mxu1 %v10217_v52  ;;  %3189 = vmatprep.mubr.bf16.mxu0 %v10218_v53  ;;  %v10310_v52 = vld [vmem:[%s11339_s24 + $0x3c0] ss:$24 sps:$4 sm:$0xff]  }
  0x7f   : > { %3710 = vmatprep.mubr.bf16.mxu1 %v10221_v54  ;;  %v10313_v53 = vld [vmem:[%s11339_s24 + $0x3c8] ss:$24 sps:$4 sm:$0xff]   ;;  %v10314_v54 = vld [vmem:[%s11339_s24 + $0x3f4] ss:$24 sps:$4 sm:$0xff]  }
  0x85   : > { %3190 = vmatmul.mubr.bf16.gmra.mxu0 %v10220_v55  ;;  %v10317_v55 = vld [vmem:[%s11339_s24 + $0x3fc] ss:$24 sps:$4 sm:$0xff]  }
  0x86   : > { %3711 = vmatmul.mubr.bf16.gmra.mxu1 %v10223_v56  ;;  %3197 = vmatprep.mubr.bf16.mxu0 %v10224_v57  ;;  %v10316_v56 = vld [vmem:[%s11339_s24 + $0x3f0] ss:$24 sps:$4 sm:$0xff]  }
  0x87   : > { %3718 = vmatprep.mubr.bf16.mxu1 %v10227_v58  ;;  %v10319_v57 = vld [vmem:[%s11339_s24 + $0x3f8] ss:$24 sps:$4 sm:$0xff]   ;;  %v10320_v58 = vld [vmem:[%s11339_s24 + $0x424] ss:$24 sps:$4 sm:$0xff]  }
  0x8d   : > { %3198 = vmatmul.mubr.bf16.gmra.mxu0 %v10226_v59  ;;  %v10323_v59 = vld [vmem:[%s11339_s24 + $0x42c] ss:$24 sps:$4 sm:$0xff]  }
  0x8e   : > { %3719 = vmatmul.mubr.bf16.gmra.mxu1 %v10229_v60  ;;  %3205 = vmatprep.mubr.bf16.mxu0 %v10230_v61  ;;  %v10322_v60 = vld [vmem:[%s11339_s24 + $0x420] ss:$24 sps:$4 sm:$0xff]  }
  0x8f   : > { %3726 = vmatprep.mubr.bf16.mxu1 %v10233_v62  ;;  %v10325_v61 = vld [vmem:[%s11339_s24 + $0x428] ss:$24 sps:$4 sm:$0xff]   ;;  %v10326_v62 = vld [vmem:[%s11339_s24 + $0x454] ss:$24 sps:$4 sm:$0xff]  }
  0x95   : > { %3206 = vmatmul.mubr.bf16.gmra.mxu0 %v10232_v63  ;;  %v10329_v63 = vld [vmem:[%s11339_s24 + $0x45c] ss:$24 sps:$4 sm:$0xff]  }
  0x96   : > { %3727 = vmatmul.mubr.bf16.gmra.mxu1 %v10235_v0  ;;  %3213 = vmatprep.mubr.bf16.mxu0 %v10236_v2  ;;  %v10328_v0 = vld [vmem:[%s11339_s24 + $0x450] ss:$24 sps:$4 sm:$0xff]  }
  0x97   : > { %3734 = vmatprep.mubr.bf16.mxu1 %v10239_v3  ;;  %v10331_v2 = vld [vmem:[%s11339_s24 + $0x458] ss:$24 sps:$4 sm:$0xff]   ;;  %v10332_v3 = vld [vmem:[%s11339_s24 + $0x484] ss:$24 sps:$4 sm:$0xff]  }
  0x9d   : > { %3214 = vmatmul.mubr.bf16.gmra.mxu0 %v10238_v4  ;;  %v10335_v4 = vld [vmem:[%s11339_s24 + $0x48c] ss:$24 sps:$4 sm:$0xff]  }
  0x9e   : > { %3735 = vmatmul.mubr.bf16.gmra.mxu1 %v10241_v5  ;;  %3221 = vmatprep.mubr.bf16.mxu0 %v10242_v6  ;;  %v10334_v5 = vld [vmem:[%s11339_s24 + $0x480] ss:$24 sps:$4 sm:$0xff]  }
  0x9f   : > { %3742 = vmatprep.mubr.bf16.mxu1 %v10245_v7  ;;  %v10337_v6 = vld [vmem:[%s11339_s24 + $0x488] ss:$24 sps:$4 sm:$0xff]   ;;  %v10338_v7 = vld [vmem:[%s11339_s24 + $0x4b4] ss:$24 sps:$4 sm:$0xff]  }
  0xa5   : > { %3222 = vmatmul.mubr.bf16.gmra.mxu0 %v10244_v8  ;;  %v11510_v8 = vld [vmem:[%s15612_s2] ss:$0 sm:$0xff] }
  0xa6   : > { %3743 = vmatmul.mubr.bf16.gmra.mxu1 %v10247_v9  ;;  %3229 = vmatprep.mubr.bf16.mxu0 %v10248_v10  ;;  %v10341_v9 = vld [vmem:[%s11339_s24 + $0x4bc] ss:$24 sps:$4 sm:$0xff]  }
  0xa7   : > { %3750 = vmatprep.mubr.bf16.mxu1 %v10251_v11 }
  0xad   : > { %3230 = vmatmul.mubr.bf16.gmra.mxu0 %v10250_v12 }
  0xae   : > { %3751 = vmatmul.mubr.bf16.gmra.mxu1 %v10253_v13  ;;  %3237 = vmatprep.mubr.bf16.mxu0 %v10254_v14 }
  0xaf   : > { %3758 = vmatprep.mubr.bf16.mxu1 %v10257_v15 }
  0xb5   : > { %3238 = vmatmul.mubr.bf16.gmra.mxu0 %v10256_v16 }
  0xb6   : > { %3759 = vmatmul.mubr.bf16.gmra.mxu1 %v10259_v17  ;;  %3245 = vmatprep.mubr.bf16.mxu0 %v10260_v18  ;;  %v10340_v17 = vld [vmem:[%s11339_s24 + $0x4b0] ss:$24 sps:$4 sm:$0xff]  }
  0xb7   : > { %3766 = vmatprep.mubr.bf16.mxu1 %v10263_v19 }
  0xbd   : > { %3246 = vmatmul.mubr.bf16.gmra.mxu0 %v10262_v20  ;;  %v10343_v20 = vld [vmem:[%s11339_s24 + $0x4b8] ss:$24 sps:$4 sm:$0xff]  }
  0xbe   : > { %3767 = vmatmul.mubr.bf16.gmra.mxu1 %v10265_v21  ;;  %3253 = vmatprep.mubr.bf16.mxu0 %v10266_v22  ;;  %v10344_v21 = vld [vmem:[%s11339_s24 + $0x4e4] ss:$24 sps:$4 sm:$0xff]  }
  0xbf   : > { %3774 = vmatprep.mubr.bf16.mxu1 %v10269_v23  ;;  %v10347_v23 = vld [vmem:[%s11339_s24 + $0x4ec] ss:$24 sps:$4 sm:$0xff]  }
  0xc5   : > { %3254 = vmatmul.mubr.bf16.gmra.mxu0 %v10268_v24 }
  0xc6   : > { %3775 = vmatmul.mubr.bf16.gmra.mxu1 %v10271_v25  ;;  %3261 = vmatprep.mubr.bf16.mxu0 %v10272_v26 }
  0xc7   : > { %3782 = vmatprep.mubr.bf16.mxu1 %v10275_v27 }
  0xcd   : > { %3262 = vmatmul.mubr.bf16.gmra.mxu0 %v10274_v28 }
  0xce   : > { %3783 = vmatmul.mubr.bf16.gmra.mxu1 %v10277_v29  ;;  %3269 = vmatprep.mubr.bf16.mxu0 %v10278_v30 }
  0xcf   : > { %3790 = vmatprep.mubr.bf16.mxu1 %v10281_v31 }
  0xd5   : > { %3270 = vmatmul.mubr.bf16.gmra.mxu0 %v10280_v32 }
  0xd6   : > { %3791 = vmatmul.mubr.bf16.gmra.mxu1 %v10283_v33  ;;  %3277 = vmatprep.mubr.bf16.mxu0 %v10284_v34  ;;  %v10346_v33 = vld [vmem:[%s11339_s24 + $0x4e0] ss:$24 sps:$4 sm:$0xff]  }
  0xd7   : > { %3798 = vmatprep.mubr.bf16.mxu1 %v10287_v35 }
  0xdd   : > { %3278 = vmatmul.mubr.bf16.gmra.mxu0 %v10286_v36  ;;  %v10349_v36 = vld [vmem:[%s11339_s24 + $0x4e8] ss:$24 sps:$4 sm:$0xff]  }
  0xde   : > { %3799 = vmatmul.mubr.bf16.gmra.mxu1 %v10289_v37  ;;  %3285 = vmatprep.mubr.bf16.mxu0 %v10290_v38  ;;  %v10350_v37 = vld [vmem:[%s11339_s24 + $0x514] ss:$24 sps:$4 sm:$0xff]  }
  0xdf   : > { %3806 = vmatprep.mubr.bf16.mxu1 %v10293_v39  ;;  %v10353_v39 = vld [vmem:[%s11339_s24 + $0x51c] ss:$24 sps:$4 sm:$0xff]  }
  0xe5   : > { %3286 = vmatmul.mubr.bf16.gmra.mxu0 %v10292_v40 }
  0xe6   : > { %3807 = vmatmul.mubr.bf16.gmra.mxu1 %v10295_v41  ;;  %3293 = vmatprep.mubr.bf16.mxu0 %v10296_v42 }
  0xe7   : > { %3814 = vmatprep.mubr.bf16.mxu1 %v10299_v43 }
  0xed   : > { %3294 = vmatmul.mubr.bf16.gmra.mxu0 %v10298_v44 }
  0xee   : > { %3815 = vmatmul.mubr.bf16.gmra.mxu1 %v10301_v45  ;;  %3301 = vmatprep.mubr.bf16.mxu0 %v10302_v46 }
  0xef   : > { %3822 = vmatprep.mubr.bf16.mxu1 %v10305_v47 }
  0xf5   : > { %3302 = vmatmul.mubr.bf16.gmra.mxu0 %v10304_v48 }
  0xf6   : > { %3823 = vmatmul.mubr.bf16.gmra.mxu1 %v10307_v49  ;;  %3309 = vmatprep.mubr.bf16.mxu0 %v10308_v50  ;;  %v10352_v49 = vld [vmem:[%s11339_s24 + $0x510] ss:$24 sps:$4 sm:$0xff]  }
  0xf7   : > { %3830 = vmatprep.mubr.bf16.mxu1 %v10311_v51 }
  0xfd   : > { %3310 = vmatmul.mubr.bf16.gmra.mxu0 %v10310_v52  ;;  %v10355_v52 = vld [vmem:[%s11339_s24 + $0x518] ss:$24 sps:$4 sm:$0xff]  }
  0xfe   : > { %3831 = vmatmul.mubr.bf16.gmra.mxu1 %v10313_v53  ;;  %3317 = vmatprep.mubr.bf16.mxu0 %v10314_v54  ;;  %v10358_v53 = vld [vmem:[%s11339_s24 + $0x544] ss:$24 sps:$4 sm:$0xff]  }
  0xff   : > { %3838 = vmatprep.mubr.bf16.mxu1 %v10317_v55  ;;  %v10361_v55 = vld [vmem:[%s11339_s24 + $0x54c] ss:$24 sps:$4 sm:$0xff]  }
 0x105   : > { %3318 = vmatmul.mubr.bf16.gmra.mxu0 %v10316_v56 }
 0x106   : > { %3839 = vmatmul.mubr.bf16.gmra.mxu1 %v10319_v57  ;;  %3325 = vmatprep.mubr.bf16.mxu0 %v10320_v58 }
 0x107   : > { %3846 = vmatprep.mubr.bf16.mxu1 %v10323_v59 }
 0x10d   : > { %3326 = vmatmul.mubr.bf16.gmra.mxu0 %v10322_v60 }
 0x10e   : > { %3847 = vmatmul.mubr.bf16.gmra.mxu1 %v10325_v61  ;;  %3333 = vmatprep.mubr.bf16.mxu0 %v10326_v62 }
 0x10f   : > { %3854 = vmatprep.mubr.bf16.mxu1 %v10329_v63 }
 0x115   : > { %3334 = vmatmul.mubr.bf16.gmra.mxu0 %v10328_v0 }
 0x116   : > { %3855 = vmatmul.mubr.bf16.gmra.mxu1 %v10331_v2  ;;  %3341 = vmatprep.mubr.bf16.mxu0 %v10332_v3  ;;  %v10356_v2 = vld [vmem:[%s11339_s24 + $0x540] ss:$24 sps:$4 sm:$0xff]  }
 0x117   : > { %3862 = vmatprep.mubr.bf16.mxu1 %v10335_v4 }
 0x11d   : > { %v3151_v10 = vpop.f32.mrf.mxu0  ;;  %3342 = vmatmul.mubr.bf16.gmra.mxu0 %v10334_v5  ;;  %v10359_v5 = vld [vmem:[%s11339_s24 + $0x548] ss:$24 sps:$4 sm:$0xff]  }
 0x11e   : > { %v3152_v11 = vadd.f32 %v11510_v8, %v3151_v10  ;;  %v3672_v12 = vpop.f32.mrf.mxu1  ;;  %3863 = vmatmul.mubr.bf16.gmra.mxu1 %v10337_v6  ;;  %3349 = vmatprep.mubr.bf16.mxu0 %v10338_v7  ;;  %v10364_v6 = vld [vmem:[%s11339_s24 + $0x574] ss:$24 sps:$4 sm:$0xff]  }
 0x11f   : > { %v3153_v13 = vpop.f32.mrf.mxu0  ;;  %3870 = vmatprep.mubr.bf16.mxu1 %v10341_v9  ;;  %v10367_v9 = vld [vmem:[%s11339_s24 + $0x57c] ss:$24 sps:$4 sm:$0xff]  }
 0x120   : > { %v11514_v14 = vadd.f32 %v3672_v12, %v3152_v11  ;;  %v3674_v15 = vpop.f32.mrf.mxu1 }
 0x121   : > { %v3154_v16 = vpop.f32.mrf.mxu0 }
 0x122   : > { %v3155_v18 = vadd.f32 %v11510_v8, %v3154_v16  ;;  %v3675_v19 = vpop.f32.mrf.mxu1 }
 0x123   : > { %v3156_v22 = vpop.f32.mrf.mxu0 }
 0x124   : > { %v11521_v24 = vadd.f32 %v3675_v19, %v3155_v18  ;;  %v3677_v25 = vpop.f32.mrf.mxu1 }
 0x125   : > { %v3159_v26 = vpop.f32.mrf.mxu0  ;;  %3350 = vmatmul.mubr.bf16.gmra.mxu0 %v10340_v17  ;;  %v10370_v25 = vld [vmem:[%s11339_s24 + $0x5a4] ss:$24 sps:$4 sm:$0xff]  }
 0x126   : > { %v3160_v27 = vadd.f32 %v11510_v8, %v3159_v26  ;;  %v3680_v28 = vpop.f32.mrf.mxu1  ;;  %3871 = vmatmul.mubr.bf16.gmra.mxu1 %v10343_v20  ;;  %3357 = vmatprep.mubr.bf16.mxu0 %v10344_v21  ;;  %v10362_v20 = vld [vmem:[%s11339_s24 + $0x570] ss:$24 sps:$4 sm:$0xff]  }
 0x127   : > { %v3161_v29 = vpop.f32.mrf.mxu0  ;;  %3878 = vmatprep.mubr.bf16.mxu1 %v10347_v23  ;;  %v10365_v23 = vld [vmem:[%s11339_s24 + $0x578] ss:$24 sps:$4 sm:$0xff]  }
 0x128   : > { %v11524_v30 = vadd.f32 %v3680_v28, %v3160_v27  ;;  %v3682_v31 = vpop.f32.mrf.mxu1  ;;  %v10373_v27 = vld [vmem:[%s11339_s24 + $0x5ac] ss:$24 sps:$4 sm:$0xff]  }
 0x129   : > { %v3162_v32 = vpop.f32.mrf.mxu0 }
 0x12a   : > { %v3163_v34 = vadd.f32 %v11510_v8, %v3162_v32  ;;  %v3683_v35 = vpop.f32.mrf.mxu1 }
 0x12b   : > { %v3164_v38 = vpop.f32.mrf.mxu0 }
 0x12c   : > { %v11531_v40 = vadd.f32 %v3683_v35, %v3163_v34  ;;  %v3685_v41 = vpop.f32.mrf.mxu1  ;;  %v10368_v38 = vld [vmem:[%s11339_s24 + $0x5a0] ss:$24 sps:$4 sm:$0xff]  }
 0x12d   : > { %v3167_v42 = vpop.f32.mrf.mxu0  ;;  %3358 = vmatmul.mubr.bf16.gmra.mxu0 %v10346_v33 }
 0x12e   : > { %v3168_v43 = vadd.f32 %v11510_v8, %v3167_v42  ;;  %v3688_v44 = vpop.f32.mrf.mxu1  ;;  %3879 = vmatmul.mubr.bf16.gmra.mxu1 %v10349_v36  ;;  %3365 = vmatprep.mubr.bf16.mxu0 %v10350_v37  ;;  %v10371_v42 = vld [vmem:[%s11339_s24 + $0x5a8] ss:$24 sps:$4 sm:$0xff]  }
 0x12f   : > { %v3169_v45 = vpop.f32.mrf.mxu0  ;;  %3886 = vmatprep.mubr.bf16.mxu1 %v10353_v39 }
 0x130   : > { %v11534_v46 = vadd.f32 %v3688_v44, %v3168_v43  ;;  %v3690_v47 = vpop.f32.mrf.mxu1  ;;  %v10376_v43 = vld [vmem:[%s11339_s24 + $0x5d4] ss:$24 sps:$4 sm:$0xff]  }
 0x131   : > { %v3170_v48 = vpop.f32.mrf.mxu0  ;;  %v10379_v45 = vld [vmem:[%s11339_s24 + $0x5dc] ss:$24 sps:$4 sm:$0xff]  }
 0x132   : > { %v3171_v50 = vadd.f32 %v11510_v8, %v3170_v48  ;;  %v3691_v51 = vpop.f32.mrf.mxu1 }
 0x133   : > { %v3172_v54 = vpop.f32.mrf.mxu0 }
 0x134   : > { %v11541_v56 = vadd.f32 %v3691_v51, %v3171_v50  ;;  %v3693_v57 = vpop.f32.mrf.mxu1 }
 0x135   : > { %v3175_v58 = vpop.f32.mrf.mxu0  ;;  %3366 = vmatmul.mubr.bf16.gmra.mxu0 %v10352_v49  ;;  %v10374_v57 = vld [vmem:[%s11339_s24 + $0x5d0] ss:$24 sps:$4 sm:$0xff]  }
 0x136   : > { %v3176_v59 = vadd.f32 %v11510_v8, %v3175_v58  ;;  %v3696_v60 = vpop.f32.mrf.mxu1  ;;  %3887 = vmatmul.mubr.bf16.gmra.mxu1 %v10355_v52  ;;  %3373 = vmatprep.mubr.bf16.mxu0 %v10358_v53 }
 0x137   : > { %v3177_v61 = vpop.f32.mrf.mxu0  ;;  %3894 = vmatprep.mubr.bf16.mxu1 %v10361_v55 }
 0x138   : > { %v11544_v62 = vadd.f32 %v3696_v60, %v3176_v59  ;;  %v3698_v63 = vpop.f32.mrf.mxu1  ;;  %v10377_v60 = vld [vmem:[%s11339_s24 + $0x5d8] ss:$24 sps:$4 sm:$0xff]   ;;  %v10382_v61 = vld [vmem:[%s11339_s24 + $0x604] ss:$24 sps:$4 sm:$0xff]  }
 0x139   : > { %v3178_v0 = vpop.f32.mrf.mxu0 }
 0x13a   : > { %v3179_v3 = vadd.f32 %v11510_v8, %v3178_v0  ;;  %v3699_v4 = vpop.f32.mrf.mxu1  ;;  %v10385_v0 = vld [vmem:[%s11339_s24 + $0x60c] ss:$24 sps:$4 sm:$0xff]  }
 0x13b   : > { %v3180_v7 = vpop.f32.mrf.mxu0 }
 0x13c   : > { %v11551_v10 = vadd.f32 %v3699_v4, %v3179_v3  ;;  %v3701_v11 = vpop.f32.mrf.mxu1 }
 0x13d   : > { %v3183_v12 = vpop.f32.mrf.mxu0  ;;  %3374 = vmatmul.mubr.bf16.gmra.mxu0 %v10356_v2 }
 0x13e   : > { %v3184_v13 = vadd.f32 %v11510_v8, %v3183_v12  ;;  %v3704_v15 = vpop.f32.mrf.mxu1  ;;  %3895 = vmatmul.mubr.bf16.gmra.mxu1 %v10359_v5  ;;  %3381 = vmatprep.mubr.bf16.mxu0 %v10364_v6 }
 0x13f   : > { %v3185_v16 = vpop.f32.mrf.mxu0  ;;  %3902 = vmatprep.mubr.bf16.mxu1 %v10367_v9 }
 0x140   : > { %v11554_v17 = vadd.f32 %v3704_v15, %v3184_v13  ;;  %v3706_v18 = vpop.f32.mrf.mxu1  ;;  %v10380_v13 = vld [vmem:[%s11339_s24 + $0x600] ss:$24 sps:$4 sm:$0xff]  }
 0x141   : > { %v3186_v19 = vpop.f32.mrf.mxu0  ;;  %v10383_v18 = vld [vmem:[%s11339_s24 + $0x608] ss:$24 sps:$4 sm:$0xff]  }
 0x142   : > { %v3187_v21 = vadd.f32 %v11510_v8, %v3186_v19  ;;  %v3707_v22 = vpop.f32.mrf.mxu1  ;;  %v10388_v19 = vld [vmem:[%s11339_s24 + $0x634] ss:$24 sps:$4 sm:$0xff]  }
 0x143   : > { %v3188_v26 = vpop.f32.mrf.mxu0 }
 0x144   : > { %v11561_v28 = vadd.f32 %v3707_v22, %v3187_v21  ;;  %v3709_v29 = vpop.f32.mrf.mxu1  ;;  %v10391_v21 = vld [vmem:[%s11339_s24 + $0x63c] ss:$24 sps:$4 sm:$0xff]  }
 0x145   : > { %v3191_v31 = vpop.f32.mrf.mxu0  ;;  %3382 = vmatmul.mubr.bf16.gmra.mxu0 %v10362_v20 }
 0x146   : > { %v3192_v32 = vadd.f32 %v11510_v8, %v3191_v31  ;;  %v3712_v33 = vpop.f32.mrf.mxu1  ;;  %3903 = vmatmul.mubr.bf16.gmra.mxu1 %v10365_v23  ;;  %3389 = vmatprep.mubr.bf16.mxu0 %v10370_v25 }
 0x147   : > { %v3193_v34 = vpop.f32.mrf.mxu0  ;;  %3910 = vmatprep.mubr.bf16.mxu1 %v10373_v27 }
 0x148   : > { %v11564_v35 = vadd.f32 %v3712_v33, %v3192_v32  ;;  %v3714_v36 = vpop.f32.mrf.mxu1  ;;  %v10386_v34 = vld [vmem:[%s11339_s24 + $0x630] ss:$24 sps:$4 sm:$0xff]  }
 0x149   : > { %v3194_v37 = vpop.f32.mrf.mxu0 }
 0x14a   : > { %v3195_v39 = vadd.f32 %v11510_v8, %v3194_v37  ;;  %v3715_v41 = vpop.f32.mrf.mxu1 }
 0x14b   : > { %v3196_v44 = vpop.f32.mrf.mxu0 }
 0x14c   : > { %v11571_v47 = vadd.f32 %v3715_v41, %v3195_v39  ;;  %v3717_v48 = vpop.f32.mrf.mxu1  ;;  %v10394_v39 = vld [vmem:[%s11339_s24 + $0x664] ss:$24 sps:$4 sm:$0xff]  }
 0x14d   : > { %v3199_v49 = vpop.f32.mrf.mxu0  ;;  %3390 = vmatmul.mubr.bf16.gmra.mxu0 %v10368_v38  ;;  %v10389_v38 = vld [vmem:[%s11339_s24 + $0x638] ss:$24 sps:$4 sm:$0xff]  }
 0x14e   : > { %v3200_v50 = vadd.f32 %v11510_v8, %v3199_v49  ;;  %v3720_v51 = vpop.f32.mrf.mxu1  ;;  %3911 = vmatmul.mubr.bf16.gmra.mxu1 %v10371_v42  ;;  %3397 = vmatprep.mubr.bf16.mxu0 %v10376_v43  ;;  %v10397_v42 = vld [vmem:[%s11339_s24 + $0x66c] ss:$24 sps:$4 sm:$0xff]  }
 0x14f   : > { %v3201_v52 = vpop.f32.mrf.mxu0  ;;  %3918 = vmatprep.mubr.bf16.mxu1 %v10379_v45 }
 0x150   : > { %v11574_v53 = vadd.f32 %v3720_v51, %v3200_v50  ;;  %v3722_v54 = vpop.f32.mrf.mxu1 }
 0x151   : > { %v3202_v55 = vpop.f32.mrf.mxu0 }
 0x152   : > { %v3203_v58 = vadd.f32 %v11510_v8, %v3202_v55  ;;  %v3723_v59 = vpop.f32.mrf.mxu1  ;;  %v10392_v55 = vld [vmem:[%s11339_s24 + $0x660] ss:$24 sps:$4 sm:$0xff]  }
 0x153   : > { %v3204_v63 = vpop.f32.mrf.mxu0 }
 0x154   : > { %v11581_v2 = vadd.f32 %v3723_v59, %v3203_v58  ;;  %v3725_v3 = vpop.f32.mrf.mxu1  ;;  %v10395_v59 = vld [vmem:[%s11339_s24 + $0x668] ss:$24 sps:$4 sm:$0xff]   ;;  %v10403_v63 = vld [vmem:[%s11339_s24 + $0x69c] ss:$24 sps:$4 sm:$0xff]  }
 0x155   : > { %v3207_v4 = vpop.f32.mrf.mxu0  ;;  %3398 = vmatmul.mubr.bf16.gmra.mxu0 %v10374_v57 }
 0x156   : > { %v3208_v5 = vadd.f32 %v11510_v8, %v3207_v4  ;;  %v3728_v6 = vpop.f32.mrf.mxu1  ;;  %3919 = vmatmul.mubr.bf16.gmra.mxu1 %v10377_v60  ;;  %3405 = vmatprep.mubr.bf16.mxu0 %v10382_v61  ;;  %v10400_v60 = vld [vmem:[%s11339_s24 + $0x694] ss:$24 sps:$4 sm:$0xff]  }
 0x157   : > { %v3209_v7 = vpop.f32.mrf.mxu0  ;;  %3926 = vmatprep.mubr.bf16.mxu1 %v10385_v0 }
 0x158   : > { %v11584_v9 = vadd.f32 %v3728_v6, %v3208_v5  ;;  %v3730_v11 = vpop.f32.mrf.mxu1 }
 0x159   : > { %v3210_v12 = vpop.f32.mrf.mxu0 }
 0x15a   : > { %v3211_v15 = vadd.f32 %v11510_v8, %v3210_v12  ;;  %v3731_v16 = vpop.f32.mrf.mxu1 }
 0x15b   : > { %v3212_v20 = vpop.f32.mrf.mxu0 }
 0x15c   : > { %v11591_v22 = vadd.f32 %v3731_v16, %v3211_v15  ;;  %v3733_v23 = vpop.f32.mrf.mxu1  ;;  %v10398_v15 = vld [vmem:[%s11339_s24 + $0x690] ss:$24 sps:$4 sm:$0xff]   ;;  %v10406_v20 = vld [vmem:[%s11339_s24 + $0x6c4] ss:$24 sps:$4 sm:$0xff]  }
 0x15d   : > { %v3215_v25 = vpop.f32.mrf.mxu0  ;;  %3406 = vmatmul.mubr.bf16.gmra.mxu0 %v10380_v13  ;;  %v10409_v23 = vld [vmem:[%s11339_s24 + $0x6cc] ss:$24 sps:$4 sm:$0xff]  }
 0x15e   : > { %v3216_v26 = vadd.f32 %v11510_v8, %v3215_v25  ;;  %v3736_v27 = vpop.f32.mrf.mxu1  ;;  %3927 = vmatmul.mubr.bf16.gmra.mxu1 %v10383_v18  ;;  %3413 = vmatprep.mubr.bf16.mxu0 %v10388_v19  ;;  %v10401_v19 = vld [vmem:[%s11339_s24 + $0x698] ss:$24 sps:$4 sm:$0xff]  }
 0x15f   : > { %v3217_v29 = vpop.f32.mrf.mxu0  ;;  %3934 = vmatprep.mubr.bf16.mxu1 %v10391_v21 }
 0x160   : > { %v11594_v31 = vadd.f32 %v3736_v27, %v3216_v26  ;;  %v3738_v32 = vpop.f32.mrf.mxu1 }
 0x161   : > { %v3218_v33 = vpop.f32.mrf.mxu0 }
 0x162   : > { %v3219_v36 = vadd.f32 %v11510_v8, %v3218_v33  ;;  %v3739_v37 = vpop.f32.mrf.mxu1 }
 0x163   : > { %v3220_v41 = vpop.f32.mrf.mxu0 }
 0x164   : > { %v11601_v43 = vadd.f32 %v3739_v37, %v3219_v36  ;;  %v3741_v44 = vpop.f32.mrf.mxu1 }
 0x165   : > { %v3223_v45 = vpop.f32.mrf.mxu0  ;;  %3414 = vmatmul.mubr.bf16.gmra.mxu0 %v10386_v34  ;;  %v10412_v44 = vld [vmem:[%s11339_s24 + $0x6f4] ss:$24 sps:$4 sm:$0xff]  }
 0x166   : > { %v3224_v48 = vadd.f32 %v11510_v8, %v3223_v45  ;;  %v3744_v49 = vpop.f32.mrf.mxu1  ;;  %3935 = vmatmul.mubr.bf16.gmra.mxu1 %v10389_v38  ;;  %3421 = vmatprep.mubr.bf16.mxu0 %v10394_v39  ;;  %v10404_v38 = vld [vmem:[%s11339_s24 + $0x6c0] ss:$24 sps:$4 sm:$0xff]  }
 0x167   : > { %v3225_v50 = vpop.f32.mrf.mxu0  ;;  %3942 = vmatprep.mubr.bf16.mxu1 %v10397_v42  ;;  %v10407_v42 = vld [vmem:[%s11339_s24 + $0x6c8] ss:$24 sps:$4 sm:$0xff]  }
 0x168   : > { %v11604_v51 = vadd.f32 %v3744_v49, %v3224_v48  ;;  %v3746_v52 = vpop.f32.mrf.mxu1  ;;  %v10415_v48 = vld [vmem:[%s11339_s24 + $0x6fc] ss:$24 sps:$4 sm:$0xff]  }
 0x169   : > { %v3226_v54 = vpop.f32.mrf.mxu0 }
 0x16a   : > { %v3227_v57 = vadd.f32 %v11510_v8, %v3226_v54  ;;  %v3747_v58 = vpop.f32.mrf.mxu1 }
 0x16b   : > { %v3228_v61 = vpop.f32.mrf.mxu0 }
 0x16c   : > { %v11611_v0 = vadd.f32 %v3747_v58, %v3227_v57  ;;  %v3749_v3 = vpop.f32.mrf.mxu1  ;;  %v10410_v61 = vld [vmem:[%s11339_s24 + $0x6f0] ss:$24 sps:$4 sm:$0xff]  }
 0x16d   : > { %v3231_v4 = vpop.f32.mrf.mxu0  ;;  %3422 = vmatmul.mubr.bf16.gmra.mxu0 %v10392_v55 }
 0x16e   : > { %v3232_v5 = vadd.f32 %v11510_v8, %v3231_v4  ;;  %v3752_v6 = vpop.f32.mrf.mxu1  ;;  %3943 = vmatmul.mubr.bf16.gmra.mxu1 %v10395_v59  ;;  %3429 = vmatprep.mubr.bf16.mxu0 %v10400_v60  ;;  %v10413_v4 = vld [vmem:[%s11339_s24 + $0x6f8] ss:$24 sps:$4 sm:$0xff]  }
 0x16f   : > { %v3233_v7 = vpop.f32.mrf.mxu0  ;;  %3950 = vmatprep.mubr.bf16.mxu1 %v10403_v63 }
 0x170   : > { %v11614_v11 = vadd.f32 %v3752_v6, %v3232_v5  ;;  %v3754_v12 = vpop.f32.mrf.mxu1  ;;  %v10418_v5 = vld [vmem:[%s11339_s24 + $0x724] ss:$24 sps:$4 sm:$0xff]  }
 0x171   : > { %v3234_v13 = vpop.f32.mrf.mxu0  ;;  %v10421_v7 = vld [vmem:[%s11339_s24 + $0x72c] ss:$24 sps:$4 sm:$0xff]  }
 0x172   : > { %v3235_v16 = vadd.f32 %v11510_v8, %v3234_v13  ;;  %v3755_v18 = vpop.f32.mrf.mxu1 }
 0x173   : > { %v3236_v21 = vpop.f32.mrf.mxu0 }
 0x174   : > { %v11621_v25 = vadd.f32 %v3755_v18, %v3235_v16  ;;  %v3757_v26 = vpop.f32.mrf.mxu1 }
 0x175   : > { %v3239_v27 = vpop.f32.mrf.mxu0  ;;  %3430 = vmatmul.mubr.bf16.gmra.mxu0 %v10398_v15  ;;  %v10416_v26 = vld [vmem:[%s11339_s24 + $0x720] ss:$24 sps:$4 sm:$0xff]  }
 0x176   : > { %v3240_v29 = vadd.f32 %v11510_v8, %v3239_v27  ;;  %v3760_v32 = vpop.f32.mrf.mxu1  ;;  %3951 = vmatmul.mubr.bf16.gmra.mxu1 %v10401_v19  ;;  %3437 = vmatprep.mubr.bf16.mxu0 %v10406_v20 }
 0x177   : > { %v3241_v33 = vpop.f32.mrf.mxu0  ;;  %3958 = vmatprep.mubr.bf16.mxu1 %v10409_v23 }
 0x178   : > { %v11624_v34 = vadd.f32 %v3760_v32, %v3240_v29  ;;  %v3762_v36 = vpop.f32.mrf.mxu1  ;;  %v10419_v32 = vld [vmem:[%s11339_s24 + $0x728] ss:$24 sps:$4 sm:$0xff]   ;;  %v10424_v33 = vld [vmem:[%s11339_s24 + $0x754] ss:$24 sps:$4 sm:$0xff]  }
 0x179   : > { %v3242_v37 = vpop.f32.mrf.mxu0 }
 0x17a   : > { %v3243_v39 = vadd.f32 %v11510_v8, %v3242_v37  ;;  %v3763_v41 = vpop.f32.mrf.mxu1  ;;  %v10427_v37 = vld [vmem:[%s11339_s24 + $0x75c] ss:$24 sps:$4 sm:$0xff]  }
 0x17b   : > { %v3244_v45 = vpop.f32.mrf.mxu0 }
 0x17c   : > { %v11631_v49 = vadd.f32 %v3763_v41, %v3243_v39  ;;  %v3765_v50 = vpop.f32.mrf.mxu1 }
 0x17d   : > { %v3247_v52 = vpop.f32.mrf.mxu0  ;;  %3438 = vmatmul.mubr.bf16.gmra.mxu0 %v10404_v38 }
 0x17e   : > { %v3248_v54 = vadd.f32 %v11510_v8, %v3247_v52  ;;  %v3768_v55 = vpop.f32.mrf.mxu1  ;;  %3959 = vmatmul.mubr.bf16.gmra.mxu1 %v10407_v42  ;;  %3445 = vmatprep.mubr.bf16.mxu0 %v10412_v44 }
 0x17f   : > { %v3249_v57 = vpop.f32.mrf.mxu0  ;;  %3966 = vmatprep.mubr.bf16.mxu1 %v10415_v48 }
 0x180   : > { %v11634_v58 = vadd.f32 %v3768_v55, %v3248_v54  ;;  %v3770_v59 = vpop.f32.mrf.mxu1  ;;  %v10422_v54 = vld [vmem:[%s11339_s24 + $0x750] ss:$24 sps:$4 sm:$0xff]  }
 0x181   : > { %v3250_v60 = vpop.f32.mrf.mxu0  ;;  %v10425_v59 = vld [vmem:[%s11339_s24 + $0x758] ss:$24 sps:$4 sm:$0xff]  }
 0x182   : > { %v3251_v63 = vadd.f32 %v11510_v8, %v3250_v60  ;;  %v3771_v3 = vpop.f32.mrf.mxu1  ;;  %v10430_v60 = vld [vmem:[%s11339_s24 + $0x784] ss:$24 sps:$4 sm:$0xff]  }
 0x183   : > { %v3252_v6 = vpop.f32.mrf.mxu0 }
 0x184   : > { %v11641_v12 = vadd.f32 %v3771_v3, %v3251_v63  ;;  %v3773_v13 = vpop.f32.mrf.mxu1  ;;  %v10433_v63 = vld [vmem:[%s11339_s24 + $0x78c] ss:$24 sps:$4 sm:$0xff]  }
 0x185   : > { %v3255_v15 = vpop.f32.mrf.mxu0  ;;  %3446 = vmatmul.mubr.bf16.gmra.mxu0 %v10410_v61 }
 0x186   : > { %v3256_v16 = vadd.f32 %v11510_v8, %v3255_v15  ;;  %v3776_v18 = vpop.f32.mrf.mxu1  ;;  %3967 = vmatmul.mubr.bf16.gmra.mxu1 %v10413_v4  ;;  %3453 = vmatprep.mubr.bf16.mxu0 %v10418_v5  ;;  %v10524_v5 = vld [vmem:[%s15643_s1 + $0x138] sm:$0xff]  }
 0x187   : > { %v3257_v19 = vpop.f32.mrf.mxu0  ;;  %3974 = vmatprep.mubr.bf16.mxu1 %v10421_v7  ;;  %4160 = vmatpush1.bf16.msra.mxu0 %v10524_v5 }
 0x188   : > { %v11644_v20 = vadd.f32 %v3776_v18, %v3256_v16  ;;  %v3778_v21 = vpop.f32.mrf.mxu1  ;;  %4161 = vmatprep.subr.bf16.mxu0 %v15624_v1  ;;  %v10525_v19 = vld [vmem:[%s15643_s1 + $0x130] sm:$0xff]  }
 0x189   : > { %v3258_v23 = vpop.f32.mrf.mxu0 }
 0x18a   : > { %v3259_v27 = vadd.f32 %v11510_v8, %v3258_v23  ;;  %v3779_v29 = vpop.f32.mrf.mxu1  ;;  %v10428_v23 = vld [vmem:[%s11339_s24 + $0x780] ss:$24 sps:$4 sm:$0xff]  }
 0x18b   : > { %v3260_v36 = vpop.f32.mrf.mxu0  ;;  %4162 = vmatpush1.bf16.msra.mxu0 %v10525_v19 }
 0x18c   : > { %v11651_v38 = vadd.f32 %v3779_v29, %v3259_v27  ;;  %v3781_v39 = vpop.f32.mrf.mxu1  ;;  %v10431_v29 = vld [vmem:[%s11339_s24 + $0x788] ss:$24 sps:$4 sm:$0xff]   ;;  %v10439_v36 = vld [vmem:[%s11339_s24 + $0x7bc] ss:$24 sps:$4 sm:$0xff]   ;;  %4163 = vmatprep.subr.bf16.mxu0 %v15624_v1 }
 0x18d   : > { %v3263_v41 = vpop.f32.mrf.mxu0  ;;  %3454 = vmatmul.mubr.bf16.gmra.mxu0 %v10416_v26 }
 0x18e   : > { %v3264_v42 = vadd.f32 %v11510_v8, %v3263_v41  ;;  %v3784_v44 = vpop.f32.mrf.mxu1  ;;  %3975 = vmatmul.mubr.bf16.gmra.mxu1 %v10419_v32  ;;  %3461 = vmatprep.mubr.bf16.mxu0 %v10424_v33  ;;  %v10436_v32 = vld [vmem:[%s11339_s24 + $0x7b4] ss:$24 sps:$4 sm:$0xff]  }
 0x18f   : > { %v3265_v45 = vpop.f32.mrf.mxu0  ;;  %3982 = vmatprep.mubr.bf16.mxu1 %v10427_v37  ;;  %v10532_v41 = vld [vmem:[%s15643_s1 + $0x128] sm:$0xff]  }
 0x190   : > { %v11654_v48 = vadd.f32 %v3784_v44, %v3264_v42  ;;  %v3786_v50 = vpop.f32.mrf.mxu1  ;;  %4164 = vmatpush1.bf16.msra.mxu0 %v10532_v41  ;;  %v10443_v41 = vld [vmem:[%s11339_s24 + $0x7e8] ss:$24 sps:$4 sm:$0xff]  }
 0x191   : > { %v3266_v52 = vpop.f32.mrf.mxu0  ;;  %4165 = vmatprep.subr.bf16.mxu0 %v15624_v1 }
 0x192   : > { %v3267_v55 = vadd.f32 %v11510_v8, %v3266_v52  ;;  %v3787_v57 = vpop.f32.mrf.mxu1 }
 0x193   : > { %v3268_v61 = vpop.f32.mrf.mxu0 }
 0x194   : > { %v11661_v3 = vadd.f32 %v3787_v57, %v3267_v55  ;;  %v3789_v4 = vpop.f32.mrf.mxu1  ;;  %v10533_v55 = vld [vmem:[%s15643_s1 + $0x120] sm:$0xff]  }
 0x195   : > { %v3271_v6 = vpop.f32.mrf.mxu0  ;;  %3462 = vmatmul.mubr.bf16.gmra.mxu0 %v10422_v54  ;;  %v10442_v4 = vld [vmem:[%s11339_s24 + $0x7e4] ss:$24 sps:$4 sm:$0xff]  }
 0x196   : > { %v3272_v7 = vadd.f32 %v11510_v8, %v3271_v6  ;;  %v3792_v13 = vpop.f32.mrf.mxu1  ;;  %3983 = vmatmul.mubr.bf16.gmra.mxu1 %v10425_v59  ;;  %3469 = vmatprep.mubr.bf16.mxu0 %v10430_v60  ;;  %v10434_v59 = vld [vmem:[%s11339_s24 + $0x7b0] ss:$24 sps:$4 sm:$0xff]   ;;  %v10445_v6 = vld [vmem:[%s11339_s24 + $0x7ec] ss:$24 sps:$4 sm:$0xff]  }
 0x197   : > { %v3273_v15 = vpop.f32.mrf.mxu0  ;;  %3990 = vmatprep.mubr.bf16.mxu1 %v10433_v63  ;;  %v10437_v63 = vld [vmem:[%s11339_s24 + $0x7b8] ss:$24 sps:$4 sm:$0xff]   ;;  %4166 = vmatpush1.bf16.msra.mxu0 %v10533_v55  ;;  %v10548_v55 = vld [vmem:[%s15643_s1 + $0x108] sm:$0xff]  }
 0x198   : > { %v11667_v16 = vadd.f32 %v3792_v13, %v3272_v7  ;;  %v3794_v18 = vpop.f32.mrf.mxu1  ;;  %4167 = vmatprep.subr.bf16.mxu0 %v15624_v1  ;;  %v10540_v15 = vld [vmem:[%s15643_s1 + $0x118] sm:$0xff]  }
 0x199   : > { %v3274_v21 = vpop.f32.mrf.mxu0 }
 0x19a   : > { %v3275_v26 = vadd.f32 %v11510_v8, %v3274_v21  ;;  %v3795_v27 = vpop.f32.mrf.mxu1 }
 0x19b   : > { %v3276_v33 = vpop.f32.mrf.mxu0  ;;  %4168 = vmatpush1.bf16.msra.mxu0 %v10540_v15 }
 0x19c   : > { %v11678_v37 = vadd.f32 %v3795_v27, %v3275_v26  ;;  %v3797_v39 = vpop.f32.mrf.mxu1  ;;  %4169 = vmatprep.subr.bf16.mxu0 %v15624_v1  ;;  %v10440_v33 = vld [vmem:[%s11339_s24 + $0x7e0] ss:$24 sps:$4 sm:$0xff]  }
 0x19d   : > { %v3279_v42 = vpop.f32.mrf.mxu0  ;;  %3470 = vmatmul.mubr.bf16.gmra.mxu0 %v10428_v23 }
 0x19e   : > { %v3280_v44 = vadd.f32 %v11510_v8, %v3279_v42  ;;  %v3800_v45 = vpop.f32.mrf.mxu1  ;;  %3991 = vmatmul.mubr.bf16.gmra.mxu1 %v10431_v29  ;;  %3477 = vmatprep.mubr.bf16.mxu0 %v10436_v32  ;;  %v10541_v29 = vld [vmem:[%s15643_s1 + $0x110] sm:$0xff]  }
 0x19f   : > { %v3281_v50 = vpop.f32.mrf.mxu0  ;;  %3998 = vmatprep.mubr.bf16.mxu1 %v10439_v36  ;;  %v10448_v42 = vld [vmem:[%s11339_s24 + $0x814] ss:$24 sps:$4 sm:$0xff]   ;;  %4170 = vmatpush1.bf16.msra.mxu0 %v10541_v29 }
 0x1a0   : > { %v11685_v52 = vadd.f32 %v3800_v45, %v3280_v44  ;;  %v3802_v54 = vpop.f32.mrf.mxu1  ;;  %v10451_v45 = vld [vmem:[%s11339_s24 + $0x81c] ss:$24 sps:$4 sm:$0xff]   ;;  %4171 = vmatprep.subr.bf16.mxu0 %v15624_v1 }
 0x1a1   : > { %v3282_v57 = vpop.f32.mrf.mxu0 }
 0x1a2   : > { %v3283_v60 = vadd.f32 %v11510_v8, %v3282_v57  ;;  %v3803_v61 = vpop.f32.mrf.mxu1 }
 0x1a3   : > { %v3284_v5 = vpop.f32.mrf.mxu0  ;;  %4172 = vmatpush1.bf16.msra.mxu0 %v10548_v55 }
 0x1a4   : > { %v11696_v7 = vadd.f32 %v3803_v61, %v3283_v60  ;;  %v3805_v13 = vpop.f32.mrf.mxu1  ;;  %4173 = vmatprep.subr.bf16.mxu0 %v15624_v1  ;;  %v10549_v5 = vld [vmem:[%s15643_s1 + $0x100] sm:$0xff]  }
 0x1a5   : > { %v3287_v18 = vpop.f32.mrf.mxu0  ;;  %3478 = vmatmul.mubr.bf16.gmra.mxu0 %v10434_v59  ;;  %v10446_v13 = vld [vmem:[%s11339_s24 + $0x810] ss:$24 sps:$4 sm:$0xff]  }
 0x1a6   : > { %v3288_v19 = vadd.f32 %v11510_v8, %v3287_v18  ;;  %v3808_v21 = vpop.f32.mrf.mxu1  ;;  %3999 = vmatmul.mubr.bf16.gmra.mxu1 %v10437_v63  ;;  %3485 = vmatprep.mubr.bf16.mxu0 %v10442_v4 }
 0x1a7   : > { %v3289_v23 = vpop.f32.mrf.mxu0  ;;  %4006 = vmatprep.mubr.bf16.mxu1 %v10445_v6  ;;  %4174 = vmatpush1.bf16.msra.mxu0 %v10549_v5 }
 0x1a8   : > { %v11703_v26 = vadd.f32 %v3808_v21, %v3288_v19  ;;  %v3810_v27 = vpop.f32.mrf.mxu1  ;;  %v10449_v19 = vld [vmem:[%s11339_s24 + $0x818] ss:$24 sps:$4 sm:$0xff]   ;;  %v10454_v21 = vld [vmem:[%s11339_s24 + $0x844] ss:$24 sps:$4 sm:$0xff]   ;;  %4183 = vmatprep.subr.bf16.mxu0 %v15624_v1 }
 0x1a9   : > { %v3290_v32 = vpop.f32.mrf.mxu0  ;;  %v10457_v27 = vld [vmem:[%s11339_s24 + $0x84c] ss:$24 sps:$4 sm:$0xff]  }
 0x1aa   : > { %v3291_v36 = vadd.f32 %v11510_v8, %v3290_v32  ;;  %v3811_v39 = vpop.f32.mrf.mxu1 }
 0x1ab   : > { %v3292_v44 = vpop.f32.mrf.mxu0 }
 0x1ac   : > { %v11714_v50 = vadd.f32 %v3811_v39, %v3291_v36  ;;  %v3813_v54 = vpop.f32.mrf.mxu1 }
 0x1ad   : > { %v3295_v57 = vpop.f32.mrf.mxu0  ;;  %3486 = vmatmul.mubr.bf16.gmra.mxu0 %v10440_v33  ;;  %v10556_v33 = vld [vmem:[%s15643_s1 + $0x158] sm:$0xff]   ;;  %v10557_v54 = vld [vmem:[%s15643_s1 + $0x150] sm:$0xff]  }
 0x1ae   : > { %v3296_v59 = vadd.f32 %v11510_v8, %v3295_v57  ;;  %v3816_v60 = vpop.f32.mrf.mxu1  ;;  %4007 = vmatmul.mubr.bf16.gmra.mxu1 %v10443_v41  ;;  %3493 = vmatprep.mubr.bf16.mxu0 %v10448_v42  ;;  %v10452_v57 = vld [vmem:[%s11339_s24 + $0x840] ss:$24 sps:$4 sm:$0xff]  }
 0x1af   : > { %v3297_v61 = vpop.f32.mrf.mxu0  ;;  %4014 = vmatprep.mubr.bf16.mxu1 %v10451_v45  ;;  %4184 = vmatpush2.bf16.msra.mxu0 %v10556_v33 }
 0x1b0   : > { %v11721_v63 = vadd.f32 %v3816_v60, %v3296_v59  ;;  %v3818_v4 = vpop.f32.mrf.mxu1  ;;  %4185 = vmatprep.subr.bf16.mxu0 %v15624_v1  ;;  %v10455_v61 = vld [vmem:[%s11339_s24 + $0x848] ss:$24 sps:$4 sm:$0xff]  }
 0x1b1   : > { %v3298_v6 = vpop.f32.mrf.mxu0  ;;  %v10460_v4 = vld [vmem:[%s11339_s24 + $0x874] ss:$24 sps:$4 sm:$0xff]  }
 0x1b2   : > { %v3299_v15 = vadd.f32 %v11510_v8, %v3298_v6  ;;  %v3819_v18 = vpop.f32.mrf.mxu1  ;;  %v10463_v6 = vld [vmem:[%s11339_s24 + $0x87c] ss:$24 sps:$4 sm:$0xff]  }
 0x1b3   : > { %v3300_v23 = vpop.f32.mrf.mxu0  ;;  %4186 = vmatpush2.bf16.msra.mxu0 %v10557_v54  ;;  %v10461_v54 = vld [vmem:[%s11339_s24 + $0x878] ss:$24 sps:$4 sm:$0xff]  }
 0x1b4   : > { %v11732_v29 = vadd.f32 %v3819_v18, %v3299_v15  ;;  %v3821_v32 = vpop.f32.mrf.mxu1  ;;  %4187 = vmatprep.subr.bf16.mxu0 %v15624_v1  ;;  %v10564_v18 = vld [vmem:[%s15643_s1 + $0x148] sm:$0xff]  }
 0x1b5   : > { %v3303_v36 = vpop.f32.mrf.mxu0  ;;  %3494 = vmatmul.mubr.bf16.gmra.mxu0 %v10446_v13 }
 0x1b6   : > { %v3304_v39 = vadd.f32 %v11510_v8, %v3303_v36  ;;  %v3824_v41 = vpop.f32.mrf.mxu1  ;;  %4015 = vmatmul.mubr.bf16.gmra.mxu1 %v10449_v19  ;;  %3501 = vmatprep.mubr.bf16.mxu0 %v10454_v21  ;;  %v10565_v36 = vld [vmem:[%s15643_s1 + $0x140] sm:$0xff]   ;;  %s431_s1 = sand.u32 1, %s11134_s26  }
 0x1b7   : > { %v3305_v42 = vpop.f32.mrf.mxu0  ;;  %4022 = vmatprep.mubr.bf16.mxu1 %v10457_v27  ;;  %4188 = vmatpush2.bf16.msra.mxu0 %v10564_v18  ;;  %s432_s23 = scalar_lea.vmem [#allocation2], %s431_s1 }
 0x1b8   : > { %v11739_v44 = vadd.f32 %v3824_v41, %v3304_v39  ;;  %v3826_v45 = vpop.f32.mrf.mxu1  ;;  %4189 = vmatprep.subr.bf16.mxu0 %v15624_v1  ;;  %v10458_v41 = vld [vmem:[%s11339_s24 + $0x870] ss:$24 sps:$4 sm:$0xff]   ;;  %s8699_s20 = sshll.u32 %s432_s23, 4  ;;  %s8700_s20 = int_to_ptr.vmem [resolvable:$true] %s8699_s20 }
 0x1b9   : > { %v3306_v55 = vpop.f32.mrf.mxu0  ;;  %s11082_s16 = scalar_lea.vmem %s8700_s20, 16 }
 0x1ba   : > { %v3307_v59 = vadd.f32 %v11510_v8, %v3306_v55  ;;  %v3827_v60 = vpop.f32.mrf.mxu1  ;;  %v10466_v55 = vld [vmem:[%s11339_s24 + $0x8a4] ss:$24 sps:$4 sm:$0xff]   ;;  %p11083_p11 = scmp.ne.s32.totalorder %s8700_s20, %s11082_s16 }
 0x1bb   : > { %v3308_v5 = vpop.f32.mrf.mxu0  ;;  %4190 = vmatpush2.bf16.msra.mxu0 %v10565_v36  ;;  %v10467_v36 = vld [vmem:[%s11339_s24 + $0x8a8] ss:$24 sps:$4 sm:$0xff]  }
 0x1bc   : > { %v11750_v13 = vadd.f32 %v3827_v60, %v3307_v59  ;;  %v3829_v15 = vpop.f32.mrf.mxu1  ;;  %v10469_v59 = vld [vmem:[%s11339_s24 + $0x8ac] ss:$24 sps:$4 sm:$0xff]   ;;  %8060 = vmatprep.subr.bf16.mxu0 %v15624_v1  ;;  %p11084_p12 = pnand %p11083_p11, %p11260_p5 }
 0x1bd   : > { %v3311_v19 = vpop.f32.mrf.mxu0  ;;  %3502 = vmatmul.mubr.bf16.gmra.mxu0 %v10452_v57 }
 0x1be   : > { %v3312_v21 = vadd.f32 %v11510_v8, %v3311_v19  ;;  %v3832_v23 = vpop.f32.mrf.mxu1  ;;  %4023 = vmatmul.mubr.bf16.gmra.mxu1 %v10455_v61  ;;  %3509 = vmatprep.mubr.bf16.mxu0 %v10460_v4  ;;  %p11085_p13 = pneg %p11084_p12 }
 0x1bf   : > { %v3313_v27 = vpop.f32.mrf.mxu0  ;;  %4030 = vmatprep.mubr.bf16.mxu1 %v10463_v6 }
 0x1c0   : > { %v11757_v32 = vadd.f32 %v3832_v23, %v3312_v21  ;;  %v3834_v33 = vpop.f32.mrf.mxu1  ;;  %v10464_v23 = vld [vmem:[%s11339_s24 + $0x8a0] ss:$24 sps:$4 sm:$0xff]  }
 0x1c1   : > { %v3314_v39 = vpop.f32.mrf.mxu0 }
 0x1c2   : > { %v3315_v42 = vadd.f32 %v11510_v8, %v3314_v39  ;;  %v3835_v45 = vpop.f32.mrf.mxu1  ;;  %v10472_v39 = vld [vmem:[%s11339_s24 + $0x8d4] ss:$24 sps:$4 sm:$0xff]  }
 0x1c3   : > { %v3316_v57 = vpop.f32.mrf.mxu0 }
 0x1c4   : > { %v11768_v60 = vadd.f32 %v3835_v45, %v3315_v42  ;;  %v3837_v61 = vpop.f32.mrf.mxu1  ;;  %v10475_v42 = vld [vmem:[%s11339_s24 + $0x8dc] ss:$24 sps:$4 sm:$0xff]  }
 0x1c5   : > { %v3319_v4 = vpop.f32.mrf.mxu0  ;;  %3510 = vmatmul.mubr.bf16.gmra.mxu0 %v10458_v41 }
 0x1c6   : > { %v3320_v5 = vadd.f32 %v11510_v8, %v3319_v4  ;;  %v3840_v6 = vpop.f32.mrf.mxu1  ;;  %4031 = vmatmul.mubr.bf16.gmra.mxu1 %v10461_v54  ;;  %3517 = vmatprep.mubr.bf16.mxu0 %v10466_v55 }
 0x1c7   : > { %v3321_v15 = vpop.f32.mrf.mxu0  ;;  %4038 = vmatprep.mubr.bf16.mxu1 %v10469_v59 }
 0x1c8   : > { %v11772_v18 = vadd.f32 %v3840_v6, %v3320_v5  ;;  %v3842_v19 = vpop.f32.mrf.mxu1  ;;  %v10470_v15 = vld [vmem:[%s11339_s24 + $0x8d0] ss:$24 sps:$4 sm:$0xff]  }
 0x1c9   : > { %v3322_v21 = vpop.f32.mrf.mxu0 }
 0x1ca   : > { %v3323_v27 = vadd.f32 %v11510_v8, %v3322_v21  ;;  %v3843_v33 = vpop.f32.mrf.mxu1 }
 0x1cb   : > { %v3324_v41 = vpop.f32.mrf.mxu0 }
 0x1cc   : > { %v11779_v45 = vadd.f32 %v3843_v33, %v3323_v27  ;;  %v3845_v54 = vpop.f32.mrf.mxu1  ;;  %v10473_v27 = vld [vmem:[%s11339_s24 + $0x8d8] ss:$24 sps:$4 sm:$0xff]   ;;  %v10478_v33 = vld [vmem:[%s11339_s24 + $0x904] ss:$24 sps:$4 sm:$0xff]  }
 0x1cd   : > { %v3327_v55 = vpop.f32.mrf.mxu0  ;;  %3518 = vmatmul.mubr.bf16.gmra.mxu0 %v10464_v23  ;;  %v10481_v41 = vld [vmem:[%s11339_s24 + $0x90c] ss:$24 sps:$4 sm:$0xff]  }
 0x1ce   : > { %v3328_v57 = vadd.f32 %v11510_v8, %v3327_v55  ;;  %v3848_v59 = vpop.f32.mrf.mxu1  ;;  %4039 = vmatmul.mubr.bf16.gmra.mxu1 %v10467_v36  ;;  %3525 = vmatprep.mubr.bf16.mxu0 %v10472_v39 }
 0x1cf   : > { %v3329_v61 = vpop.f32.mrf.mxu0  ;;  %4046 = vmatprep.mubr.bf16.mxu1 %v10475_v42 }
 0x1d0   : > { %v11782_v4 = vadd.f32 %v3848_v59, %v3328_v57  ;;  %v3850_v5 = vpop.f32.mrf.mxu1 }
 0x1d1   : > { %v3330_v6 = vpop.f32.mrf.mxu0 }
 0x1d2   : > { %v3331_v19 = vadd.f32 %v11510_v8, %v3330_v6  ;;  %v3851_v21 = vpop.f32.mrf.mxu1  ;;  %v10476_v6 = vld [vmem:[%s11339_s24 + $0x900] ss:$24 sps:$4 sm:$0xff]  }
 0x1d3   : > { %v3332_v23 = vpop.f32.mrf.mxu0 }
 0x1d4   : > { %v11789_v54 = vadd.f32 %v3851_v21, %v3331_v19  ;;  %v3853_v36 = vpop.f32.mrf.mxu1  ;;  %v10479_v23 = vld [vmem:[%s11339_s24 + $0x908] ss:$24 sps:$4 sm:$0xff]  }
 0x1d5   : > { %v3335_v39 = vpop.f32.mrf.mxu0  ;;  %3526 = vmatmul.mubr.bf16.gmra.mxu0 %v10470_v15  ;;  %v10484_v36 = vld [vmem:[%s11339_s24 + $0x934] ss:$24 sps:$4 sm:$0xff]  }
 0x1d6   : > { %15645 = vst [vmem:[#allocation6_spill] sm:$0xff] %v11789_v54  ;;  %v3336_v42 = vadd.f32 %v11510_v8, %v3335_v39  ;;  %v3856_v55 = vpop.f32.mrf.mxu1  ;;  %4047 = vmatmul.mubr.bf16.gmra.mxu1 %v10473_v27  ;;  %3533 = vmatprep.mubr.bf16.mxu0 %v10478_v33  ;;  %v10487_v15 = vld [vmem:[%s11339_s24 + $0x93c] ss:$24 sps:$4 sm:$0xff]   ;;  %v11804_v33 = vld [vmem:[%s15612_s2] ss:$0 sm:$0xff] }
 0x1d7   : > { %v3337_v57 = vpop.f32.mrf.mxu0  ;;  %4054 = vmatprep.mubr.bf16.mxu1 %v10481_v41 }
 0x1d8   : > { %v11792_v59 = vadd.f32 %v3856_v55, %v3336_v42  ;;  %v3858_v61 = vpop.f32.mrf.mxu1 }
 0x1d9   : > { %v3338_v5 = vpop.f32.mrf.mxu0  ;;  %v10482_v61 = vld [vmem:[%s11339_s24 + $0x930] ss:$24 sps:$4 sm:$0xff]  }
 0x1da   : > { %15646 = vst [vmem:[#allocation7_spill] sm:$0xff] %v11792_v59  ;;  %v3339_v19 = vadd.f32 %v11510_v8, %v3338_v5  ;;  %v3859_v21 = vpop.f32.mrf.mxu1 }
 0x1db   : > { %v3340_v1 = vpop.f32.mrf.mxu0 }
 0x1dc   : > { %v11799_v54 = vadd.f32 %v3859_v21, %v3339_v19  ;;  %v3861_v39 = vpop.f32.mrf.mxu1  ;;  %v10485_v19 = vld [vmem:[%s11339_s24 + $0x938] ss:$24 sps:$4 sm:$0xff]   ;;  %v10490_v21 = vld [vmem:[%s11339_s24 + $0x964] ss:$24 sps:$4 sm:$0xff]  }
 0x1dd   : > { %v3343_v27 = vpop.f32.mrf.mxu0  ;;  %3534 = vmatmul.mubr.bf16.gmra.mxu0 %v10476_v6 }
 0x1de   : > { %15647 = vst [vmem:[#allocation8_spill] sm:$0xff] %v11799_v54  ;;  %v3344_v8 = vadd.f32 %v11804_v33, %v3343_v27  ;;  %v3864_v41 = vpop.f32.mrf.mxu1  ;;  %4055 = vmatmul.mubr.bf16.gmra.mxu1 %v10479_v23  ;;  %3541 = vmatprep.mubr.bf16.mxu0 %v10484_v36  ;;  %v10493_v54 = vld [vmem:[%s11339_s24 + $0x96c] ss:$24 sps:$4 sm:$0xff]  }
 0x1df   : > { %v3345_v1 = vpop.f32.mrf.mxu0  ;;  %4062 = vmatprep.mubr.bf16.mxu1 %v10487_v15 }
 0x1e0   : > { %v11807_v42 = vadd.f32 %v3864_v41, %v3344_v8  ;;  %v3866_v55 = vpop.f32.mrf.mxu1 }
 0x1e1   : > { %v3346_v57 = vpop.f32.mrf.mxu0 }
 0x1e2   : > { %15648 = vst [vmem:[#allocation9_spill] sm:$0xff] %v11807_v42  ;;  %v3347_v5 = vadd.f32 %v11804_v33, %v3346_v57  ;;  %v3867_v6 = vpop.f32.mrf.mxu1  ;;  %v10488_v57 = vld [vmem:[%s11339_s24 + $0x960] ss:$24 sps:$4 sm:$0xff]  }
 0x1e3   : > { %v3348_v39 = vpop.f32.mrf.mxu0 }
 0x1e4   : > { %v11814_v59 = vadd.f32 %v3867_v6, %v3347_v5  ;;  %v3869_v23 = vpop.f32.mrf.mxu1  ;;  %v10491_v39 = vld [vmem:[%s11339_s24 + $0x968] ss:$24 sps:$4 sm:$0xff]  }
 0x1e5   : > { %v3351_v36 = vpop.f32.mrf.mxu0  ;;  %3542 = vmatmul.mubr.bf16.gmra.mxu0 %v10482_v61  ;;  %v10496_v23 = vld [vmem:[%s11339_s24 + $0x994] ss:$24 sps:$4 sm:$0xff]  }
 0x1e6   : > { %15649 = vst [vmem:[#allocation10_spill] sm:$0xff] %v11814_v59  ;;  %v3352_v15 = vadd.f32 %v11804_v33, %v3351_v36  ;;  %v3872_v27 = vpop.f32.mrf.mxu1  ;;  %4063 = vmatmul.mubr.bf16.gmra.mxu1 %v10485_v19  ;;  %3549 = vmatprep.mubr.bf16.mxu0 %v10490_v21  ;;  %v10499_v59 = vld [vmem:[%s11339_s24 + $0x99c] ss:$24 sps:$4 sm:$0xff]  }
 0x1e7   : > { %v3353_v8 = vpop.f32.mrf.mxu0  ;;  %4070 = vmatprep.mubr.bf16.mxu1 %v10493_v54 }
 0x1e8   : > { %v11817_v41 = vadd.f32 %v3872_v27, %v3352_v15  ;;  %v3874_v1 = vpop.f32.mrf.mxu1 }
 0x1e9   : > { %v3354_v55 = vpop.f32.mrf.mxu0 }
 0x1ea   : > { %15650 = vst [vmem:[#allocation11_spill] sm:$0xff] %v11817_v41  ;;  %v3355_v5 = vadd.f32 %v11804_v33, %v3354_v55  ;;  %v3875_v6 = vpop.f32.mrf.mxu1  ;;  %v10494_v55 = vld [vmem:[%s11339_s24 + $0x990] ss:$24 sps:$4 sm:$0xff]  }
 0x1eb   : > { %v3356_v61 = vpop.f32.mrf.mxu0 }
 0x1ec   : > { %v11824_v42 = vadd.f32 %v3875_v6, %v3355_v5  ;;  %v3877_v19 = vpop.f32.mrf.mxu1  ;;  %v10497_v61 = vld [vmem:[%s11339_s24 + $0x998] ss:$24 sps:$4 sm:$0xff]  }
 0x1ed   : > { %v3359_v21 = vpop.f32.mrf.mxu0  ;;  %3550 = vmatmul.mubr.bf16.gmra.mxu0 %v10488_v57  ;;  %v10502_v19 = vld [vmem:[%s11339_s24 + $0x9c4] ss:$24 sps:$4 sm:$0xff]  }
 0x1ee   : > { %15651 = vst [vmem:[#allocation12_spill] sm:$0xff] %v11824_v42  ;;  %v3360_v54 = vadd.f32 %v11804_v33, %v3359_v21  ;;  %v3880_v36 = vpop.f32.mrf.mxu1  ;;  %4071 = vmatmul.mubr.bf16.gmra.mxu1 %v10491_v39  ;;  %3557 = vmatprep.mubr.bf16.mxu0 %v10496_v23  ;;  %v10505_v42 = vld [vmem:[%s11339_s24 + $0x9cc] ss:$24 sps:$4 sm:$0xff]  }
 0x1ef   : > { %v3361_v15 = vpop.f32.mrf.mxu0  ;;  %4078 = vmatprep.mubr.bf16.mxu1 %v10499_v59 }
 0x1f0   : > { %v11827_v27 = vadd.f32 %v3880_v36, %v3360_v54  ;;  %v3882_v8 = vpop.f32.mrf.mxu1 }
 0x1f1   : > { %v3362_v1 = vpop.f32.mrf.mxu0 }
 0x1f2   : > { %15652 = vst [vmem:[#allocation13_spill] sm:$0xff] %v11827_v27  ;;  %v3363_v5 = vadd.f32 %v11804_v33, %v3362_v1  ;;  %v3883_v6 = vpop.f32.mrf.mxu1  ;;  %v10500_v1 = vld [vmem:[%s11339_s24 + $0x9c0] ss:$24 sps:$4 sm:$0xff]  }
 0x1f3   : > { %v3364_v57 = vpop.f32.mrf.mxu0 }
 0x1f4   : > { %v11834_v41 = vadd.f32 %v3883_v6, %v3363_v5  ;;  %v3885_v39 = vpop.f32.mrf.mxu1  ;;  %v10503_v57 = vld [vmem:[%s11339_s24 + $0x9c8] ss:$24 sps:$4 sm:$0xff]  }
 0x1f5   : > { %v3367_v23 = vpop.f32.mrf.mxu0  ;;  %3558 = vmatmul.mubr.bf16.gmra.mxu0 %v10494_v55  ;;  %v10508_v39 = vld [vmem:[%s11339_s24 + $0x9f4] ss:$24 sps:$4 sm:$0xff]  }
 0x1f6   : > { %15653 = vst [vmem:[#allocation14_spill] sm:$0xff] %v11834_v41  ;;  %v3368_v59 = vadd.f32 %v11804_v33, %v3367_v23  ;;  %v3888_v21 = vpop.f32.mrf.mxu1  ;;  %4079 = vmatmul.mubr.bf16.gmra.mxu1 %v10497_v61  ;;  %3565 = vmatprep.mubr.bf16.mxu0 %v10502_v19  ;;  %v10511_v41 = vld [vmem:[%s11339_s24 + $0x9fc] ss:$24 sps:$4 sm:$0xff]  }
 0x1f7   : > { %v3369_v54 = vpop.f32.mrf.mxu0  ;;  %4086 = vmatprep.mubr.bf16.mxu1 %v10505_v42 }
 0x1f8   : > { %v11837_v36 = vadd.f32 %v3888_v21, %v3368_v59  ;;  %v3890_v15 = vpop.f32.mrf.mxu1 }
 0x1f9   : > { %v3370_v8 = vpop.f32.mrf.mxu0 }
 0x1fa   : > { %15654 = vst [vmem:[#allocation15_spill] sm:$0xff] %v11837_v36  ;;  %v3371_v5 = vadd.f32 %v11804_v33, %v3370_v8  ;;  %v3891_v6 = vpop.f32.mrf.mxu1  ;;  %v10506_v8 = vld [vmem:[%s11339_s24 + $0x9f0] ss:$24 sps:$4 sm:$0xff]  }
 0x1fb   : > { %v3372_v55 = vpop.f32.mrf.mxu0 }
 0x1fc   : > { %v11844_v27 = vadd.f32 %v3891_v6, %v3371_v5  ;;  %v3893_v61 = vpop.f32.mrf.mxu1  ;;  %v10509_v55 = vld [vmem:[%s11339_s24 + $0x9f8] ss:$24 sps:$4 sm:$0xff]  }
 0x1fd   : > { %v3375_v19 = vpop.f32.mrf.mxu0  ;;  %3566 = vmatmul.mubr.bf16.gmra.mxu0 %v10500_v1  ;;  %v10514_v61 = vld [vmem:[%s11339_s24 + $0xa24] ss:$24 sps:$4 sm:$0xff]  }
 0x1fe   : > { %15655 = vst [vmem:[#allocation16_spill] sm:$0xff] %v11844_v27  ;;  %v3376_v42 = vadd.f32 %v11804_v33, %v3375_v19  ;;  %v3896_v23 = vpop.f32.mrf.mxu1  ;;  %4087 = vmatmul.mubr.bf16.gmra.mxu1 %v10503_v57  ;;  %3573 = vmatprep.mubr.bf16.mxu0 %v10508_v39  ;;  %v10517_v27 = vld [vmem:[%s11339_s24 + $0xa2c] ss:$24 sps:$4 sm:$0xff]  }
 0x1ff   : > { %v3377_v59 = vpop.f32.mrf.mxu0  ;;  %4094 = vmatprep.mubr.bf16.mxu1 %v10511_v41 }
 0x200   : > { %v11847_v21 = vadd.f32 %v3896_v23, %v3376_v42  ;;  %v3898_v54 = vpop.f32.mrf.mxu1 }
 0x201   : > { %v3378_v15 = vpop.f32.mrf.mxu0 }
 0x202   : > { %15656 = vst [vmem:[#allocation17_spill] sm:$0xff] %v11847_v21  ;;  %v3379_v5 = vadd.f32 %v11804_v33, %v3378_v15  ;;  %v3899_v6 = vpop.f32.mrf.mxu1  ;;  %v10512_v15 = vld [vmem:[%s11339_s24 + $0xa20] ss:$24 sps:$4 sm:$0xff]  }
 0x203   : > { %v3380_v1 = vpop.f32.mrf.mxu0 }
 0x204   : > { %v11854_v36 = vadd.f32 %v3899_v6, %v3379_v5  ;;  %v3901_v57 = vpop.f32.mrf.mxu1  ;;  %v10515_v1 = vld [vmem:[%s11339_s24 + $0xa28] ss:$24 sps:$4 sm:$0xff]  }
 0x205   : > { %v3383_v39 = vpop.f32.mrf.mxu0  ;;  %3574 = vmatmul.mubr.bf16.gmra.mxu0 %v10506_v8  ;;  %v10520_v57 = vld [vmem:[%s11339_s24 + $0xa54] ss:$24 sps:$4 sm:$0xff]  }
 0x206   : > { %15657 = vst [vmem:[#allocation18_spill] sm:$0xff] %v11854_v36  ;;  %v3384_v41 = vadd.f32 %v11804_v33, %v3383_v39  ;;  %v3904_v19 = vpop.f32.mrf.mxu1  ;;  %4095 = vmatmul.mubr.bf16.gmra.mxu1 %v10509_v55  ;;  %3581 = vmatprep.mubr.bf16.mxu0 %v10514_v61  ;;  %v10523_v36 = vld [vmem:[%s11339_s24 + $0xa5c] ss:$24 sps:$4 sm:$0xff]  }
 0x207   : > { %v3385_v42 = vpop.f32.mrf.mxu0  ;;  %4102 = vmatprep.mubr.bf16.mxu1 %v10517_v27 }
 0x208   : > { %v11857_v23 = vadd.f32 %v3904_v19, %v3384_v41  ;;  %v3906_v59 = vpop.f32.mrf.mxu1 }
 0x209   : > { %v3386_v54 = vpop.f32.mrf.mxu0 }
 0x20a   : > { %15658 = vst [vmem:[#allocation19_spill] sm:$0xff] %v11857_v23  ;;  %v3387_v5 = vadd.f32 %v11804_v33, %v3386_v54  ;;  %v3907_v6 = vpop.f32.mrf.mxu1  ;;  %v10518_v54 = vld [vmem:[%s11339_s24 + $0xa50] ss:$24 sps:$4 sm:$0xff]  }
 0x20b   : > { %v3388_v8 = vpop.f32.mrf.mxu0 }
 0x20c   : > { %v11864_v21 = vadd.f32 %v3907_v6, %v3387_v5  ;;  %v3909_v55 = vpop.f32.mrf.mxu1  ;;  %v10521_v8 = vld [vmem:[%s11339_s24 + $0xa58] ss:$24 sps:$4 sm:$0xff]  }
 0x20d   : > { %v3391_v61 = vpop.f32.mrf.mxu0  ;;  %3582 = vmatmul.mubr.bf16.gmra.mxu0 %v10512_v15  ;;  %v10528_v55 = vld [vmem:[%s11339_s24 + $0xa84] ss:$24 sps:$4 sm:$0xff]  }
 0x20e   : > { %15659 = vst [vmem:[#allocation20_spill] sm:$0xff] %v11864_v21  ;;  %v3392_v27 = vadd.f32 %v11804_v33, %v3391_v61  ;;  %v3912_v39 = vpop.f32.mrf.mxu1  ;;  %4103 = vmatmul.mubr.bf16.gmra.mxu1 %v10515_v1  ;;  %3589 = vmatprep.mubr.bf16.mxu0 %v10520_v57  ;;  %v10531_v21 = vld [vmem:[%s11339_s24 + $0xa8c] ss:$24 sps:$4 sm:$0xff]  }
 0x20f   : > { %v3393_v41 = vpop.f32.mrf.mxu0  ;;  %4110 = vmatprep.mubr.bf16.mxu1 %v10523_v36 }
 0x210   : > { %v11867_v19 = vadd.f32 %v3912_v39, %v3392_v27  ;;  %v3914_v42 = vpop.f32.mrf.mxu1 }
 0x211   : > { %v3394_v59 = vpop.f32.mrf.mxu0 }
 0x212   : > { %15660 = vst [vmem:[#allocation21_spill] sm:$0xff] %v11867_v19  ;;  %v3395_v5 = vadd.f32 %v11804_v33, %v3394_v59  ;;  %v3915_v6 = vpop.f32.mrf.mxu1  ;;  %v10526_v59 = vld [vmem:[%s11339_s24 + $0xa80] ss:$24 sps:$4 sm:$0xff]  }
 0x213   : > { %v3396_v15 = vpop.f32.mrf.mxu0 }
 0x214   : > { %v11874_v23 = vadd.f32 %v3915_v6, %v3395_v5  ;;  %v3917_v1 = vpop.f32.mrf.mxu1  ;;  %v10529_v15 = vld [vmem:[%s11339_s24 + $0xa88] ss:$24 sps:$4 sm:$0xff]  }
 0x215   : > { %v3399_v57 = vpop.f32.mrf.mxu0  ;;  %3590 = vmatmul.mubr.bf16.gmra.mxu0 %v10518_v54  ;;  %v10536_v1 = vld [vmem:[%s11339_s24 + $0xab4] ss:$24 sps:$4 sm:$0xff]  }
 0x216   : > { %15661 = vst [vmem:[#allocation22_spill] sm:$0xff] %v11874_v23  ;;  %v3400_v36 = vadd.f32 %v11804_v33, %v3399_v57  ;;  %v3920_v61 = vpop.f32.mrf.mxu1  ;;  %4111 = vmatmul.mubr.bf16.gmra.mxu1 %v10521_v8  ;;  %3597 = vmatprep.mubr.bf16.mxu0 %v10528_v55  ;;  %v10539_v23 = vld [vmem:[%s11339_s24 + $0xabc] ss:$24 sps:$4 sm:$0xff]  }
 0x217   : > { %v3401_v27 = vpop.f32.mrf.mxu0  ;;  %4118 = vmatprep.mubr.bf16.mxu1 %v10531_v21 }
 0x218   : > { %v11877_v39 = vadd.f32 %v3920_v61, %v3400_v36  ;;  %v3922_v41 = vpop.f32.mrf.mxu1 }
 0x219   : > { %v3402_v42 = vpop.f32.mrf.mxu0 }
 0x21a   : > { %15662 = vst [vmem:[#allocation23_spill] sm:$0xff] %v11877_v39  ;;  %v3403_v5 = vadd.f32 %v11804_v33, %v3402_v42  ;;  %v3923_v6 = vpop.f32.mrf.mxu1  ;;  %v10534_v42 = vld [vmem:[%s11339_s24 + $0xab0] ss:$24 sps:$4 sm:$0xff]  }
 0x21b   : > { %v3404_v54 = vpop.f32.mrf.mxu0 }
 0x21c   : > { %v11884_v19 = vadd.f32 %v3923_v6, %v3403_v5  ;;  %v3925_v8 = vpop.f32.mrf.mxu1  ;;  %v10537_v54 = vld [vmem:[%s11339_s24 + $0xab8] ss:$24 sps:$4 sm:$0xff]  }
 0x21d   : > { %v3407_v55 = vpop.f32.mrf.mxu0  ;;  %3598 = vmatmul.mubr.bf16.gmra.mxu0 %v10526_v59  ;;  %v10544_v8 = vld [vmem:[%s11339_s24 + $0xae4] ss:$24 sps:$4 sm:$0xff]  }
 0x21e   : > { %15663 = vst [vmem:[#allocation24_spill] sm:$0xff] %v11884_v19  ;;  %v3408_v21 = vadd.f32 %v11804_v33, %v3407_v55  ;;  %v3928_v57 = vpop.f32.mrf.mxu1  ;;  %4119 = vmatmul.mubr.bf16.gmra.mxu1 %v10529_v15  ;;  %3605 = vmatprep.mubr.bf16.mxu0 %v10536_v1  ;;  %v10547_v19 = vld [vmem:[%s11339_s24 + $0xaec] ss:$24 sps:$4 sm:$0xff]  }
 0x21f   : > { %v3409_v36 = vpop.f32.mrf.mxu0  ;;  %4126 = vmatprep.mubr.bf16.mxu1 %v10539_v23 }
 0x220   : > { %v11887_v61 = vadd.f32 %v3928_v57, %v3408_v21  ;;  %v3930_v27 = vpop.f32.mrf.mxu1 }
 0x221   : > { %v3410_v41 = vpop.f32.mrf.mxu0 }
 0x222   : > { %15664 = vst [vmem:[#allocation25_spill] sm:$0xff] %v11887_v61  ;;  %v3411_v5 = vadd.f32 %v11804_v33, %v3410_v41  ;;  %v3931_v6 = vpop.f32.mrf.mxu1  ;;  %v10542_v41 = vld [vmem:[%s11339_s24 + $0xae0] ss:$24 sps:$4 sm:$0xff]  }
 0x223   : > { %v3412_v59 = vpop.f32.mrf.mxu0 }
 0x224   : > { %v11894_v39 = vadd.f32 %v3931_v6, %v3411_v5  ;;  %v3933_v15 = vpop.f32.mrf.mxu1  ;;  %v10545_v59 = vld [vmem:[%s11339_s24 + $0xae8] ss:$24 sps:$4 sm:$0xff]  }
 0x225   : > { %v3415_v1 = vpop.f32.mrf.mxu0  ;;  %3606 = vmatmul.mubr.bf16.gmra.mxu0 %v10534_v42  ;;  %v10552_v15 = vld [vmem:[%s11339_s24 + $0xb14] ss:$24 sps:$4 sm:$0xff]  }
 0x226   : > { %15665 = vst [vmem:[#allocation26_spill] sm:$0xff] %v11894_v39  ;;  %v3416_v23 = vadd.f32 %v11804_v33, %v3415_v1  ;;  %v3936_v55 = vpop.f32.mrf.mxu1  ;;  %4127 = vmatmul.mubr.bf16.gmra.mxu1 %v10537_v54  ;;  %3613 = vmatprep.mubr.bf16.mxu0 %v10544_v8  ;;  %v10555_v39 = vld [vmem:[%s11339_s24 + $0xb1c] ss:$24 sps:$4 sm:$0xff]  }
 0x227   : > { %v3417_v21 = vpop.f32.mrf.mxu0  ;;  %4134 = vmatprep.mubr.bf16.mxu1 %v10547_v19 }
 0x228   : > { %v11897_v57 = vadd.f32 %v3936_v55, %v3416_v23  ;;  %v3938_v36 = vpop.f32.mrf.mxu1 }
 0x229   : > { %v3418_v27 = vpop.f32.mrf.mxu0 }
 0x22a   : > { %15666 = vst [vmem:[#allocation27_spill] sm:$0xff] %v11897_v57  ;;  %v3419_v5 = vadd.f32 %v11804_v33, %v3418_v27  ;;  %v3939_v6 = vpop.f32.mrf.mxu1  ;;  %v10550_v27 = vld [vmem:[%s11339_s24 + $0xb10] ss:$24 sps:$4 sm:$0xff]  }
 0x22b   : > { %v3420_v42 = vpop.f32.mrf.mxu0 }
 0x22c   : > { %v11904_v61 = vadd.f32 %v3939_v6, %v3419_v5  ;;  %v3941_v54 = vpop.f32.mrf.mxu1  ;;  %v10553_v42 = vld [vmem:[%s11339_s24 + $0xb18] ss:$24 sps:$4 sm:$0xff]  }
 0x22d   : > { %v3423_v8 = vpop.f32.mrf.mxu0  ;;  %3614 = vmatmul.mubr.bf16.gmra.mxu0 %v10542_v41  ;;  %v10560_v54 = vld [vmem:[%s11339_s24 + $0xb44] ss:$24 sps:$4 sm:$0x1f]  }
 0x22e   : > { %15667 = vst [vmem:[#allocation28_spill] sm:$0xff] %v11904_v61  ;;  %v3424_v19 = vadd.f32 %v11804_v33, %v3423_v8  ;;  %v3944_v1 = vpop.f32.mrf.mxu1  ;;  %4135 = vmatmul.mubr.bf16.gmra.mxu1 %v10545_v59  ;;  %3621 = vmatprep.mubr.bf16.mxu0 %v10552_v15  ;;  %v10563_v61 = vld [vmem:[%s11339_s24 + $0xb4c] ss:$24 sps:$4 sm:$0x1f]  }
 0x22f   : > { %v3425_v23 = vpop.f32.mrf.mxu0  ;;  %4142 = vmatprep.mubr.bf16.mxu1 %v10555_v39 }
 0x230   : > { %v11907_v55 = vadd.f32 %v3944_v1, %v3424_v19  ;;  %v3946_v21 = vpop.f32.mrf.mxu1 }
 0x231   : > { %v3426_v36 = vpop.f32.mrf.mxu0 }
 0x232   : > { %15668 = vst [vmem:[#allocation29_spill] sm:$0xff] %v11907_v55  ;;  %v3427_v5 = vadd.f32 %v11804_v33, %v3426_v36  ;;  %v3947_v6 = vpop.f32.mrf.mxu1  ;;  %v10558_v36 = vld [vmem:[%s11339_s24 + $0xb40] ss:$24 sps:$4 sm:$0x1f]  }
 0x233   : > { %v3428_v41 = vpop.f32.mrf.mxu0 }
 0x234   : > { %v11914_v57 = vadd.f32 %v3947_v6, %v3427_v5  ;;  %v3949_v59 = vpop.f32.mrf.mxu1  ;;  %v10561_v41 = vld [vmem:[%s11339_s24 + $0xb48] ss:$24 sps:$4 sm:$0x1f]  }
 0x235   : > { %v3431_v15 = vpop.f32.mrf.mxu0  ;;  %3622 = vmatmul.mubr.bf16.gmra.mxu0 %v10550_v27  ;;  %v10568_v59 = vld [vmem:[%s11339_s24 + $0x14] ss:$24 sps:$4 sm:$0xff]  }
 0x236   : > { %15669 = vst [vmem:[#allocation30_spill] sm:$0xff] %v11914_v57  ;;  %v3432_v39 = vadd.f32 %v11804_v33, %v3431_v15  ;;  %v3952_v8 = vpop.f32.mrf.mxu1  ;;  %4143 = vmatmul.mubr.bf16.gmra.mxu1 %v10553_v42  ;;  %3629 = vmatprep.mubr.bf16.mxu0 %v10560_v54 }
 0x237   : > { %v3433_v19 = vpop.f32.mrf.mxu0  ;;  %4150 = vmatprep.mubr.bf16.mxu1 %v10563_v61 }
 0x238   : > { %v11917_v1 = vadd.f32 %v3952_v8, %v3432_v39  ;;  %v3954_v23 = vpop.f32.mrf.mxu1 }
 0x239   : > { %v3434_v21 = vpop.f32.mrf.mxu0 }
 0x23a   : > { %15670 = vst [vmem:[#allocation31_spill] sm:$0xff] %v11917_v1  ;;  %v3435_v5 = vadd.f32 %v11804_v33, %v3434_v21  ;;  %v3955_v6 = vpop.f32.mrf.mxu1  ;;  %v10566_v21 = vld [vmem:[%s11339_s24 + $0x10] ss:$24 sps:$4 sm:$0xff]  }
 0x23b   : > { %v3436_v57 = vpop.f32.mrf.mxu0 }
 0x23c   : > { %v11923_v27 = vadd.f32 %v3955_v6, %v3435_v5  ;;  %v3957_v42 = vpop.f32.mrf.mxu1  ;;  %v10569_v6 = vld [vmem:[%s11339_s24 + $0x44] ss:$24 sps:$4 sm:$0xff]  }
 0x23d   : > { %v3439_v54 = vpop.f32.mrf.mxu0  ;;  %3630 = vmatmul.mubr.bf16.gmra.mxu0 %v10558_v36 }
 0x23e   : > { %15671 = vst [vmem:[#allocation32_spill] sm:$0xff] %v11923_v27  ;;  %v3440_v61 = vadd.f32 %v11804_v33, %v3439_v54  ;;  %v3960_v15 = vpop.f32.mrf.mxu1  ;;  %4151 = vmatmul.mubr.bf16.gmra.mxu1 %v10561_v41  ;;  %9170 = vmatprep.mubr.msk.bf16.mxu0 %vm2933_vm0, %v10568_v59 }
 0x23f   : > { %v3441_v39 = vpop.f32.mrf.mxu0 }
 0x240   : > { %v11927_v8 = vadd.f32 %v3960_v15, %v3440_v61  ;;  %v3962_v19 = vpop.f32.mrf.mxu1 }
 0x241   : > { %v3442_v23 = vpop.f32.mrf.mxu0 }
 0x242   : > { %15672 = vst [vmem:[#allocation33_spill] sm:$0xff] %v11927_v8  ;;  %v3443_v57 = vadd.f32 %v11804_v33, %v3442_v23  ;;  %v3963_v5 = vpop.f32.mrf.mxu1  ;;  %v10571_v23 = vld [vmem:[%s11339_s24 + $0x40] ss:$24 sps:$4 sm:$0xff]  }
 0x243   : > { %v3444_v42 = vpop.f32.mrf.mxu0 }
 0x244   : > { %v11932_v36 = vadd.f32 %v3963_v5, %v3443_v57  ;;  %v3965_v54 = vpop.f32.mrf.mxu1  ;;  %v10572_v57 = vld [vmem:[%s11339_s24 + $0x74] ss:$24 sps:$4 sm:$0xff]  }
 0x245   : > { %v3447_v27 = vpop.f32.mrf.mxu0  ;;  %4192 = vmatmul.mubr.bf16.vlgmr.msra.gmra.mxu0 %v10566_v21 }
 0x246   : > { %15673 = vst [vmem:[#allocation34_spill] sm:$0xff] %v11932_v36  ;;  %v3448_v41 = vadd.f32 %v11804_v33, %v3447_v27  ;;  %v3968_v59 = vpop.f32.mrf.mxu1  ;;  %9171 = vmatprep.mubr.msk.bf16.mxu0 %vm2933_vm0, %v10569_v6 }
 0x247   : > { %v3449_v61 = vpop.f32.mrf.mxu0 }
 0x248   : > { %v11936_v15 = vadd.f32 %v3968_v59, %v3448_v41  ;;  %v3970_v39 = vpop.f32.mrf.mxu1 }
 0x249   : > { %v3450_v19 = vpop.f32.mrf.mxu0 }
 0x24a   : > { %15674 = vst [vmem:[#allocation35_spill] sm:$0xff] %v11936_v15  ;;  %v3451_v8 = vadd.f32 %v11804_v33, %v3450_v19  ;;  %v3971_v42 = vpop.f32.mrf.mxu1  ;;  %v10574_v19 = vld [vmem:[%s11339_s24 + $0x70] ss:$24 sps:$4 sm:$0xff]  }
 0x24b   : > { %v3452_v5 = vpop.f32.mrf.mxu0 }
 0x24c   : > { %v11941_v54 = vadd.f32 %v3971_v42, %v3451_v8  ;;  %v3973_v21 = vpop.f32.mrf.mxu1  ;;  %v10575_v8 = vld [vmem:[%s11339_s24 + $0xa4] ss:$24 sps:$4 sm:$0xff]  }
 0x24d   : > { %v3455_v27 = vpop.f32.mrf.mxu0  ;;  %4200 = vmatmul.mubr.bf16.gmra.mxu0 %v10571_v23 }
 0x24e   : > { %15675 = vst [vmem:[#allocation36_spill] sm:$0xff] %v11941_v54  ;;  %v3456_v6 = vadd.f32 %v11804_v33, %v3455_v27  ;;  %v3976_v61 = vpop.f32.mrf.mxu1  ;;  %9172 = vmatprep.mubr.msk.bf16.mxu0 %vm2933_vm0, %v10572_v57 }
 0x24f   : > { %v3457_v41 = vpop.f32.mrf.mxu0 }
 0x250   : > { %v11945_v59 = vadd.f32 %v3976_v61, %v3456_v6  ;;  %v3978_v39 = vpop.f32.mrf.mxu1 }
 0x251   : > { %v3458_v15 = vpop.f32.mrf.mxu0 }
 0x252   : > { %15676 = vst [vmem:[#allocation37_spill] sm:$0xff] %v11945_v59  ;;  %v3459_v36 = vadd.f32 %v11804_v33, %v3458_v15  ;;  %v3979_v5 = vpop.f32.mrf.mxu1  ;;  %v10577_v15 = vld [vmem:[%s11339_s24 + $0xa0] ss:$24 sps:$4 sm:$0xff]  }
 0x253   : > { %v3460_v42 = vpop.f32.mrf.mxu0 }
 0x254   : > { %v11950_v21 = vadd.f32 %v3979_v5, %v3459_v36  ;;  %v3981_v23 = vpop.f32.mrf.mxu1  ;;  %v10578_v36 = vld [vmem:[%s11339_s24 + $0xd4] ss:$24 sps:$4 sm:$0xff]  }
 0x255   : > { %v3463_v27 = vpop.f32.mrf.mxu0  ;;  %4208 = vmatmul.mubr.bf16.gmra.mxu0 %v10574_v19 }
 0x256   : > { %15677 = vst [vmem:[#allocation38_spill] sm:$0xff] %v11950_v21  ;;  %v3464_v57 = vadd.f32 %v11804_v33, %v3463_v27  ;;  %v3984_v41 = vpop.f32.mrf.mxu1  ;;  %9173 = vmatprep.mubr.msk.bf16.mxu0 %vm2933_vm0, %v10575_v8 }
 0x257   : > { %v3465_v6 = vpop.f32.mrf.mxu0 }
 0x258   : > { %v11954_v61 = vadd.f32 %v3984_v41, %v3464_v57  ;;  %v3986_v39 = vpop.f32.mrf.mxu1 }
 0x259   : > { %v3466_v59 = vpop.f32.mrf.mxu0 }
 0x25a   : > { %15678 = vst [vmem:[#allocation39_spill] sm:$0xff] %v11954_v61  ;;  %v3467_v54 = vadd.f32 %v11804_v33, %v3466_v59  ;;  %v3987_v42 = vpop.f32.mrf.mxu1  ;;  %v10580_v59 = vld [vmem:[%s11339_s24 + $0xd0] ss:$24 sps:$4 sm:$0xff]  }
 0x25b   : > { %v3468_v5 = vpop.f32.mrf.mxu0 }
 0x25c   : > { %v11959_v23 = vadd.f32 %v3987_v42, %v3467_v54  ;;  %v3989_v19 = vpop.f32.mrf.mxu1  ;;  %v10581_v54 = vld [vmem:[%s11339_s24 + $0x104] ss:$24 sps:$4 sm:$0xff]  }
 0x25d   : > { %v3471_v27 = vpop.f32.mrf.mxu0  ;;  %4216 = vmatmul.mubr.bf16.gmra.mxu0 %v10577_v15 }
 0x25e   : > { %15679 = vst [vmem:[#allocation40_spill] sm:$0xff] %v11959_v23  ;;  %v3472_v8 = vadd.f32 %v11804_v33, %v3471_v27  ;;  %v3992_v6 = vpop.f32.mrf.mxu1  ;;  %9174 = vmatprep.mubr.msk.bf16.mxu0 %vm2933_vm0, %v10578_v36 }
 0x25f   : > { %v3473_v57 = vpop.f32.mrf.mxu0 }
 0x260   : > { %v11963_v41 = vadd.f32 %v3992_v6, %v3472_v8  ;;  %v3994_v39 = vpop.f32.mrf.mxu1 }
 0x261   : > { %v3474_v61 = vpop.f32.mrf.mxu0 }
 0x262   : > { %15680 = vst [vmem:[#allocation41_spill] sm:$0xff] %v11963_v41  ;;  %v3475_v21 = vadd.f32 %v11804_v33, %v3474_v61  ;;  %v3995_v5 = vpop.f32.mrf.mxu1  ;;  %v10583_v61 = vld [vmem:[%s11339_s24 + $0x100] ss:$24 sps:$4 sm:$0xff]  }
 0x263   : > { %v3476_v42 = vpop.f32.mrf.mxu0 }
 0x264   : > { %v11968_v19 = vadd.f32 %v3995_v5, %v3475_v21  ;;  %v3997_v15 = vpop.f32.mrf.mxu1  ;;  %v10584_v21 = vld [vmem:[%s11339_s24 + $0x134] ss:$24 sps:$4 sm:$0xff]  }
 0x265   : > { %v3479_v27 = vpop.f32.mrf.mxu0  ;;  %4224 = vmatmul.mubr.bf16.gmra.mxu0 %v10580_v59 }
 0x266   : > { %15681 = vst [vmem:[#allocation42_spill] sm:$0xff] %v11968_v19  ;;  %v3480_v36 = vadd.f32 %v11804_v33, %v3479_v27  ;;  %v4000_v57 = vpop.f32.mrf.mxu1  ;;  %9175 = vmatprep.mubr.msk.bf16.mxu0 %vm2933_vm0, %v10581_v54 }
 0x267   : > { %v3481_v8 = vpop.f32.mrf.mxu0 }
 0x268   : > { %v11972_v6 = vadd.f32 %v4000_v57, %v3480_v36  ;;  %v4002_v39 = vpop.f32.mrf.mxu1 }
 0x269   : > { %v3482_v41 = vpop.f32.mrf.mxu0 }
 0x26a   : > { %15682 = vst [vmem:[#allocation43_spill] sm:$0xff] %v11972_v6  ;;  %v3483_v23 = vadd.f32 %v11804_v33, %v3482_v41  ;;  %v4003_v42 = vpop.f32.mrf.mxu1  ;;  %v10586_v41 = vld [vmem:[%s11339_s24 + $0x130] ss:$24 sps:$4 sm:$0xff]  }
 0x26b   : > { %v3484_v5 = vpop.f32.mrf.mxu0 }
 0x26c   : > { %v11977_v15 = vadd.f32 %v4003_v42, %v3483_v23  ;;  %v4005_v59 = vpop.f32.mrf.mxu1  ;;  %v10587_v23 = vld [vmem:[%s11339_s24 + $0x164] ss:$24 sps:$4 sm:$0xff]  }
 0x26d   : > { %v3487_v27 = vpop.f32.mrf.mxu0  ;;  %4232 = vmatmul.mubr.bf16.gmra.mxu0 %v10583_v61 }
 0x26e   : > { %15683 = vst [vmem:[#allocation44_spill] sm:$0xff] %v11977_v15  ;;  %v3488_v54 = vadd.f32 %v11804_v33, %v3487_v27  ;;  %v4008_v8 = vpop.f32.mrf.mxu1  ;;  %9176 = vmatprep.mubr.msk.bf16.mxu0 %vm2933_vm0, %v10584_v21 }
 0x26f   : > { %v3489_v36 = vpop.f32.mrf.mxu0 }
 0x270   : > { %v11981_v57 = vadd.f32 %v4008_v8, %v3488_v54  ;;  %v4010_v39 = vpop.f32.mrf.mxu1 }
 0x271   : > { %v3490_v6 = vpop.f32.mrf.mxu0 }
 0x272   : > { %15684 = vst [vmem:[#allocation45_spill] sm:$0xff] %v11981_v57  ;;  %v3491_v19 = vadd.f32 %v11804_v33, %v3490_v6  ;;  %v4011_v5 = vpop.f32.mrf.mxu1  ;;  %v10589_v6 = vld [vmem:[%s11339_s24 + $0x160] ss:$24 sps:$4 sm:$0xff]  }
 0x273   : > { %v3492_v42 = vpop.f32.mrf.mxu0 }
 0x274   : > { %v11986_v59 = vadd.f32 %v4011_v5, %v3491_v19  ;;  %v4013_v61 = vpop.f32.mrf.mxu1  ;;  %v10590_v19 = vld [vmem:[%s11339_s24 + $0x194] ss:$24 sps:$4 sm:$0xff]  }
 0x275   : > { %v3495_v27 = vpop.f32.mrf.mxu0  ;;  %4240 = vmatmul.mubr.bf16.gmra.mxu0 %v10586_v41 }
 0x276   : > { %15685 = vst [vmem:[#allocation46_spill] sm:$0xff] %v11986_v59  ;;  %v3496_v21 = vadd.f32 %v11804_v33, %v3495_v27  ;;  %v4016_v36 = vpop.f32.mrf.mxu1  ;;  %9177 = vmatprep.mubr.msk.bf16.mxu0 %vm2933_vm0, %v10587_v23 }
 0x277   : > { %v3497_v54 = vpop.f32.mrf.mxu0 }
 0x278   : > { %v11990_v8 = vadd.f32 %v4016_v36, %v3496_v21  ;;  %v4018_v39 = vpop.f32.mrf.mxu1 }
 0x279   : > { %v3498_v57 = vpop.f32.mrf.mxu0 }
 0x27a   : > { %15686 = vst [vmem:[#allocation47_spill] sm:$0xff] %v11990_v8  ;;  %v3499_v15 = vadd.f32 %v11804_v33, %v3498_v57  ;;  %v4019_v42 = vpop.f32.mrf.mxu1  ;;  %v10592_v57 = vld [vmem:[%s11339_s24 + $0x190] ss:$24 sps:$4 sm:$0xff]  }
 0x27b   : > { %v3500_v5 = vpop.f32.mrf.mxu0 }
 0x27c   : > { %v11995_v61 = vadd.f32 %v4019_v42, %v3499_v15  ;;  %v4021_v41 = vpop.f32.mrf.mxu1  ;;  %v10593_v15 = vld [vmem:[%s11339_s24 + $0x1c4] ss:$24 sps:$4 sm:$0xff]  }
 0x27d   : > { %v3503_v27 = vpop.f32.mrf.mxu0  ;;  %4248 = vmatmul.mubr.bf16.gmra.mxu0 %v10589_v6 }
 0x27e   : > { %15687 = vst [vmem:[#allocation48_spill] sm:$0xff] %v11995_v61  ;;  %v3504_v23 = vadd.f32 %v11804_v33, %v3503_v27  ;;  %v4024_v54 = vpop.f32.mrf.mxu1  ;;  %9178 = vmatprep.mubr.msk.bf16.mxu0 %vm2933_vm0, %v10590_v19 }
 0x27f   : > { %v3505_v21 = vpop.f32.mrf.mxu0 }
 0x280   : > { %v11999_v36 = vadd.f32 %v4024_v54, %v3504_v23  ;;  %v4026_v39 = vpop.f32.mrf.mxu1 }
 0x281   : > { %v3506_v8 = vpop.f32.mrf.mxu0 }
 0x282   : > { %15688 = vst [vmem:[#allocation49_spill] sm:$0xff] %v11999_v36  ;;  %v3507_v59 = vadd.f32 %v11804_v33, %v3506_v8  ;;  %v4027_v5 = vpop.f32.mrf.mxu1  ;;  %v10595_v8 = vld [vmem:[%s11339_s24 + $0x1c0] ss:$24 sps:$4 sm:$0xff]  }
 0x283   : > { %v3508_v42 = vpop.f32.mrf.mxu0 }
 0x284   : > { %v12004_v41 = vadd.f32 %v4027_v5, %v3507_v59  ;;  %v4029_v6 = vpop.f32.mrf.mxu1  ;;  %v10596_v59 = vld [vmem:[%s11339_s24 + $0x1f4] ss:$24 sps:$4 sm:$0xff]  }
 0x285   : > { %v3511_v27 = vpop.f32.mrf.mxu0  ;;  %4256 = vmatmul.mubr.bf16.gmra.mxu0 %v10592_v57 }
 0x286   : > { %15689 = vst [vmem:[#allocation50_spill] sm:$0xff] %v12004_v41  ;;  %v3512_v19 = vadd.f32 %v11804_v33, %v3511_v27  ;;  %v4032_v21 = vpop.f32.mrf.mxu1  ;;  %9179 = vmatprep.mubr.msk.bf16.mxu0 %vm2933_vm0, %v10593_v15 }
 0x287   : > { %v3513_v23 = vpop.f32.mrf.mxu0 }
 0x288   : > { %v12008_v54 = vadd.f32 %v4032_v21, %v3512_v19  ;;  %v4034_v39 = vpop.f32.mrf.mxu1 }
 0x289   : > { %v3514_v36 = vpop.f32.mrf.mxu0 }
 0x28a   : > { %15690 = vst [vmem:[#allocation51_spill] sm:$0xff] %v12008_v54  ;;  %v3515_v61 = vadd.f32 %v11804_v33, %v3514_v36  ;;  %v4035_v42 = vpop.f32.mrf.mxu1  ;;  %v10598_v36 = vld [vmem:[%s11339_s24 + $0x1f0] ss:$24 sps:$4 sm:$0xff]  }
 0x28b   : > { %v3516_v5 = vpop.f32.mrf.mxu0 }
 0x28c   : > { %v12013_v6 = vadd.f32 %v4035_v42, %v3515_v61  ;;  %v4037_v57 = vpop.f32.mrf.mxu1  ;;  %v10599_v61 = vld [vmem:[%s11339_s24 + $0x224] ss:$24 sps:$4 sm:$0xff]  }
 0x28d   : > { %v3519_v27 = vpop.f32.mrf.mxu0  ;;  %4264 = vmatmul.mubr.bf16.gmra.mxu0 %v10595_v8 }
 0x28e   : > { %15691 = vst [vmem:[#allocation52_spill] sm:$0xff] %v12013_v6  ;;  %v3520_v15 = vadd.f32 %v11804_v33, %v3519_v27  ;;  %v4040_v23 = vpop.f32.mrf.mxu1  ;;  %9180 = vmatprep.mubr.msk.bf16.mxu0 %vm2933_vm0, %v10596_v59 }
 0x28f   : > { %v3521_v19 = vpop.f32.mrf.mxu0 }
 0x290   : > { %v12017_v21 = vadd.f32 %v4040_v23, %v3520_v15  ;;  %v4042_v39 = vpop.f32.mrf.mxu1 }
 0x291   : > { %v3522_v54 = vpop.f32.mrf.mxu0 }
 0x292   : > { %15692 = vst [vmem:[#allocation53_spill] sm:$0xff] %v12017_v21  ;;  %v3523_v41 = vadd.f32 %v11804_v33, %v3522_v54  ;;  %v4043_v5 = vpop.f32.mrf.mxu1  ;;  %v10601_v54 = vld [vmem:[%s11339_s24 + $0x220] ss:$24 sps:$4 sm:$0xff]  }
 0x293   : > { %v3524_v42 = vpop.f32.mrf.mxu0 }
 0x294   : > { %v12022_v57 = vadd.f32 %v4043_v5, %v3523_v41  ;;  %v4045_v8 = vpop.f32.mrf.mxu1  ;;  %v10602_v41 = vld [vmem:[%s11339_s24 + $0x254] ss:$24 sps:$4 sm:$0xff]  }
 0x295   : > { %v3527_v27 = vpop.f32.mrf.mxu0  ;;  %4272 = vmatmul.mubr.bf16.gmra.mxu0 %v10598_v36 }
 0x296   : > { %15693 = vst [vmem:[#allocation54_spill] sm:$0xff] %v12022_v57  ;;  %v3528_v59 = vadd.f32 %v11804_v33, %v3527_v27  ;;  %v4048_v19 = vpop.f32.mrf.mxu1  ;;  %9181 = vmatprep.mubr.msk.bf16.mxu0 %vm2933_vm0, %v10599_v61 }
 0x297   : > { %v3529_v15 = vpop.f32.mrf.mxu0 }
 0x298   : > { %v12026_v23 = vadd.f32 %v4048_v19, %v3528_v59  ;;  %v4050_v39 = vpop.f32.mrf.mxu1 }
 0x299   : > { %v3530_v21 = vpop.f32.mrf.mxu0 }
 0x29a   : > { %15694 = vst [vmem:[#allocation55_spill] sm:$0xff] %v12026_v23  ;;  %v3531_v6 = vadd.f32 %v11804_v33, %v3530_v21  ;;  %v4051_v42 = vpop.f32.mrf.mxu1  ;;  %v10604_v21 = vld [vmem:[%s11339_s24 + $0x250] ss:$24 sps:$4 sm:$0xff]  }
 0x29b   : > { %v3532_v5 = vpop.f32.mrf.mxu0 }
 0x29c   : > { %v12031_v8 = vadd.f32 %v4051_v42, %v3531_v6  ;;  %v4053_v36 = vpop.f32.mrf.mxu1  ;;  %v10605_v6 = vld [vmem:[%s11339_s24 + $0x284] ss:$24 sps:$4 sm:$0xff]  }
 0x29d   : > { %v3535_v27 = vpop.f32.mrf.mxu0  ;;  %4280 = vmatmul.mubr.bf16.gmra.mxu0 %v10601_v54 }
 0x29e   : > { %15695 = vst [vmem:[#allocation56_spill] sm:$0xff] %v12031_v8  ;;  %v3536_v61 = vadd.f32 %v11804_v33, %v3535_v27  ;;  %v4056_v15 = vpop.f32.mrf.mxu1  ;;  %9182 = vmatprep.mubr.msk.bf16.mxu0 %vm2933_vm0, %v10602_v41 }
 0x29f   : > { %v3537_v59 = vpop.f32.mrf.mxu0 }
 0x2a0   : > { %v12035_v19 = vadd.f32 %v4056_v15, %v3536_v61  ;;  %v4058_v39 = vpop.f32.mrf.mxu1 }
 0x2a1   : > { %v3538_v23 = vpop.f32.mrf.mxu0 }
 0x2a2   : > { %15696 = vst [vmem:[#allocation57_spill] sm:$0xff] %v12035_v19  ;;  %v3539_v57 = vadd.f32 %v11804_v33, %v3538_v23  ;;  %v4059_v5 = vpop.f32.mrf.mxu1  ;;  %v10607_v23 = vld [vmem:[%s11339_s24 + $0x280] ss:$24 sps:$4 sm:$0xff]  }
 0x2a3   : > { %v3540_v42 = vpop.f32.mrf.mxu0 }
 0x2a4   : > { %v12040_v36 = vadd.f32 %v4059_v5, %v3539_v57  ;;  %v4061_v54 = vpop.f32.mrf.mxu1  ;;  %v10608_v57 = vld [vmem:[%s11339_s24 + $0x2b4] ss:$24 sps:$4 sm:$0xff]  }
 0x2a5   : > { %v3543_v27 = vpop.f32.mrf.mxu0  ;;  %4288 = vmatmul.mubr.bf16.gmra.mxu0 %v10604_v21 }
 0x2a6   : > { %15697 = vst [vmem:[#allocation58_spill] sm:$0xff] %v12040_v36  ;;  %v3544_v41 = vadd.f32 %v11804_v33, %v3543_v27  ;;  %v4064_v59 = vpop.f32.mrf.mxu1  ;;  %9183 = vmatprep.mubr.msk.bf16.mxu0 %vm2933_vm0, %v10605_v6 }
 0x2a7   : > { %v3545_v61 = vpop.f32.mrf.mxu0 }
 0x2a8   : > { %v12044_v15 = vadd.f32 %v4064_v59, %v3544_v41  ;;  %v4066_v39 = vpop.f32.mrf.mxu1 }
 0x2a9   : > { %v3546_v19 = vpop.f32.mrf.mxu0 }
 0x2aa   : > { %15698 = vst [vmem:[#allocation59_spill] sm:$0xff] %v12044_v15  ;;  %v3547_v8 = vadd.f32 %v11804_v33, %v3546_v19  ;;  %v4067_v42 = vpop.f32.mrf.mxu1  ;;  %v10610_v19 = vld [vmem:[%s11339_s24 + $0x2b0] ss:$24 sps:$4 sm:$0xff]  }
 0x2ab   : > { %v3548_v5 = vpop.f32.mrf.mxu0 }
 0x2ac   : > { %v12049_v54 = vadd.f32 %v4067_v42, %v3547_v8  ;;  %v4069_v21 = vpop.f32.mrf.mxu1  ;;  %v10611_v8 = vld [vmem:[%s11339_s24 + $0x2e4] ss:$24 sps:$4 sm:$0xff]  }
 0x2ad   : > { %v3551_v27 = vpop.f32.mrf.mxu0  ;;  %4296 = vmatmul.mubr.bf16.gmra.mxu0 %v10607_v23 }
 0x2ae   : > { %15699 = vst [vmem:[#allocation60_spill] sm:$0xff] %v12049_v54  ;;  %v3552_v6 = vadd.f32 %v11804_v33, %v3551_v27  ;;  %v4072_v61 = vpop.f32.mrf.mxu1  ;;  %9184 = vmatprep.mubr.msk.bf16.mxu0 %vm2933_vm0, %v10608_v57 }
 0x2af   : > { %v3553_v41 = vpop.f32.mrf.mxu0 }
 0x2b0   : > { %v12053_v59 = vadd.f32 %v4072_v61, %v3552_v6  ;;  %v4074_v39 = vpop.f32.mrf.mxu1 }
 0x2b1   : > { %v3554_v15 = vpop.f32.mrf.mxu0 }
 0x2b2   : > { %15700 = vst [vmem:[#allocation61_spill] sm:$0xff] %v12053_v59  ;;  %v3555_v36 = vadd.f32 %v11804_v33, %v3554_v15  ;;  %v4075_v5 = vpop.f32.mrf.mxu1  ;;  %v10613_v15 = vld [vmem:[%s11339_s24 + $0x2e0] ss:$24 sps:$4 sm:$0xff]  }
 0x2b3   : > { %v3556_v42 = vpop.f32.mrf.mxu0 }
 0x2b4   : > { %v12058_v21 = vadd.f32 %v4075_v5, %v3555_v36  ;;  %v4077_v23 = vpop.f32.mrf.mxu1  ;;  %v10614_v36 = vld [vmem:[%s11339_s24 + $0x314] ss:$24 sps:$4 sm:$0xff]  }
 0x2b5   : > { %v3559_v27 = vpop.f32.mrf.mxu0  ;;  %4304 = vmatmul.mubr.bf16.gmra.mxu0 %v10610_v19 }
 0x2b6   : > { %15701 = vst [vmem:[#allocation62_spill] sm:$0xff] %v12058_v21  ;;  %v3560_v57 = vadd.f32 %v11804_v33, %v3559_v27  ;;  %v4080_v41 = vpop.f32.mrf.mxu1  ;;  %9185 = vmatprep.mubr.msk.bf16.mxu0 %vm2933_vm0, %v10611_v8 }
 0x2b7   : > { %v3561_v6 = vpop.f32.mrf.mxu0 }
 0x2b8   : > { %v12062_v61 = vadd.f32 %v4080_v41, %v3560_v57  ;;  %v4082_v39 = vpop.f32.mrf.mxu1 }
 0x2b9   : > { %v3562_v59 = vpop.f32.mrf.mxu0 }
 0x2ba   : > { %15702 = vst [vmem:[#allocation63_spill] sm:$0xff] %v12062_v61  ;;  %v3563_v54 = vadd.f32 %v11804_v33, %v3562_v59  ;;  %v4083_v42 = vpop.f32.mrf.mxu1  ;;  %v10616_v59 = vld [vmem:[%s11339_s24 + $0x310] ss:$24 sps:$4 sm:$0xff]  }
 0x2bb   : > { %v3564_v5 = vpop.f32.mrf.mxu0 }
 0x2bc   : > { %v12067_v23 = vadd.f32 %v4083_v42, %v3563_v54  ;;  %v4085_v19 = vpop.f32.mrf.mxu1  ;;  %v10617_v54 = vld [vmem:[%s11339_s24 + $0x344] ss:$24 sps:$4 sm:$0xff]  }
 0x2bd   : > { %v3567_v27 = vpop.f32.mrf.mxu0  ;;  %4312 = vmatmul.mubr.bf16.gmra.mxu0 %v10613_v15 }
 0x2be   : > { %15703 = vst [vmem:[#allocation64_spill] sm:$0xff] %v12067_v23  ;;  %v3568_v8 = vadd.f32 %v11804_v33, %v3567_v27  ;;  %v4088_v6 = vpop.f32.mrf.mxu1  ;;  %9186 = vmatprep.mubr.msk.bf16.mxu0 %vm2933_vm0, %v10614_v36  ;;  %v12081_v36 = vld [vmem:[%s15612_s2] ss:$0 sm:$0xff] }
 0x2bf   : > { %v3569_v57 = vpop.f32.mrf.mxu0 }
 0x2c0   : > { %v12071_v41 = vadd.f32 %v4088_v6, %v3568_v8  ;;  %v4090_v39 = vpop.f32.mrf.mxu1 }
 0x2c1   : > { %v3570_v61 = vpop.f32.mrf.mxu0 }
 0x2c2   : > { %15704 = vst [vmem:[#allocation65_spill] sm:$0xff] %v12071_v41  ;;  %v3571_v21 = vadd.f32 %v11804_v33, %v3570_v61  ;;  %v4091_v5 = vpop.f32.mrf.mxu1 }
 0x2c3   : > { %v3572_v42 = vpop.f32.mrf.mxu0 }
 0x2c4   : > { %v12076_v19 = vadd.f32 %v4091_v5, %v3571_v21  ;;  %v4093_v15 = vpop.f32.mrf.mxu1  ;;  %v10619_v21 = vld [vmem:[%s11339_s24 + $0x340] ss:$24 sps:$4 sm:$0xff]   ;;  %v10620_v42 = vld [vmem:[%s11339_s24 + $0x374] ss:$24 sps:$4 sm:$0xff]  }
 0x2c5   : > { %v3575_v27 = vpop.f32.mrf.mxu0  ;;  %4320 = vmatmul.mubr.bf16.gmra.mxu0 %v10616_v59 }
 0x2c6   : > { %15705 = vst [vmem:[#allocation66_spill] sm:$0xff] %v12076_v19  ;;  %v3576_v8 = vadd.f32 %v12081_v36, %v3575_v27  ;;  %v4096_v6 = vpop.f32.mrf.mxu1  ;;  %9187 = vmatprep.mubr.msk.bf16.mxu0 %vm2933_vm0, %v10617_v54 }
 0x2c7   : > { %v3577_v33 = vpop.f32.mrf.mxu0 }
 0x2c8   : > { %v12085_v61 = vadd.f32 %v4096_v6, %v3576_v8  ;;  %v4098_v57 = vpop.f32.mrf.mxu1 }
 0x2c9   : > { %v3578_v39 = vpop.f32.mrf.mxu0 }
 0x2ca   : > { %15706 = vst [vmem:[#allocation67_spill] sm:$0xff] %v12085_v61  ;;  %v3579_v5 = vadd.f32 %v12081_v36, %v3578_v39  ;;  %v4099_v59 = vpop.f32.mrf.mxu1  ;;  %v10622_v39 = vld [vmem:[%s11339_s24 + $0x370] ss:$24 sps:$4 sm:$0xff]  }
 0x2cb   : > { %v3580_v15 = vpop.f32.mrf.mxu0 }
 0x2cc   : > { %v12090_v19 = vadd.f32 %v4099_v59, %v3579_v5  ;;  %v4101_v41 = vpop.f32.mrf.mxu1  ;;  %v10623_v5 = vld [vmem:[%s11339_s24 + $0x3a4] ss:$24 sps:$4 sm:$0xff]  }
 0x2cd   : > { %v3583_v27 = vpop.f32.mrf.mxu0  ;;  %4328 = vmatmul.mubr.bf16.gmra.mxu0 %v10619_v21 }
 0x2ce   : > { %15707 = vst [vmem:[#allocation68_spill] sm:$0xff] %v12090_v19  ;;  %v3584_v54 = vadd.f32 %v12081_v36, %v3583_v27  ;;  %v4104_v33 = vpop.f32.mrf.mxu1  ;;  %9188 = vmatprep.mubr.msk.bf16.mxu0 %vm2933_vm0, %v10620_v42 }
 0x2cf   : > { %v3585_v8 = vpop.f32.mrf.mxu0 }
 0x2d0   : > { %v12094_v6 = vadd.f32 %v4104_v33, %v3584_v54  ;;  %v4106_v57 = vpop.f32.mrf.mxu1 }
 0x2d1   : > { %v3586_v61 = vpop.f32.mrf.mxu0 }
 0x2d2   : > { %15708 = vst [vmem:[#allocation69_spill] sm:$0xff] %v12094_v6  ;;  %v3587_v23 = vadd.f32 %v12081_v36, %v3586_v61  ;;  %v4107_v15 = vpop.f32.mrf.mxu1  ;;  %v10625_v61 = vld [vmem:[%s11339_s24 + $0x3a0] ss:$24 sps:$4 sm:$0xff]  }
 0x2d3   : > { %v3588_v41 = vpop.f32.mrf.mxu0 }
 0x2d4   : > { %v12099_v59 = vadd.f32 %v4107_v15, %v3587_v23  ;;  %v4109_v21 = vpop.f32.mrf.mxu1  ;;  %v10626_v23 = vld [vmem:[%s11339_s24 + $0x3d4] ss:$24 sps:$4 sm:$0xff]  }
 0x2d5   : > { %v3591_v27 = vpop.f32.mrf.mxu0  ;;  %4336 = vmatmul.mubr.bf16.gmra.mxu0 %v10622_v39 }
 0x2d6   : > { %15709 = vst [vmem:[#allocation70_spill] sm:$0xff] %v12099_v59  ;;  %v3592_v42 = vadd.f32 %v12081_v36, %v3591_v27  ;;  %v4112_v8 = vpop.f32.mrf.mxu1  ;;  %9189 = vmatprep.mubr.msk.bf16.mxu0 %vm2933_vm0, %v10623_v5 }
 0x2d7   : > { %v3593_v54 = vpop.f32.mrf.mxu0 }
 0x2d8   : > { %v12103_v33 = vadd.f32 %v4112_v8, %v3592_v42  ;;  %v4114_v57 = vpop.f32.mrf.mxu1 }
 0x2d9   : > { %v3594_v6 = vpop.f32.mrf.mxu0 }
 0x2da   : > { %15710 = vst [vmem:[#allocation71_spill] sm:$0xff] %v12103_v33  ;;  %v3595_v19 = vadd.f32 %v12081_v36, %v3594_v6  ;;  %v4115_v41 = vpop.f32.mrf.mxu1  ;;  %v10628_v6 = vld [vmem:[%s11339_s24 + $0x3d0] ss:$24 sps:$4 sm:$0xff]  }
 0x2db   : > { %v3596_v15 = vpop.f32.mrf.mxu0 }
 0x2dc   : > { %v12108_v21 = vadd.f32 %v4115_v41, %v3595_v19  ;;  %v4117_v39 = vpop.f32.mrf.mxu1  ;;  %v10629_v19 = vld [vmem:[%s11339_s24 + $0x404] ss:$24 sps:$4 sm:$0xff]  }
 0x2dd   : > { %v3599_v27 = vpop.f32.mrf.mxu0  ;;  %4344 = vmatmul.mubr.bf16.gmra.mxu0 %v10625_v61 }
 0x2de   : > { %15711 = vst [vmem:[#allocation72_spill] sm:$0xff] %v12108_v21  ;;  %v3600_v5 = vadd.f32 %v12081_v36, %v3599_v27  ;;  %v4120_v54 = vpop.f32.mrf.mxu1  ;;  %9190 = vmatprep.mubr.msk.bf16.mxu0 %vm2933_vm0, %v10626_v23 }
 0x2df   : > { %v3601_v42 = vpop.f32.mrf.mxu0 }
 0x2e0   : > { %v12112_v8 = vadd.f32 %v4120_v54, %v3600_v5  ;;  %v4122_v57 = vpop.f32.mrf.mxu1 }
 0x2e1   : > { %v3602_v33 = vpop.f32.mrf.mxu0 }
 0x2e2   : > { %15712 = vst [vmem:[#allocation73_spill] sm:$0xff] %v12112_v8  ;;  %v3603_v59 = vadd.f32 %v12081_v36, %v3602_v33  ;;  %v4123_v15 = vpop.f32.mrf.mxu1  ;;  %v10631_v33 = vld [vmem:[%s11339_s24 + $0x400] ss:$24 sps:$4 sm:$0xff]  }
 0x2e3   : > { %v3604_v41 = vpop.f32.mrf.mxu0 }
 0x2e4   : > { %v12117_v39 = vadd.f32 %v4123_v15, %v3603_v59  ;;  %v4125_v61 = vpop.f32.mrf.mxu1  ;;  %v10632_v59 = vld [vmem:[%s11339_s24 + $0x434] ss:$24 sps:$4 sm:$0xff]  }
 0x2e5   : > { %v3607_v27 = vpop.f32.mrf.mxu0  ;;  %4352 = vmatmul.mubr.bf16.gmra.mxu0 %v10628_v6 }
 0x2e6   : > { %15713 = vst [vmem:[#allocation74_spill] sm:$0xff] %v12117_v39  ;;  %v3608_v23 = vadd.f32 %v12081_v36, %v3607_v27  ;;  %v4128_v42 = vpop.f32.mrf.mxu1  ;;  %9191 = vmatprep.mubr.msk.bf16.mxu0 %vm2933_vm0, %v10629_v19 }
 0x2e7   : > { %v3609_v5 = vpop.f32.mrf.mxu0 }
 0x2e8   : > { %v12121_v54 = vadd.f32 %v4128_v42, %v3608_v23  ;;  %v4130_v57 = vpop.f32.mrf.mxu1 }
 0x2e9   : > { %v3610_v8 = vpop.f32.mrf.mxu0 }
 0x2ea   : > { %15714 = vst [vmem:[#allocation75_spill] sm:$0xff] %v12121_v54  ;;  %v3611_v21 = vadd.f32 %v12081_v36, %v3610_v8  ;;  %v4131_v41 = vpop.f32.mrf.mxu1  ;;  %v10634_v8 = vld [vmem:[%s11339_s24 + $0x430] ss:$24 sps:$4 sm:$0xff]  }
 0x2eb   : > { %v3612_v15 = vpop.f32.mrf.mxu0 }
 0x2ec   : > { %v12126_v61 = vadd.f32 %v4131_v41, %v3611_v21  ;;  %v4133_v6 = vpop.f32.mrf.mxu1  ;;  %v10635_v21 = vld [vmem:[%s11339_s24 + $0x464] ss:$24 sps:$4 sm:$0xff]  }
 0x2ed   : > { %v3615_v27 = vpop.f32.mrf.mxu0  ;;  %4360 = vmatmul.mubr.bf16.gmra.mxu0 %v10631_v33 }
 0x2ee   : > { %15715 = vst [vmem:[#allocation76_spill] sm:$0xff] %v12126_v61  ;;  %v3616_v19 = vadd.f32 %v12081_v36, %v3615_v27  ;;  %v4136_v5 = vpop.f32.mrf.mxu1  ;;  %9192 = vmatprep.mubr.msk.bf16.mxu0 %vm2933_vm0, %v10632_v59 }
 0x2ef   : > { %v3617_v23 = vpop.f32.mrf.mxu0 }
 0x2f0   : > { %v12130_v42 = vadd.f32 %v4136_v5, %v3616_v19  ;;  %v4138_v57 = vpop.f32.mrf.mxu1 }
 0x2f1   : > { %v3618_v54 = vpop.f32.mrf.mxu0 }
 0x2f2   : > { %15716 = vst [vmem:[#allocation77_spill] sm:$0xff] %v12130_v42  ;;  %v3619_v39 = vadd.f32 %v12081_v36, %v3618_v54  ;;  %v4139_v15 = vpop.f32.mrf.mxu1  ;;  %v10637_v54 = vld [vmem:[%s11339_s24 + $0x460] ss:$24 sps:$4 sm:$0xff]  }
 0x2f3   : > { %v3620_v41 = vpop.f32.mrf.mxu0 }
 0x2f4   : > { %v12135_v6 = vadd.f32 %v4139_v15, %v3619_v39  ;;  %v4141_v33 = vpop.f32.mrf.mxu1  ;;  %v10638_v39 = vld [vmem:[%s11339_s24 + $0x494] ss:$24 sps:$4 sm:$0xff]  }
 0x2f5   : > { %v3623_v27 = vpop.f32.mrf.mxu0  ;;  %4368 = vmatmul.mubr.bf16.gmra.mxu0 %v10634_v8 }
 0x2f6   : > { %15717 = vst [vmem:[#allocation78_spill] sm:$0xff] %v12135_v6  ;;  %v3624_v59 = vadd.f32 %v12081_v36, %v3623_v27  ;;  %v4144_v23 = vpop.f32.mrf.mxu1  ;;  %9193 = vmatprep.mubr.msk.bf16.mxu0 %vm2933_vm0, %v10635_v21 }
 0x2f7   : > { %v3625_v19 = vpop.f32.mrf.mxu0 }
 0x2f8   : > { %v12139_v5 = vadd.f32 %v4144_v23, %v3624_v59  ;;  %v4146_v57 = vpop.f32.mrf.mxu1 }
 0x2f9   : > { %v3626_v42 = vpop.f32.mrf.mxu0 }
 0x2fa   : > { %15718 = vst [vmem:[#allocation79_spill] sm:$0xff] %v12139_v5  ;;  %v3627_v61 = vadd.f32 %v12081_v36, %v3626_v42  ;;  %v4147_v41 = vpop.f32.mrf.mxu1  ;;  %v10640_v5 = vld [vmem:[%s11339_s24 + $0x490] ss:$24 sps:$4 sm:$0xff]  }
 0x2fb   : > { %v3628_v15 = vpop.f32.mrf.mxu0 }
 0x2fc   : > { %v12144_v33 = vadd.f32 %v4147_v41, %v3627_v61  ;;  %v4149_v8 = vpop.f32.mrf.mxu1  ;;  %v10641_v41 = vld [vmem:[%s11339_s24 + $0x4c4] ss:$24 sps:$4 sm:$0xff]  }
 0x2fd   : > { %v3631_v27 = vpop.f32.mrf.mxu0  ;;  %4376 = vmatmul.mubr.bf16.gmra.mxu0 %v10637_v54 }
 0x2fe   : > { %15719 = vst [vmem:[#allocation80_spill] sm:$0xff] %v12144_v33  ;;  %v3632_v21 = vadd.f32 %v12081_v36, %v3631_v27  ;;  %v4152_v19 = vpop.f32.mrf.mxu1  ;;  %9194 = vmatprep.mubr.msk.bf16.mxu0 %vm2933_vm0, %v10638_v39 }
 0x2ff   : > { %v3633_v59 = vpop.f32.mrf.mxu0 }
 0x300   : > { %v12148_v23 = vadd.f32 %v4152_v19, %v3632_v21  ;;  %v4154_v57 = vpop.f32.mrf.mxu1 }
 0x301   : > { %v3634_v42 = vpop.f32.mrf.mxu0  ;;  %v10643_v57 = vld [vmem:[%s11339_s24 + $0x4c0] ss:$24 sps:$4 sm:$0xff]  }
 0x302   : > { %15720 = vst [vmem:[#allocation81_spill] sm:$0xff] %v12148_v23  ;;  %v3635_v6 = vadd.f32 %v12081_v36, %v3634_v42  ;;  %v4155_v61 = vpop.f32.mrf.mxu1  ;;  %v10644_v42 = vld [vmem:[%s11339_s24 + $0x4f4] ss:$24 sps:$4 sm:$0xff]  }
 0x303   : > { %v3636_v15 = vpop.f32.mrf.mxu0 }
 0x304   : > { %v12153_v8 = vadd.f32 %v4155_v61, %v3635_v6  ;;  %v4157_v54 = vpop.f32.mrf.mxu1 }
 0x305   : > { %v4193_v27 = vpop.f32.mrf.mxu0  ;;  %4384 = vmatmul.mubr.bf16.gmra.mxu0 %v10640_v5 }
 0x306   : > { %15721 = vst [vmem:[#allocation82_spill] sm:$0xff] %v12153_v8  ;;  %v4194_v39 = vadd.f32 %v4193_v27, %v11514_v14  ;;  %9195 = vmatprep.mubr.msk.bf16.mxu0 %vm2933_vm0, %v10641_v41  ;;  %v10646_v27 = vld [vmem:[%s11339_s24 + $0x4f0] ss:$24 sps:$4 sm:$0xff]  }
 0x307   : > { %v4195_v21 = vpop.f32.mrf.mxu0 }
 0x308   : > { %v4802_v19 = vmul.f32 1.442695, %v4194_v39  ;;  %vm4680_vm1 = vcmp.gt.f32.partialorder %v4194_v39, 0.0 }
 0x309   : > { %v4196_v59 = vpop.f32.mrf.mxu0 }
 0x30a   : > { %10794 = vpow2.f32 %v4802_v19  ;;  %v4197_v36 = vadd.f32 %v4196_v59, %v11521_v24  ;;  %v10647_v19 = vld [vmem:[%s11339_s24 + $0x524] ss:$24 sps:$4 sm:$0xff]  }
 0x30b   : > { %v4198_v15 = vpop.f32.mrf.mxu0 }
 0x30c   : > { %v4804_v6 = vmul.f32 1.442695, %v4197_v36  ;;  %vm4681_vm2 = vcmp.gt.f32.partialorder %v4197_v36, 0.0 }
 0x30d   : > { %v4201_v61 = vpop.f32.mrf.mxu0  ;;  %4392 = vmatmul.mubr.bf16.gmra.mxu0 %v10643_v57 }
 0x30e   : > { %10796 = vpow2.f32 %v4804_v6  ;;  %v4202_v5 = vadd.f32 %v4201_v61, %v11524_v30  ;;  %9196 = vmatprep.mubr.msk.bf16.mxu0 %vm2933_vm0, %v10644_v42 }
 0x30f   : > { %v4203_v14 = vpop.f32.mrf.mxu0 }
 0x310   : > { %v4806_v41 = vmul.f32 1.442695, %v4202_v5  ;;  %v10649_v14 = vld [vmem:[%s11339_s24 + $0x520] ss:$24 sps:$4 sm:$0xff]   ;;  %vm4682_vm3 = vcmp.gt.f32.partialorder %v4202_v5, 0.0 }
 0x311   : > { %v4204_v54 = vpop.f32.mrf.mxu0 }
 0x312   : > { %10798 = vpow2.f32 %v4806_v41  ;;  %v4205_v21 = vadd.f32 %v4204_v54, %v11531_v40  ;;  %v10650_v54 = vld [vmem:[%s11339_s24 + $0x554] ss:$24 sps:$4 sm:$0xff]  }
 0x313   : > { %v4206_v24 = vpop.f32.mrf.mxu0 }
 0x314   : > { %v4808_v59 = vmul.f32 1.442695, %v4205_v21  ;;  %vm4683_vm4 = vcmp.gt.f32.partialorder %v4205_v21, 0.0 }
 0x315   : > { %v4209_v15 = vpop.f32.mrf.mxu0  ;;  %4400 = vmatmul.mubr.bf16.gmra.mxu0 %v10646_v27 }
 0x316   : > { %10800 = vpow2.f32 %v4808_v59  ;;  %v12166_v57 = vadd.f32 %v4209_v15, %v11534_v46  ;;  %9197 = vmatprep.mubr.msk.bf16.mxu0 %vm2933_vm0, %v10647_v19 }
 0x317   : > { %v10795_v30 = vpop.eup %10794  ;;  %v4211_v42 = vpop.f32.mrf.mxu0 }
 0x318   : > { %v4810_v6 = vmul.f32 1.442695, %v12166_v57  ;;  %v9231_v41 = vadd.f32 -1.0, %v10795_v30  ;;  %vm4684_vm5 = vcmp.gt.f32.partialorder %v12166_v57, 0.0 }
 0x319   : > { %v4212_v61 = vpop.f32.mrf.mxu0 }
 0x31a   : > { %10802 = vpow2.f32 %v4810_v6  ;;  %v4213_v40 = vadd.f32 %v4212_v61, %v11541_v56  ;;  %v12173_v19 = vsel %vm4680_vm1, %v4194_v39, %v9231_v41 }
 0x31b   : > { %v10797_v24 = vpop.eup %10796  ;;  %v4214_v8 = vpop.f32.mrf.mxu0 }
 0x31c   : > { %v9232_v27 = vadd.f32 -1.0, %v10797_v24  ;;  %v4812_v59 = vmul.f32 1.442695, %v4213_v40  ;;  %v10652_v24 = vld [vmem:[%s11339_s24 + $0x550] ss:$24 sps:$4 sm:$0xff]   ;;  %vm4685_vm6 = vcmp.gt.f32.partialorder %v4213_v40, 0.0 }
 0x31d   : > { %v4217_v46 = vpop.f32.mrf.mxu0  ;;  %4408 = vmatmul.mubr.bf16.gmra.mxu0 %v10649_v14  ;;  %v10655_v8 = vld [vmem:[%s11339_s24 + $0x580] ss:$24 sps:$4 sm:$0xff]  }
 0x31e   : > { %v12175_v15 = vsel %vm4681_vm2, %v4197_v36, %v9232_v27  ;;  %10804 = vpow2.f32 %v4812_v59  ;;  %v12178_v30 = vadd.f32 %v4217_v46, %v11544_v62  ;;  %9198 = vmatprep.mubr.msk.bf16.mxu0 %vm2933_vm0, %v10650_v54  ;;  %v10653_v36 = vld [vmem:[%s11339_s24 + $0x584] ss:$24 sps:$4 sm:$0xff]  }
 0x31f   : > { %v10799_v56 = vpop.eup %10798  ;;  %v4219_v42 = vpop.f32.mrf.mxu0 }
 0x320   : > { %v4814_v6 = vmul.f32 1.442695, %v12178_v30  ;;  %v9233_v14 = vadd.f32 -1.0, %v10799_v56  ;;  %vm4686_vm7 = vcmp.gt.f32.partialorder %v12178_v30, 0.0 }
 0x321   : > { %v4220_v61 = vpop.f32.mrf.mxu0 }
 0x322   : > { %10806 = vpow2.f32 %v4814_v6  ;;  %v4221_v39 = vadd.f32 %v4220_v61, %v11551_v10  ;;  %v12187_v46 = vsel %vm4682_vm3, %v4202_v5, %v9233_v14 }
 0x323   : > { %v10801_v41 = vpop.eup %10800  ;;  %v4222_v27 = vpop.f32.mrf.mxu0 }
 0x324   : > { %v9234_v62 = vadd.f32 -1.0, %v10801_v41  ;;  %v4816_v59 = vmul.f32 1.442695, %v4221_v39  ;;  %vm4687_vm8 = vcmp.gt.f32.partialorder %v4221_v39, 0.0 }
 0x325   : > { %v4225_v54 = vpop.f32.mrf.mxu0  ;;  %4416 = vmatmul.mubr.bf16.gmra.mxu0 %v10652_v24 }
 0x326   : > { %v12189_v42 = vsel %vm4683_vm4, %v4205_v21, %v9234_v62  ;;  %10808 = vpow2.f32 %v4816_v59  ;;  %v12192_v56 = vadd.f32 %v4225_v54, %v11554_v17  ;;  %9199 = vmatprep.mubr.msk.bf16.mxu0 %vm2933_vm0, %v10653_v36  ;;  %v10656_v21 = vld [vmem:[%s11339_s24 + $0x5b4] ss:$24 sps:$4 sm:$0xff]  }
 0x327   : > { %v10803_v10 = vpop.eup %10802  ;;  %v4227_v61 = vpop.f32.mrf.mxu0 }
 0x328   : > { %v4818_v41 = vmul.f32 1.442695, %v12192_v56  ;;  %v9235_v24 = vadd.f32 -1.0, %v10803_v10  ;;  %vm4688_vm9 = vcmp.gt.f32.partialorder %v12192_v56, 0.0 }
 0x329   : > { %v4228_v27 = vpop.f32.mrf.mxu0 }
 0x32a   : > { %10810 = vpow2.f32 %v4818_v41  ;;  %v4229_v5 = vadd.f32 %v4228_v27, %v11561_v28  ;;  %v12203_v54 = vsel %vm4684_vm5, %v12166_v57, %v9235_v24 }
 0x32b   : > { %v10805_v14 = vpop.eup %10804  ;;  %v4230_v62 = vpop.f32.mrf.mxu0 }
 0x32c   : > { %v9236_v17 = vadd.f32 -1.0, %v10805_v14  ;;  %v4820_v59 = vmul.f32 1.442695, %v4229_v5  ;;  %vm4689_vm10 = vcmp.gt.f32.partialorder %v4229_v5, 0.0 }
 0x32d   : > { %v4233_v36 = vpop.f32.mrf.mxu0  ;;  %4424 = vmatmul.mubr.bf16.gmra.mxu0 %v10655_v8  ;;  %v10658_v8 = vld [vmem:[%s11339_s24 + $0x5b0] ss:$24 sps:$4 sm:$0xff]  }
 0x32e   : > { %v12205_v61 = vsel %vm4685_vm6, %v4213_v40, %v9236_v17  ;;  %10812 = vpow2.f32 %v4820_v59  ;;  %v12208_v28 = vadd.f32 %v4233_v36, %v11564_v35  ;;  %9200 = vmatprep.mubr.msk.bf16.mxu0 %vm2933_vm0, %v10656_v21  ;;  %v10659_v40 = vld [vmem:[%s11339_s24 + $0x5e4] ss:$24 sps:$4 sm:$0xff]  }
 0x32f   : > { %v10807_v10 = vpop.eup %10806  ;;  %v4235_v27 = vpop.f32.mrf.mxu0 }
 0x330   : > { %v4822_v14 = vmul.f32 1.442695, %v12208_v28  ;;  %v9237_v6 = vadd.f32 -1.0, %v10807_v10  ;;  %vm4690_vm11 = vcmp.gt.f32.partialorder %v12208_v28, 0.0 }
 0x331   : > { %v4236_v62 = vpop.f32.mrf.mxu0 }
 0x332   : > { %10814 = vpow2.f32 %v4822_v14  ;;  %v4237_v57 = vadd.f32 %v4236_v62, %v11571_v47  ;;  %v12219_v36 = vsel %vm4686_vm7, %v12178_v30, %v9237_v6 }
 0x333   : > { %v10809_v24 = vpop.eup %10808  ;;  %v4238_v17 = vpop.f32.mrf.mxu0 }
 0x334   : > { %v9238_v35 = vadd.f32 -1.0, %v10809_v24  ;;  %v4824_v59 = vmul.f32 1.442695, %v4237_v57  ;;  %vm4691_vm12 = vcmp.gt.f32.partialorder %v4237_v57, 0.0 }
 0x335   : > { %v4241_v21 = vpop.f32.mrf.mxu0  ;;  %4432 = vmatmul.mubr.bf16.gmra.mxu0 %v10658_v8  ;;  %v10661_v8 = vld [vmem:[%s11339_s24 + $0x5e0] ss:$24 sps:$4 sm:$0xff]  }
 0x336   : > { %v12221_v27 = vsel %vm4687_vm8, %v4221_v39, %v9238_v35  ;;  %10816 = vpow2.f32 %v4824_v59  ;;  %v12224_v47 = vadd.f32 %v4241_v21, %v11574_v53  ;;  %9201 = vmatprep.mubr.msk.bf16.mxu0 %vm2933_vm0, %v10659_v40  ;;  %v10662_v39 = vld [vmem:[%s11339_s24 + $0x614] ss:$24 sps:$4 sm:$0xff]  }
 0x337   : > { %v10811_v10 = vpop.eup %10810  ;;  %v4243_v62 = vpop.f32.mrf.mxu0 }
 0x338   : > { %v4826_v24 = vmul.f32 1.442695, %v12224_v47  ;;  %v9239_v41 = vadd.f32 -1.0, %v10811_v10  ;;  %vm4692_vm13 = vcmp.gt.f32.partialorder %v12224_v47, 0.0 }
 0x339   : > { %v4244_v17 = vpop.f32.mrf.mxu0 }
 0x33a   : > { %10818 = vpow2.f32 %v4826_v24  ;;  %v4245_v30 = vadd.f32 %v4244_v17, %v11581_v2  ;;  %v12235_v21 = vsel %vm4688_vm9, %v12192_v56, %v9239_v41 }
 0x33b   : > { %v10813_v6 = vpop.eup %10812  ;;  %v4246_v35 = vpop.f32.mrf.mxu0 }
 0x33c   : > { %v9240_v53 = vadd.f32 -1.0, %v10813_v6  ;;  %v4828_v59 = vmul.f32 1.442695, %v4245_v30  ;;  %vm4693_vm14 = vcmp.gt.f32.partialorder %v4245_v30, 0.0 }
 0x33d   : > { %v4249_v40 = vpop.f32.mrf.mxu0  ;;  %4440 = vmatmul.mubr.bf16.gmra.mxu0 %v10661_v8  ;;  %v10664_v8 = vld [vmem:[%s11339_s24 + $0x610] ss:$24 sps:$4 sm:$0xff]  }
 0x33e   : > { %v12237_v62 = vsel %vm4689_vm10, %v4229_v5, %v9240_v53  ;;  %10820 = vpow2.f32 %v4828_v59  ;;  %v12240_v2 = vadd.f32 %v4249_v40, %v11584_v9  ;;  %9202 = vmatprep.mubr.msk.bf16.mxu0 %vm2933_vm0, %v10662_v39  ;;  %v10665_v5 = vld [vmem:[%s11339_s24 + $0x644] ss:$24 sps:$4 sm:$0xff]  }
 0x33f   : > { %v10815_v10 = vpop.eup %10814  ;;  %v4251_v17 = vpop.f32.mrf.mxu0 }
 0x340   : > { %v4830_v6 = vmul.f32 1.442695, %v12240_v2  ;;  %v9241_v14 = vadd.f32 -1.0, %v10815_v10  ;;  %vm4694_vm15 = vcmp.gt.f32.partialorder %v12240_v2, 0.0 }
 0x341   : > { %v4252_v35 = vpop.f32.mrf.mxu0 }
 0x342   : > { %10822 = vpow2.f32 %v4830_v6  ;;  %v4253_v56 = vadd.f32 %v4252_v35, %v11591_v22  ;;  %v12251_v40 = vsel %vm4690_vm11, %v12208_v28, %v9241_v14 }
 0x343   : > { %v10817_v41 = vpop.eup %10816  ;;  %v4254_v53 = vpop.f32.mrf.mxu0 }
 0x344   : > { %v9242_v9 = vadd.f32 -1.0, %v10817_v41  ;;  %v4832_v59 = vmul.f32 1.442695, %v4253_v56  ;;  %vm4695_vm1 = vcmp.gt.f32.partialorder %v4253_v56, 0.0 }
 0x345   : > { %v4257_v39 = vpop.f32.mrf.mxu0  ;;  %4448 = vmatmul.mubr.bf16.gmra.mxu0 %v10664_v8  ;;  %v10667_v8 = vld [vmem:[%s11339_s24 + $0x640] ss:$24 sps:$4 sm:$0xff]  }
 0x346   : > { %v12253_v17 = vsel %vm4691_vm12, %v4237_v57, %v9242_v9  ;;  %10824 = vpow2.f32 %v4832_v59  ;;  %v12256_v22 = vadd.f32 %v4257_v39, %v11594_v31  ;;  %9203 = vmatprep.mubr.msk.bf16.mxu0 %vm2933_vm0, %v10665_v5  ;;  %v10668_v57 = vld [vmem:[%s11339_s24 + $0x674] ss:$24 sps:$4 sm:$0xff]  }
 0x347   : > { %v10819_v10 = vpop.eup %10818  ;;  %v4259_v35 = vpop.f32.mrf.mxu0 }
 0x348   : > { %v4834_v41 = vmul.f32 1.442695, %v12256_v22  ;;  %v9243_v24 = vadd.f32 -1.0, %v10819_v10  ;;  %vm4696_vm2 = vcmp.gt.f32.partialorder %v12256_v22, 0.0 }
 0x349   : > { %v4260_v53 = vpop.f32.mrf.mxu0 }
 0x34a   : > { %10826 = vpow2.f32 %v4834_v41  ;;  %v12264_v28 = vadd.f32 %v4260_v53, %v11601_v43  ;;  %v12270_v39 = vsel %vm4692_vm13, %v12224_v47, %v9243_v24  ;;  %v10673_v41 = vld [vmem:[%s11339_s24 + $0x6a0] ss:$24 sps:$4 sm:$0xff]  }
 0x34b   : > { %v10821_v14 = vpop.eup %10820  ;;  %v4262_v31 = vpop.f32.mrf.mxu0 }
 0x34c   : > { %v9244_v9 = vadd.f32 -1.0, %v10821_v14  ;;  %v4836_v5 = vmul.f32 1.442695, %v12264_v28  ;;  %vm4697_vm3 = vcmp.gt.f32.partialorder %v12264_v28, 0.0 }
 0x34d   : > { %v4265_v59 = vpop.f32.mrf.mxu0  ;;  %4456 = vmatmul.mubr.bf16.gmra.mxu0 %v10667_v8  ;;  %v10670_v8 = vld [vmem:[%s11339_s24 + $0x670] ss:$24 sps:$4 sm:$0xff]  }
 0x34e   : > { %v12272_v10 = vsel %vm4693_vm14, %v4245_v30, %v9244_v9  ;;  %10828 = vpow2.f32 %v4836_v5  ;;  %v12275_v43 = vadd.f32 %v4265_v59, %v11604_v51  ;;  %9204 = vmatprep.mubr.msk.bf16.mxu0 %vm2933_vm0, %v10668_v57  ;;  %v10671_v30 = vld [vmem:[%s11339_s24 + $0x6a4] ss:$24 sps:$4 sm:$0xff]  }
 0x34f   : > { %v10823_v35 = vpop.eup %10822  ;;  %v4267_v53 = vpop.f32.mrf.mxu0 }
 0x350   : > { %v4838_v14 = vmul.f32 1.442695, %v12275_v43  ;;  %v9245_v6 = vadd.f32 -1.0, %v10823_v35  ;;  %vm4698_vm4 = vcmp.gt.f32.partialorder %v12275_v43, 0.0 }
 0x351   : > { %v4268_v31 = vpop.f32.mrf.mxu0 }
 0x352   : > { %10830 = vpow2.f32 %v4838_v14  ;;  %v12283_v47 = vadd.f32 %v4268_v31, %v11611_v0  ;;  %v12289_v59 = vsel %vm4694_vm15, %v12240_v2, %v9245_v6 }
 0x353   : > { %v10825_v24 = vpop.eup %10824  ;;  %v4270_v51 = vpop.f32.mrf.mxu0 }
 0x354   : > { %v9246_v9 = vadd.f32 -1.0, %v10825_v24  ;;  %v4840_v57 = vmul.f32 1.442695, %v12283_v47  ;;  %vm4699_vm5 = vcmp.gt.f32.partialorder %v12283_v47, 0.0 }
 0x355   : > { %v4273_v5 = vpop.f32.mrf.mxu0  ;;  %4464 = vmatmul.mubr.bf16.gmra.mxu0 %v10670_v8 }
 0x356   : > { %v12291_v35 = vsel %vm4695_vm1, %v4253_v56, %v9246_v9  ;;  %10832 = vpow2.f32 %v4840_v57  ;;  %v12294_v0 = vadd.f32 %v4273_v5, %v11614_v11  ;;  %9205 = vmatprep.mubr.msk.bf16.mxu0 %vm2933_vm0, %v10671_v30  ;;  %v10674_v56 = vld [vmem:[%s11339_s24 + $0x6d4] ss:$24 sps:$4 sm:$0xff]  }
 0x357   : > { %v10827_v53 = vpop.eup %10826  ;;  %v4275_v31 = vpop.f32.mrf.mxu0 }
 0x358   : > { %v4842_v24 = vmul.f32 1.442695, %v12294_v0  ;;  %v9247_v51 = vadd.f32 -1.0, %v10827_v53  ;;  %v12319_v53 = vld [vmem:[%s15613_s3 + $0x20] sm:$0xff]  ;;  %vm4700_vm6 = vcmp.gt.f32.partialorder %v12294_v0, 0.0 }
 0x359   : > { %v4276_v8 = vpop.f32.mrf.mxu0 }
 0x35a   : > { %10834 = vpow2.f32 %v4842_v24  ;;  %v12302_v2 = vadd.f32 %v4276_v8, %v11621_v25  ;;  %v12309_v5 = vsel %vm4696_vm2, %v12256_v22, %v9247_v51  ;;  %v12314_v25 = vld [vmem:[%s15613_s3] sm:$0xff] }
 0x35b   : > { %v10829_v6 = vpop.eup %10828  ;;  %v4278_v11 = vpop.f32.mrf.mxu0 }
 0x35c   : > { %v9248_v30 = vadd.f32 -1.0, %v10829_v6  ;;  %v4844_v9 = vmul.f32 1.442695, %v12302_v2  ;;  %vm4701_vm7 = vcmp.gt.f32.partialorder %v12302_v2, 0.0 }
 0x35d   : > { %v4281_v57 = vpop.f32.mrf.mxu0  ;;  %4472 = vmatmul.mubr.bf16.gmra.mxu0 %v10673_v41  ;;  %v9354_v41 = vcombine.high %v12314_v25, %v12319_v53 }
 0x35e   : > { %10836 = vpow2.f32 %v4844_v9  ;;  %v12322_v31 = vadd.f32 %v4281_v57, %v11624_v34  ;;  %9206 = vmatprep.mubr.msk.bf16.mxu0 %vm2933_vm0, %v10674_v56  ;;  %v12326_v22 = vsel %vm4697_vm3, %v12264_v28, %v9248_v30  ;;  %v10676_v9 = vld [vmem:[%s11339_s24 + $0x6d0] ss:$24 sps:$4 sm:$0xff]   ;;  %v10677_v30 = vld [vmem:[%s11339_s24 + $0x704] ss:$24 sps:$4 sm:$0xff]  }
 0x35f   : > { %v10831_v24 = vpop.eup %10830  ;;  %v4283_v51 = vpop.f32.mrf.mxu0  ;;  %5925 = vmatprep.mubr.bf16.mxu1 %v9354_v41 }
 0x360   : > { %v4846_v11 = vmul.f32 1.442695, %v12322_v31  ;;  %v9249_v56 = vadd.f32 -1.0, %v10831_v24  ;;  %vm4702_vm8 = vcmp.gt.f32.partialorder %v12322_v31, 0.0 }
 0x361   : > { %v4284_v34 = vpop.f32.mrf.mxu0 }
 0x362   : > { %10838 = vpow2.f32 %v4846_v11  ;;  %v4285_v28 = vadd.f32 %v4284_v34, %v11631_v49  ;;  %v12345_v49 = vsel %vm4698_vm4, %v12275_v43, %v9249_v56 }
 0x363   : > { %v10833_v57 = vpop.eup %10832  ;;  %v4286_v14 = vpop.f32.mrf.mxu0 }
 0x364   : > { %v9250_v23 = vadd.f32 -1.0, %v10833_v57  ;;  %v4848_v51 = vmul.f32 1.442695, %v4285_v28  ;;  %vm4703_vm9 = vcmp.gt.f32.partialorder %v4285_v28, 0.0 }
 0x365   : > { %v4289_v6 = vpop.f32.mrf.mxu0  ;;  %4480 = vmatmul.mubr.bf16.gmra.mxu0 %v10676_v9 }
 0x366   : > { %10840 = vpow2.f32 %v4848_v51  ;;  %v12341_v41 = vadd.f32 %v4289_v6, %v11634_v58  ;;  %9207 = vmatprep.mubr.msk.bf16.mxu0 %vm2933_vm0, %v10677_v30  ;;  %v12348_v14 = vsel %vm4699_vm5, %v12283_v47, %v9250_v23  ;;  %v10679_v51 = vld [vmem:[%s11339_s24 + $0x700] ss:$24 sps:$4 sm:$0xff]   ;;  %v10680_v6 = vld [vmem:[%s11339_s24 + $0x734] ss:$24 sps:$4 sm:$0xff]  }
 0x367   : > { %v10835_v24 = vpop.eup %10834  ;;  %v4291_v11 = vpop.f32.mrf.mxu0 }
 0x368   : > { %v4850_v57 = vmul.f32 1.442695, %v12341_v41  ;;  %v9251_v8 = vadd.f32 -1.0, %v10835_v24  ;;  %vm4704_vm10 = vcmp.gt.f32.partialorder %v12341_v41, 0.0 }
 0x369   : > { %v4292_v9 = vpop.f32.mrf.mxu0 }
 0x36a   : > { %10842 = vpow2.f32 %v4850_v57  ;;  %v4293_v58 = vadd.f32 %v4292_v9, %v11641_v12  ;;  %v12363_v12 = vsel %vm4700_vm6, %v12294_v0, %v9251_v8 }
 0x36b   : > { %v10837_v30 = vpop.eup %10836  ;;  %v4294_v43 = vpop.f32.mrf.mxu0 }
 0x36c   : > { %v9252_v56 = vadd.f32 -1.0, %v10837_v30  ;;  %v4852_v23 = vmul.f32 1.442695, %v4293_v58  ;;  %vm4705_vm11 = vcmp.gt.f32.partialorder %v4293_v58, 0.0 }
 0x36d   : > { %v4297_v47 = vpop.f32.mrf.mxu0  ;;  %4488 = vmatmul.mubr.bf16.gmra.mxu0 %v10679_v51 }
 0x36e   : > { %10844 = vpow2.f32 %v4852_v23  ;;  %v12359_v11 = vadd.f32 %v4297_v47, %v11644_v20  ;;  %9208 = vmatprep.mubr.msk.bf16.mxu0 %vm2933_vm0, %v10680_v6  ;;  %v12366_v24 = vsel %vm4701_vm7, %v12302_v2, %v9252_v56  ;;  %v10682_v23 = vld [vmem:[%s11339_s24 + $0x730] ss:$24 sps:$4 sm:$0xff]   ;;  %v10683_v6 = vld [vmem:[%s11339_s24 + $0x764] ss:$24 sps:$4 sm:$0xff]  }
 0x36f   : > { %v10839_v57 = vpop.eup %10838  ;;  %v4299_v9 = vpop.f32.mrf.mxu0 }
 0x370   : > { %v4854_v43 = vmul.f32 1.442695, %v12359_v11  ;;  %v9253_v34 = vadd.f32 -1.0, %v10839_v57  ;;  %vm4706_vm12 = vcmp.gt.f32.partialorder %v12359_v11, 0.0 }
 0x371   : > { %v4300_v51 = vpop.f32.mrf.mxu0 }
 0x372   : > { %10846 = vpow2.f32 %v4854_v43  ;;  %v4301_v20 = vadd.f32 %v4300_v51, %v11651_v38  ;;  %v12380_v38 = vsel %vm4702_vm8, %v12322_v31, %v9253_v34 }
 0x373   : > { %v10841_v47 = vpop.eup %10840  ;;  %v4302_v0 = vpop.f32.mrf.mxu0 }
 0x374   : > { %v9254_v8 = vadd.f32 -1.0, %v10841_v47  ;;  %v4856_v2 = vmul.f32 1.442695, %v4301_v20  ;;  %vm4707_vm13 = vcmp.gt.f32.partialorder %v4301_v20, 0.0 }
 0x375   : > { %v4305_v56 = vpop.f32.mrf.mxu0  ;;  %4496 = vmatmul.mubr.bf16.gmra.mxu0 %v10682_v23  ;;  %v10685_v23 = vld [vmem:[%s11339_s24 + $0x760] ss:$24 sps:$4 sm:$0xff]  }
 0x376   : > { %10848 = vpow2.f32 %v4856_v2  ;;  %v12376_v9 = vadd.f32 %v4305_v56, %v11654_v48  ;;  %9209 = vmatprep.mubr.msk.bf16.mxu0 %vm2933_vm0, %v10683_v6  ;;  %v12382_v57 = vsel %vm4703_vm9, %v4285_v28, %v9254_v8  ;;  %v10686_v56 = vld [vmem:[%s11339_s24 + $0x794] ss:$24 sps:$4 sm:$0xff]  }
 0x377   : > { %v10843_v43 = vpop.eup %10842  ;;  %v4307_v51 = vpop.f32.mrf.mxu0 }
 0x378   : > { %v4858_v0 = vmul.f32 1.442695, %v12376_v9  ;;  %v9255_v2 = vadd.f32 -1.0, %v10843_v43  ;;  %vm4708_vm14 = vcmp.gt.f32.partialorder %v12376_v9, 0.0 }
 0x379   : > { %v4308_v30 = vpop.f32.mrf.mxu0 }
 0x37a   : > { %10850 = vpow2.f32 %v4858_v0  ;;  %v4309_v48 = vadd.f32 %v4308_v30, %v11661_v3  ;;  %v12396_v3 = vsel %vm4704_vm10, %v12341_v41, %v9255_v2 }
 0x37b   : > { %v10845_v6 = vpop.eup %10844  ;;  %v4310_v33 = vpop.f32.mrf.mxu0 }
 0x37c   : > { %v9256_v31 = vadd.f32 -1.0, %v10845_v6  ;;  %v4860_v28 = vmul.f32 1.442695, %v4309_v48  ;;  %vm4709_vm15 = vcmp.gt.f32.partialorder %v4309_v48, 0.0 }
 0x37d   : > { %v4313_v34 = vpop.f32.mrf.mxu0  ;;  %4504 = vmatmul.mubr.bf16.gmra.mxu0 %v10685_v23  ;;  %v10688_v23 = vld [vmem:[%s11339_s24 + $0x790] ss:$24 sps:$4 sm:$0xff]  }
 0x37e   : > { %10852 = vpow2.f32 %v4860_v28  ;;  %v12392_v8 = vadd.f32 %v4313_v34, %v11667_v16  ;;  %9210 = vmatprep.mubr.msk.bf16.mxu0 %vm2933_vm0, %v10686_v56  ;;  %v12398_v30 = vsel %vm4705_vm11, %v4293_v58, %v9256_v31  ;;  %v10689_v34 = vld [vmem:[%s11339_s24 + $0x7c4] ss:$24 sps:$4 sm:$0xff]  }
 0x37f   : > { %v10847_v33 = vpop.eup %10846  ;;  %v4315_v43 = vpop.f32.mrf.mxu0 }
 0x380   : > { %v4862_v0 = vmul.f32 1.442695, %v12392_v8  ;;  %v9257_v28 = vadd.f32 -1.0, %v10847_v33  ;;  %vm4710_vm1 = vcmp.gt.f32.partialorder %v12392_v8, 0.0 }
 0x381   : > { %v4316_v6 = vpop.f32.mrf.mxu0 }
 0x382   : > { %10854 = vpow2.f32 %v4862_v0  ;;  %v4317_v16 = vadd.f32 %v4316_v6, %v11678_v37  ;;  %v12412_v37 = vsel %vm4706_vm12, %v12359_v11, %v9257_v28  ;;  %v10694_v0 = vld [vmem:[%s11339_s24 + $0x7f0] ss:$24 sps:$4 sm:$0xff]  }
 0x383   : > { %v10849_v56 = vpop.eup %10848  ;;  %v4318_v47 = vpop.f32.mrf.mxu0 }
 0x384   : > { %v9258_v41 = vadd.f32 -1.0, %v10849_v56  ;;  %v4864_v58 = vmul.f32 1.442695, %v4317_v16  ;;  %vm4711_vm2 = vcmp.gt.f32.partialorder %v4317_v16, 0.0 }
 0x385   : > { %v4321_v2 = vpop.f32.mrf.mxu0  ;;  %4512 = vmatmul.mubr.bf16.gmra.mxu0 %v10688_v23  ;;  %v10691_v23 = vld [vmem:[%s11339_s24 + $0x7c0] ss:$24 sps:$4 sm:$0xff]  }
 0x386   : > { %10856 = vpow2.f32 %v4864_v58  ;;  %v12408_v31 = vadd.f32 %v4321_v2, %v11685_v52  ;;  %9211 = vmatprep.mubr.msk.bf16.mxu0 %vm2933_vm0, %v10689_v34  ;;  %v12414_v33 = vsel %vm4707_vm13, %v4301_v20, %v9258_v41  ;;  %v10692_v2 = vld [vmem:[%s11339_s24 + $0x7f4] ss:$24 sps:$4 sm:$0xff]  }
 0x387   : > { %v10851_v47 = vpop.eup %10850  ;;  %v4323_v43 = vpop.f32.mrf.mxu0 }
 0x388   : > { %v4866_v6 = vmul.f32 1.442695, %v12408_v31  ;;  %v9259_v58 = vadd.f32 -1.0, %v10851_v47  ;;  %vm4712_vm3 = vcmp.gt.f32.partialorder %v12408_v31, 0.0 }
 0x389   : > { %v4324_v56 = vpop.f32.mrf.mxu0 }
 0x38a   : > { %10858 = vpow2.f32 %v4866_v6  ;;  %v4325_v52 = vadd.f32 %v4324_v56, %v11696_v7  ;;  %v5196_v7 = vsel %vm4708_vm14, %v12376_v9, %v9259_v58 }
 0x38b   : > { %v10853_v34 = vpop.eup %10852  ;;  %v4326_v51 = vpop.f32.mrf.mxu0 }
 0x38c   : > { %v9260_v11 = vadd.f32 -1.0, %v10853_v34  ;;  %v4868_v20 = vmul.f32 1.442695, %v4325_v52  ;;  %vm4713_vm4 = vcmp.gt.f32.partialorder %v4325_v52, 0.0 }
 0x38d   : > { %v4329_v28 = vpop.f32.mrf.mxu0  ;;  %4520 = vmatmul.mubr.bf16.gmra.mxu0 %v10691_v23 }
 0x38e   : > { %10860 = vpow2.f32 %v4868_v20  ;;  %v12424_v41 = vadd.f32 %v4329_v28, %v11703_v26  ;;  %9212 = vmatprep.mubr.msk.bf16.mxu0 %vm2933_vm0, %v10692_v2  ;;  %v5197_v47 = vsel %vm4709_vm15, %v4309_v48, %v9260_v11  ;;  %v10695_v20 = vld [vmem:[%s11339_s24 + $0x824] ss:$24 sps:$4 sm:$0xff]  }
 0x38f   : > { %v10855_v43 = vpop.eup %10854  ;;  %v4331_v51 = vpop.f32.mrf.mxu0  ;;  %v5388_v6 = vpack.c.bf16 %v5197_v47, %v5196_v7 }
 0x390   : > { %v4870_v56 = vmul.f32 1.442695, %v12424_v41  ;;  %v9261_v1 = vadd.f32 -1.0, %v10855_v43  ;;  %vm4714_vm5 = vcmp.gt.f32.partialorder %v12424_v41, 0.0 }
 0x391   : > { %v4332_v34 = vpop.f32.mrf.mxu0 }
 0x392   : > { %10862 = vpow2.f32 %v4870_v56  ;;  %v12431_v23 = vadd.f32 %v4332_v34, %v11714_v50  ;;  %v5198_v50 = vsel %vm4710_vm1, %v12392_v8, %v9261_v1  ;;  %v10697_v56 = vld [vmem:[%s11339_s24 + $0x820] ss:$24 sps:$4 sm:$0xff]  }
 0x393   : > { %v10857_v26 = vpop.eup %10856  ;;  %v4334_v28 = vpop.f32.mrf.mxu0 }
 0x394   : > { %v9262_v55 = vadd.f32 -1.0, %v10857_v26  ;;  %v4872_v2 = vmul.f32 1.442695, %v12431_v23  ;;  %vm4715_vm6 = vcmp.gt.f32.partialorder %v12431_v23, 0.0 }
 0x395   : > { %v4337_v9 = vpop.f32.mrf.mxu0  ;;  %4528 = vmatmul.mubr.bf16.gmra.mxu0 %v10694_v0 }
 0x396   : > { %10864 = vpow2.f32 %v4872_v2  ;;  %v12437_v48 = vadd.f32 %v4337_v9, %v11721_v63  ;;  %v5199_v58 = vsel %vm4711_vm2, %v4317_v16, %v9262_v55  ;;  %9213 = vmatprep.mubr.msk.bf16.mxu0 %vm2933_vm0, %v10695_v20  ;;  %v15722_v63 = vpack.c.bf16 %v12291_v35, %v12289_v59  ;;  %v10698_v55 = vld [vmem:[%s11339_s24 + $0x854] ss:$24 sps:$4 sm:$0xff]  }
 0x397   : > { %v10859_v11 = vpop.eup %10858  ;;  %v4339_v7 = vpop.f32.mrf.mxu0  ;;  %v5389_v47 = vpack.c.bf16 %v5199_v58, %v5198_v50  ;;  %v15723_v35 = vpack.c.bf16 %v12272_v10, %v12270_v39  ;;  %v15725_v10 = vpack.c.bf16 %v12253_v17, %v12251_v40 }
 0x398   : > { %v4874_v43 = vmul.f32 1.442695, %v12437_v48  ;;  %v9263_v34 = vadd.f32 -1.0, %v10859_v11  ;;  %v10701_v11 = vld [vmem:[%s11339_s24 + $0x884] ss:$24 sps:$4 sm:$0xff]   ;;  %vm4716_vm7 = vcmp.gt.f32.partialorder %v12437_v48, 0.0 }
 0x399   : > { %v4340_v51 = vpop.f32.mrf.mxu0  ;;  %9517 = vmatprep.subr.bf16.mxu1 %v5389_v47 }
 0x39a   : > { %10866 = vpow2.f32 %v4874_v43  ;;  %v12444_v0 = vadd.f32 %v4340_v51, %v11732_v29  ;;  %9518 = vmatpush3.bf16.msra.mxu1 %v15722_v63  ;;  %v12453_v29 = vsel %vm4712_vm3, %v12408_v31, %v9263_v34  ;;  %v15724_v31 = vpack.c.bf16 %v12414_v33, %v12412_v37 }
 0x39b   : > { %v10861_v1 = vpop.eup %10860  ;;  %v4342_v8 = vpop.f32.mrf.mxu0  ;;  %9519 = vmatprep.subr.bf16.mxu1 %v5388_v6  ;;  %v15726_v37 = vpack.c.bf16 %v12398_v30, %v12396_v3  ;;  %v15727_v30 = vpack.c.bf16 %v12237_v62, %v12235_v21  ;;  %v15729_v62 = vpack.c.bf16 %v12221_v27, %v12219_v36 }
 0x39c   : > { %v9264_v16 = vadd.f32 -1.0, %v10861_v1  ;;  %v4876_v20 = vmul.f32 1.442695, %v12444_v0  ;;  %v10704_v1 = vld [vmem:[%s11339_s24 + $0x8b4] ss:$24 sps:$4 sm:$0xff]   ;;  %vm4717_vm8 = vcmp.gt.f32.partialorder %v12444_v0, 0.0 }
 0x39d   : > { %v4345_v26 = vpop.f32.mrf.mxu0  ;;  %4536 = vmatmul.mubr.bf16.gmra.mxu0 %v10697_v56 }
 0x39e   : > { %v12455_v28 = vsel %vm4713_vm4, %v4325_v52, %v9264_v16  ;;  %10868 = vpow2.f32 %v4876_v20  ;;  %v12458_v59 = vadd.f32 %v4345_v26, %v11739_v44  ;;  %9520 = vmatpush3.bf16.msra.mxu1 %v15723_v35  ;;  %9214 = vmatprep.mubr.msk.bf16.mxu0 %vm2933_vm0, %v10698_v55  ;;  %v10700_v44 = vld [vmem:[%s11339_s24 + $0x850] ss:$24 sps:$4 sm:$0xff]  }
 0x39f   : > { %v10863_v6 = vpop.eup %10862  ;;  %v4347_v9 = vpop.f32.mrf.mxu0  ;;  %9521 = vmatprep.subr.bf16.mxu1 %v15724_v31 }
 0x3a0   : > { %v4878_v52 = vmul.f32 1.442695, %v12458_v59  ;;  %v9265_v58 = vadd.f32 -1.0, %v10863_v6  ;;  %vm4718_vm9 = vcmp.gt.f32.partialorder %v12458_v59, 0.0 }
 0x3a1   : > { %v4348_v50 = vpop.f32.mrf.mxu0 }
 0x3a2   : > { %10870 = vpow2.f32 %v4878_v52  ;;  %v12472_v39 = vadd.f32 %v4348_v50, %v11750_v13  ;;  %9522 = vmatpush3.bf16.msra.mxu1 %v15725_v10  ;;  %v12485_v40 = vsel %vm4714_vm5, %v12424_v41, %v9265_v58  ;;  %v10707_v52 = vld [vmem:[%s11339_s24 + $0x8e4] ss:$24 sps:$4 sm:$0xff]   ;;  %v15734_v58 = vpack.c.bf16 %v12326_v22, %v12309_v5 }
 0x3a3   : > { %v10865_v7 = vpop.eup %10864  ;;  %v4350_v47 = vpop.f32.mrf.mxu0  ;;  %9523 = vmatprep.subr.bf16.mxu1 %v15726_v37  ;;  %v5298_v50 = vld [vmem:[%s15613_s3 + $0x40] sm:$0xff]  ;;  %v15735_v22 = vpack.c.bf16 %v12175_v15, %v12173_v19  ;;  %v10710_v15 = vld [vmem:[%s11339_s24 + $0x914] ss:$24 sps:$4 sm:$0xff]  }
 0x3a4   : > { %v9266_v33 = vadd.f32 -1.0, %v10865_v7  ;;  %v4880_v43 = vmul.f32 1.442695, %v12472_v39  ;;  %vm4719_vm10 = vcmp.gt.f32.partialorder %v12472_v39, 0.0 }
 0x3a5   : > { %v4353_v13 = vpop.f32.mrf.mxu0  ;;  %4544 = vmatmul.mubr.bf16.gmra.mxu0 %v10700_v44 }
 0x3a6   : > { %v12488_v17 = vsel %vm4715_vm6, %v12431_v23, %v9266_v33  ;;  %10872 = vpow2.f32 %v4880_v43  ;;  %v12491_v3 = vadd.f32 %v4353_v13, %v11757_v32  ;;  %9524 = vmatpush3.bf16.msra.mxu1 %v15727_v30  ;;  %9215 = vmatprep.mubr.msk.bf16.mxu0 %vm2933_vm0, %v10701_v11  ;;  %v15728_v23 = vpack.c.bf16 %v12382_v57, %v12380_v38  ;;  %v10703_v32 = vld [vmem:[%s11339_s24 + $0x880] ss:$24 sps:$4 sm:$0xff]  }
 0x3a7   : > { %v10867_v51 = vpop.eup %10866  ;;  %v4355_v41 = vpop.f32.mrf.mxu0  ;;  %v15730_v38 = vpack.c.bf16 %v12366_v24, %v12363_v12  ;;  %v15731_v24 = vpack.c.bf16 %v12205_v61, %v12203_v54  ;;  %v15733_v61 = vpack.c.bf16 %v12189_v42, %v12187_v46  ;;  %v15736_v13 = vcombine.low %v12314_v25, %v12319_v53  ;;  %v15737_v30 = vld [vmem:[#allocation6_spill] sm:$0xff] }
 0x3a8   : > { %9525 = vmatprep.subr.bf16.mxu1 %v15728_v23  ;;  %v4882_v34 = vmul.f32 1.442695, %v12491_v3  ;;  %v9267_v55 = vadd.f32 -1.0, %v10867_v51  ;;  %v5306_v51 = vld [vmem:[%s15613_s3 + $0x80] sm:$0xff]  ;;  %vm4720_vm11 = vcmp.gt.f32.partialorder %v12491_v3, 0.0 }
 0x3a9   : > { %v4356_v63 = vpop.f32.mrf.mxu0  ;;  %v5310_v41 = vld [vmem:[%s15613_s3 + $0xa0] sm:$0xff] }
 0x3aa   : > { %10874 = vpow2.f32 %v4882_v34  ;;  %v12505_v21 = vadd.f32 %v4356_v63, %v11768_v60  ;;  %9526 = vmatpush3.bf16.msra.mxu1 %v15729_v62  ;;  %v12518_v36 = vsel %vm4716_vm7, %v12437_v48, %v9267_v55  ;;  %v9370_v55 = vcombine.high %v5306_v51, %v5310_v41 }
 0x3ab   : > { %v10869_v8 = vpop.eup %10868  ;;  %v4358_v16 = vpop.f32.mrf.mxu0  ;;  %9527 = vmatprep.subr.bf16.mxu1 %v15730_v38 }
 0x3ac   : > { %v9268_v57 = vadd.f32 -1.0, %v10869_v8  ;;  %v4884_v20 = vmul.f32 1.442695, %v12505_v21  ;;  %vm4721_vm12 = vcmp.gt.f32.partialorder %v12505_v21, 0.0  ;;  %v15738_v8 = vld [vmem:[#allocation7_spill] sm:$0xff] }
 0x3ad   : > { %v4361_v60 = vpop.f32.mrf.mxu0  ;;  %4552 = vmatmul.mubr.bf16.gmra.mxu0 %v10703_v32 }
 0x3ae   : > { %v12521_v27 = vsel %vm4717_vm8, %v12444_v0, %v9268_v57  ;;  %10876 = vpow2.f32 %v4884_v20  ;;  %v12524_v12 = vadd.f32 %v4361_v60, %v11772_v18  ;;  %9528 = vmatpush3.bf16.msra.mxu1 %v15731_v24  ;;  %9216 = vmatprep.mubr.msk.bf16.mxu0 %vm2933_vm0, %v10704_v1  ;;  %v15732_v0 = vpack.c.bf16 %v12348_v14, %v12345_v49  ;;  %v10706_v18 = vld [vmem:[%s11339_s24 + $0x8b0] ss:$24 sps:$4 sm:$0xff]   ;;  %v5302_v49 = vld [vmem:[%s15613_s3 + $0x60] sm:$0xff] }
 0x3af   : > { %v10871_v26 = vpop.eup %10870  ;;  %v5392_v35 = vpack.c.bf16 %v12521_v27, %v12518_v36  ;;  %v4363_v48 = vpop.f32.mrf.mxu0  ;;  %v9362_v42 = vcombine.high %v5298_v50, %v5302_v49  ;;  %v9361_v32 = vcombine.low %v5298_v50, %v5302_v49  ;;  %v9369_v49 = vcombine.low %v5306_v51, %v5310_v41  ;;  %v5299_v27 = vld [vmem:[%s15613_s3 + $0x48] sm:$0xff] }
 0x3b0   : > { %9529 = vmatprep.subr.bf16.mxu1 %v15732_v0  ;;  %v4886_v6 = vmul.f32 1.442695, %v12524_v12  ;;  %v9269_v31 = vadd.f32 -1.0, %v10871_v26  ;;  %v10712_v26 = vld [vmem:[%s11339_s24 + $0x910] ss:$24 sps:$4 sm:$0xff]   ;;  %vm4722_vm13 = vcmp.gt.f32.partialorder %v12524_v12, 0.0  ;;  %v15769_v36 = vpack.c.bf16 %v12488_v17, %v12485_v40 }
 0x3b1   : > { %v4364_v9 = vpop.f32.mrf.mxu0  ;;  %v10713_v0 = vld [vmem:[%s11339_s24 + $0x944] ss:$24 sps:$4 sm:$0xff]  }
 0x3b2   : > { %10878 = vpow2.f32 %v4886_v6  ;;  %v12538_v54 = vadd.f32 %v4364_v9, %v11779_v45  ;;  %9530 = vmatpush3.bf16.msra.mxu1 %v15733_v61  ;;  %v12557_v11 = vsel %vm4718_vm9, %v12458_v59, %v9269_v31  ;;  %v5314_v6 = vld [vmem:[%s15613_s3 + $0xc0] sm:$0xff] }
 0x3b3   : > { %v10873_v14 = vpop.eup %10872  ;;  %v4366_v44 = vpop.f32.mrf.mxu0  ;;  %9531 = vmatprep.subr.bf16.mxu1 %v15734_v58  ;;  %v5318_v9 = vld [vmem:[%s15613_s3 + $0xe0] sm:$0xff] }
 0x3b4   : > { %v9270_v45 = vadd.f32 -1.0, %v10873_v14  ;;  %v4888_v10 = vmul.f32 1.442695, %v12538_v54  ;;  %vm4723_vm14 = vcmp.gt.f32.partialorder %v12538_v54, 0.0  ;;  %v9378_v14 = vcombine.high %v5314_v6, %v5318_v9 }
 0x3b5   : > { %v4369_v46 = vpop.f32.mrf.mxu0  ;;  %4560 = vmatmul.mubr.bf16.gmra.mxu0 %v10706_v18 }
 0x3b6   : > { %v12560_v7 = vsel %vm4719_vm10, %v12472_v39, %v9270_v45  ;;  %10880 = vpow2.f32 %v4888_v10  ;;  %v12563_v5 = vadd.f32 %v4369_v46, %v11782_v4  ;;  %9532 = vmatpush3.bf16.msra.mxu1 %v15735_v22  ;;  %9217 = vmatprep.mubr.msk.bf16.mxu0 %vm2933_vm0, %v10707_v52  ;;  %v10709_v39 = vld [vmem:[%s11339_s24 + $0x8e0] ss:$24 sps:$4 sm:$0xff]  }
 0x3b7   : > { %v10875_v47 = vpop.eup %10874  ;;  %v5393_v37 = vpack.c.bf16 %v12560_v7, %v12557_v11  ;;  %v4371_v59 = vpop.f32.mrf.mxu0  ;;  %v15740_v45 = vld [vmem:[#allocation9_spill] sm:$0xff]  ;;  %v15766_v7 = vld [vmem:[#allocation35_spill] sm:$0xff] }
 0x3b8   : > { %v4890_v33 = vmul.f32 1.442695, %v12563_v5  ;;  %v9271_v4 = vadd.f32 -1.0, %v10875_v47  ;;  %vm4724_vm15 = vcmp.gt.f32.partialorder %v12563_v5, 0.0 }
 0x3b9   : > { %v4372_v43 = vpop.f32.mrf.mxu0  ;;  %5926 = vmatmul.mubr.bf16.vlgmr.msra.gmra.mxu1 %v15736_v13  ;;  %v5322_v13 = vld [vmem:[%s15613_s3 + $0x100] sm:$0xff] }
 0x3ba   : > { %10882 = vpow2.f32 %v4890_v33  ;;  %v12577_v19 = vadd.f32 %v4372_v43, %v15737_v30  ;;  %5933 = vmatprep.mubr.bf16.mxu1 %v9362_v42  ;;  %v12590_v62 = vsel %vm4720_vm11, %v12491_v3, %v9271_v4  ;;  %v10715_v33 = vld [vmem:[%s11339_s24 + $0x940] ss:$24 sps:$4 sm:$0xff]  }
 0x3bb   : > { %v10877_v23 = vpop.eup %10876  ;;  %v4374_v34 = vpop.f32.mrf.mxu0  ;;  %v5326_v4 = vld [vmem:[%s15613_s3 + $0x120] sm:$0xff] }
 0x3bc   : > { %v9272_v63 = vadd.f32 -1.0, %v10877_v23  ;;  %v4892_v25 = vmul.f32 1.442695, %v12577_v19  ;;  %vm4725_vm1 = vcmp.gt.f32.partialorder %v12577_v19, 0.0  ;;  %v9377_v34 = vcombine.low %v5314_v6, %v5318_v9  ;;  %v5334_v6 = vld [vmem:[%s15613_s3 + $0x160] sm:$0xff] }
 0x3bd   : > { %v4377_v53 = vpop.f32.mrf.mxu0  ;;  %4568 = vmatmul.mubr.bf16.gmra.mxu0 %v10709_v39  ;;  %v10716_v39 = vld [vmem:[%s11339_s24 + $0x974] ss:$24 sps:$4 sm:$0xff]  }
 0x3be   : > { %v12593_v1 = vsel %vm4721_vm12, %v12505_v21, %v9272_v63  ;;  %10884 = vpow2.f32 %v4892_v25  ;;  %v12596_v16 = vadd.f32 %v4377_v53, %v15738_v8  ;;  %9218 = vmatprep.mubr.msk.bf16.mxu0 %vm2933_vm0, %v10710_v15  ;;  %v15739_v21 = vld [vmem:[#allocation8_spill] sm:$0xff]  ;;  %v9386_v63 = vcombine.high %v5322_v13, %v5326_v4 }
 0x3bf   : > { %v10879_v38 = vpop.eup %10878  ;;  %v5394_v57 = vpack.c.bf16 %v12593_v1, %v12590_v62  ;;  %v4379_v20 = vpop.f32.mrf.mxu0 }
 0x3c0   : > { %v4894_v60 = vmul.f32 1.442695, %v12596_v16  ;;  %v9273_v3 = vadd.f32 -1.0, %v10879_v38  ;;  %vm4726_vm2 = vcmp.gt.f32.partialorder %v12596_v16, 0.0 }
 0x3c1   : > { %v4380_v24 = vpop.f32.mrf.mxu0  ;;  %5934 = vmatmul.mubr.bf16.gmra.mxu1 %v9361_v32  ;;  %v15742_v32 = vld [vmem:[#allocation11_spill] sm:$0xff] }
 0x3c2   : > { %10886 = vpow2.f32 %v4894_v60  ;;  %v12604_v48 = vadd.f32 %v4380_v24, %v15739_v21  ;;  %5941 = vmatprep.mubr.bf16.mxu1 %v9370_v55  ;;  %v12617_v44 = vsel %vm4722_vm13, %v12524_v12, %v9273_v3  ;;  %v10719_v21 = vld [vmem:[%s11339_s24 + $0x9a4] ss:$24 sps:$4 sm:$0xff]  }
 0x3c3   : > { %v10881_v18 = vpop.eup %10880  ;;  %v4382_v31 = vpop.f32.mrf.mxu0 }
 0x3c4   : > { %v9274_v61 = vadd.f32 -1.0, %v10881_v18  ;;  %v4896_v52 = vmul.f32 1.442695, %v12604_v48  ;;  %vm4727_vm3 = vcmp.gt.f32.partialorder %v12604_v48, 0.0 }
 0x3c5   : > { %v4385_v50 = vpop.f32.mrf.mxu0  ;;  %4576 = vmatmul.mubr.bf16.gmra.mxu0 %v10712_v26  ;;  %v10718_v26 = vld [vmem:[%s11339_s24 + $0x970] ss:$24 sps:$4 sm:$0xff]  }
 0x3c6   : > { %v12620_v58 = vsel %vm4723_vm14, %v12538_v54, %v9274_v61  ;;  %10888 = vpow2.f32 %v4896_v52  ;;  %v12623_v10 = vadd.f32 %v4385_v50, %v15740_v45  ;;  %9219 = vmatprep.mubr.msk.bf16.mxu0 %vm2933_vm0, %v10713_v0  ;;  %v15741_v54 = vld [vmem:[#allocation10_spill] sm:$0xff]  ;;  %v9385_v50 = vcombine.low %v5322_v13, %v5326_v4  ;;  %v10722_v4 = vld [vmem:[%s11339_s24 + $0x9d4] ss:$24 sps:$4 sm:$0xff]  }
 0x3c7   : > { %v10883_v46 = vpop.eup %10882  ;;  %v5395_v42 = vpack.c.bf16 %v12620_v58, %v12617_v44  ;;  %v4387_v22 = vpop.f32.mrf.mxu0  ;;  %v5330_v0 = vld [vmem:[%s15613_s3 + $0x140] sm:$0xff] }
 0x3c8   : > { %v4898_v47 = vmul.f32 1.442695, %v12623_v10  ;;  %v9275_v12 = vadd.f32 -1.0, %v10883_v46  ;;  %v15744_v46 = vld [vmem:[#allocation13_spill] sm:$0xff]  ;;  %vm4728_vm4 = vcmp.gt.f32.partialorder %v12623_v10, 0.0 }
 0x3c9   : > { %v4388_v59 = vpop.f32.mrf.mxu0  ;;  %5942 = vmatmul.mubr.bf16.gmra.mxu1 %v9369_v49  ;;  %v9394_v49 = vcombine.high %v5330_v0, %v5334_v6  ;;  %v15764_v58 = vld [vmem:[#allocation33_spill] sm:$0xff] }
 0x3ca   : > { %10890 = vpow2.f32 %v4898_v47  ;;  %v12631_v43 = vadd.f32 %v4388_v59, %v15741_v54  ;;  %5949 = vmatprep.mubr.bf16.mxu1 %v9378_v14  ;;  %v12644_v25 = vsel %vm4724_vm15, %v12563_v5, %v9275_v12 }
 0x3cb   : > { %v10885_v30 = vpop.eup %10884  ;;  %v4390_v15 = vpop.f32.mrf.mxu0 }
 0x3cc   : > { %v9276_v51 = vadd.f32 -1.0, %v10885_v30  ;;  %v4900_v41 = vmul.f32 1.442695, %v12631_v43  ;;  %v5338_v30 = vld [vmem:[%s15613_s3 + $0x180] sm:$0xff]  ;;  %vm4729_vm5 = vcmp.gt.f32.partialorder %v12631_v43, 0.0 }
 0x3cd   : > { %v4393_v23 = vpop.f32.mrf.mxu0  ;;  %4584 = vmatmul.mubr.bf16.gmra.mxu0 %v10715_v33  ;;  %v5342_v15 = vld [vmem:[%s15613_s3 + $0x1a0] sm:$0xff] }
 0x3ce   : > { %v12647_v53 = vsel %vm4725_vm1, %v12577_v19, %v9276_v51  ;;  %10892 = vpow2.f32 %v4900_v41  ;;  %v12650_v55 = vadd.f32 %v4393_v23, %v15742_v32  ;;  %9220 = vmatprep.mubr.msk.bf16.mxu0 %vm2933_vm0, %v10716_v39  ;;  %v15743_v19 = vld [vmem:[#allocation12_spill] sm:$0xff]  ;;  %v9393_v32 = vcombine.low %v5330_v0, %v5334_v6 }
 0x3cf   : > { %v10887_v8 = vpop.eup %10886  ;;  %v5396_v38 = vpack.c.bf16 %v12647_v53, %v12644_v25  ;;  %v4395_v20 = vpop.f32.mrf.mxu0  ;;  %v10721_v39 = vld [vmem:[%s11339_s24 + $0x9a0] ss:$24 sps:$4 sm:$0xff]  }
 0x3d0   : > { %v4902_v60 = vmul.f32 1.442695, %v12650_v55  ;;  %v9277_v5 = vadd.f32 -1.0, %v10887_v8  ;;  %v9402_v8 = vcombine.high %v5338_v30, %v5342_v15  ;;  %v15746_v20 = vld [vmem:[#allocation15_spill] sm:$0xff]  ;;  %vm4730_vm6 = vcmp.gt.f32.partialorder %v12650_v55, 0.0 }
 0x3d1   : > { %v4396_v24 = vpop.f32.mrf.mxu0  ;;  %5950 = vmatmul.mubr.bf16.gmra.mxu1 %v9377_v34 }
 0x3d2   : > { %10894 = vpow2.f32 %v4902_v60  ;;  %v12658_v3 = vadd.f32 %v4396_v24, %v15743_v19  ;;  %5957 = vmatprep.mubr.bf16.mxu1 %v9386_v63  ;;  %v12671_v14 = vsel %vm4726_vm2, %v12596_v16, %v9277_v5 }
 0x3d3   : > { %v10889_v9 = vpop.eup %10888  ;;  %v4398_v18 = vpop.f32.mrf.mxu0 }
 0x3d4   : > { %v9278_v31 = vadd.f32 -1.0, %v10889_v9  ;;  %v4904_v61 = vmul.f32 1.442695, %v12658_v3  ;;  %v10724_v9 = vld [vmem:[%s11339_s24 + $0x9d0] ss:$24 sps:$4 sm:$0xff]   ;;  %vm4731_vm7 = vcmp.gt.f32.partialorder %v12658_v3, 0.0 }
 0x3d5   : > { %v4401_v52 = vpop.f32.mrf.mxu0  ;;  %4592 = vmatmul.mubr.bf16.gmra.mxu0 %v10718_v26 }
 0x3d6   : > { %v12674_v45 = vsel %vm4727_vm3, %v12604_v48, %v9278_v31  ;;  %10896 = vpow2.f32 %v4904_v61  ;;  %v12677_v22 = vadd.f32 %v4401_v52, %v15744_v46  ;;  %9221 = vmatprep.mubr.msk.bf16.mxu0 %vm2933_vm0, %v10719_v21  ;;  %v15745_v48 = vld [vmem:[#allocation14_spill] sm:$0xff]  ;;  %v15747_v31 = vld [vmem:[#allocation16_spill] sm:$0xff] }
 0x3d7   : > { %v10891_v47 = vpop.eup %10890  ;;  %v5397_v59 = vpack.c.bf16 %v12674_v45, %v12671_v14  ;;  %v4403_v33 = vpop.f32.mrf.mxu0  ;;  %v5350_v52 = vld [vmem:[%s15613_s3 + $0x1e0] sm:$0xff]  ;;  %v10742_v21 = vld [vmem:[%s11339_s24 + $0xaf0] ss:$24 sps:$4 sm:$0xff]  }
 0x3d8   : > { %v4906_v12 = vmul.f32 1.442695, %v12677_v22  ;;  %v9279_v16 = vadd.f32 -1.0, %v10891_v47  ;;  %vm4732_vm8 = vcmp.gt.f32.partialorder %v12677_v22, 0.0  ;;  %v15762_v14 = vld [vmem:[#allocation31_spill] sm:$0xff] }
 0x3d9   : > { %v4404_v54 = vpop.f32.mrf.mxu0  ;;  %5958 = vmatmul.mubr.bf16.gmra.mxu1 %v9385_v50 }
 0x3da   : > { %10898 = vpow2.f32 %v4906_v12  ;;  %v12685_v13 = vadd.f32 %v4404_v54, %v15745_v48  ;;  %5965 = vmatprep.mubr.bf16.mxu1 %v9394_v49  ;;  %v12702_v24 = vsel %vm4728_vm4, %v12623_v10, %v9279_v16  ;;  %v10725_v10 = vld [vmem:[%s11339_s24 + $0xa04] ss:$24 sps:$4 sm:$0xff]   ;;  %v9401_v12 = vcombine.low %v5338_v30, %v5342_v15 }
 0x3db   : > { %v10893_v51 = vpop.eup %10892  ;;  %v4406_v41 = vpop.f32.mrf.mxu0 }
 0x3dc   : > { %v9280_v23 = vadd.f32 -1.0, %v10893_v51  ;;  %v4908_v34 = vmul.f32 1.442695, %v12685_v13  ;;  %vm4733_vm9 = vcmp.gt.f32.partialorder %v12685_v13, 0.0 }
 0x3dd   : > { %v4409_v63 = vpop.f32.mrf.mxu0  ;;  %4600 = vmatmul.mubr.bf16.gmra.mxu0 %v10721_v39  ;;  %v15748_v39 = vld [vmem:[#allocation17_spill] sm:$0xff] }
 0x3de   : > { %10900 = vpow2.f32 %v4908_v34  ;;  %v12698_v60 = vadd.f32 %v4409_v63, %v15746_v20  ;;  %9222 = vmatprep.mubr.msk.bf16.mxu0 %vm2933_vm0, %v10722_v4  ;;  %v12705_v26 = vsel %vm4729_vm5, %v12631_v43, %v9280_v23  ;;  %v5346_v43 = vld [vmem:[%s15613_s3 + $0x1c0] sm:$0xff] }
 0x3df   : > { %v10895_v5 = vpop.eup %10894  ;;  %v4411_v19 = vpop.f32.mrf.mxu0  ;;  %v9410_v54 = vcombine.high %v5346_v43, %v5350_v52  ;;  %v10727_v34 = vld [vmem:[%s11339_s24 + $0xa00] ss:$24 sps:$4 sm:$0xff]  }
 0x3e0   : > { %v4910_v0 = vmul.f32 1.442695, %v12698_v60  ;;  %v9281_v18 = vadd.f32 -1.0, %v10895_v5  ;;  %v5358_v20 = vld [vmem:[%s15613_s3 + $0x220] sm:$0xff]  ;;  %vm4734_vm10 = vcmp.gt.f32.partialorder %v12698_v60, 0.0 }
 0x3e1   : > { %v4412_v6 = vpop.f32.mrf.mxu0  ;;  %5966 = vmatmul.mubr.bf16.gmra.mxu1 %v9393_v32  ;;  %v15749_v32 = vld [vmem:[#allocation18_spill] sm:$0xff] }
 0x3e2   : > { %10902 = vpow2.f32 %v4910_v0  ;;  %v12712_v61 = vadd.f32 %v4412_v6, %v15747_v31  ;;  %5973 = vmatprep.mubr.bf16.mxu1 %v9402_v8  ;;  %v12729_v48 = vsel %vm4730_vm6, %v12650_v55, %v9281_v18  ;;  %v10728_v55 = vld [vmem:[%s11339_s24 + $0xa34] ss:$24 sps:$4 sm:$0xff]   ;;  %v9409_v18 = vcombine.low %v5346_v43, %v5350_v52 }
 0x3e3   : > { %v10897_v50 = vpop.eup %10896  ;;  %v4414_v49 = vpop.f32.mrf.mxu0 }
 0x3e4   : > { %v9282_v46 = vadd.f32 -1.0, %v10897_v50  ;;  %v4912_v47 = vmul.f32 1.442695, %v12712_v61  ;;  %vm4735_vm11 = vcmp.gt.f32.partialorder %v12712_v61, 0.0 }
 0x3e5   : > { %v4417_v33 = vpop.f32.mrf.mxu0  ;;  %4608 = vmatmul.mubr.bf16.gmra.mxu0 %v10724_v9 }
 0x3e6   : > { %10904 = vpow2.f32 %v4912_v47  ;;  %v12725_v16 = vadd.f32 %v4417_v33, %v15748_v39  ;;  %9223 = vmatprep.mubr.msk.bf16.mxu0 %vm2933_vm0, %v10725_v10  ;;  %v12732_v4 = vsel %vm4731_vm7, %v12658_v3, %v9282_v46  ;;  %v5354_v3 = vld [vmem:[%s15613_s3 + $0x200] sm:$0xff]  ;;  %v15750_v10 = vld [vmem:[#allocation19_spill] sm:$0xff] }
 0x3e7   : > { %v10899_v51 = vpop.eup %10898  ;;  %v4419_v41 = vpop.f32.mrf.mxu0  ;;  %v9418_v31 = vcombine.high %v5354_v3, %v5358_v20 }
 0x3e8   : > { %v4914_v30 = vmul.f32 1.442695, %v12725_v16  ;;  %v9283_v63 = vadd.f32 -1.0, %v10899_v51  ;;  %v15751_v51 = vld [vmem:[#allocation20_spill] sm:$0xff]  ;;  %vm4736_vm12 = vcmp.gt.f32.partialorder %v12725_v16, 0.0 }
 0x3e9   : > { %v4420_v15 = vpop.f32.mrf.mxu0  ;;  %5974 = vmatmul.mubr.bf16.gmra.mxu1 %v9401_v12 }
 0x3ea   : > { %10906 = vpow2.f32 %v4914_v30  ;;  %v12739_v8 = vadd.f32 %v4420_v15, %v15749_v32  ;;  %5981 = vmatprep.mubr.bf16.mxu1 %v9410_v54  ;;  %v12756_v49 = vsel %vm4732_vm8, %v12677_v22, %v9283_v63  ;;  %v10730_v54 = vld [vmem:[%s11339_s24 + $0xa30] ss:$24 sps:$4 sm:$0xff]   ;;  %v10731_v22 = vld [vmem:[%s11339_s24 + $0xa64] ss:$24 sps:$4 sm:$0xff]  }
 0x3eb   : > { %v10901_v5 = vpop.eup %10900  ;;  %v4422_v19 = vpop.f32.mrf.mxu0  ;;  %v5366_v30 = vld [vmem:[%s15613_s3 + $0x260] sm:$0xff] }
 0x3ec   : > { %v9284_v0 = vadd.f32 -1.0, %v10901_v5  ;;  %v4916_v6 = vmul.f32 1.442695, %v12739_v8  ;;  %v9417_v5 = vcombine.low %v5354_v3, %v5358_v20  ;;  %vm4737_vm13 = vcmp.gt.f32.partialorder %v12739_v8, 0.0 }
 0x3ed   : > { %v4425_v9 = vpop.f32.mrf.mxu0  ;;  %4616 = vmatmul.mubr.bf16.gmra.mxu0 %v10727_v34 }
 0x3ee   : > { %10908 = vpow2.f32 %v4916_v6  ;;  %v12752_v50 = vadd.f32 %v4425_v9, %v15750_v10  ;;  %9224 = vmatprep.mubr.msk.bf16.mxu0 %vm2933_vm0, %v10728_v55  ;;  %v12759_v46 = vsel %vm4733_vm9, %v12685_v13, %v9284_v0  ;;  %v5362_v13 = vld [vmem:[%s15613_s3 + $0x240] sm:$0xff] }
 0x3ef   : > { %v10903_v47 = vpop.eup %10902  ;;  %v4427_v33 = vpop.f32.mrf.mxu0  ;;  %v5400_v12 = vpack.c.bf16 %v12759_v46, %v12756_v49  ;;  %v9426_v19 = vcombine.high %v5362_v13, %v5366_v30  ;;  %v15752_v0 = vld [vmem:[#allocation21_spill] sm:$0xff] }
 0x3f0   : > { %v4918_v43 = vmul.f32 1.442695, %v12752_v50  ;;  %v9285_v39 = vadd.f32 -1.0, %v10903_v47  ;;  %v10733_v33 = vld [vmem:[%s11339_s24 + $0xa60] ss:$24 sps:$4 sm:$0xff]   ;;  %vm4738_vm14 = vcmp.gt.f32.partialorder %v12752_v50, 0.0 }
 0x3f1   : > { %v4428_v52 = vpop.f32.mrf.mxu0  ;;  %5982 = vmatmul.mubr.bf16.gmra.mxu1 %v9409_v18 }
 0x3f2   : > { %10910 = vpow2.f32 %v4918_v43  ;;  %v12766_v41 = vadd.f32 %v4428_v52, %v15751_v51  ;;  %5989 = vmatprep.mubr.bf16.mxu1 %v9418_v31  ;;  %v12783_v9 = vsel %vm4734_vm10, %v12698_v60, %v9285_v39  ;;  %v15753_v52 = vld [vmem:[#allocation22_spill] sm:$0xff]  ;;  %v10734_v60 = vld [vmem:[%s11339_s24 + $0xa94] ss:$24 sps:$4 sm:$0xff]  }
 0x3f3   : > { %v10905_v15 = vpop.eup %10904  ;;  %v4430_v34 = vpop.f32.mrf.mxu0 }
 0x3f4   : > { %v9286_v63 = vadd.f32 -1.0, %v10905_v15  ;;  %v4920_v32 = vmul.f32 1.442695, %v12766_v41  ;;  %vm4739_vm15 = vcmp.gt.f32.partialorder %v12766_v41, 0.0 }
 0x3f5   : > { %v4433_v55 = vpop.f32.mrf.mxu0  ;;  %4624 = vmatmul.mubr.bf16.gmra.mxu0 %v10730_v54 }
 0x3f6   : > { %10912 = vpow2.f32 %v4920_v32  ;;  %v12779_v6 = vadd.f32 %v4433_v55, %v15752_v0  ;;  %9225 = vmatprep.mubr.msk.bf16.mxu0 %vm2933_vm0, %v10731_v22  ;;  %v12786_v18 = vsel %vm4735_vm11, %v12712_v61, %v9286_v63  ;;  %v5370_v61 = vld [vmem:[%s15613_s3 + $0x280] sm:$0x11]  ;;  %v9425_v63 = vcombine.low %v5362_v13, %v5366_v30  ;;  %v15754_v55 = vld [vmem:[#allocation23_spill] sm:$0xff] }
 0x3f7   : > { %v10907_v31 = vpop.eup %10906  ;;  %v4435_v10 = vpop.f32.mrf.mxu0  ;;  %v5401_v47 = vpack.c.bf16 %v12786_v18, %v12783_v9  ;;  %v9434_v32 = vcombine.high %v5370_v61, %v5370_v61 }
 0x3f8   : > { %v4922_v3 = vmul.f32 1.442695, %v12779_v6  ;;  %v9287_v43 = vadd.f32 -1.0, %v10907_v31  ;;  %vm4740_vm1 = vcmp.gt.f32.partialorder %v12779_v6, 0.0 }
 0x3f9   : > { %v4436_v20 = vpop.f32.mrf.mxu0  ;;  %5990 = vmatmul.mubr.bf16.gmra.mxu1 %v9417_v5 }
 0x3fa   : > { %10914 = vpow2.f32 %v4922_v3  ;;  %v12793_v54 = vadd.f32 %v4436_v20, %v15753_v52  ;;  %5997 = vmatprep.mubr.bf16.mxu1 %v9426_v19  ;;  %v12807_v19 = vsel %vm4736_vm12, %v12725_v16, %v9287_v43  ;;  %v10736_v20 = vld [vmem:[%s11339_s24 + $0xa90] ss:$24 sps:$4 sm:$0xff]   ;;  %v10737_v16 = vld [vmem:[%s11339_s24 + $0xac4] ss:$24 sps:$4 sm:$0xff]  }
 0x3fb   : > { %v10909_v39 = vpop.eup %10908  ;;  %v4438_v51 = vpop.f32.mrf.mxu0  ;;  %v15755_v52 = vld [vmem:[#allocation24_spill] sm:$0xff]  ;;  %v12828_v43 = vld [vmem:[%s15613_s3 + $0x28] sm:$0xff] }
 0x3fc   : > { %v9288_v22 = vadd.f32 -1.0, %v10909_v39  ;;  %v4924_v15 = vmul.f32 1.442695, %v12793_v54  ;;  %vm4741_vm2 = vcmp.gt.f32.partialorder %v12793_v54, 0.0 }
 0x3fd   : > { %v4441_v34 = vpop.f32.mrf.mxu0  ;;  %4632 = vmatmul.mubr.bf16.gmra.mxu0 %v10733_v33 }
 0x3fe   : > { %10916 = vpow2.f32 %v4924_v15  ;;  %v12803_v5 = vadd.f32 %v4441_v34, %v15754_v55  ;;  %9226 = vmatprep.mubr.msk.bf16.mxu0 %vm2933_vm0, %v10734_v60  ;;  %v12810_v0 = vsel %vm4737_vm13, %v12739_v8, %v9288_v22  ;;  %v12823_v8 = vld [vmem:[%s15613_s3 + $0x8] sm:$0xff]  ;;  %v15756_v55 = vld [vmem:[#allocation25_spill] sm:$0xff] }
 0x3ff   : > { %v10911_v31 = vpop.eup %10910  ;;  %v4443_v10 = vpop.f32.mrf.mxu0  ;;  %v5402_v3 = vpack.c.bf16 %v12810_v0, %v12807_v19  ;;  %v9355_v17 = vcombine.low %v12823_v8, %v12828_v43 }
 0x400   : > { %v4926_v13 = vmul.f32 1.442695, %v12803_v5  ;;  %v9289_v33 = vadd.f32 -1.0, %v10911_v31  ;;  %vm4742_vm3 = vcmp.gt.f32.partialorder %v12803_v5, 0.0 }
 0x401   : > { %v4444_v30 = vpop.f32.mrf.mxu0  ;;  %5998 = vmatmul.mubr.bf16.gmra.mxu1 %v9425_v63  ;;  %v9433_v63 = vcombine.low %v5370_v61, %v5370_v61 }
 0x402   : > { %10918 = vpow2.f32 %v4926_v13  ;;  %v12817_v60 = vadd.f32 %v4444_v30, %v15755_v52  ;;  %6005 = vmatprep.mubr.bf16.mxu1 %v9434_v32  ;;  %v9356_v32 = vcombine.high %v12823_v8, %v12828_v43  ;;  %v12840_v10 = vsel %vm4738_vm14, %v12752_v50, %v9289_v33 }
 0x403   : > { %v10913_v39 = vpop.eup %10912  ;;  %v4446_v51 = vpop.f32.mrf.mxu0 }
 0x404   : > { %v9290_v22 = vadd.f32 -1.0, %v10913_v39  ;;  %v4928_v15 = vmul.f32 1.442695, %v12817_v60  ;;  %v10739_v51 = vld [vmem:[%s11339_s24 + $0xac0] ss:$24 sps:$4 sm:$0xff]   ;;  %vm4743_vm4 = vcmp.gt.f32.partialorder %v12817_v60, 0.0 }
 0x405   : > { %v4449_v34 = vpop.f32.mrf.mxu0  ;;  %4640 = vmatmul.mubr.bf16.gmra.mxu0 %v10736_v20 }
 0x406   : > { %10920 = vpow2.f32 %v4928_v15  ;;  %v12836_v31 = vadd.f32 %v4449_v34, %v15756_v55  ;;  %9227 = vmatprep.mubr.msk.bf16.mxu0 %vm2933_vm0, %v10737_v16  ;;  %v12843_v13 = vsel %vm4739_vm15, %v12766_v41, %v9290_v22  ;;  %v15757_v34 = vld [vmem:[#allocation26_spill] sm:$0xff]  ;;  %v10740_v55 = vld [vmem:[%s11339_s24 + $0xaf4] ss:$24 sps:$4 sm:$0xff]  }
 0x407   : > { %v10915_v30 = vpop.eup %10914  ;;  %v4451_v52 = vpop.f32.mrf.mxu0  ;;  %v5403_v61 = vpack.c.bf16 %v12843_v13, %v12840_v10 }
 0x408   : > { %v4930_v20 = vmul.f32 1.442695, %v12836_v31  ;;  %v9291_v15 = vadd.f32 -1.0, %v10915_v30  ;;  %vm4744_vm5 = vcmp.gt.f32.partialorder %v12836_v31, 0.0 }
 0x409   : > { %v4452_v39 = vpop.f32.mrf.mxu0  ;;  %6006 = vmatmul.mubr.bf16.gmra.mxu1 %v9433_v63  ;;  %v15758_v63 = vld [vmem:[#allocation27_spill] sm:$0xff] }
 0x40a   : > { %10922 = vpow2.f32 %v4930_v20  ;;  %v4453_v16 = vadd.f32 %v4452_v39, %v15757_v34  ;;  %6045 = vmatprep.mubr.bf16.mxu1 %v9356_v32  ;;  %v5228_v32 = vsel %vm4740_vm1, %v12779_v6, %v9291_v15  ;;  %v15760_v15 = vld [vmem:[#allocation29_spill] sm:$0xff] }
 0x40b   : > { %v10917_v50 = vpop.eup %10916  ;;  %v4454_v33 = vpop.f32.mrf.mxu0 }
 0x40c   : > { %v9292_v41 = vadd.f32 -1.0, %v10917_v50  ;;  %v4932_v22 = vmul.f32 1.442695, %v4453_v16  ;;  %vm4745_vm6 = vcmp.gt.f32.partialorder %v4453_v16, 0.0 }
 0x40d   : > { %v4457_v52 = vpop.f32.mrf.mxu0  ;;  %4648 = vmatmul.mubr.bf16.gmra.mxu0 %v10739_v51  ;;  %v15759_v51 = vld [vmem:[#allocation28_spill] sm:$0xff] }
 0x40e   : > { %10924 = vpow2.f32 %v4932_v22  ;;  %v12854_v30 = vadd.f32 %v4457_v52, %v15758_v63  ;;  %9228 = vmatprep.mubr.msk.bf16.mxu0 %vm2933_vm0, %v10740_v55  ;;  %v5229_v20 = vsel %vm4741_vm2, %v12793_v54, %v9292_v41  ;;  %v10743_v52 = vld [vmem:[%s11339_s24 + $0xb24] ss:$24 sps:$4 sm:$0xff]  }
 0x40f   : > { %v10919_v39 = vpop.eup %10918  ;;  %v4459_v34 = vpop.f32.mrf.mxu0  ;;  %v5404_v50 = vpack.c.bf16 %v5229_v20, %v5228_v32 }
 0x410   : > { %v4934_v33 = vmul.f32 1.442695, %v12854_v30  ;;  %v9293_v56 = vadd.f32 -1.0, %v10919_v39  ;;  %vm4746_vm7 = vcmp.gt.f32.partialorder %v12854_v30, 0.0 }
 0x411   : > { %v4460_v2 = vpop.f32.mrf.mxu0 }
 0x412   : > { %10926 = vpow2.f32 %v4934_v33  ;;  %v12862_v22 = vadd.f32 %v4460_v2, %v15759_v51  ;;  %v5230_v2 = vsel %vm4742_vm3, %v12803_v5, %v9293_v56  ;;  %v10745_v51 = vld [vmem:[%s11339_s24 + $0xb20] ss:$24 sps:$4 sm:$0xff]   ;;  %v10746_v56 = vld [vmem:[%s11339_s24 + $0xb54] ss:$24 sps:$4 sm:$0x1f]  }
 0x413   : > { %v10921_v63 = vpop.eup %10920  ;;  %v4462_v23 = vpop.f32.mrf.mxu0 }
 0x414   : > { %v9294_v55 = vadd.f32 -1.0, %v10921_v63  ;;  %v4936_v6 = vmul.f32 1.442695, %v12862_v22  ;;  %v15761_v63 = vld [vmem:[#allocation30_spill] sm:$0xff]  ;;  %vm4747_vm8 = vcmp.gt.f32.partialorder %v12862_v22, 0.0 }
 0x415   : > { %v4465_v54 = vpop.f32.mrf.mxu0  ;;  %4656 = vmatmul.mubr.bf16.gmra.mxu0 %v10742_v21 }
 0x416   : > { %10928 = vpow2.f32 %v4936_v6  ;;  %v12869_v41 = vadd.f32 %v4465_v54, %v15760_v15  ;;  %v5231_v32 = vsel %vm4743_vm4, %v12817_v60, %v9294_v55  ;;  %9229 = vmatprep.mubr.msk.bf16.mxu0 %vm2933_vm0, %v10743_v52 }
 0x417   : > { %v10923_v23 = vpop.eup %10922  ;;  %v4467_v20 = vpop.f32.mrf.mxu0  ;;  %v5405_v39 = vpack.c.bf16 %v5231_v32, %v5230_v2 }
 0x418   : > { %v4938_v34 = vmul.f32 1.442695, %v12869_v41  ;;  %v9295_v21 = vadd.f32 -1.0, %v10923_v23  ;;  %v10748_v23 = vld [vmem:[%s11339_s24 + $0xb50] ss:$24 sps:$4 sm:$0x1f]  }
 0x419   : > { %v4468_v33 = vpop.f32.mrf.mxu0  ;;  %9599 = vmatprep.subr.bf16.mxu1 %v5405_v39  ;;  %v15763_v39 = vld [vmem:[#allocation32_spill] sm:$0xff]  ;;  %vm4748_vm9 = vcmp.gt.f32.partialorder %v12869_v41, 0.0  ;;  %s9514_s24 = sshll.u32 %s11243_s29, 4  ;;  %s11151_s29 = smov [#allocation2]  }
 0x41a   : > { %10930 = vpow2.f32 %v4938_v34  ;;  %v12877_v6 = vadd.f32 %v4468_v33, %v15761_v63  ;;  %9600 = vmatpush3.bf16.msra.mxu1 %v5397_v59  ;;  %v12886_v15 = vsel %vm4744_vm5, %v12836_v31, %v9295_v21  ;;  %s11086_s0 = sshll.u32 %s11151_s29, 4  ;;  %s11087_s0 = int_to_ptr.vmem [resolvable:$false] %s11086_s0 }
 0x41b   : > { %v10925_v5 = vpop.eup %10924  ;;  %v4470_v60 = vpop.f32.mrf.mxu0  ;;  %9601 = vmatprep.subr.bf16.mxu1 %v5404_v50  ;;  %p11089_p0 = scmp.lt.s32.totalorder %s8700_s20, %s11087_s0 }
 0x41c   : > { %v9296_v52 = vadd.f32 -1.0, %v10925_v5  ;;  %v4940_v55 = vmul.f32 1.442695, %v12877_v6  ;;  %vm4749_vm10 = vcmp.gt.f32.partialorder %v12877_v6, 0.0  ;;  %v15768_v5 = vld [vmem:[#allocation36_spill] sm:$0xff] }
 0x41d   : > { %v4473_v54 = vpop.f32.mrf.mxu0  ;;  %4664 = vmatmul.mubr.bf16.gmra.mxu0 %v10745_v51  ;;  %v15765_v51 = vld [vmem:[#allocation34_spill] sm:$0xff] }
 0x41e   : > { %v12888_v2 = vsel %vm4745_vm6, %v4453_v16, %v9296_v52  ;;  %10932 = vpow2.f32 %v4940_v55  ;;  %v12891_v45 = vadd.f32 %v4473_v54, %v15762_v14  ;;  %9602 = vmatpush3.bf16.msra.mxu1 %v5396_v38  ;;  %9230 = vmatprep.mubr.msk.bf16.mxu0 %vm2933_vm0, %v10746_v56  ;;  %v15770_v52 = vpack.c.bf16 %v12705_v26, %v12702_v24  ;;  %v15771_v24 = vld [vmem:[#allocation37_spill] sm:$0xff] }
 0x41f   : > { %v10927_v59 = vpop.eup %10926  ;;  %v4475_v32 = vpop.f32.mrf.mxu0  ;;  %9603 = vmatprep.subr.bf16.mxu1 %v5403_v61 }
 0x420   : > { %v4942_v31 = vmul.f32 1.442695, %v12891_v45  ;;  %v9297_v20 = vadd.f32 -1.0, %v10927_v59  ;;  %vm4750_vm11 = vcmp.gt.f32.partialorder %v12891_v45, 0.0 }
 0x421   : > { %v4476_v16 = vpop.f32.mrf.mxu0 }
 0x422   : > { %10934 = vpow2.f32 %v4942_v31  ;;  %v12905_v25 = vadd.f32 %v4476_v16, %v15763_v39  ;;  %9604 = vmatpush3.bf16.msra.mxu1 %v5395_v42  ;;  %v12917_v34 = vsel %vm4746_vm7, %v12854_v30, %v9297_v20  ;;  %v15772_v31 = vpack.c.bf16 %v12455_v28, %v12453_v29  ;;  %v15773_v39 = vld [vmem:[#allocation38_spill] sm:$0xff] }
 0x423   : > { %v10929_v53 = vpop.eup %10928  ;;  %v4478_v38 = vpop.f32.mrf.mxu0  ;;  %9605 = vmatprep.subr.bf16.mxu1 %v5402_v3  ;;  %v5307_v29 = vld [vmem:[%s15613_s3 + $0x88] sm:$0xff] }
 0x424   : > { %v9298_v10 = vadd.f32 -1.0, %v10929_v53  ;;  %v4944_v13 = vmul.f32 1.442695, %v12905_v25  ;;  %vm4751_vm12 = vcmp.gt.f32.partialorder %v12905_v25, 0.0  ;;  %v5311_v28 = vld [vmem:[%s15613_s3 + $0xa8] sm:$0xff] }
 0x425   : > { %v4481_v61 = vpop.f32.mrf.mxu0  ;;  %4672 = vmatmul.mubr.bf16.gmra.mxu0 %v10748_v23 }
 0x426   : > { %v12920_v44 = vsel %vm4747_vm8, %v12862_v22, %v9298_v10  ;;  %10936 = vpow2.f32 %v4944_v13  ;;  %v12923_v42 = vadd.f32 %v4481_v61, %v15764_v58  ;;  %9606 = vmatpush3.bf16.msra.mxu1 %v5394_v57 }
 0x427   : > { %v10931_v19 = vpop.eup %10930  ;;  %v4483_v3 = vpop.f32.mrf.mxu0  ;;  %9607 = vmatprep.subr.bf16.mxu1 %v5401_v47 }
 0x428   : > { %v4946_v30 = vmul.f32 1.442695, %v12923_v42  ;;  %v9299_v33 = vadd.f32 -1.0, %v10931_v19  ;;  %vm4752_vm13 = vcmp.gt.f32.partialorder %v12923_v42, 0.0  ;;  %v9372_v19 = vcombine.high %v5307_v29, %v5311_v28 }
 0x429   : > { %v4484_v22 = vpop.f32.mrf.mxu0 }
 0x42a   : > { %10938 = vpow2.f32 %v4946_v30  ;;  %v12935_v21 = vadd.f32 %v4484_v22, %v15765_v51  ;;  %9608 = vmatpush3.bf16.msra.mxu1 %v5393_v37  ;;  %v12947_v47 = vsel %vm4748_vm9, %v12869_v41, %v9299_v33  ;;  %v15767_v41 = vpack.c.bf16 %v12732_v4, %v12729_v48  ;;  %v15774_v22 = vld [vmem:[#allocation39_spill] sm:$0xff] }
 0x42b   : > { %v10933_v62 = vpop.eup %10932  ;;  %v4486_v1 = vpop.f32.mrf.mxu0  ;;  %9609 = vmatprep.subr.bf16.mxu1 %v5400_v12 }
 0x42c   : > { %v9300_v57 = vadd.f32 -1.0, %v10933_v62  ;;  %v4948_v9 = vmul.f32 1.442695, %v12935_v21  ;;  %vm4753_vm14 = vcmp.gt.f32.partialorder %v12935_v21, 0.0 }
 0x42d   : > { %v4489_v18 = vpop.f32.mrf.mxu0 }
 0x42e   : > { %v12950_v11 = vsel %vm4749_vm10, %v12877_v6, %v9300_v57  ;;  %10940 = vpow2.f32 %v4948_v9  ;;  %v12953_v37 = vadd.f32 %v4489_v18, %v15766_v7  ;;  %9610 = vmatpush3.bf16.msra.mxu1 %v5392_v35  ;;  %v5303_v35 = vld [vmem:[%s15613_s3 + $0x68] sm:$0xff] }
 0x42f   : > { %v10935_v49 = vpop.eup %10934  ;;  %v4491_v12 = vpop.f32.mrf.mxu0  ;;  %9611 = vmatprep.subr.bf16.mxu1 %v15767_v41  ;;  %v9364_v14 = vcombine.high %v5299_v27, %v5303_v35  ;;  %v9363_v58 = vcombine.low %v5299_v27, %v5303_v35 }
 0x430   : > { %v4950_v63 = vmul.f32 1.442695, %v12953_v37  ;;  %v9301_v56 = vadd.f32 -1.0, %v10935_v49  ;;  %v5319_v49 = vld [vmem:[%s15613_s3 + $0xe8] sm:$0xff]  ;;  %vm4754_vm15 = vcmp.gt.f32.partialorder %v12953_v37, 0.0 }
 0x431   : > { %v4492_v6 = vpop.f32.mrf.mxu0 }
 0x432   : > { %10942 = vpow2.f32 %v4950_v63  ;;  %v12965_v60 = vadd.f32 %v4492_v6, %v15768_v5  ;;  %9612 = vmatpush3.bf16.msra.mxu1 %v15769_v36  ;;  %v12985_v59 = vsel %vm4750_vm11, %v12891_v45, %v9301_v56  ;;  %v9371_v5 = vcombine.low %v5307_v29, %v5311_v28 }
 0x433   : > { %v10937_v48 = vpop.eup %10936  ;;  %v4494_v4 = vpop.f32.mrf.mxu0  ;;  %9613 = vmatprep.subr.bf16.mxu1 %v15770_v52 }
 0x434   : > { %v9302_v55 = vadd.f32 -1.0, %v10937_v48  ;;  %v4952_v54 = vmul.f32 1.442695, %v12965_v60  ;;  %vm4755_vm1 = vcmp.gt.f32.partialorder %v12965_v60, 0.0  ;;  %v15776_v48 = vld [vmem:[#allocation41_spill] sm:$0xff] }
 0x435   : > { %v4497_v40 = vpop.f32.mrf.mxu0 }
 0x436   : > { %v12988_v32 = vsel %vm4751_vm12, %v12905_v25, %v9302_v55  ;;  %10944 = vpow2.f32 %v4952_v54  ;;  %v12991_v26 = vadd.f32 %v4497_v40, %v15771_v24  ;;  %9614 = vmatpush3.bf16.msra.mxu1 %v15772_v31  ;;  %v5327_v31 = vld [vmem:[%s15613_s3 + $0x128] sm:$0xff]  ;;  %v15795_v55 = vld [vmem:[#allocation60_spill] sm:$0xff] }
 0x437   : > { %v10939_v16 = vpop.eup %10938  ;;  %v4499_v8 = vpop.f32.mrf.mxu0 }
 0x438   : > { %v4954_v43 = vmul.f32 1.442695, %v12991_v26  ;;  %v9303_v20 = vadd.f32 -1.0, %v10939_v16  ;;  %vm4756_vm2 = vcmp.gt.f32.partialorder %v12991_v26, 0.0 }
 0x439   : > { %v4500_v45 = vpop.f32.mrf.mxu0  ;;  %6046 = vmatmul.mubr.bf16.vlgmr.msra.gmra.mxu1 %v9355_v17 }
 0x43a   : > { %10946 = vpow2.f32 %v4954_v43  ;;  %v13000_v25 = vadd.f32 %v4500_v45, %v15773_v39  ;;  %6053 = vmatprep.mubr.bf16.mxu1 %v9364_v14  ;;  %v13012_v3 = vsel %vm4752_vm13, %v12923_v42, %v9303_v20  ;;  %v15775_v42 = vld [vmem:[#allocation40_spill] sm:$0xff] }
 0x43b   : > { %v10941_v53 = vpop.eup %10940  ;;  %v4502_v38 = vpop.f32.mrf.mxu0 }
 0x43c   : > { %v9304_v10 = vadd.f32 -1.0, %v10941_v53  ;;  %v4956_v13 = vmul.f32 1.442695, %v13000_v25  ;;  %vm4757_vm3 = vcmp.gt.f32.partialorder %v13000_v25, 0.0  ;;  %v15778_v38 = vld [vmem:[#allocation43_spill] sm:$0xff] }
 0x43d   : > { %v4505_v61 = vpop.f32.mrf.mxu0 }
 0x43e   : > { %v13015_v30 = vsel %vm4753_vm14, %v12935_v21, %v9304_v10  ;;  %10948 = vpow2.f32 %v4956_v13  ;;  %v13018_v33 = vadd.f32 %v4505_v61, %v15774_v22  ;;  %v5315_v21 = vld [vmem:[%s15613_s3 + $0xc8] sm:$0xff] }
 0x43f   : > { %v10943_v51 = vpop.eup %10942  ;;  %v4507_v1 = vpop.f32.mrf.mxu0  ;;  %v9380_v36 = vcombine.high %v5315_v21, %v5319_v49  ;;  %v9379_v39 = vcombine.low %v5315_v21, %v5319_v49 }
 0x440   : > { %v4958_v57 = vmul.f32 1.442695, %v13018_v33  ;;  %v9305_v18 = vadd.f32 -1.0, %v10943_v51  ;;  %vm4758_vm4 = vcmp.gt.f32.partialorder %v13018_v33, 0.0 }
 0x441   : > { %v4508_v9 = vpop.f32.mrf.mxu0  ;;  %6054 = vmatmul.mubr.bf16.gmra.mxu1 %v9363_v58 }
 0x442   : > { %10950 = vpow2.f32 %v4958_v57  ;;  %v13024_v7 = vadd.f32 %v4508_v9, %v15775_v42  ;;  %6061 = vmatprep.mubr.bf16.mxu1 %v9372_v19  ;;  %v13036_v27 = vsel %vm4754_vm15, %v12953_v37, %v9305_v18  ;;  %v15777_v37 = vld [vmem:[#allocation42_spill] sm:$0xff] }
 0x443   : > { %v10945_v12 = vpop.eup %10944  ;;  %v4510_v41 = vpop.f32.mrf.mxu0  ;;  %v5335_v57 = vld [vmem:[%s15613_s3 + $0x168] sm:$0xff] }
 0x444   : > { %v9306_v63 = vadd.f32 -1.0, %v10945_v12  ;;  %v4960_v6 = vmul.f32 1.442695, %v13024_v7  ;;  %vm4759_vm5 = vcmp.gt.f32.partialorder %v13024_v7, 0.0 }
 0x445   : > { %v4513_v56 = vpop.f32.mrf.mxu0 }
 0x446   : > { %v13039_v35 = vsel %vm4755_vm1, %v12965_v60, %v9306_v63  ;;  %10952 = vpow2.f32 %v4960_v6  ;;  %v13042_v4 = vadd.f32 %v4513_v56, %v15776_v48  ;;  %v5323_v60 = vld [vmem:[%s15613_s3 + $0x108] sm:$0xff]  ;;  %v15780_v56 = vld [vmem:[#allocation45_spill] sm:$0xff] }
 0x447   : > { %v10947_v52 = vpop.eup %10946  ;;  %v4515_v54 = vpop.f32.mrf.mxu0  ;;  %v9388_v29 = vcombine.high %v5323_v60, %v5327_v31  ;;  %v9387_v12 = vcombine.low %v5323_v60, %v5327_v31 }
 0x448   : > { %v4962_v40 = vmul.f32 1.442695, %v13042_v4  ;;  %v9307_v14 = vadd.f32 -1.0, %v10947_v52  ;;  %vm4760_vm6 = vcmp.gt.f32.partialorder %v13042_v4, 0.0 }
 0x449   : > { %v4516_v17 = vpop.f32.mrf.mxu0  ;;  %6062 = vmatmul.mubr.bf16.gmra.mxu1 %v9371_v5 }
 0x44a   : > { %10954 = vpow2.f32 %v4962_v40  ;;  %v13048_v24 = vadd.f32 %v4516_v17, %v15777_v37  ;;  %6069 = vmatprep.mubr.bf16.mxu1 %v9380_v36  ;;  %v13060_v28 = vsel %vm4756_vm2, %v12991_v26, %v9307_v14  ;;  %v15779_v26 = vld [vmem:[#allocation44_spill] sm:$0xff]  ;;  %v5343_v37 = vld [vmem:[%s15613_s3 + $0x1a8] sm:$0xff] }
 0x44b   : > { %v10949_v16 = vpop.eup %10948  ;;  %v4518_v8 = vpop.f32.mrf.mxu0 }
 0x44c   : > { %v9308_v43 = vadd.f32 -1.0, %v10949_v16  ;;  %v4964_v45 = vmul.f32 1.442695, %v13048_v24  ;;  %vm4761_vm7 = vcmp.gt.f32.partialorder %v13048_v24, 0.0 }
 0x44d   : > { %v4521_v20 = vpop.f32.mrf.mxu0 }
 0x44e   : > { %v13063_v53 = vsel %vm4757_vm3, %v13000_v25, %v9308_v43  ;;  %10956 = vpow2.f32 %v4964_v45  ;;  %v13066_v10 = vadd.f32 %v4521_v20, %v15778_v38  ;;  %v5331_v25 = vld [vmem:[%s15613_s3 + $0x148] sm:$0xff] }
 0x44f   : > { %v10951_v13 = vpop.eup %10950  ;;  %v4523_v58 = vpop.f32.mrf.mxu0  ;;  %v9396_v41 = vcombine.high %v5331_v25, %v5335_v57  ;;  %v9395_v45 = vcombine.low %v5331_v25, %v5335_v57  ;;  %v15783_v57 = vld [vmem:[#allocation48_spill] sm:$0xff] }
 0x450   : > { %v4966_v19 = vmul.f32 1.442695, %v13066_v10  ;;  %v9309_v51 = vadd.f32 -1.0, %v10951_v13  ;;  %vm4762_vm8 = vcmp.gt.f32.partialorder %v13066_v10, 0.0 }
 0x451   : > { %v4524_v22 = vpop.f32.mrf.mxu0  ;;  %6070 = vmatmul.mubr.bf16.gmra.mxu1 %v9379_v39  ;;  %v15782_v39 = vld [vmem:[#allocation47_spill] sm:$0xff] }
 0x452   : > { %10958 = vpow2.f32 %v4966_v19  ;;  %v13072_v1 = vadd.f32 %v4524_v22, %v15779_v26  ;;  %6077 = vmatprep.mubr.bf16.mxu1 %v9388_v29  ;;  %v13084_v63 = vsel %vm4758_vm4, %v13018_v33, %v9309_v51  ;;  %v15781_v33 = vld [vmem:[#allocation46_spill] sm:$0xff] }
 0x453   : > { %v10953_v9 = vpop.eup %10952  ;;  %v4526_v18 = vpop.f32.mrf.mxu0 }
 0x454   : > { %v9310_v42 = vadd.f32 -1.0, %v10953_v9  ;;  %v4968_v21 = vmul.f32 1.442695, %v13072_v1  ;;  %vm4763_vm9 = vcmp.gt.f32.partialorder %v13072_v1, 0.0 }
 0x455   : > { %v4529_v49 = vpop.f32.mrf.mxu0 }
 0x456   : > { %v13087_v6 = vsel %vm4759_vm5, %v13024_v7, %v9310_v42  ;;  %10960 = vpow2.f32 %v4968_v21  ;;  %v13090_v5 = vadd.f32 %v4529_v49, %v15780_v56  ;;  %v5339_v7 = vld [vmem:[%s15613_s3 + $0x188] sm:$0xff] }
 0x457   : > { %v10955_v36 = vpop.eup %10954  ;;  %v4531_v52 = vpop.f32.mrf.mxu0  ;;  %v9404_v20 = vcombine.high %v5339_v7, %v5343_v37 }
 0x458   : > { %v4970_v54 = vmul.f32 1.442695, %v13090_v5  ;;  %v9311_v17 = vadd.f32 -1.0, %v10955_v36  ;;  %v15784_v36 = vld [vmem:[#allocation49_spill] sm:$0xff]  ;;  %vm4764_vm10 = vcmp.gt.f32.partialorder %v13090_v5, 0.0 }
 0x459   : > { %v4532_v40 = vpop.f32.mrf.mxu0  ;;  %6078 = vmatmul.mubr.bf16.gmra.mxu1 %v9387_v12 }
 0x45a   : > { %10962 = vpow2.f32 %v4970_v54  ;;  %v13096_v14 = vadd.f32 %v4532_v40, %v15781_v33  ;;  %6085 = vmatprep.mubr.bf16.mxu1 %v9396_v41  ;;  %v13111_v38 = vsel %vm4760_vm6, %v13042_v4, %v9311_v17  ;;  %v5347_v4 = vld [vmem:[%s15613_s3 + $0x1c8] sm:$0xff]  ;;  %v9403_v41 = vcombine.low %v5339_v7, %v5343_v37 }
 0x45b   : > { %v10957_v60 = vpop.eup %10956  ;;  %v4534_v31 = vpop.f32.mrf.mxu0  ;;  %v15785_v37 = vld [vmem:[#allocation50_spill] sm:$0xff] }
 0x45c   : > { %v9312_v16 = vadd.f32 -1.0, %v10957_v60  ;;  %v4972_v8 = vmul.f32 1.442695, %v13096_v14  ;;  %vm4765_vm11 = vcmp.gt.f32.partialorder %v13096_v14, 0.0 }
 0x45d   : > { %v4537_v43 = vpop.f32.mrf.mxu0 }
 0x45e   : > { %10964 = vpow2.f32 %v4972_v8  ;;  %v13108_v29 = vadd.f32 %v4537_v43, %v15782_v39  ;;  %v13114_v13 = vsel %vm4761_vm7, %v13048_v24, %v9312_v16  ;;  %v5351_v24 = vld [vmem:[%s15613_s3 + $0x1e8] sm:$0xff] }
 0x45f   : > { %v10959_v58 = vpop.eup %10958  ;;  %v4539_v19 = vpop.f32.mrf.mxu0  ;;  %v9412_v56 = vcombine.high %v5347_v4, %v5351_v24 }
 0x460   : > { %v4974_v51 = vmul.f32 1.442695, %v13108_v29  ;;  %v9313_v25 = vadd.f32 -1.0, %v10959_v58  ;;  %v9411_v19 = vcombine.low %v5347_v4, %v5351_v24  ;;  %v15787_v24 = vld [vmem:[#allocation52_spill] sm:$0xff]  ;;  %vm4766_vm12 = vcmp.gt.f32.partialorder %v13108_v29, 0.0 }
 0x461   : > { %v4540_v26 = vpop.f32.mrf.mxu0  ;;  %6086 = vmatmul.mubr.bf16.gmra.mxu1 %v9395_v45 }
 0x462   : > { %10966 = vpow2.f32 %v4974_v51  ;;  %v13120_v9 = vadd.f32 %v4540_v26, %v15783_v57  ;;  %6093 = vmatprep.mubr.bf16.mxu1 %v9404_v20  ;;  %v13135_v54 = vsel %vm4762_vm8, %v13066_v10, %v9313_v25  ;;  %v5355_v10 = vld [vmem:[%s15613_s3 + $0x208] sm:$0xff] }
 0x463   : > { %v10961_v18 = vpop.eup %10960  ;;  %v4542_v42 = vpop.f32.mrf.mxu0  ;;  %v15786_v26 = vld [vmem:[#allocation51_spill] sm:$0xff] }
 0x464   : > { %v9314_v21 = vadd.f32 -1.0, %v10961_v18  ;;  %v4976_v49 = vmul.f32 1.442695, %v13120_v9  ;;  %vm4767_vm13 = vcmp.gt.f32.partialorder %v13120_v9, 0.0 }
 0x465   : > { %v4545_v12 = vpop.f32.mrf.mxu0 }
 0x466   : > { %10968 = vpow2.f32 %v4976_v49  ;;  %v13132_v52 = vadd.f32 %v4545_v12, %v15784_v36  ;;  %v13138_v40 = vsel %vm4763_vm9, %v13072_v1, %v9314_v21  ;;  %v5359_v1 = vld [vmem:[%s15613_s3 + $0x228] sm:$0xff] }
 0x467   : > { %v10963_v17 = vpop.eup %10962  ;;  %v4547_v33 = vpop.f32.mrf.mxu0  ;;  %v9420_v51 = vcombine.high %v5355_v10, %v5359_v1 }
 0x468   : > { %v4978_v31 = vmul.f32 1.442695, %v13132_v52  ;;  %v9315_v7 = vadd.f32 -1.0, %v10963_v17  ;;  %vm4768_vm14 = vcmp.gt.f32.partialorder %v13132_v52, 0.0 }
 0x469   : > { %v4548_v16 = vpop.f32.mrf.mxu0  ;;  %6094 = vmatmul.mubr.bf16.gmra.mxu1 %v9403_v41 }
 0x46a   : > { %10970 = vpow2.f32 %v4978_v31  ;;  %v13144_v8 = vadd.f32 %v4548_v16, %v15785_v37  ;;  %6101 = vmatprep.mubr.bf16.mxu1 %v9412_v56  ;;  %v13159_v57 = vsel %vm4764_vm10, %v13090_v5, %v9315_v7  ;;  %v5363_v5 = vld [vmem:[%s15613_s3 + $0x248] sm:$0xff]  ;;  %v9419_v7 = vcombine.low %v5355_v10, %v5359_v1 }
 0x46b   : > { %v10965_v43 = vpop.eup %10964  ;;  %v4550_v45 = vpop.f32.mrf.mxu0 }
 0x46c   : > { %v9316_v20 = vadd.f32 -1.0, %v10965_v43  ;;  %v4980_v39 = vmul.f32 1.442695, %v13144_v8  ;;  %v15788_v43 = vld [vmem:[#allocation53_spill] sm:$0xff]  ;;  %vm4769_vm15 = vcmp.gt.f32.partialorder %v13144_v8, 0.0 }
 0x46d   : > { %v4553_v58 = vpop.f32.mrf.mxu0 }
 0x46e   : > { %10972 = vpow2.f32 %v4980_v39  ;;  %v13156_v25 = vadd.f32 %v4553_v58, %v15786_v26  ;;  %v13162_v18 = vsel %vm4765_vm11, %v13096_v14, %v9316_v20  ;;  %v5367_v14 = vld [vmem:[%s15613_s3 + $0x268] sm:$0xff] }
 0x46f   : > { %v10967_v42 = vpop.eup %10966  ;;  %v4555_v21 = vpop.f32.mrf.mxu0  ;;  %v9428_v37 = vcombine.high %v5363_v5, %v5367_v14 }
 0x470   : > { %v4982_v12 = vmul.f32 1.442695, %v13156_v25  ;;  %v9317_v4 = vadd.f32 -1.0, %v10967_v42  ;;  %v15789_v21 = vld [vmem:[#allocation54_spill] sm:$0xff]  ;;  %vm4770_vm1 = vcmp.gt.f32.partialorder %v13156_v25, 0.0 }
 0x471   : > { %v4556_v41 = vpop.f32.mrf.mxu0  ;;  %6102 = vmatmul.mubr.bf16.gmra.mxu1 %v9411_v19 }
 0x472   : > { %10974 = vpow2.f32 %v4982_v12  ;;  %v13168_v56 = vadd.f32 %v4556_v41, %v15787_v24  ;;  %6109 = vmatprep.mubr.bf16.mxu1 %v9420_v51  ;;  %v13183_v20 = vsel %vm4766_vm12, %v13108_v29, %v9317_v4  ;;  %v5371_v29 = vld [vmem:[%s15613_s3 + $0x288] sm:$0x11] }
 0x473   : > { %v10969_v36 = vpop.eup %10968  ;;  %v4558_v17 = vpop.f32.mrf.mxu0 }
 0x474   : > { %v9318_v33 = vadd.f32 -1.0, %v10969_v36  ;;  %v4984_v31 = vmul.f32 1.442695, %v13168_v56  ;;  %vm4771_vm2 = vcmp.gt.f32.partialorder %v13168_v56, 0.0 }
 0x475   : > { %v4561_v16 = vpop.f32.mrf.mxu0 }
 0x476   : > { %10976 = vpow2.f32 %v4984_v31  ;;  %v13180_v45 = vadd.f32 %v4561_v16, %v15788_v43  ;;  %v13186_v39 = vsel %vm4767_vm13, %v13120_v9, %v9318_v33  ;;  %v9427_v31 = vcombine.low %v5363_v5, %v5367_v14 }
 0x477   : > { %v10971_v58 = vpop.eup %10970  ;;  %v4563_v19 = vpop.f32.mrf.mxu0  ;;  %v9436_v16 = vcombine.high %v5371_v29, %v5371_v29 }
 0x478   : > { %v4986_v26 = vmul.f32 1.442695, %v13180_v45  ;;  %v9319_v1 = vadd.f32 -1.0, %v10971_v58  ;;  %vm4772_vm3 = vcmp.gt.f32.partialorder %v13180_v45, 0.0 }
 0x479   : > { %v4564_v42 = vpop.f32.mrf.mxu0  ;;  %6110 = vmatmul.mubr.bf16.gmra.mxu1 %v9419_v7  ;;  %v9533_v10 = vpop.f32.mrf.mxu1 }
 0x47a   : > { %10978 = vpow2.f32 %v4986_v26  ;;  %v13192_v12 = vadd.f32 %v4564_v42, %v15789_v21  ;;  %6117 = vmatprep.mubr.bf16.mxu1 %v9428_v37  ;;  %v15790_v37 = vld [vmem:[#allocation55_spill] sm:$0xff]  ;;  %v13208_v58 = vsel %vm4768_vm14, %v13132_v52, %v9319_v1 }
 0x47b   : > { %v10973_v9 = vpop.eup %10972  ;;  %v4566_v41 = vpop.f32.mrf.mxu0  ;;  %v13229_v1 = vld [vmem:[%s15613_s3 + $0x30] sm:$0xff] }
 0x47c   : > { %v9534_v4 = vpop.f32.mrf.mxu1  ;;  %v9320_v24 = vadd.f32 -1.0, %v10973_v9  ;;  %v4988_v36 = vmul.f32 1.442695, %v13192_v12  ;;  %vm4773_vm4 = vcmp.gt.f32.partialorder %v13192_v12, 0.0 }
 0x47d   : > { %v13198_v17 = vadd.f32 %v9534_v4, %v9533_v10  ;;  %v4569_v33 = vpop.f32.mrf.mxu0  ;;  %v15791_v4 = vld [vmem:[#allocation56_spill] sm:$0xff] }
 0x47e   : > { %v13202_v7 = vpop.f32.mrf.mxu1  ;;  %10980 = vpow2.f32 %v4988_v36  ;;  %v13205_v43 = vadd.f32 %v4569_v33, %v15790_v37  ;;  %v13211_v19 = vsel %vm4769_vm15, %v13144_v8, %v9320_v24  ;;  %v13224_v8 = vld [vmem:[%s15613_s3 + $0x10] sm:$0xff] }
 0x47f   : > { %v10975_v26 = vpop.eup %10974  ;;  %v4571_v42 = vpop.f32.mrf.mxu0 }
 0x480   : > { %v13215_v21 = vpop.f32.mrf.mxu1  ;;  %v4990_v5 = vmul.f32 1.442695, %v13205_v43  ;;  %v9321_v41 = vadd.f32 -1.0, %v10975_v26  ;;  %v9435_v42 = vcombine.low %v5371_v29, %v5371_v29  ;;  %vm4774_vm5 = vcmp.gt.f32.partialorder %v13205_v43, 0.0 }
 0x481   : > { %v4572_v14 = vpop.f32.mrf.mxu0  ;;  %6118 = vmatmul.mubr.bf16.gmra.mxu1 %v9427_v31 }
 0x482   : > { %v9539_v9 = vpop.f32.mrf.mxu1  ;;  %10982 = vpow2.f32 %v4990_v5  ;;  %v13219_v52 = vadd.f32 %v4572_v14, %v15791_v4  ;;  %6125 = vmatprep.mubr.bf16.mxu1 %v9436_v16  ;;  %v9358_v14 = vcombine.high %v13224_v8, %v13229_v1  ;;  %v15792_v4 = vld [vmem:[#allocation57_spill] sm:$0xff] }
 0x483   : > { %v10977_v24 = vpop.eup %10976  ;;  %v4574_v36 = vpop.f32.mrf.mxu0 }
 0x484   : > { %v9540_v33 = vpop.f32.mrf.mxu1  ;;  %v9322_v31 = vadd.f32 -1.0, %v10977_v24  ;;  %v4992_v37 = vmul.f32 1.442695, %v13219_v52  ;;  %v13244_v24 = vsel %vm4770_vm1, %v13156_v25, %v9321_v41  ;;  %vm4775_vm6 = vcmp.gt.f32.partialorder %v13219_v52, 0.0 }
 0x485   : > { %v13232_v26 = vadd.f32 %v9540_v33, %v9539_v9  ;;  %v4577_v16 = vpop.f32.mrf.mxu0 }
 0x486   : > { %v13236_v5 = vpop.f32.mrf.mxu1  ;;  %10984 = vpow2.f32 %v4992_v37  ;;  %v13241_v36 = vadd.f32 %v4577_v16, %v15792_v4  ;;  %v13247_v9 = vsel %vm4771_vm2, %v13168_v56, %v9322_v31  ;;  %v15793_v4 = vld [vmem:[#allocation58_spill] sm:$0xff] }
 0x487   : > { %v10979_v33 = vpop.eup %10978  ;;  %v4579_v50 = vpop.f32.mrf.mxu0 }
 0x488   : > { %v13251_v22 = vpop.f32.mrf.mxu1  ;;  %v4994_v0 = vmul.f32 1.442695, %v13241_v36  ;;  %v9323_v16 = vadd.f32 -1.0, %v10979_v33  ;;  %vm4776_vm7 = vcmp.gt.f32.partialorder %v13241_v36, 0.0 }
 0x489   : > { %v4580_v60 = vpop.f32.mrf.mxu0  ;;  %6126 = vmatmul.mubr.bf16.gmra.mxu1 %v9435_v42 }
 0x48a   : > { %v9545_v37 = vpop.f32.mrf.mxu1  ;;  %10986 = vpow2.f32 %v4994_v0  ;;  %v13255_v25 = vadd.f32 %v4580_v60, %v15793_v4  ;;  %6165 = vmatprep.mubr.bf16.mxu1 %v9358_v14  ;;  %v15794_v0 = vld [vmem:[#allocation59_spill] sm:$0xff]  ;;  %v5260_v14 = vsel %vm4772_vm3, %v13180_v45, %v9323_v16 }
 0x48b   : > { %v10981_v56 = vpop.eup %10980  ;;  %v4582_v41 = vpop.f32.mrf.mxu0 }
 0x48c   : > { %v9546_v31 = vpop.f32.mrf.mxu1  ;;  %v9324_v50 = vadd.f32 -1.0, %v10981_v56  ;;  %v4996_v46 = vmul.f32 1.442695, %v13255_v25  ;;  %vm4777_vm8 = vcmp.gt.f32.partialorder %v13255_v25, 0.0 }
 0x48d   : > { %v13258_v49 = vadd.f32 %v9546_v31, %v9545_v37  ;;  %v4585_v42 = vpop.f32.mrf.mxu0 }
 0x48e   : > { %v13262_v23 = vpop.f32.mrf.mxu1  ;;  %10988 = vpow2.f32 %v4996_v46  ;;  %v13265_v60 = vadd.f32 %v4585_v42, %v15794_v0  ;;  %v5261_v33 = vsel %vm4773_vm4, %v13192_v12, %v9324_v50 }
 0x48f   : > { %v10983_v4 = vpop.eup %10982  ;;  %v4587_v56 = vpop.f32.mrf.mxu0  ;;  %v5420_v41 = vpack.c.bf16 %v5261_v33, %v5260_v14  ;;  %v15797_v33 = vld [vmem:[#allocation61_spill] sm:$0xff] }
 0x490   : > { %v13269_v37 = vpop.f32.mrf.mxu1  ;;  %v4998_v31 = vmul.f32 1.442695, %v13265_v60  ;;  %v9325_v10 = vadd.f32 -1.0, %v10983_v4  ;;  %vm4778_vm9 = vcmp.gt.f32.partialorder %v13265_v60, 0.0 }
 0x491   : > { %v4588_v51 = vpop.f32.mrf.mxu0 }
 0x492   : > { %v9551_v62 = vpop.f32.mrf.mxu1  ;;  %10990 = vpow2.f32 %v4998_v31  ;;  %v13273_v46 = vadd.f32 %v4588_v51, %v15795_v55  ;;  %v5262_v55 = vsel %vm4774_vm5, %v13205_v43, %v9325_v10  ;;  %v15799_v43 = vpack.c.bf16 %v13087_v6, %v13084_v63  ;;  %v15800_v6 = vld [vmem:[#allocation63_spill] sm:$0xff] }
 0x493   : > { %v10985_v42 = vpop.eup %10984  ;;  %v4590_v0 = vpop.f32.mrf.mxu0 }
 0x494   : > { %v9552_v29 = vpop.f32.mrf.mxu1  ;;  %v9326_v45 = vadd.f32 -1.0, %v10985_v42  ;;  %v5000_v12 = vmul.f32 1.442695, %v13273_v46  ;;  %vm4779_vm10 = vcmp.gt.f32.partialorder %v13273_v46, 0.0 }
 0x495   : > { %v13276_v16 = vadd.f32 %v9552_v29, %v9551_v62  ;;  %v4593_v50 = vpop.f32.mrf.mxu0 }
 0x496   : > { %v13280_v14 = vpop.f32.mrf.mxu1  ;;  %10992 = vpow2.f32 %v5000_v12  ;;  %v13283_v4 = vadd.f32 %v4593_v50, %v15797_v33  ;;  %v5263_v51 = vsel %vm4775_vm6, %v13219_v52, %v9326_v45  ;;  %v15798_v12 = vld [vmem:[#allocation62_spill] sm:$0xff] }
 0x497   : > { %15796 = vst [vmem:[#allocation6_spill] sm:$0xff] %v13280_v14  ;;  %v10987_v56 = vpop.eup %10986  ;;  %v4595_v31 = vpop.f32.mrf.mxu0  ;;  %v5421_v42 = vpack.c.bf16 %v5263_v51, %v5262_v55 }
 0x498   : > { %v13287_v62 = vpop.f32.mrf.mxu1  ;;  %v5002_v29 = vmul.f32 1.442695, %v13283_v4  ;;  %v9327_v48 = vadd.f32 -1.0, %v10987_v56  ;;  %vm4780_vm11 = vcmp.gt.f32.partialorder %v13283_v4, 0.0 }
 0x499   : > { %v4596_v0 = vpop.f32.mrf.mxu0  ;;  %9681 = vmatprep.subr.bf16.mxu1 %v5421_v42 }
 0x49a   : > { %v9557_v61 = vpop.f32.mrf.mxu1  ;;  %10994 = vpow2.f32 %v5002_v29  ;;  %v13291_v14 = vadd.f32 %v4596_v0, %v15798_v12  ;;  %9682 = vmatpush3.bf16.msra.mxu1 %v15799_v43  ;;  %v13304_v31 = vsel %vm4776_vm7, %v13241_v36, %v9327_v48  ;;  %v15802_v48 = vpack.c.bf16 %v13247_v9, %v13244_v24 }
 0x49b   : > { %v10989_v10 = vpop.eup %10988  ;;  %v4598_v52 = vpop.f32.mrf.mxu0  ;;  %9683 = vmatprep.subr.bf16.mxu1 %v5420_v41  ;;  %v15805_v24 = vpack.c.bf16 %v13211_v19, %v13208_v58  ;;  %v15806_v58 = vld [vmem:[#allocation65_spill] sm:$0xff] }
 0x49c   : > { %v9558_v45 = vpop.f32.mrf.mxu1  ;;  %v9328_v50 = vadd.f32 -1.0, %v10989_v10  ;;  %v5004_v33 = vmul.f32 1.442695, %v13291_v14  ;;  %v15803_v52 = vld [vmem:[#allocation64_spill] sm:$0xff]  ;;  %vm4781_vm12 = vcmp.gt.f32.partialorder %v13291_v14, 0.0 }
 0x49d   : > { %v13297_v55 = vadd.f32 %v9558_v45, %v9557_v61  ;;  %v4601_v51 = vpop.f32.mrf.mxu0  ;;  %v15801_v61 = vpack.c.bf16 %v13063_v53, %v13060_v28  ;;  %v15804_v53 = vpack.c.bf16 %v13039_v35, %v13036_v27 }
 0x49e   : > { %v13301_v56 = vpop.f32.mrf.mxu1  ;;  %v13307_v63 = vsel %vm4777_vm8, %v13255_v25, %v9328_v50  ;;  %10996 = vpow2.f32 %v5004_v33  ;;  %v13310_v41 = vadd.f32 %v4601_v51, %v15800_v6 }
 0x49f   : > { %9684 = vmatpush3.bf16.msra.mxu1 %v15801_v61  ;;  %v10991_v42 = vpop.eup %10990  ;;  %v4603_v0 = vpop.f32.mrf.mxu0 }
 0x4a0   : > { %9685 = vmatprep.subr.bf16.mxu1 %v15802_v48  ;;  %v13320_v36 = vpop.f32.mrf.mxu1  ;;  %v5006_v25 = vmul.f32 1.442695, %v13310_v41  ;;  %v9329_v10 = vadd.f32 -1.0, %v10991_v42  ;;  %v15807_v0 = vpack.c.bf16 %v13015_v30, %v13012_v3  ;;  %v15810_v30 = vpack.c.bf16 %v12988_v32, %v12985_v59 }
 0x4a1   : > { %v4604_v12 = vpop.f32.mrf.mxu0  ;;  %vm4782_vm13 = vcmp.gt.f32.partialorder %v13310_v41, 0.0 }
 0x4a2   : > { %v9563_v43 = vpop.f32.mrf.mxu1  ;;  %10998 = vpow2.f32 %v5006_v25  ;;  %v13324_v28 = vadd.f32 %v4604_v12, %v15803_v52  ;;  %v13340_v27 = vsel %vm4778_vm9, %v13265_v60, %v9329_v10  ;;  %v15808_v60 = vpack.c.bf16 %v13186_v39, %v13183_v20 }
 0x4a3   : > { %9686 = vmatpush3.bf16.msra.mxu1 %v15804_v53  ;;  %v10993_v45 = vpop.eup %10992  ;;  %v4606_v50 = vpop.f32.mrf.mxu0  ;;  %v15811_v20 = vpack.c.bf16 %v13162_v18, %v13159_v57  ;;  %v15812_v57 = vld [vmem:[#allocation67_spill] sm:$0xff] }
 0x4a4   : > { %9687 = vmatprep.subr.bf16.mxu1 %v15805_v24  ;;  %v9564_v9 = vpop.f32.mrf.mxu1  ;;  %v9330_v33 = vadd.f32 -1.0, %v10993_v45  ;;  %v5008_v51 = vmul.f32 1.442695, %v13324_v28  ;;  %v15809_v45 = vld [vmem:[#allocation66_spill] sm:$0xff]  ;;  %vm4783_vm14 = vcmp.gt.f32.partialorder %v13324_v28, 0.0 }
 0x4a5   : > { %v13333_v6 = vadd.f32 %v9564_v9, %v9563_v43  ;;  %v4609_v61 = vpop.f32.mrf.mxu0 }
 0x4a6   : > { %v13337_v42 = vpop.f32.mrf.mxu1  ;;  %v13343_v35 = vsel %vm4779_vm10, %v13273_v46, %v9330_v33  ;;  %11000 = vpow2.f32 %v5008_v51  ;;  %v13346_v19 = vadd.f32 %v4609_v61, %v15806_v58 }
 0x4a7   : > { %9688 = vmatpush3.bf16.msra.mxu1 %v15807_v0  ;;  %v10995_v48 = vpop.eup %10994  ;;  %v4611_v12 = vpop.f32.mrf.mxu0  ;;  %v15813_v0 = vpack.c.bf16 %v12950_v11, %v12947_v47  ;;  %v15816_v11 = vpack.c.bf16 %v12920_v44, %v12917_v34 }
 0x4a8   : > { %9689 = vmatprep.subr.bf16.mxu1 %v15808_v60  ;;  %v13356_v43 = vpop.f32.mrf.mxu1  ;;  %v5010_v46 = vmul.f32 1.442695, %v13346_v19  ;;  %v9331_v53 = vadd.f32 -1.0, %v10995_v48  ;;  %vm4784_vm15 = vcmp.gt.f32.partialorder %v13346_v19, 0.0 }
 0x4a9   : > { %v4612_v10 = vpop.f32.mrf.mxu0 }
 0x4aa   : > { %v9569_v52 = vpop.f32.mrf.mxu1  ;;  %11002 = vpow2.f32 %v5010_v46  ;;  %v13360_v3 = vadd.f32 %v4612_v10, %v15809_v45  ;;  %v13376_v59 = vsel %vm4780_vm11, %v13283_v4, %v9331_v53  ;;  %v15814_v4 = vpack.c.bf16 %v13138_v40, %v13135_v54  ;;  %v15815_v45 = vld [vmem:[#allocation68_spill] sm:$0xff] }
 0x4ab   : > { %9690 = vmatpush3.bf16.msra.mxu1 %v15810_v30  ;;  %v10997_v50 = vpop.eup %10996  ;;  %v4614_v24 = vpop.f32.mrf.mxu0  ;;  %v5300_v54 = vld [vmem:[%s15613_s3 + $0x50] sm:$0xff] }
 0x4ac   : > { %9691 = vmatprep.subr.bf16.mxu1 %v15811_v20  ;;  %v9570_v39 = vpop.f32.mrf.mxu1  ;;  %v9332_v9 = vadd.f32 -1.0, %v10997_v50  ;;  %v5012_v33 = vmul.f32 1.442695, %v13360_v3  ;;  %v5304_v40 = vld [vmem:[%s15613_s3 + $0x70] sm:$0xff]  ;;  %v15817_v24 = vpack.c.bf16 %v13114_v13, %v13111_v38  ;;  %vm4785_vm1 = vcmp.gt.f32.partialorder %v13360_v3, 0.0 }
 0x4ad   : > { %v13369_v51 = vadd.f32 %v9570_v39, %v9569_v52  ;;  %v4617_v61 = vpop.f32.mrf.mxu0 }
 0x4ae   : > { %v13373_v58 = vpop.f32.mrf.mxu1  ;;  %v13379_v32 = vsel %vm4781_vm12, %v13291_v14, %v9332_v9  ;;  %11004 = vpow2.f32 %v5012_v33  ;;  %v13382_v18 = vadd.f32 %v4617_v61, %v15812_v57  ;;  %v9357_v33 = vcombine.low %v13224_v8, %v13229_v1 }
 0x4af   : > { %9692 = vmatpush3.bf16.msra.mxu1 %v15813_v0  ;;  %v10999_v48 = vpop.eup %10998  ;;  %v4619_v60 = vpop.f32.mrf.mxu0  ;;  %v9366_v61 = vcombine.high %v5300_v54, %v5304_v40  ;;  %v15818_v0 = vld [vmem:[#allocation69_spill] sm:$0xff] }
 0x4b0   : > { %9693 = vmatprep.subr.bf16.mxu1 %v15814_v4  ;;  %v13392_v46 = vpop.f32.mrf.mxu1  ;;  %v5014_v14 = vmul.f32 1.442695, %v13382_v18  ;;  %v9333_v53 = vadd.f32 -1.0, %v10999_v48  ;;  %v15819_v60 = vpack.c.bf16 %v12888_v2, %v12886_v15  ;;  %v5308_v15 = vld [vmem:[%s15613_s3 + $0x90] sm:$0xff]  ;;  %vm4786_vm2 = vcmp.gt.f32.partialorder %v13382_v18, 0.0 }
 0x4b1   : > { %v4620_v10 = vpop.f32.mrf.mxu0  ;;  %v5312_v2 = vld [vmem:[%s15613_s3 + $0xb0] sm:$0xff] }
 0x4b2   : > { %v9575_v52 = vpop.f32.mrf.mxu1  ;;  %11006 = vpow2.f32 %v5014_v14  ;;  %v13396_v47 = vadd.f32 %v4620_v10, %v15815_v45  ;;  %v13420_v38 = vsel %vm4782_vm13, %v13310_v41, %v9333_v53  ;;  %v15820_v14 = vmov 0   ;;  %v15821_v45 = vld [vmem:[#allocation70_spill] sm:$0xff] }
 0x4b3   : > { %9694 = vmatpush3.bf16.msra.mxu1 %v15816_v11  ;;  %v11001_v30 = vpop.eup %11000  ;;  %v4622_v50 = vpop.f32.mrf.mxu0 }
 0x4b4   : > { %9695 = vmatprep.subr.bf16.mxu1 %v15817_v24  ;;  %v9576_v20 = vpop.f32.mrf.mxu1  ;;  %v9334_v39 = vadd.f32 -1.0, %v11001_v30  ;;  %v5016_v9 = vmul.f32 1.442695, %v13396_v47  ;;  %vm4787_vm3 = vcmp.gt.f32.partialorder %v13396_v47, 0.0 }
 0x4b5   : > { %v13411_v34 = vadd.f32 %v9576_v20, %v9575_v52  ;;  %v4625_v44 = vpop.f32.mrf.mxu0 }
 0x4b6   : > { %v13417_v57 = vpop.f32.mrf.mxu1  ;;  %v13423_v13 = vsel %vm4783_vm14, %v13324_v28, %v9334_v39  ;;  %11008 = vpow2.f32 %v5016_v9  ;;  %v13426_v48 = vadd.f32 %v4625_v44, %v15818_v0 }
 0x4b7   : > { %9696 = vmatpush3.bf16.msra.mxu1 %v15819_v60  ;;  %v11003_v4 = vpop.eup %11002  ;;  %v4627_v1 = vpop.f32.mrf.mxu0 }
 0x4b8   : > { %6253 = vmatprep.subr.bf16.mxu1 %v15820_v14  ;;  %v13434_v41 = vpop.f32.mrf.mxu1  ;;  %v5018_v28 = vmul.f32 1.442695, %v13426_v48  ;;  %v9335_v53 = vadd.f32 -1.0, %v11003_v4  ;;  %v15824_v1 = vld [vmem:[#allocation71_spill] sm:$0xff]  ;;  %vm4788_vm4 = vcmp.gt.f32.partialorder %v13426_v48, 0.0 }
 0x4b9   : > { %v4628_v10 = vpop.f32.mrf.mxu0 }
 0x4ba   : > { %6166 = vmatmul.mubr.bf16.vlgmr.msra.gmra.mxu1 %v9357_v33  ;;  %v9581_v52 = vpop.f32.mrf.mxu1  ;;  %11010 = vpow2.f32 %v5018_v28  ;;  %v13438_v11 = vadd.f32 %v4628_v10, %v15821_v45  ;;  %v9365_v33 = vcombine.low %v5300_v54, %v5304_v40  ;;  %v13454_v60 = vsel %vm4784_vm15, %v13346_v19, %v9335_v53 }
 0x4bb   : > { %6173 = vmatprep.mubr.bf16.mxu1 %v9366_v61  ;;  %v11005_v30 = vpop.eup %11004  ;;  %v4630_v50 = vpop.f32.mrf.mxu0  ;;  %v9374_v61 = vcombine.high %v5308_v15, %v5312_v2 }
 0x4bc   : > { %v9582_v24 = vpop.f32.mrf.mxu1  ;;  %v9336_v20 = vadd.f32 -1.0, %v11005_v30  ;;  %v5020_v39 = vmul.f32 1.442695, %v13438_v11  ;;  %vm4789_vm5 = vcmp.gt.f32.partialorder %v13438_v11, 0.0 }
 0x4bd   : > { %v13447_v9 = vadd.f32 %v9582_v24, %v9581_v52  ;;  %v4633_v44 = vpop.f32.mrf.mxu0  ;;  %v5316_v24 = vld [vmem:[%s15613_s3 + $0xd0] sm:$0xff] }
 0x4be   : > { %v13451_v0 = vpop.f32.mrf.mxu1  ;;  %v13457_v4 = vsel %vm4785_vm1, %v13360_v3, %v9336_v20  ;;  %11012 = vpow2.f32 %v5020_v39  ;;  %v13460_v28 = vadd.f32 %v4633_v44, %v15824_v1  ;;  %v15826_v3 = vld [vmem:[#allocation72_spill] sm:$0xff]  ;;  %vm5886_vm1 = vcmask 1043456  }
 0x4bf   : > { %15822 = vst [vmem:[#allocation7_spill] sm:$0xff] %v13447_v9  ;;  %15823 = vst [vmem:[#allocation8_spill] sm:$0xff] %v13451_v0  ;;  %v11007_v10 = vpop.eup %11006  ;;  %v4635_v45 = vpop.f32.mrf.mxu0  ;;  %v5320_v20 = vld [vmem:[%s15613_s3 + $0xf0] sm:$0xff] }
 0x4c0   : > { %v13464_v30 = vpop.f32.mrf.mxu1  ;;  %v5022_v54 = vmul.f32 1.442695, %v13460_v28  ;;  %v9337_v53 = vadd.f32 -1.0, %v11007_v10  ;;  %vm4790_vm6 = vcmp.gt.f32.partialorder %v13460_v28, 0.0 }
 0x4c1   : > { %15825 = vst [vmem:[#allocation9_spill] sm:$0xff] %v13464_v30  ;;  %v4636_v40 = vpop.f32.mrf.mxu0 }
 0x4c2   : > { %6174 = vmatmul.mubr.bf16.gmra.mxu1 %v9365_v33  ;;  %v9587_v19 = vpop.f32.mrf.mxu1  ;;  %11014 = vpow2.f32 %v5022_v54  ;;  %v13468_v50 = vadd.f32 %v4636_v40, %v15826_v3  ;;  %v9373_v54 = vcombine.low %v5308_v15, %v5312_v2  ;;  %v9382_v40 = vcombine.high %v5316_v24, %v5320_v20 }
 0x4c3   : > { %6181 = vmatprep.mubr.bf16.mxu1 %v9374_v61  ;;  %v11009_v39 = vpop.eup %11008  ;;  %v4638_v44 = vpop.f32.mrf.mxu0  ;;  %v13484_v29 = vsel %vm4786_vm2, %v13382_v18, %v9337_v53  ;;  %vm5887_vm2 = vcmask 1044480  }
 0x4c4   : > { %v9588_v1 = vpop.f32.mrf.mxu1  ;;  %v9338_v45 = vadd.f32 -1.0, %v11009_v39  ;;  %v5024_v33 = vmul.f32 1.442695, %v13468_v50  ;;  %v15829_v39 = vld [vmem:[#allocation73_spill] sm:$0xff]  ;;  %vm4791_vm7 = vcmp.gt.f32.partialorder %v13468_v50, 0.0 }
 0x4c5   : > { %v13477_v10 = vadd.f32 %v9588_v1, %v9587_v19  ;;  %v4641_v61 = vpop.f32.mrf.mxu0 }
 0x4c6   : > { %v13481_v3 = vpop.f32.mrf.mxu1  ;;  %v13487_v44 = vsel %vm4787_vm3, %v13396_v47, %v9338_v45  ;;  %11016 = vpow2.f32 %v5024_v33  ;;  %v13490_v25 = vadd.f32 %v4641_v61, %v15829_v39  ;;  %v15831_v47 = vld [vmem:[#allocation74_spill] sm:$0xff]  ;;  %v5324_v33 = vld [vmem:[%s15613_s3 + $0x110] sm:$0xff] }
 0x4c7   : > { %15827 = vst [vmem:[#allocation10_spill] sm:$0xff] %v13477_v10  ;;  %15828 = vst [vmem:[#allocation11_spill] sm:$0xff] %v13481_v3  ;;  %v11011_v19 = vpop.eup %11010  ;;  %v4643_v12 = vpop.f32.mrf.mxu0 }
 0x4c8   : > { %v13494_v8 = vpop.f32.mrf.mxu1  ;;  %v5026_v15 = vmul.f32 1.442695, %v13490_v25  ;;  %v9339_v53 = vadd.f32 -1.0, %v11011_v19  ;;  %v5328_v12 = vld [vmem:[%s15613_s3 + $0x130] sm:$0xff]  ;;  %vm4792_vm8 = vcmp.gt.f32.partialorder %v13490_v25, 0.0 }
 0x4c9   : > { %15830 = vst [vmem:[#allocation12_spill] sm:$0xff] %v13494_v8  ;;  %v4644_v2 = vpop.f32.mrf.mxu0 }
 0x4ca   : > { %6182 = vmatmul.mubr.bf16.gmra.mxu1 %v9373_v54  ;;  %v9593_v18 = vpop.f32.mrf.mxu1  ;;  %11018 = vpow2.f32 %v5026_v15  ;;  %v13498_v45 = vadd.f32 %v4644_v2, %v15831_v47  ;;  %v9381_v15 = vcombine.low %v5316_v24, %v5320_v20  ;;  %v9390_v2 = vcombine.high %v5324_v33, %v5328_v12  ;;  %v15834_v24 = vld [vmem:[#allocation76_spill] sm:$0xff] }
 0x4cb   : > { %6189 = vmatprep.mubr.bf16.mxu1 %v9382_v40  ;;  %v11013_v61 = vpop.eup %11012  ;;  %v4646_v39 = vpop.f32.mrf.mxu0  ;;  %v5276_v8 = vsel %vm4788_vm4, %v13426_v48, %v9339_v53  ;;  %v5332_v48 = vld [vmem:[%s15613_s3 + $0x150] sm:$0xff] }
 0x4cc   : > { %v9594_v52 = vpop.f32.mrf.mxu1  ;;  %v9340_v1 = vadd.f32 -1.0, %v11013_v61  ;;  %v5028_v54 = vmul.f32 1.442695, %v13498_v45  ;;  %v15833_v39 = vld [vmem:[#allocation75_spill] sm:$0xff]  ;;  %vm4793_vm9 = vcmp.gt.f32.partialorder %v13498_v45, 0.0 }
 0x4cd   : > { %v13507_v19 = vadd.f32 %v9594_v52, %v9593_v18  ;;  %v4649_v40 = vpop.f32.mrf.mxu0 }
 0x4ce   : > { %v9596_v47 = vpop.f32.mrf.mxu1  ;;  %v5277_v3 = vsel %vm4789_vm5, %v13438_v11, %v9340_v1  ;;  %11020 = vpow2.f32 %v5028_v54  ;;  %v13514_v10 = vadd.f32 %v4649_v40, %v15833_v39  ;;  %v9389_v54 = vcombine.low %v5324_v33, %v5328_v12 }
 0x4cf   : > { %15832 = vst [vmem:[#allocation13_spill] sm:$0xff] %v13507_v19  ;;  %v11015_v61 = vpop.eup %11014  ;;  %v5428_v30 = vpack.c.bf16 %v5277_v3, %v5276_v8  ;;  %v4651_v52 = vpop.f32.mrf.mxu0  ;;  %v5336_v8 = vld [vmem:[%s15613_s3 + $0x170] sm:$0xff]  ;;  %vm5852_vm5 = vcmask 596992  }
 0x4d0   : > { %v9597_v18 = vpop.f32.mrf.mxu1  ;;  %v5030_v19 = vmul.f32 1.442695, %v13514_v10  ;;  %v9341_v9 = vadd.f32 -1.0, %v11015_v61  ;;  %vm4794_vm10 = vcmp.gt.f32.partialorder %v13514_v10, 0.0 }
 0x4d1   : > { %v4652_v0 = vpop.f32.mrf.mxu0 }
 0x4d2   : > { %6190 = vmatmul.mubr.bf16.gmra.mxu1 %v9381_v15  ;;  %11022 = vpow2.f32 %v5030_v19  ;;  %v13518_v20 = vadd.f32 %v4652_v0, %v15834_v24  ;;  %v9398_v19 = vcombine.high %v5332_v48, %v5336_v8  ;;  %v5278_v40 = vsel %vm4790_vm6, %v13460_v28, %v9341_v9  ;;  %v5340_v9 = vld [vmem:[%s15613_s3 + $0x190] sm:$0xff] }
 0x4d3   : > { %6197 = vmatprep.mubr.bf16.mxu1 %v9390_v2  ;;  %v11017_v11 = vpop.eup %11016  ;;  %v4654_v3 = vpop.f32.mrf.mxu0  ;;  %v15835_v2 = vld [vmem:[#allocation77_spill] sm:$0xff]  ;;  %v5344_v28 = vld [vmem:[%s15613_s3 + $0x1b0] sm:$0xff]  ;;  %vm7034_vm6 = vcmask 1040384  }
 0x4d4   : > { %v9342_v1 = vadd.f32 -1.0, %v11017_v11  ;;  %v5032_v53 = vmul.f32 1.442695, %v13518_v20  ;;  %v15836_v3 = vld [vmem:[#allocation78_spill] sm:$0xff]  ;;  %vm4795_vm11 = vcmp.gt.f32.partialorder %v13518_v20, 0.0 }
 0x4d5   : > { %v4657_v0 = vpop.f32.mrf.mxu0 }
 0x4d6   : > { %v5279_v15 = vsel %vm4791_vm7, %v13468_v50, %v9342_v1  ;;  %11024 = vpow2.f32 %v5032_v53  ;;  %v13532_v47 = vadd.f32 %v4657_v0, %v15835_v2  ;;  %v15837_v2 = vld [vmem:[#allocation79_spill] sm:$0xff]  ;;  %vm6494_vm7 = vcmask 1046528  }
 0x4d7   : > { %v11019_v39 = vpop.eup %11018  ;;  %v5429_v61 = vpack.c.bf16 %v5279_v15, %v5278_v40  ;;  %v4659_v52 = vpop.f32.mrf.mxu0 }
 0x4d8   : > { %v5034_v18 = vmul.f32 1.442695, %v13532_v47  ;;  %v9343_v11 = vadd.f32 -1.0, %v11019_v39  ;;  %vm4796_vm12 = vcmp.gt.f32.partialorder %v13532_v47, 0.0 }
 0x4d9   : > { %v4660_v24 = vpop.f32.mrf.mxu0  ;;  %6254 = vmatpush1.bf16.msra.mxu1 %v5429_v61 }
 0x4da   : > { %6198 = vmatmul.mubr.bf16.gmra.mxu1 %v9389_v54  ;;  %11026 = vpow2.f32 %v5034_v18  ;;  %v13536_v33 = vadd.f32 %v4660_v24, %v15836_v3  ;;  %6255 = vmatprep.subr.bf16.mxu1 %v15820_v14  ;;  %v9397_v54 = vcombine.low %v5332_v48, %v5336_v8  ;;  %v13549_v40 = vsel %vm4792_vm8, %v13490_v25, %v9343_v11  ;;  %v5352_v3 = vld [vmem:[%s15613_s3 + $0x1f0] sm:$0xff] }
 0x4db   : > { %6205 = vmatprep.mubr.bf16.mxu1 %v9398_v19  ;;  %v11021_v50 = vpop.eup %11020  ;;  %v4662_v12 = vpop.f32.mrf.mxu0  ;;  %v9406_v19 = vcombine.high %v5340_v9, %v5344_v28  ;;  %v15839_v11 = vpack.c.bf16 %v13487_v44, %v13484_v29  ;;  %v9405_v44 = vcombine.low %v5340_v9, %v5344_v28  ;;  %vm6384_vm8 = vsmask.f32 7424 }
 0x4dc   : > { %v9344_v1 = vadd.f32 -1.0, %v11021_v50  ;;  %v5036_v53 = vmul.f32 1.442695, %v13536_v33  ;;  %vm4797_vm13 = vcmp.gt.f32.partialorder %v13536_v33, 0.0 }
 0x4dd   : > { %v4665_v0 = vpop.f32.mrf.mxu0  ;;  %6256 = vmatpush1.bf16.msra.mxu1 %v5428_v30  ;;  %v5348_v30 = vld [vmem:[%s15613_s3 + $0x1d0] sm:$0xff] }
 0x4de   : > { %v13552_v15 = vsel %vm4793_vm9, %v13498_v45, %v9344_v1  ;;  %11028 = vpow2.f32 %v5036_v53  ;;  %v13555_v39 = vadd.f32 %v4665_v0, %v15837_v2  ;;  %6257 = vmatprep.subr.bf16.mxu1 %v15820_v14  ;;  %v15838_v45 = vld [vmem:[#allocation80_spill] sm:$0xff]  ;;  %v9414_v0 = vcombine.high %v5348_v30, %v5352_v3  ;;  %v15840_v2 = vld [vmem:[#allocation81_spill] sm:$0xff] }
 0x4df   : > { %v11023_v61 = vpop.eup %11022  ;;  %v5430_v52 = vpack.c.bf16 %v13552_v15, %v13549_v40  ;;  %v4667_v18 = vpop.f32.mrf.mxu0  ;;  %v5313_v40 = vld [vmem:[%s15613_s3 + $0xb8] sm:$0xff]  ;;  %vm6854_vm9 = vcmask 1042432  }
 0x4e0   : > { %v5038_v48 = vmul.f32 1.442695, %v13555_v39  ;;  %v9345_v25 = vadd.f32 -1.0, %v11023_v61  ;;  %v15841_v18 = vpack.c.bf16 %v13457_v4, %v13454_v60  ;;  %vm4798_vm14 = vcmp.gt.f32.partialorder %v13555_v39, 0.0 }
 0x4e1   : > { %v4668_v8 = vpop.f32.mrf.mxu0  ;;  %6258 = vmatpush1.bf16.msra.mxu1 %v15839_v11  ;;  %v15843_v11 = vpack.c.bf16 %v13423_v13, %v13420_v38  ;;  %v9413_v38 = vcombine.low %v5348_v30, %v5352_v3 }
 0x4e2   : > { %6206 = vmatmul.mubr.bf16.gmra.mxu1 %v9397_v54  ;;  %11030 = vpow2.f32 %v5038_v48  ;;  %v13562_v24 = vadd.f32 %v4668_v8, %v15838_v45  ;;  %6259 = vmatprep.subr.bf16.mxu1 %v15820_v14  ;;  %v13578_v54 = vsel %vm4794_vm10, %v13514_v10, %v9345_v25  ;;  %v15842_v25 = vld [vmem:[#allocation82_spill] sm:$0xff]  ;;  %vm6614_vm10 = vsmask.f32 5376 }
 0x4e3   : > { %6213 = vmatprep.mubr.bf16.mxu1 %v9406_v19  ;;  %v11025_v50 = vpop.eup %11024  ;;  %v4670_v12 = vpop.f32.mrf.mxu0 }
 0x4e4   : > { %v9346_v1 = vadd.f32 -1.0, %v11025_v50  ;;  %v5040_v53 = vmul.f32 1.442695, %v13562_v24  ;;  %v5356_v50 = vld [vmem:[%s15613_s3 + $0x210] sm:$0xff]  ;;  %vm4799_vm15 = vcmp.gt.f32.partialorder %v13562_v24, 0.0 }
 0x4e5   : > { %v4673_v29 = vpop.f32.mrf.mxu0  ;;  %6260 = vmatpush1.bf16.msra.mxu1 %v15841_v18  ;;  %v5360_v12 = vld [vmem:[%s15613_s3 + $0x230] sm:$0xff] }
 0x4e6   : > { %v13581_v19 = vsel %vm4795_vm11, %v13518_v20, %v9346_v1  ;;  %11032 = vpow2.f32 %v5040_v53  ;;  %v13584_v61 = vadd.f32 %v4673_v29, %v15840_v2  ;;  %6261 = vmatprep.subr.bf16.mxu1 %v15820_v14  ;;  %vm6534_vm11 = vsmask.f32 6400 }
 0x4e7   : > { %v11027_v48 = vpop.eup %11026  ;;  %v5431_v8 = vpack.c.bf16 %v13581_v19, %v13578_v54  ;;  %v4675_v9 = vpop.f32.mrf.mxu0 }
 0x4e8   : > { %v5042_v10 = vmul.f32 1.442695, %v13584_v61  ;;  %v9347_v20 = vadd.f32 -1.0, %v11027_v48  ;;  %v9421_v48 = vcombine.low %v5356_v50, %v5360_v12  ;;  %v15846_v9 = vpack.c.bf16 %v13307_v63, %v13304_v31  ;;  %v5372_v31 = vld [vmem:[%s15613_s3 + $0x290] sm:$0x11] }
 0x4e9   : > { %v4676_v28 = vpop.f32.mrf.mxu0  ;;  %6262 = vmatpush1.bf16.msra.mxu1 %v15843_v11  ;;  %vm4800_vm3 = vcmp.gt.f32.partialorder %v13584_v61, 0.0 }
 0x4ea   : > { %6214 = vmatmul.mubr.bf16.gmra.mxu1 %v9405_v44  ;;  %11034 = vpow2.f32 %v5042_v10  ;;  %v4677_v45 = vadd.f32 %v4676_v28, %v15842_v25  ;;  %6263 = vmatprep.subr.bf16.mxu1 %v15820_v14  ;;  %v13607_v13 = vsel %vm4796_vm12, %v13532_v47, %v9347_v20  ;;  %v15844_v44 = vpack.c.bf16 %v13379_v32, %v13376_v59  ;;  %v5364_v59 = vld [vmem:[%s15613_s3 + $0x250] sm:$0xff] }
 0x4eb   : > { %6221 = vmatprep.mubr.bf16.mxu1 %v9414_v0  ;;  %v11029_v60 = vpop.eup %11028  ;;  %v4678_v4 = vpop.f32.mrf.mxu0  ;;  %v9422_v0 = vcombine.high %v5356_v50, %v5360_v12  ;;  %v15845_v47 = vpack.c.bf16 %v13343_v35, %v13340_v27  ;;  %v5368_v32 = vld [vmem:[%s15613_s3 + $0x270] sm:$0xff]  ;;  %vm6714_vm12 = vsmask.f32 4352 }
 0x4ec   : > { %v9348_v1 = vadd.f32 -1.0, %v11029_v60  ;;  %v5044_v53 = vmul.f32 1.442695, %v4677_v45  ;;  %v9430_v10 = vcombine.high %v5364_v59, %v5368_v32  ;;  %v11145_v60 = vmov 65535  }
 0x4ed   : > { %6264 = vmatpush1.bf16.msra.mxu1 %v15844_v44  ;;  %vm4801_vm4 = vcmp.gt.f32.partialorder %v4677_v45, 0.0 }
 0x4ee   : > { %v13610_v29 = vsel %vm4797_vm13, %v13536_v33, %v9348_v1  ;;  %11036 = vpow2.f32 %v5044_v53  ;;  %6265 = vmatprep.subr.bf16.mxu1 %v15820_v14  ;;  %v9429_v1 = vcombine.low %v5364_v59, %v5368_v32  ;;  %vm6794_vm13 = vsmask.f32 3328 }
 0x4ef   : > { %v11031_v2 = vpop.eup %11030  ;;  %v5432_v18 = vpack.c.bf16 %v13610_v29, %v13607_v13  ;;  %v5301_v13 = vld [vmem:[%s15613_s3 + $0x58] sm:$0xff] }
 0x4f0   : > { %v9349_v30 = vadd.f32 -1.0, %v11031_v2  ;;  %v9438_v2 = vcombine.high %v5372_v31, %v5372_v31 }
 0x4f1   : > { %6266 = vmatpush1.bf16.msra.mxu1 %v15845_v47 }
 0x4f2   : > { %6222 = vmatmul.mubr.bf16.gmra.mxu1 %v9413_v38  ;;  %6267 = vmatprep.subr.bf16.mxu1 %v15820_v14  ;;  %v5286_v27 = vsel %vm4798_vm14, %v13555_v39, %v9349_v30  ;;  %v5888_v39 = vsel %vm5886_vm1, 4294967295, %v11145_v60  ;;  %vm6974_vm14 = vsmask.f32 1280 }
 0x4f3   : > { %6229 = vmatprep.mubr.bf16.mxu1 %v9422_v0  ;;  %v11033_v33 = vpop.eup %11032  ;;  %v5889_v53 = vsel %vm5887_vm2, %v5888_v39, 0 }
 0x4f4   : > { %v9350_v3 = vadd.f32 -1.0, %v11033_v33  ;;  %v9538_v33 = vadd.f32 %v13215_v21, %v13202_v7  ;;  %v9437_v21 = vcombine.low %v5372_v31, %v5372_v31 }
 0x4f5   : > { %6268 = vmatpush1.bf16.msra.mxu1 %v15846_v9 }
 0x4f6   : > { %v5287_v35 = vsel %vm4799_vm15, %v13562_v24, %v9350_v3  ;;  %6275 = vmatprep.subr.bf16.mxu1 %v15820_v14  ;;  %vm6894_vm15 = vsmask.f32 2304 }
 0x4f7   : > { %v11035_v28 = vpop.eup %11034  ;;  %v5433_v20 = vpack.c.bf16 %v5287_v35, %v5286_v27 }
 0x4f8   : > { %v9351_v11 = vadd.f32 -1.0, %v11035_v28  ;;  %v9544_v28 = vadd.f32 %v13251_v22, %v13236_v5 }
 0x4f9   : > { %v9615_v25 = vpop.f32.mrf.mxu1 }
 0x4fa   : > { %6230 = vmatmul.mubr.bf16.gmra.mxu1 %v9421_v48  ;;  %v5288_v38 = vsel %vm4800_vm3, %v13584_v61, %v9351_v11  ;;  %v5297_v61 = vld [vmem:[%s15613_s3 + $0x38] sm:$0xff]  ;;  %vm7074_vm3 = vsmask.f32 256 }
 0x4fb   : > { %6237 = vmatprep.mubr.bf16.mxu1 %v9430_v10  ;;  %v11037_v4 = vpop.eup %11036  ;;  %v9616_v24 = vpop.f32.mrf.mxu1 }
 0x4fc   : > { %v9352_v63 = vadd.f32 -1.0, %v11037_v4  ;;  %v9617_v50 = vadd.f32 %v9616_v24, %v9615_v25  ;;  %v9550_v4 = vadd.f32 %v13269_v37, %v13262_v23 }
 0x4fd   : > { %v9618_v12 = vpop.f32.mrf.mxu1 }
 0x4fe   : > { %v5289_v44 = vsel %vm4801_vm4, %v4677_v45, %v9352_v63  ;;  %v13644_v0 = vadd.f32 %v9617_v50, %v13198_v17  ;;  %v5293_v17 = vld [vmem:[%s15613_s3 + $0x18] sm:$0xff]  ;;  %v15847_v50 = vld [vmem:[#allocation6_spill] sm:$0xff]  ;;  %vm6594_vm4 = vcmask 1045504  }
 0x4ff   : > { %v5434_v30 = vpack.c.bf16 %v5289_v44, %v5288_v38  ;;  %v9619_v47 = vpop.f32.mrf.mxu1  ;;  %v9360_v9 = vcombine.high %v5293_v17, %v5297_v61  ;;  %v9359_v31 = vcombine.low %v5293_v17, %v5297_v61 }
 0x500   : > { %v9620_v3 = vadd.f32 %v9619_v47, %v9618_v12  ;;  %v9556_v12 = vadd.f32 %v13287_v62, %v15847_v50 }
 0x501   : > { %v9621_v48 = vpop.f32.mrf.mxu1  ;;  %v5891_v27 = vand.u32 %v5889_v53, %v5434_v30  ;;  %v5309_v53 = vld [vmem:[%s15613_s3 + $0x98] sm:$0xff] }
 0x502   : > { %6238 = vmatmul.mubr.bf16.gmra.mxu1 %v9429_v1  ;;  %v13648_v35 = vadd.f32 %v9620_v3, %v9538_v33  ;;  %v9376_v44 = vcombine.high %v5309_v53, %v5313_v40  ;;  %v9562_v33 = vadd.f32 %v13320_v36, %v13301_v56  ;;  %v9568_v36 = vadd.f32 %v13356_v43, %v13337_v42 }
 0x503   : > { %6245 = vmatprep.mubr.bf16.mxu1 %v9438_v2  ;;  %v9622_v59 = vpop.f32.mrf.mxu1  ;;  %6276 = vmatpush2.bf16.msra.mxu1 %v5891_v27  ;;  %v5321_v27 = vld [vmem:[%s15613_s3 + $0xf8] sm:$0xff]  ;;  %v9574_v43 = vadd.f32 %v13392_v46, %v13373_v58  ;;  %v9580_v46 = vadd.f32 %v13434_v41, %v13417_v57 }
 0x504   : > { %v9623_v45 = vadd.f32 %v9622_v59, %v9621_v48  ;;  %6277 = vmatprep.subr.bf16.mxu1 %v15820_v14  ;;  %v5317_v48 = vld [vmem:[%s15613_s3 + $0xd8] sm:$0xff] }
 0x505   : > { %v9624_v7 = vpop.f32.mrf.mxu1  ;;  %v15849_v41 = vld [vmem:[#allocation8_spill] sm:$0xff] }
 0x506   : > { %v13658_v32 = vadd.f32 %v9623_v45, %v13232_v26  ;;  %v9384_v45 = vcombine.high %v5317_v48, %v5321_v27 }
 0x507   : > { %v9625_v10 = vpop.f32.mrf.mxu1  ;;  %6278 = vmatpush2.bf16.msra.mxu1 %v5433_v20 }
 0x508   : > { %v9626_v25 = vadd.f32 %v9625_v10, %v9624_v7  ;;  %6279 = vmatprep.subr.bf16.mxu1 %v15820_v14 }
 0x509   : > { %v9627_v11 = vpop.f32.mrf.mxu1 }
 0x50a   : > { %6246 = vmatmul.mubr.bf16.gmra.mxu1 %v9437_v21  ;;  %v13663_v60 = vadd.f32 %v9626_v25, %v9544_v28  ;;  %v5325_v28 = vld [vmem:[%s15613_s3 + $0x118] sm:$0xff] }
 0x50b   : > { %9441 = vmatprep.mubr.msk.bf16.mxu1 %vm5852_vm5, %v9360_v9  ;;  %v9628_v39 = vpop.f32.mrf.mxu1  ;;  %6280 = vmatpush2.bf16.msra.mxu1 %v5432_v18  ;;  %v5329_v25 = vld [vmem:[%s15613_s3 + $0x138] sm:$0xff] }
 0x50c   : > { %v9629_v26 = vadd.f32 %v9628_v39, %v9627_v11  ;;  %6281 = vmatprep.subr.bf16.mxu1 %v15820_v14 }
 0x50d   : > { %v9630_v20 = vpop.f32.mrf.mxu1 }
 0x50e   : > { %v13671_v22 = vadd.f32 %v9629_v26, %v13258_v49  ;;  %v5305_v49 = vld [vmem:[%s15613_s3 + $0x78] sm:$0xff] }
 0x50f   : > { %v9631_v5 = vpop.f32.mrf.mxu1  ;;  %6282 = vmatpush2.bf16.msra.mxu1 %v5431_v8  ;;  %v9368_v23 = vcombine.high %v5301_v13, %v5305_v49 }
 0x510   : > { %v9632_v24 = vadd.f32 %v9631_v5, %v9630_v20  ;;  %6283 = vmatprep.subr.bf16.mxu1 %v15820_v14  ;;  %v9392_v20 = vcombine.high %v5325_v28, %v5329_v25 }
 0x511   : > { %v9633_v29 = vpop.f32.mrf.mxu1 }
 0x512   : > { %v13685_v18 = vadd.f32 %v9632_v24, %v9550_v4 }
 0x513   : > { %v9634_v54 = vpop.f32.mrf.mxu1  ;;  %6284 = vmatpush2.bf16.msra.mxu1 %v5430_v52 }
 0x514   : > { %v9635_v37 = vadd.f32 %v9634_v54, %v9633_v29  ;;  %v5337_v29 = vld [vmem:[%s15613_s3 + $0x178] sm:$0xff] }
 0x515   : > { %v9636_v19 = vpop.f32.mrf.mxu1 }
 0x516   : > { %v13691_v8 = vadd.f32 %v9635_v37, %v13276_v16  ;;  %6286 = vmatmul.mubr.bf16.vlgmr.msra.gmra.mxu1 %v9359_v31  ;;  %v9367_v16 = vcombine.low %v5301_v13, %v5305_v49  ;;  %v5333_v49 = vld [vmem:[%s15613_s3 + $0x158] sm:$0xff] }
 0x517   : > { %v9637_v63 = vpop.f32.mrf.mxu1  ;;  %9442 = vmatprep.mubr.msk.bf16.mxu1 %vm5852_vm5, %v9368_v23  ;;  %v9400_v37 = vcombine.high %v5333_v49, %v5337_v29 }
 0x518   : > { %v9638_v1 = vadd.f32 %v9637_v63, %v9636_v19 }
 0x519   : > { %v9639_v15 = vpop.f32.mrf.mxu1 }
 0x51a   : > { %v13702_v52 = vadd.f32 %v9638_v1, %v9556_v12  ;;  %v5341_v1 = vld [vmem:[%s15613_s3 + $0x198] sm:$0xff] }
 0x51b   : > { %v9640_v38 = vpop.f32.mrf.mxu1 }
 0x51c   : > { %v9641_v2 = vadd.f32 %v9640_v38, %v9639_v15 }
 0x51d   : > { %v9642_v30 = vpop.f32.mrf.mxu1 }
 0x51e   : > { %v13705_v47 = vadd.f32 %v9641_v2, %v13297_v55  ;;  %6294 = vmatmul.mubr.bf16.gmra.mxu1 %v9367_v16  ;;  %v9375_v55 = vcombine.low %v5309_v53, %v5313_v40  ;;  %v5345_v53 = vld [vmem:[%s15613_s3 + $0x1b8] sm:$0xff] }
 0x51f   : > { %v9643_v62 = vpop.f32.mrf.mxu1  ;;  %9443 = vmatprep.mubr.msk.bf16.mxu1 %vm5852_vm5, %v9376_v44  ;;  %v9408_v38 = vcombine.high %v5341_v1, %v5345_v53 }
 0x520   : > { %v9644_v3 = vadd.f32 %v9643_v62, %v9642_v30  ;;  %v15848_v30 = vld [vmem:[#allocation7_spill] sm:$0xff] }
 0x521   : > { %v9645_v59 = vpop.f32.mrf.mxu1 }
 0x522   : > { %v13716_v17 = vadd.f32 %v9644_v3, %v9562_v33  ;;  %v15850_v33 = vld [vmem:[#allocation9_spill] sm:$0xff] }
 0x523   : > { %v9646_v61 = vpop.f32.mrf.mxu1  ;;  %v9586_v3 = vadd.f32 %v15850_v33, %v15849_v41 }
 0x524   : > { %v9647_v7 = vadd.f32 %v9646_v61, %v9645_v59  ;;  %v5353_v59 = vld [vmem:[%s15613_s3 + $0x1f8] sm:$0xff] }
 0x525   : > { %v9648_v21 = vpop.f32.mrf.mxu1 }
 0x526   : > { %v13719_v9 = vadd.f32 %v9647_v7, %v13333_v6  ;;  %6302 = vmatmul.mubr.bf16.gmra.mxu1 %v9375_v55  ;;  %v9383_v6 = vcombine.low %v5317_v48, %v5321_v27  ;;  %v5349_v27 = vld [vmem:[%s15613_s3 + $0x1d8] sm:$0xff] }
 0x527   : > { %v9649_v56 = vpop.f32.mrf.mxu1  ;;  %9444 = vmatprep.mubr.msk.bf16.mxu1 %vm5852_vm5, %v9384_v45  ;;  %v9407_v45 = vcombine.low %v5341_v1, %v5345_v53  ;;  %v5373_v1 = vld [vmem:[%s15613_s3 + $0x298] sm:$0x11] }
 0x528   : > { %v9650_v10 = vadd.f32 %v9649_v56, %v9648_v21  ;;  %v9416_v21 = vcombine.high %v5349_v27, %v5353_v59 }
 0x529   : > { %v9651_v11 = vpop.f32.mrf.mxu1 }
 0x52a   : > { %v13730_v39 = vadd.f32 %v9650_v10, %v9568_v36  ;;  %v15851_v10 = vld [vmem:[#allocation10_spill] sm:$0xff] }
 0x52b   : > { %v9652_v26 = vpop.f32.mrf.mxu1 }
 0x52c   : > { %v9653_v5 = vadd.f32 %v9652_v26, %v9651_v11  ;;  %v15852_v11 = vld [vmem:[#allocation11_spill] sm:$0xff] }
 0x52d   : > { %v9654_v4 = vpop.f32.mrf.mxu1 }
 0x52e   : > { %v13733_v24 = vadd.f32 %v9653_v5, %v13369_v51  ;;  %6310 = vmatmul.mubr.bf16.gmra.mxu1 %v9383_v6  ;;  %v9391_v51 = vcombine.low %v5325_v28, %v5329_v25  ;;  %v15853_v6 = vld [vmem:[#allocation12_spill] sm:$0xff] }
 0x52f   : > { %v9655_v42 = vpop.f32.mrf.mxu1  ;;  %9445 = vmatprep.mubr.msk.bf16.mxu1 %vm5852_vm5, %v9392_v20  ;;  %v9592_v26 = vadd.f32 %v15853_v6, %v15852_v11  ;;  %v5357_v5 = vld [vmem:[%s15613_s3 + $0x218] sm:$0xff] }
 0x530   : > { %v9656_v13 = vadd.f32 %v9655_v42, %v9654_v4  ;;  %v5361_v4 = vld [vmem:[%s15613_s3 + $0x238] sm:$0xff] }
 0x531   : > { %v9657_v31 = vpop.f32.mrf.mxu1 }
 0x532   : > { %v13744_v54 = vadd.f32 %v9656_v13, %v9574_v43  ;;  %v9415_v13 = vcombine.low %v5349_v27, %v5353_v59 }
 0x533   : > { %v9658_v23 = vpop.f32.mrf.mxu1 }
 0x534   : > { %v9659_v19 = vadd.f32 %v9658_v23, %v9657_v31  ;;  %v15854_v23 = vld [vmem:[#allocation13_spill] sm:$0xff] }
 0x535   : > { %v9660_v63 = vpop.f32.mrf.mxu1 }
 0x536   : > { %v13747_v50 = vadd.f32 %v9659_v19, %v13411_v34  ;;  %6318 = vmatmul.mubr.bf16.gmra.mxu1 %v9391_v51  ;;  %v9399_v34 = vcombine.low %v5333_v49, %v5337_v29  ;;  %v9424_v29 = vcombine.high %v5357_v5, %v5361_v4 }
 0x537   : > { %v9661_v58 = vpop.f32.mrf.mxu1  ;;  %9446 = vmatprep.mubr.msk.bf16.mxu1 %vm5852_vm5, %v9400_v37 }
 0x538   : > { %v9662_v12 = vadd.f32 %v9661_v58, %v9660_v63  ;;  %v5365_v63 = vld [vmem:[%s15613_s3 + $0x258] sm:$0xff] }
 0x539   : > { %v9663_v40 = vpop.f32.mrf.mxu1  ;;  %v5369_v58 = vld [vmem:[%s15613_s3 + $0x278] sm:$0xff] }
 0x53a   : > { %v13758_v15 = vadd.f32 %v9662_v12, %v9580_v46  ;;  %v9423_v46 = vcombine.low %v5357_v5, %v5361_v4  ;;  %v9432_v12 = vcombine.high %v5365_v63, %v5369_v58  ;;  %v9431_v53 = vcombine.low %v5365_v63, %v5369_v58 }
 0x53b   : > { %v9664_v16 = vpop.f32.mrf.mxu1 }
 0x53c   : > { %v9665_v44 = vadd.f32 %v9664_v16, %v9663_v40  ;;  %v9440_v40 = vcombine.high %v5373_v1, %v5373_v1 }
 0x53d   : > { %v9666_v2 = vpop.f32.mrf.mxu1 }
 0x53e   : > { %v13761_v62 = vadd.f32 %v9665_v44, %v15848_v30  ;;  %6326 = vmatmul.mubr.bf16.gmra.mxu1 %v9399_v34  ;;  %v9439_v34 = vcombine.low %v5373_v1, %v5373_v1 }
 0x53f   : > { %v9667_v57 = vpop.f32.mrf.mxu1  ;;  %9447 = vmatprep.mubr.msk.bf16.mxu1 %vm5852_vm5, %v9408_v38 }
 0x540   : > { %v9668_v48 = vadd.f32 %v9667_v57, %v9666_v2 }
 0x541   : > { %v9669_v55 = vpop.f32.mrf.mxu1 }
 0x542   : > { %v13772_v61 = vadd.f32 %v9668_v48, %v9586_v3 }
 0x543   : > { %v9670_v7 = vpop.f32.mrf.mxu1 }
 0x544   : > { %v9671_v56 = vadd.f32 %v9670_v7, %v9669_v55 }
 0x545   : > { %v9672_v36 = vpop.f32.mrf.mxu1 }
 0x546   : > { %v13775_v28 = vadd.f32 %v9671_v56, %v15851_v10  ;;  %6334 = vmatmul.mubr.bf16.gmra.mxu1 %v9407_v45 }
 0x547   : > { %v9673_v25 = vpop.f32.mrf.mxu1  ;;  %9448 = vmatprep.mubr.msk.bf16.mxu1 %vm5852_vm5, %v9416_v21 }
 0x548   : > { %v9674_v20 = vadd.f32 %v9673_v25, %v9672_v36 }
 0x549   : > { %v9675_v42 = vpop.f32.mrf.mxu1 }
 0x54a   : > { %v13786_v43 = vadd.f32 %v9674_v20, %v9592_v26 }
 0x54b   : > { %v9676_v49 = vpop.f32.mrf.mxu1 }
 0x54c   : > { %v9677_v31 = vadd.f32 %v9676_v49, %v9675_v42 }
 0x54d   : > { %v9678_v51 = vpop.f32.mrf.mxu1 }
 0x54e   : > { %v13789_v37 = vadd.f32 %v9677_v31, %v15854_v23  ;;  %6342 = vmatmul.mubr.bf16.gmra.mxu1 %v9415_v13 }
 0x54f   : > { %9449 = vmatprep.mubr.msk.bf16.mxu1 %vm5852_vm5, %v9424_v29  ;;  %v9679_v19 = vpop.f32.mrf.mxu1 }
 0x556   : > { %6350 = vmatmul.mubr.bf16.gmra.mxu1 %v9423_v46 }
 0x557   : > { %9450 = vmatprep.mubr.msk.bf16.mxu1 %vm5852_vm5, %v9432_v12 }
 0x55e   : > { %6358 = vmatmul.mubr.bf16.gmra.mxu1 %v9431_v53 }
 0x55f   : > { %9451 = vmatprep.mubr.msk.bf16.mxu1 %vm5852_vm5, %v9440_v40  ;;  %vm7127_vm5 = vcmask 261120  }
 0x566   : > { %6366 = vmatmul.mubr.bf16.gmra.mxu1 %v9439_v34 }
 0x57a   : > { %v9697_v16 = vpop.f32.mrf.mxu1 }
 0x57c   : > { %v9698_v38 = vpop.f32.mrf.mxu1 }
 0x57d   : > { %v9699_v44 = vadd.f32 %v9698_v38, %v9697_v16 }
 0x57e   : > { %v9700_v2 = vpop.f32.mrf.mxu1 }
 0x57f   : > { %v13804_v30 = vadd.f32 %v9699_v44, %v13644_v0 }
 0x580   : > { %v9701_v57 = vpop.f32.mrf.mxu1 }
 0x581   : > { %v9702_v41 = vadd.f32 %v9701_v57, %v9700_v2 }
 0x582   : > { %v9703_v33 = vpop.f32.mrf.mxu1 }
 0x583   : > { %v13807_v3 = vadd.f32 %v9702_v41, %v13648_v35 }
 0x584   : > { %v9704_v48 = vpop.f32.mrf.mxu1 }
 0x585   : > { %v9705_v27 = vadd.f32 %v9704_v48, %v9703_v33 }
 0x586   : > { %v9706_v59 = vpop.f32.mrf.mxu1 }
 0x587   : > { %v13810_v55 = vadd.f32 %v9705_v27, %v13658_v32 }
 0x588   : > { %v9707_v45 = vpop.f32.mrf.mxu1 }
 0x589   : > { %v9708_v7 = vadd.f32 %v9707_v45, %v9706_v59 }
 0x58a   : > { %v9709_v21 = vpop.f32.mrf.mxu1 }
 0x58b   : > { %v13813_v56 = vadd.f32 %v9708_v7, %v13663_v60 }
 0x58c   : > { %v9710_v0 = vpop.f32.mrf.mxu1 }
 0x58d   : > { %v9711_v36 = vadd.f32 %v9710_v0, %v9709_v21 }
 0x58e   : > { %v9712_v10 = vpop.f32.mrf.mxu1 }
 0x58f   : > { %v13816_v25 = vadd.f32 %v9711_v36, %v13671_v22 }
 0x590   : > { %v9713_v35 = vpop.f32.mrf.mxu1 }
 0x591   : > { %v9714_v11 = vadd.f32 %v9713_v35, %v9712_v10 }
 0x592   : > { %v9715_v6 = vpop.f32.mrf.mxu1 }
 0x593   : > { %v13819_v26 = vadd.f32 %v9714_v11, %v13685_v18 }
 0x594   : > { %v9716_v32 = vpop.f32.mrf.mxu1 }
 0x595   : > { %v9717_v20 = vadd.f32 %v9716_v32, %v9715_v6 }
 0x596   : > { %v9718_v5 = vpop.f32.mrf.mxu1 }
 0x597   : > { %v13822_v4 = vadd.f32 %v9717_v20, %v13691_v8 }
 0x598   : > { %v9719_v60 = vpop.f32.mrf.mxu1 }
 0x599   : > { %v9720_v42 = vadd.f32 %v9719_v60, %v9718_v5 }
 0x59a   : > { %v9721_v13 = vpop.f32.mrf.mxu1 }
 0x59b   : > { %v13825_v49 = vadd.f32 %v9720_v42, %v13702_v52 }
 0x59c   : > { %v9722_v22 = vpop.f32.mrf.mxu1 }
 0x59d   : > { %v9723_v29 = vadd.f32 %v9722_v22, %v9721_v13 }
 0x59e   : > { %v9724_v31 = vpop.f32.mrf.mxu1 }
 0x59f   : > { %v13828_v51 = vadd.f32 %v9723_v29, %v13705_v47  ;;  %v10760_v29 = vld [vmem:[%s15614_s4 + $0x30] sm:$0xff]  }
 0x5a0   : > { %v9725_v18 = vpop.f32.mrf.mxu1 }
 0x5a1   : > { %v9726_v23 = vadd.f32 %v9725_v18, %v9724_v31  ;;  %v10761_v18 = vld [vmem:[%s15614_s4 + $0x68] sm:$0xff]  }
 0x5a2   : > { %v9727_v19 = vpop.f32.mrf.mxu1 }
 0x5a3   : > { %v13831_v63 = vadd.f32 %v9726_v23, %v13716_v17 }
 0x5a4   : > { %v9728_v8 = vpop.f32.mrf.mxu1 }
 0x5a5   : > { %v9729_v58 = vadd.f32 %v9728_v8, %v9727_v19  ;;  %v10763_v19 = vld [vmem:[%s15614_s4 + $0x60] sm:$0xff]  }
 0x5a6   : > { %v9730_v46 = vpop.f32.mrf.mxu1  ;;  %v10764_v8 = vld [vmem:[%s15614_s4 + $0x20] sm:$0xff]  }
 0x5a7   : > { %v13834_v12 = vadd.f32 %v9729_v58, %v13719_v9 }
 0x5a8   : > { %v9731_v52 = vpop.f32.mrf.mxu1 }
 0x5a9   : > { %v9732_v1 = vadd.f32 %v9731_v52, %v9730_v46  ;;  %v10765_v52 = vld [vmem:[%s15614_s4 + $0x58] sm:$0xff]  }
 0x5aa   : > { %v9733_v53 = vpop.f32.mrf.mxu1 }
 0x5ab   : > { %v13837_v40 = vadd.f32 %v9732_v1, %v13730_v39  ;;  %v10766_v1 = vld [vmem:[%s15614_s4 + $0x18] sm:$0xff]  }
 0x5ac   : > { %v9734_v47 = vpop.f32.mrf.mxu1 }
 0x5ad   : > { %v9735_v34 = vadd.f32 %v9734_v47, %v9733_v53 }
 0x5ae   : > { %v9736_v16 = vpop.f32.mrf.mxu1 }
 0x5af   : > { %v13840_v38 = vadd.f32 %v9735_v34, %v13733_v24 }
 0x5b0   : > { %v9737_v17 = vpop.f32.mrf.mxu1 }
 0x5b1   : > { %v9738_v44 = vadd.f32 %v9737_v17, %v9736_v16 }
 0x5b2   : > { %v9739_v2 = vpop.f32.mrf.mxu1 }
 0x5b3   : > { %v13843_v57 = vadd.f32 %v9738_v44, %v13744_v54  ;;  %v10767_v44 = vld [vmem:[%s15614_s4 + $0x50] sm:$0xff]  }
 0x5b4   : > { %v9740_v9 = vpop.f32.mrf.mxu1 }
 0x5b5   : > { %v9741_v41 = vadd.f32 %v9740_v9, %v9739_v2  ;;  %v10768_v2 = vld [vmem:[%s15614_s4 + $0x10] sm:$0xff]  }
 0x5b6   : > { %v9742_v33 = vpop.f32.mrf.mxu1 }
 0x5b7   : > { %v13846_v48 = vadd.f32 %v9741_v41, %v13747_v50  ;;  %v10770_v41 = vld [vmem:[%s15614_s4 + $0x8] sm:$0xff]  }
 0x5b8   : > { %v9743_v39 = vpop.f32.mrf.mxu1 }
 0x5b9   : > { %v9744_v27 = vadd.f32 %v9743_v39, %v9742_v33 }
 0x5ba   : > { %v9745_v59 = vpop.f32.mrf.mxu1 }
 0x5bb   : > { %v13849_v45 = vadd.f32 %v9744_v27, %v13758_v15 }
 0x5bc   : > { %v9746_v24 = vpop.f32.mrf.mxu1 }
 0x5bd   : > { %v9747_v7 = vadd.f32 %v9746_v24, %v9745_v59 }
 0x5be   : > { %v9748_v21 = vpop.f32.mrf.mxu1 }
 0x5bf   : > { %v13852_v0 = vadd.f32 %v9747_v7, %v13761_v62  ;;  %v10757_v62 = vld [vmem:[%s15614_s4 + $0x78] sm:$0xff]  }
 0x5c0   : > { %v9749_v54 = vpop.f32.mrf.mxu1  ;;  %9763 = vmatprep.subr.bf16.mxu1 %v10757_v62 }
 0x5c1   : > { %v9750_v36 = vadd.f32 %v9749_v54, %v9748_v21 }
 0x5c2   : > { %v9751_v10 = vpop.f32.mrf.mxu1 }
 0x5c3   : > { %v13855_v35 = vadd.f32 %v9750_v36, %v13772_v61  ;;  %v10758_v61 = vld [vmem:[%s15614_s4 + $0x38] sm:$0xff]  }
 0x5c4   : > { %v9752_v50 = vpop.f32.mrf.mxu1  ;;  %9764 = vmatpush3.bf16.msra.mxu1 %v10758_v61 }
 0x5c5   : > { %v9753_v11 = vadd.f32 %v9752_v50, %v9751_v10 }
 0x5c6   : > { %v9754_v6 = vpop.f32.mrf.mxu1 }
 0x5c7   : > { %v13858_v32 = vadd.f32 %v9753_v11, %v13775_v28 }
 0x5c8   : > { %v9755_v15 = vpop.f32.mrf.mxu1 }
 0x5c9   : > { %v9756_v20 = vadd.f32 %v9755_v15, %v9754_v6 }
 0x5ca   : > { %v9757_v5 = vpop.f32.mrf.mxu1 }
 0x5cb   : > { %v13861_v60 = vadd.f32 %v9756_v20, %v13786_v43  ;;  %v10759_v43 = vld [vmem:[%s15614_s4 + $0x70] sm:$0xff]  }
 0x5cc   : > { %v9758_v42 = vpop.f32.mrf.mxu1  ;;  %9765 = vmatprep.subr.bf16.mxu1 %v10759_v43 }
 0x5cd   : > { %v9759_v13 = vadd.f32 %v9758_v42, %v9757_v5  ;;  %9766 = vmatpush3.bf16.msra.mxu1 %v10760_v29 }
 0x5ce   : > { %v9760_v22 = vpop.f32.mrf.mxu1  ;;  %9767 = vmatprep.subr.bf16.mxu1 %v10761_v18 }
 0x5cf   : > { %v13870_v28 = vadd.f32 %v9759_v13, %v13789_v37  ;;  %v10762_v37 = vld [vmem:[%s15614_s4 + $0x28] sm:$0xff]  }
 0x5d0   : > { %v9761_v31 = vpop.f32.mrf.mxu1 }
 0x5d1   : > { %9768 = vmatpush3.bf16.msra.mxu1 %v10762_v37 }
 0x5d2   : > { %9769 = vmatprep.subr.bf16.mxu1 %v10763_v19 }
 0x5d5   : > { %9770 = vmatpush3.bf16.msra.mxu1 %v10764_v8 }
 0x5d6   : > { %v6287_v23 = vpop.f32.mrf.mxu1  ;;  %9771 = vmatprep.subr.bf16.mxu1 %v10765_v52 }
 0x5d7   : > { %v6288_v53 = vadd.f32 %v6287_v23, %v13804_v30 }
 0x5d8   : > { %v6289_v58 = vpop.f32.mrf.mxu1 }
 0x5d9   : > { %9772 = vmatpush3.bf16.msra.mxu1 %v10766_v1 }
 0x5da   : > { %v6290_v46 = vpop.f32.mrf.mxu1  ;;  %9773 = vmatprep.subr.bf16.mxu1 %v10767_v44 }
 0x5db   : > { %v6291_v47 = vadd.f32 %v6290_v46, %v13807_v3  ;;  %v10769_v3 = vld [vmem:[%s15614_s4 + $0x48] sm:$0xff]  }
 0x5dc   : > { %v6292_v34 = vpop.f32.mrf.mxu1 }
 0x5dd   : > { %v13898_v16 = vpack.c.bf16 %v6291_v47, %v6288_v53  ;;  %9774 = vmatpush3.bf16.msra.mxu1 %v10768_v2 }
 0x5de   : > { %v6295_v17 = vpop.f32.mrf.mxu1  ;;  %9775 = vmatprep.subr.bf16.mxu1 %v10769_v3 }
 0x5df   : > { %v6296_v33 = vadd.f32 %v6295_v17, %v13810_v55  ;;  %v13915_v27 = vshll.u32 %v13898_v16, 16  ;;  %v13920_v7 = vshrl.u32 %v13898_v16, 16  ;;  %v7035_v54 = vrot.slane %v13898_v16, 7  ;;  %v10771_v55 = vld [vmem:[%s15614_s4 + $0x40] sm:$0xff]  }
 0x5e0   : > { %v6297_v9 = vpop.f32.mrf.mxu1  ;;  %v6675_v10 = vrot.slane %v13898_v16, 3  ;;  %v6495_v15 = vrot.slane %v13898_v16, 1  ;;  %v6855_v13 = vrot.slane %v13898_v16, 5 }
 0x5e1   : > { %9776 = vmatpush3.bf16.msra.mxu1 %v10770_v41  ;;  %v6390_v11 = vrot.slane %v13915_v27, 1  ;;  %v6615_v22 = vrot.slane %v13920_v7, 2  ;;  %v6616_v31 = vrot.slane %v13915_v27, 3  ;;  %v6535_v2 = vrot.slane %v13920_v7, 1 }
 0x5e2   : > { %v6298_v30 = vpop.f32.mrf.mxu1  ;;  %9777 = vmatprep.subr.bf16.mxu1 %v10771_v55  ;;  %v6536_v9 = vrot.slane %v13915_v27, 2  ;;  %v6716_v3 = vrot.slane %v13915_v27, 4 }
 0x5e3   : > { %v6299_v39 = vadd.f32 %v6298_v30, %v13813_v56  ;;  %v10772_v56 = vld [vmem:[%s15614_s4] sm:$0xff]   ;;  %v6391_v8 = vor.u32 %v6390_v11, %v13920_v7  ;;  %v6715_v30 = vrot.slane %v13920_v7, 3  ;;  %v6617_v41 = vor.u32 %v6616_v31, %v6615_v22 }
 0x5e4   : > { %v6300_v59 = vpop.f32.mrf.mxu1  ;;  %v6975_v31 = vrot.slane %v13920_v7, 6 }
 0x5e5   : > { %v13917_v24 = vpack.c.bf16 %v6299_v39, %v6296_v33  ;;  %9778 = vmatpush3.bf16.msra.mxu1 %v10772_v56 }
 0x5e6   : > { %v6303_v21 = vpop.f32.mrf.mxu1 }
 0x5e7   : > { %v7036_v36 = vrot.slane %v13917_v24, 7  ;;  %v6676_v50 = vrot.slane %v13917_v24, 3  ;;  %v6496_v20 = vrot.slane %v13917_v24, 1  ;;  %v13936_v5 = vshll.u32 %v13917_v24, 16 }
 0x5e8   : > { %v6305_v6 = vpop.f32.mrf.mxu1  ;;  %v13939_v62 = vshrl.u32 %v13917_v24, 16  ;;  %v6304_v23 = vadd.f32 %v6303_v21, %v13816_v25  ;;  %v6856_v58 = vrot.slane %v13917_v24, 5 }
 0x5e9   : > { %v7037_v61 = vsel %vm7034_vm6, %v7035_v54, %v7036_v36  ;;  %v6677_v42 = vsel %vm5887_vm2, %v6675_v10, %v6676_v50  ;;  %v6395_v29 = vrot.slane %v13936_v5, 1  ;;  %v6619_v37 = vrot.slane %v13936_v5, 3 }
 0x5ea   : > { %v6306_v43 = vpop.f32.mrf.mxu1  ;;  %7054 = vrot.lane.b32.xlu0 %v7037_v61, %s15634_s17  ;;  %6694 = vrot.lane.b32.xlu1 %v6677_v42, %s15634_s17  ;;  %v6618_v18 = vrot.slane %v13939_v62, 2  ;;  %v6497_v52 = vsel %vm6494_vm7, %v6495_v15, %v6496_v20  ;;  %v6538_v1 = vrot.slane %v13939_v62, 1  ;;  %v6539_v53 = vrot.slane %v13936_v5, 2 }
 0x5eb   : > { %v6307_v19 = vadd.f32 %v6306_v43, %v13819_v26  ;;  %v6718_v47 = vrot.slane %v13939_v62, 3  ;;  %v6396_v25 = vsel %vm6384_vm8, %v6391_v8, %v6395_v29  ;;  %v6719_v17 = vrot.slane %v13936_v5, 4 }
 0x5ec   : > { %v6308_v46 = vpop.f32.mrf.mxu1  ;;  %v13970_v26 = vor.u32 %v6619_v37, %v6618_v18  ;;  %v6857_v39 = vsel %vm6854_vm9, %v6855_v13, %v6856_v58  ;;  %v13982_v59 = vor.u32 %v6539_v53, %v6538_v1  ;;  %v6798_v21 = vrot.slane %v13939_v62, 4 }
 0x5ed   : > { %v13965_v34 = vpack.c.bf16 %v6307_v19, %v6304_v23  ;;  %v6799_v54 = vrot.slane %v13936_v5, 5  ;;  %v13988_v56 = vor.u32 %v6719_v17, %v6718_v47  ;;  %v6978_v10 = vrot.slane %v13939_v62, 6 }
 0x5ee   : > { %v6311_v44 = vpop.f32.mrf.mxu1  ;;  %6514 = vrot.lane.b32.xlu1 %v6497_v52, %s15634_s17  ;;  %6464 = vrot.lane.b32.xlu0 %v6396_v25, %s15636_s30  ;;  %v6621_v55 = vsel %vm6614_vm10, %v6617_v41, %v13970_v26  ;;  %v6979_v11 = vrot.slane %v13936_v5, 7  ;;  %v6537_v15 = vor.u32 %v6536_v9, %v6535_v2  ;;  %v6717_v61 = vor.u32 %v6716_v3, %v6715_v30 }
 0x5ef   : > { %v6795_v42 = vrot.slane %v13920_v7, 4  ;;  %v6796_v13 = vrot.slane %v13915_v27, 5  ;;  %v6312_v22 = vadd.f32 %v6311_v44, %v13822_v4  ;;  %v6976_v18 = vrot.slane %v13915_v27, 7 }
 0x5f0   : > { %v6313_v33 = vpop.f32.mrf.mxu1  ;;  %v6541_v23 = vsel %vm6534_vm11, %v6537_v15, %v13982_v59  ;;  %v14002_v19 = vor.u32 %v6799_v54, %v6798_v21  ;;  %v6898_v8 = vrot.slane %v13939_v62, 5  ;;  %v6899_v46 = vrot.slane %v13936_v5, 6 }
 0x5f1   : > { %v6721_v4 = vsel %vm6714_vm12, %v6717_v61, %v13988_v56  ;;  %v7076_v1 = vrot.slane %v13939_v62, 7  ;;  %v6895_v47 = vrot.slane %v13920_v7, 5  ;;  %v6896_v25 = vrot.slane %v13915_v27, 6 }
 0x5f2   : > { %v6314_v6 = vpop.f32.mrf.mxu1  ;;  %6874 = vrot.lane.b32.xlu1 %v6857_v39, %s15634_s17  ;;  %6654 = vrot.lane.b32.xlu0 %v6621_v55, %s15636_s30  ;;  %v6797_v17 = vor.u32 %v6796_v13, %v6795_v42  ;;  %v6977_v44 = vor.u32 %v6976_v18, %v6975_v31  ;;  %v14017_v9 = vor.u32 %v6899_v46, %v6898_v8  ;;  %v7075_v54 = vrot.slane %v13920_v7, 7 }
 0x5f3   : > { %v6315_v43 = vadd.f32 %v6314_v6, %v13825_v49  ;;  %v14010_v49 = vor.u32 %v6979_v11, %v6978_v10  ;;  %v7077_v41 = vor.u32 %v7076_v1, %v13936_v5  ;;  %v6897_v27 = vor.u32 %v6896_v25, %v6895_v47 }
 0x5f4   : > { %v6316_v37 = vpop.f32.mrf.mxu1  ;;  %v6801_v30 = vsel %vm6794_vm13, %v6797_v17, %v14002_v19  ;;  %v6498_v11 = vrot.slane %v13965_v34, 1  ;;  %v6678_v6 = vrot.slane %v13965_v34, 3  ;;  %v14039_v42 = vshll.u32 %v13965_v34, 16 }
 0x5f5   : > { %v14006_v52 = vpack.c.bf16 %v6315_v43, %v6312_v22  ;;  %v6981_v3 = vsel %vm6974_vm14, %v6977_v44, %v14010_v49  ;;  %v6901_v10 = vsel %vm6894_vm15, %v6897_v27, %v14017_v9  ;;  %v7078_v61 = vsel %vm7074_vm3, %v7075_v54, %v7077_v41 }
 0x5f6   : > { %v6319_v53 = vpop.f32.mrf.mxu1  ;;  %6574 = vrot.lane.b32.xlu1 %v6541_v23, %s15632_s22  ;;  %6754 = vrot.lane.b32.xlu0 %v6721_v4, %s15632_s22  ;;  %v15627_v7 = vrot.slane %v13965_v34, 5  ;;  %v15626_v22 = vrot.slane %v13965_v34, 7  ;;  %v6499_v43 = vsel %vm6494_vm7, %v6496_v20, %v6498_v11  ;;  %v6679_v31 = vsel %vm5887_vm2, %v6676_v50, %v6678_v6 }
 0x5f7   : > { %v6320_v39 = vadd.f32 %v6319_v53, %v13828_v51  ;;  %v14042_v51 = vshrl.u32 %v13965_v34, 16  ;;  %v6623_v37 = vrot.slane %v14039_v42, 3  ;;  %v6403_v53 = vrot.slane %v14039_v42, 1 }
 0x5f8   : > { %v6321_v2 = vpop.f32.mrf.mxu1  ;;  %v6859_v20 = vsel %vm6854_vm9, %v6856_v58, %v15627_v7  ;;  %v7039_v4 = vsel %vm7034_vm6, %v7036_v36, %v15626_v22  ;;  %v6723_v58 = vrot.slane %v14039_v42, 4  ;;  %v6399_v36 = vor.u32 %v13939_v62, %v6395_v29 }
 0x5f9   : > { %v6622_v18 = vrot.slane %v14042_v51, 2  ;;  %v6542_v47 = vrot.slane %v14042_v51, 1  ;;  %v6722_v17 = vrot.slane %v14042_v51, 3  ;;  %v6802_v41 = vrot.slane %v14042_v51, 4 }
 0x5fa   : > { %v6322_v33 = vpop.f32.mrf.mxu1  ;;  %6834 = vrot.lane.b32.xlu1 %v6801_v30, %s15636_s30  ;;  %7014 = vrot.lane.b32.xlu0 %v6981_v3, %s15636_s30  ;;  %v6404_v30 = vsel %vm6384_vm8, %v6399_v36, %v6403_v53  ;;  %v6982_v5 = vrot.slane %v14042_v51, 6  ;;  %v6983_v29 = vrot.slane %v14039_v42, 7 }
 0x5fb   : > { %v6323_v21 = vadd.f32 %v6322_v33, %v13831_v63  ;;  %v14079_v25 = vor.u32 %v6623_v37, %v6622_v18  ;;  %v6803_v33 = vrot.slane %v14039_v42, 5 }
 0x5fc   : > { %v6324_v55 = vpop.f32.mrf.mxu1  ;;  %v14117_v18 = vor.u32 %v6983_v29, %v6982_v5  ;;  %v6407_v5 = vor.u32 %v14042_v51, %v6403_v53 }
 0x5fd   : > { %v14035_v15 = vpack.c.bf16 %v6323_v21, %v6320_v39  ;;  %v6625_v27 = vsel %vm6614_vm10, %v13970_v26, %v14079_v25  ;;  %v14098_v39 = vor.u32 %v6723_v58, %v6722_v17  ;;  %v6903_v26 = vrot.slane %v14039_v42, 6 }
 0x5fe   : > { %v6327_v63 = vpop.f32.mrf.mxu1  ;;  %6934 = vrot.lane.b32.xlu1 %v6901_v10, %s15632_s22  ;;  %7107 = vrot.lane.b32.xlu0 %v7078_v61, %s15632_s22  ;;  %v6804_v61 = vor.u32 %v6803_v33, %v6802_v41  ;;  %v6500_v17 = vrot.slane %v14006_v52, 1  ;;  %v6680_v58 = vrot.slane %v14006_v52, 3 }
 0x5ff   : > { %v6328_v8 = vadd.f32 %v6327_v63, %v13834_v12  ;;  %v6543_v12 = vrot.slane %v14039_v42, 2  ;;  %v6902_v63 = vrot.slane %v14042_v51, 5 }
 0x600   : > { %v6329_v13 = vpop.f32.mrf.mxu1  ;;  %v6501_v33 = vsel %vm6494_vm7, %v6498_v11, %v6500_v17  ;;  %v6502_v11 = vrot.slane %v14035_v15, 1 }
 0x601   : > { %v14091_v3 = vor.u32 %v6543_v12, %v6542_v47  ;;  %v7079_v13 = vrot.slane %v14042_v51, 7 }
 0x602   : > { %v6330_v23 = vpop.f32.mrf.mxu1  ;;  %6516 = vrot.lane.b32.xlu1 %v6499_v43, %s15634_s17  ;;  %6696 = vrot.lane.b32.xlu0 %v6679_v31, %s15634_s17 }
 0x603   : > { %v6331_v46 = vadd.f32 %v6330_v23, %v13837_v40  ;;  %v6545_v31 = vsel %vm6534_vm11, %v13982_v59, %v14091_v3  ;;  %v14121_v23 = vor.u32 %v6903_v26, %v6902_v63  ;;  %v6805_v59 = vsel %vm6794_vm13, %v14002_v19, %v6804_v61 }
 0x604   : > { %v6332_v50 = vpop.f32.mrf.mxu1 }
 0x605   : > { %v14077_v40 = vpack.c.bf16 %v6331_v46, %v6328_v8  ;;  %v7080_v8 = vor.u32 %v7079_v13, %v14039_v42  ;;  %v14132_v46 = vshll.u32 %v14006_v52, 16 }
 0x606   : > { %v6335_v44 = vpop.f32.mrf.mxu1  ;;  %6876 = vrot.lane.b32.xlu1 %v6859_v20, %s15634_s17  ;;  %7056 = vrot.lane.b32.xlu0 %v7039_v4, %s15634_s17  ;;  %v14135_v20 = vshrl.u32 %v14006_v52, 16 }
 0x607   : > { %v6336_v54 = vadd.f32 %v6335_v44, %v13840_v38  ;;  %v6725_v38 = vsel %vm6714_vm12, %v13988_v56, %v14098_v39  ;;  %v6985_v56 = vsel %vm6974_vm14, %v14010_v49, %v14117_v18  ;;  %v6905_v49 = vsel %vm6894_vm15, %v14017_v9, %v14121_v23 }
 0x608   : > { %v6337_v2 = vpop.f32.mrf.mxu1  ;;  %v7081_v12 = vsel %vm7074_vm3, %v7076_v1, %v7080_v8  ;;  %v6626_v36 = vrot.slane %v14135_v20, 2  ;;  %v6807_v62 = vrot.slane %v14132_v46, 5  ;;  %v6411_v1 = vrot.slane %v14132_v46, 1 }
 0x609   : > { %v6546_v9 = vrot.slane %v14135_v20, 1 }
 0x60a   : > { %v6338_v21 = vpop.f32.mrf.mxu1  ;;  %6466 = vrot.lane.b32.xlu1 %v6404_v30, %s15636_s30  ;;  %6656 = vrot.lane.b32.xlu0 %v6625_v27, %s15636_s30  ;;  %v6547_v30 = vrot.slane %v14132_v46, 2  ;;  %v6681_v27 = vsel %vm5887_vm2, %v6678_v6, %v6680_v58  ;;  %v6412_v53 = vsel %vm6384_vm8, %v6407_v5, %v6411_v1 }
 0x60b   : > { %v6339_v55 = vadd.f32 %v6338_v21, %v13843_v57  ;;  %v6726_v21 = vrot.slane %v14135_v20, 3 }
 0x60c   : > { %v6340_v10 = vpop.f32.mrf.mxu1  ;;  %v14181_v63 = vor.u32 %v6547_v30, %v6546_v9 }
 0x60d   : > { %v14109_v43 = vpack.c.bf16 %v6339_v55, %v6336_v54  ;;  %v6727_v54 = vrot.slane %v14132_v46, 4 }
 0x60e   : > { %v6343_v57 = vpop.f32.mrf.mxu1  ;;  %6576 = vrot.lane.b32.xlu1 %v6545_v31, %s15632_s22  ;;  %6756 = vrot.lane.b32.xlu0 %v6725_v38, %s15632_s22  ;;  %v14184_v31 = vshll.u32 %v14035_v15, 16  ;;  %v14187_v38 = vshrl.u32 %v14035_v15, 16 }
 0x60f   : > { %v6344_v4 = vadd.f32 %v6343_v57, %v13846_v48  ;;  %v6627_v48 = vrot.slane %v14132_v46, 3  ;;  %v14199_v8 = vor.u32 %v6727_v54, %v6726_v21  ;;  %v6504_v21 = vrot.slane %v14077_v40, 1 }
 0x610   : > { %v6345_v37 = vpop.f32.mrf.mxu1  ;;  %v6731_v9 = vrot.slane %v14184_v31, 4  ;;  %v6906_v54 = vrot.slane %v14135_v20, 5 }
 0x611   : > { %v14169_v29 = vor.u32 %v6627_v48, %v6626_v36  ;;  %v6986_v37 = vrot.slane %v14135_v20, 6  ;;  %v6729_v36 = vsel %vm6714_vm12, %v14098_v39, %v14199_v8  ;;  %v6550_v48 = vrot.slane %v14187_v38, 1 }
 0x612   : > { %v6346_v50 = vpop.f32.mrf.mxu1  ;;  %6836 = vrot.lane.b32.xlu1 %v6805_v59, %s15636_s30  ;;  %7016 = vrot.lane.b32.xlu0 %v6985_v56, %s15636_s30  ;;  %v6987_v59 = vrot.slane %v14132_v46, 7 }
 0x613   : > { %v6347_v47 = vadd.f32 %v6346_v50, %v13849_v45  ;;  %v6806_v45 = vrot.slane %v14135_v20, 4  ;;  %v6682_v50 = vrot.slane %v14035_v15, 3 }
 0x614   : > { %v6348_v19 = vpop.f32.mrf.mxu1 }
 0x615   : > { %v14149_v44 = vpack.c.bf16 %v6347_v47, %v6344_v4  ;;  %v14173_v55 = vor.u32 %v6807_v62, %v6806_v45  ;;  %v6419_v47 = vrot.slane %v14184_v31, 1  ;;  %v6631_v19 = vrot.slane %v14184_v31, 3 }
 0x616   : > { %v6351_v2 = vpop.f32.mrf.mxu1  ;;  %6936 = vrot.lane.b32.xlu1 %v6905_v49, %s15632_s22  ;;  %7109 = vrot.lane.b32.xlu0 %v7081_v12, %s15632_s22  ;;  %v14211_v49 = vor.u32 %v6987_v59, %v6986_v37  ;;  %v6549_v12 = vsel %vm6534_vm11, %v14091_v3, %v14181_v63  ;;  %v6730_v62 = vrot.slane %v14187_v38, 3  ;;  %v14227_v3 = vshll.u32 %v14077_v40, 16 }
 0x617   : > { %v6352_v6 = vadd.f32 %v6351_v2, %v13852_v0  ;;  %v14191_v57 = vsel %vm6794_vm13, %v6804_v61, %v14173_v55  ;;  %v6503_v61 = vsel %vm6494_vm7, %v6500_v17, %v6502_v11  ;;  %v6415_v17 = vor.u32 %v14135_v20, %v6411_v1 }
 0x618   : > { %v6353_v41 = vpop.f32.mrf.mxu1  ;;  %v6551_v2 = vrot.slane %v14184_v31, 2  ;;  %v6683_v30 = vsel %vm5887_vm2, %v6680_v58, %v6682_v50  ;;  %v7082_v37 = vrot.slane %v14135_v20, 7 }
 0x619   : > { %v14233_v41 = vshrl.u32 %v14077_v40, 16 }
 0x61a   : > { %v6354_v10 = vpop.f32.mrf.mxu1  ;;  %6518 = vrot.lane.b32.xlu1 %v6501_v33, %s15634_s17  ;;  %6698 = vrot.lane.b32.xlu0 %v6681_v27, %s15634_s17  ;;  %v6420_v27 = vsel %vm6384_vm8, %v6415_v17, %v6419_v47  ;;  %v6686_v17 = vrot.slane %v14109_v43, 3 }
 0x61b   : > { %v6355_v42 = vadd.f32 %v6354_v10, %v13855_v35  ;;  %v6629_v35 = vsel %vm6614_vm10, %v14079_v25, %v14169_v29  ;;  %v6630_v25 = vrot.slane %v14187_v38, 2  ;;  %v6554_v59 = vrot.slane %v14233_v41, 1 }
 0x61c   : > { %v6356_v26 = vpop.f32.mrf.mxu1  ;;  %v7088_v20 = vrot.slane %v14233_v41, 7 }
 0x61d   : > { %v14194_v0 = vpack.c.bf16 %v6355_v42, %v6352_v6  ;;  %v6632_v5 = vor.u32 %v6631_v19, %v6630_v25  ;;  %v6684_v6 = vrot.slane %v14077_v40, 3  ;;  %v6552_v42 = vor.u32 %v6551_v2, %v6550_v48 }
 0x61e   : > { %v6359_v56 = vpop.f32.mrf.mxu1  ;;  %6468 = vrot.lane.b32.xlu1 %v6412_v53, %s15636_s30  ;;  %6658 = vrot.lane.b32.xlu0 %v6629_v35, %s15636_s30  ;;  %v14249_v53 = vor.u32 %v6731_v9, %v6730_v62  ;;  %v6635_v26 = vrot.slane %v14227_v3, 3  ;;  %v6735_v25 = vrot.slane %v14227_v3, 4  ;;  %v7083_v48 = vor.u32 %v7082_v37, %v14132_v46 }
 0x61f   : > { %v6360_v39 = vadd.f32 %v6359_v56, %v13858_v32  ;;  %v14244_v32 = vsel %vm6974_vm14, %v14117_v18, %v14211_v49  ;;  %v6634_v18 = vrot.slane %v14233_v41, 2  ;;  %v6555_v56 = vrot.slane %v14227_v3, 2 }
 0x620   : > { %v6361_v4 = vpop.f32.mrf.mxu1  ;;  %v14276_v2 = vshll.u32 %v14109_v43, 16  ;;  %v14279_v62 = vshrl.u32 %v14109_v43, 16 }
 0x621   : > { %v6427_v4 = vrot.slane %v14227_v3, 1 }
 0x622   : > { %v6362_v45 = vpop.f32.mrf.mxu1  ;;  %6578 = vrot.lane.b32.xlu1 %v6549_v12, %s15632_s22  ;;  %6758 = vrot.lane.b32.xlu0 %v6729_v36, %s15632_s22  ;;  %v6734_v36 = vrot.slane %v14233_v41, 3 }
 0x623   : > { %v6363_v1 = vadd.f32 %v6362_v45, %v13861_v60  ;;  %v6907_v60 = vrot.slane %v14132_v46, 6  ;;  %v6423_v45 = vor.u32 %v14187_v38, %v6419_v47  ;;  %v6553_v46 = vsel %vm6534_vm11, %v14181_v63, %v6552_v42 }
 0x624   : > { %v6364_v33 = vpop.f32.mrf.mxu1 }
 0x625   : > { %v14238_v10 = vpack.c.bf16 %v6363_v1, %v6360_v39  ;;  %v6908_v19 = vor.u32 %v6907_v60, %v6906_v54  ;;  %v6685_v39 = vsel %vm5887_vm2, %v6682_v50, %v6684_v6  ;;  %v6636_v1 = vor.u32 %v6635_v26, %v6634_v18 }
 0x626   : > { %v6367_v58 = vpop.f32.mrf.mxu1  ;;  %6520 = vrot.lane.b32.xlu1 %v6503_v61, %s15634_s17  ;;  %6700 = vrot.lane.b32.xlu0 %v6683_v30, %s15634_s17  ;;  %v6633_v61 = vsel %vm6614_vm10, %v14169_v29, %v6632_v5  ;;  %v6505_v29 = vsel %vm6494_vm7, %v6502_v11, %v6504_v21  ;;  %v14284_v30 = vor.u32 %v6555_v56, %v6554_v59  ;;  %v6811_v26 = vrot.slane %v14184_v31, 5 }
 0x627   : > { %v14254_v35 = vadd.f32 %v6367_v58, %v13870_v28  ;;  %v6506_v28 = vrot.slane %v14109_v43, 1  ;;  %v6733_v11 = vsel %vm6714_vm12, %v14199_v8, %v14249_v53  ;;  %v6428_v47 = vsel %vm6384_vm8, %v6423_v45, %v6427_v4 }
 0x628   : > { %v6369_v12 = vpop.f32.mrf.mxu1  ;;  %v6431_v33 = vor.u32 %v14233_v41, %v6427_v4  ;;  %v14295_v60 = vor.u32 %v6735_v25, %v6734_v36  ;;  %v14305_v8 = vsel %vm5887_vm2, %v6684_v6, %v6686_v17  ;;  %v14310_v50 = vsel %vm7074_vm3, %v7079_v13, %v7083_v48 }
 0x629   : > { %v14300_v63 = vsel %vm6494_vm7, %v6504_v21, %v6506_v28  ;;  %v6639_v58 = vrot.slane %v14276_v2, 3  ;;  %v6810_v21 = vrot.slane %v14187_v38, 4  ;;  %v6637_v6 = vsel %vm6614_vm10, %v6632_v5, %v6636_v1 }
 0x62a   : > { %6470 = vrot.lane.b32.xlu1 %v6420_v27, %s15636_s30  ;;  %6660 = vrot.lane.b32.xlu0 %v6633_v61, %s15636_s30  ;;  %v6370_v9 = vpop.f32.mrf.mxu1  ;;  %v14293_v27 = vsel %vm6894_vm15, %v14121_v23, %v6908_v19  ;;  %v6638_v23 = vrot.slane %v14279_v62, 2  ;;  %v6557_v51 = vsel %vm6534_vm11, %v6552_v42, %v14284_v30  ;;  %v6990_v13 = vrot.slane %v14187_v38, 6 }
 0x62b   : > { %v6991_v18 = vrot.slane %v14184_v31, 7  ;;  %v6435_v59 = vrot.slane %v14276_v2, 1  ;;  %v6558_v56 = vrot.slane %v14279_v62, 1  ;;  %v6559_v61 = vrot.slane %v14276_v2, 2 }
 0x62c   : > { %v6371_v54 = vpop.f32.mrf.mxu1  ;;  %v6812_v4 = vor.u32 %v6811_v26, %v6810_v21  ;;  %v6910_v12 = vrot.slane %v14187_v38, 5  ;;  %v6911_v36 = vrot.slane %v14184_v31, 6  ;;  %v7085_v5 = vrot.slane %v14187_v38, 7 }
 0x62d   : > { %v6992_v25 = vor.u32 %v6991_v18, %v6990_v13  ;;  %v14331_v42 = vor.u32 %v6639_v58, %v6638_v23  ;;  %v6738_v48 = vrot.slane %v14279_v62, 3  ;;  %v6739_v45 = vrot.slane %v14276_v2, 4 }
 0x62e   : > { %6580 = vrot.lane.b32.xlu1 %v6553_v46, %s15632_s22  ;;  %6760 = vrot.lane.b32.xlu0 %v6733_v11, %s15632_s22  ;;  %v14337_v9 = vsel %vm6794_vm13, %v14173_v55, %v6812_v4  ;;  %v6912_v11 = vor.u32 %v6911_v36, %v6910_v12  ;;  %v7086_v38 = vor.u32 %v7085_v5, %v14184_v31  ;;  %v6815_v54 = vrot.slane %v14227_v3, 5 }
 0x62f   : > { %v14341_v46 = vsel %vm6974_vm14, %v14211_v49, %v6992_v25  ;;  %v6994_v23 = vrot.slane %v14233_v41, 6  ;;  %v6995_v55 = vrot.slane %v14227_v3, 7  ;;  %v6436_v58 = vsel %vm6384_vm8, %v6431_v33, %v6435_v59 }
 0x630   : > { %v14353_v49 = vor.u32 %v14279_v62, %v6435_v59  ;;  %v14356_v21 = vsel %vm6894_vm15, %v6908_v19, %v6912_v11  ;;  %v14361_v31 = vsel %vm7074_vm3, %v7082_v37, %v7086_v38  ;;  %v6914_v13 = vrot.slane %v14233_v41, 5 }
 0x631   : > { %v6996_v26 = vor.u32 %v6995_v55, %v6994_v23  ;;  %v6915_v33 = vrot.slane %v14227_v3, 6  ;;  %v6641_v18 = vsel %vm6614_vm10, %v6636_v1, %v14331_v42  ;;  %v14369_v19 = vor.u32 %v6559_v61, %v6558_v56 }
 0x632   : > { %6522 = vrot.lane.b32.xlu1 %v6505_v29, %s15634_s17  ;;  %6702 = vrot.lane.b32.xlu0 %v6685_v39, %s15634_s17  ;;  %v6814_v29 = vrot.slane %v14233_v41, 4  ;;  %v6737_v39 = vsel %vm6714_vm12, %v14249_v53, %v14295_v60  ;;  %v14371_v59 = vor.u32 %v6739_v45, %v6738_v48  ;;  %v6818_v12 = vrot.slane %v14279_v62, 4 }
 0x633   : > { %v14382_v36 = vshrl.u32 %v14149_v44, 16  ;;  %v7089_v1 = vor.u32 %v7088_v20, %v14227_v3  ;;  %v6819_v56 = vrot.slane %v14276_v2, 5  ;;  %v6998_v61 = vrot.slane %v14279_v62, 6 }
 0x634   : > { %v6816_v53 = vor.u32 %v6815_v54, %v6814_v29  ;;  %v15629_v41 = vrot.slane %v14149_v44, 1  ;;  %v6999_v48 = vrot.slane %v14276_v2, 7  ;;  %v6918_v38 = vrot.slane %v14279_v62, 5 }
 0x635   : > { %v14398_v3 = vsel %vm7074_vm3, %v7085_v5, %v7089_v1  ;;  %v6820_v45 = vor.u32 %v6819_v56, %v6818_v12  ;;  %v6561_v29 = vsel %vm6534_vm11, %v14284_v30, %v14369_v19  ;;  %v14408_v23 = vshrl.u32 %v14194_v0, 16 }
 0x636   : > { %6472 = vrot.lane.b32.xlu1 %v6428_v47, %s15636_s30  ;;  %6662 = vrot.lane.b32.xlu0 %v6637_v6, %s15636_s30  ;;  %v14375_v37 = vsel %vm6794_vm13, %v6812_v4, %v6816_v53  ;;  %v14378_v47 = vsel %vm6974_vm14, %v6992_v25, %v6996_v26  ;;  %v6916_v6 = vor.u32 %v6915_v33, %v6914_v13  ;;  %v14391_v4 = vshll.u32 %v14149_v44, 16 }
 0x637   : > { %v7000_v54 = vor.u32 %v6999_v48, %v6998_v61  ;;  %v14411_v5 = vsel %vm6794_vm13, %v6816_v53, %v6820_v45  ;;  %v6822_v13 = vrot.slane %v14382_v36, 4  ;;  %v7002_v12 = vrot.slane %v14382_v36, 6 }
 0x638   : > { %v14394_v25 = vsel %vm6894_vm15, %v6912_v11, %v6916_v6  ;;  %v7091_v11 = vrot.slane %v14279_v62, 7  ;;  %v6823_v33 = vrot.slane %v14391_v4, 5  ;;  %v6741_v53 = vsel %vm6714_vm12, %v14295_v60, %v14371_v59 }
 0x639   : > { %v14419_v30 = vsel %vm6974_vm14, %v6996_v26, %v7000_v54  ;;  %v14428_v1 = vshll.u32 %v14194_v0, 16  ;;  %v6922_v60 = vrot.slane %v14382_v36, 5  ;;  %v6923_v48 = vrot.slane %v14391_v4, 6 }
 0x63a   : > { %6582 = vrot.lane.b32.xlu1 %v6557_v51, %s15632_s22  ;;  %6762 = vrot.lane.b32.xlu0 %v6737_v39, %s15632_s22  ;;  %v6919_v51 = vrot.slane %v14276_v2, 6  ;;  %v15628_v39 = vrot.slane %v14149_v44, 3  ;;  %v7092_v62 = vor.u32 %v7091_v11, %v14276_v2  ;;  %v6509_v2 = vsel %vm6494_vm7, %v6506_v28, %v15629_v41 }
 0x63b   : > { %v6824_v56 = vor.u32 %v6823_v33, %v6822_v13  ;;  %v6826_v13 = vrot.slane %v14408_v23, 4  ;;  %v14470_v22 = vshrl.u32 %v14238_v10, 16  ;;  %v6383_v7 = vpack.c.bf16 %v14254_v35, %v14254_v35 }
 0x63c   : > { %v6920_v55 = vor.u32 %v6919_v51, %v6918_v38  ;;  %v14440_v26 = vsel %vm7074_vm3, %v7088_v20, %v7092_v62  ;;  %v7094_v38 = vrot.slane %v14382_v36, 7  ;;  %v6642_v20 = vrot.slane %v14382_v36, 2 }
 0x63d   : > { %v14455_v51 = vsel %vm6794_vm13, %v6820_v45, %v6824_v56  ;;  %v6924_v62 = vor.u32 %v6923_v48, %v6922_v60  ;;  %v7007_v45 = vrot.slane %v14428_v1, 7  ;;  %v6926_v41 = vrot.slane %v14408_v23, 5 }
 0x63e   : > { %6524 = vrot.lane.b32.xlu1 %v14300_v63, %s15634_s17  ;;  %6704 = vrot.lane.b32.xlu0 %v14305_v8, %s15634_s17  ;;  %v14431_v63 = vsel %vm6894_vm15, %v6916_v6, %v6920_v55  ;;  %v7003_v8 = vrot.slane %v14391_v4, 7  ;;  %v6689_v6 = vsel %vm5887_vm2, %v6686_v17, %v15628_v39  ;;  %v7095_v33 = vor.u32 %v7094_v38, %v14391_v4 }
 0x63f   : > { %v6927_v28 = vrot.slane %v14428_v1, 6  ;;  %v6562_v14 = vrot.slane %v14382_v36, 1  ;;  %v6742_v35 = vrot.slane %v14382_v36, 3 }
 0x640   : > { %v7004_v61 = vor.u32 %v7003_v8, %v7002_v12  ;;  %v6827_v12 = vrot.slane %v14428_v1, 5  ;;  %v7006_v8 = vrot.slane %v14408_v23, 6  ;;  %v14476_v60 = vsel %vm7074_vm3, %v7091_v11, %v7095_v33 }
 0x641   : > { %15857 = vst [vmem:[#allocation16_spill] sm:$0xff] %v14476_v60  ;;  %v6928_v33 = vor.u32 %v6927_v28, %v6926_v41 }
 0x642   : > { %6474 = vrot.lane.b32.xlu1 %v6436_v58, %s15636_s30  ;;  %6664 = vrot.lane.b32.xlu0 %v6641_v18, %s15636_s30  ;;  %v14459_v17 = vsel %vm6974_vm14, %v7000_v54, %v7004_v61  ;;  %v6643_v58 = vrot.slane %v14391_v4, 3  ;;  %v14465_v18 = vshll.u32 %v14238_v10, 16  ;;  %v14473_v54 = vsel %vm6894_vm15, %v6920_v55, %v6924_v62 }
 0x643   : > { %15855 = vst [vmem:[#allocation14_spill] sm:$0xff] %v14459_v17  ;;  %15856 = vst [vmem:[#allocation15_spill] sm:$0xff] %v14473_v54  ;;  %v6828_v48 = vor.u32 %v6827_v12, %v6826_v13  ;;  %v7008_v39 = vor.u32 %v7007_v45, %v7006_v8  ;;  %v6563_v55 = vrot.slane %v14391_v4, 2  ;;  %v7097_v13 = vrot.slane %v14408_v23, 7 }
 0x644   : > { %v6644_v12 = vor.u32 %v6643_v58, %v6642_v20  ;;  %v6830_v45 = vrot.slane %v14470_v22, 4  ;;  %v6831_v60 = vrot.slane %v14465_v18, 5  ;;  %v7104_v54 = vshll.u32 %v6383_v7, 16 }
 0x645   : > { %v14487_v11 = vsel %vm6794_vm13, %v6824_v56, %v6828_v48  ;;  %v7098_v8 = vor.u32 %v7097_v13, %v14428_v1  ;;  %v14501_v56 = vsel %vm6894_vm15, %v6924_v62, %v6928_v33  ;;  %v7011_v7 = vrot.slane %v14465_v18, 7 }
 0x646   : > { %6584 = vrot.lane.b32.xlu1 %v6561_v29, %s15632_s22  ;;  %6764 = vrot.lane.b32.xlu0 %v6741_v53, %s15632_s22  ;;  %15858 = vst [vmem:[#allocation17_spill] sm:$0xff] %v14487_v11  ;;  %v6743_v29 = vrot.slane %v14391_v4, 4  ;;  %v14493_v53 = vsel %vm6974_vm14, %v7004_v61, %v7008_v39  ;;  %15860 = vst [vmem:[#allocation19_spill] sm:$0xff] %v14501_v56  ;;  %v7010_v11 = vrot.slane %v14470_v22, 6  ;;  %v15861_v61 = vrot.slane %v14391_v4, 1 }
 0x647   : > { %15859 = vst [vmem:[#allocation18_spill] sm:$0xff] %v14493_v53  ;;  %v14509_v28 = vsel %vm7074_vm3, %v7094_v38, %v7098_v8  ;;  %v14511_v20 = vor.u32 %v6831_v60, %v6830_v45  ;;  %v6931_v62 = vrot.slane %v14465_v18, 6  ;;  %v7100_v58 = vrot.slane %v14470_v22, 7 }
 0x648   : > { %v6444_v41 = vsel %vm6384_vm8, %v14353_v49, %v15861_v61  ;;  %v6645_v56 = vsel %vm6614_vm10, %v14331_v42, %v6644_v12  ;;  %v6744_v53 = vor.u32 %v6743_v29, %v6742_v35  ;;  %v14519_v17 = vor.u32 %v7011_v7, %v7010_v11 }
 0x649   : > { %v14523_v49 = vsel %vm6794_vm13, %v6828_v48, %v14511_v20  ;;  %v7101_v38 = vor.u32 %v7100_v58, %v14465_v18  ;;  %v14531_v60 = vsel %vm7074_vm3, %v7100_v58, %v7104_v54  ;;  %v6690_v48 = vrot.slane %v14194_v0, 3 }
 0x64a   : > { %6526 = vrot.lane.b32.xlu1 %v6509_v2, %s15634_s17  ;;  %6706 = vrot.lane.b32.xlu0 %v6689_v6, %s15634_s17  ;;  %v6564_v2 = vor.u32 %v6563_v55, %v6562_v14  ;;  %v6930_v6 = vrot.slane %v14470_v22, 5  ;;  %v14535_v42 = vsel %vm6974_vm14, %v7008_v39, %v14519_v17  ;;  %v6510_v55 = vrot.slane %v14194_v0, 1 }
 0x64b   : > { %v14544_v35 = vsel %vm7074_vm3, %v7097_v13, %v7101_v38  ;;  %v6745_v54 = vsel %vm6714_vm12, %v14371_v59, %v6744_v53  ;;  %v6646_v39 = vrot.slane %v14408_v23, 2  ;;  %v6647_v8 = vrot.slane %v14428_v1, 3  ;;  %v10773_v38 = vld [vmem:[%s15614_s4 + $0xf8] sm:$0xff]  }
 0x64c   : > { %v14527_v14 = vor.u32 %v6931_v62, %v6930_v6  ;;  %v6565_v29 = vsel %vm6534_vm11, %v14369_v19, %v6564_v2  ;;  %v15863_v13 = vrot.slane %v14149_v44, 3  ;;  %v6451_v19 = vrot.slane %v14428_v1, 1  ;;  %9839 = vmatprep.subr.bf16.mxu1 %v10773_v38 }
 0x64d   : > { %v6566_v59 = vrot.slane %v14408_v23, 1  ;;  %v14562_v61 = vor.u32 %v6647_v8, %v6646_v39  ;;  %v6746_v7 = vrot.slane %v14408_v23, 3  ;;  %v6747_v6 = vrot.slane %v14428_v1, 4 }
 0x64e   : > { %6476 = vrot.lane.b32.xlu1 %v6444_v41, %s15636_s30  ;;  %6666 = vrot.lane.b32.xlu0 %v6645_v56, %s15636_s30  ;;  %v14541_v11 = vsel %vm6894_vm15, %v6928_v33, %v14527_v14  ;;  %v15862_v33 = vrot.slane %v14149_v44, 1  ;;  %v6691_v56 = vsel %vm5887_vm2, %v15863_v13, %v6690_v48  ;;  %v6567_v41 = vrot.slane %v14428_v1, 2 }
 0x64f   : > { %v15864_v62 = vrot.slane %v14391_v4, 1  ;;  %v14580_v1 = vor.u32 %v6747_v6, %v6746_v7  ;;  %v6512_v13 = vrot.slane %v14238_v10, 1  ;;  %vm7168_vm13 = vcmask 785408  }
 0x650   : > { %v6511_v45 = vsel %vm6494_vm7, %v15862_v33, %v6510_v55  ;;  %v14578_v39 = vor.u32 %v6567_v41, %v6566_v59  ;;  %v15631_v59 = vrot.slane %v13917_v24, 2 }
 0x651   : > { %v6447_v58 = vor.u32 %v14382_v36, %v15864_v62  ;;  %v6749_v33 = vsel %vm6714_vm12, %v6744_v53, %v14580_v1  ;;  %v6595_v53 = vrot.slane %v13898_v16, 2  ;;  %v6513_v6 = vsel %vm6494_vm7, %v6510_v55, %v6512_v13 }
 0x652   : > { %6586 = vrot.lane.b32.xlu1 %v6565_v29, %s15632_s22  ;;  %6766 = vrot.lane.b32.xlu0 %v6745_v54, %s15632_s22  ;;  %v6649_v54 = vsel %vm6614_vm10, %v6644_v12, %v14562_v61  ;;  %v6569_v8 = vsel %vm6534_vm11, %v6564_v2, %v14578_v39  ;;  %v6650_v62 = vrot.slane %v14470_v22, 2  ;;  %v6455_v55 = vor.u32 %v14408_v23, %v6451_v19  ;;  %v10774_v23 = vld [vmem:[%s15614_s4 + $0xb8] sm:$0xff]  }
 0x653   : > { %v6452_v29 = vsel %vm6384_vm8, %v6447_v58, %v6451_v19  ;;  %v6597_v41 = vsel %vm6594_vm4, %v6595_v53, %v15631_v59  ;;  %v6651_v58 = vrot.slane %v14465_v18, 3  ;;  %v10775_v19 = vld [vmem:[%s15614_s4 + $0xf0] sm:$0xff]  }
 0x656   : > { %6528 = vrot.lane.b32.xlu1 %v6511_v45, %s15634_s17  ;;  %6708 = vrot.lane.b32.xlu0 %v6691_v56, %s15634_s17  ;;  %v6692_v56 = vrot.slane %v14238_v10, 3 }
 0x65a   : > { %6478 = vrot.lane.b32.xlu1 %v6452_v29, %s15636_s30  ;;  %6668 = vrot.lane.b32.xlu0 %v6649_v54, %s15636_s30  ;;  %v6693_v54 = vsel %vm5887_vm2, %v6690_v48, %v6692_v56  ;;  %v6751_v48 = vrot.slane %v14465_v18, 4  ;;  %vm6954_vm2 = vcmask 1041408  }
 0x65c   : > { %v14584_v4 = vpop.permute.xlu0 %7054  ;;  %v6695_v36 = vpop.permute.xlu1 %6694 }
 0x65e   : > { %6588 = vrot.lane.b32.xlu1 %v6569_v8, %s15632_s22  ;;  %6768 = vrot.lane.b32.xlu0 %v6749_v33, %s15632_s22  ;;  %v6459_v8 = vrot.slane %v14465_v18, 1  ;;  %v6750_v33 = vrot.slane %v14470_v22, 3 }
 0x660   : > { %v6515_v12 = vpop.permute.xlu1 %6514  ;;  %v6465_v45 = vpop.permute.xlu0 %6464 }
 0x661   : > { %v7129_v38 = vsel %vm7127_vm5, %v13898_v16, %v6465_v45  ;;  %v6652_v45 = vor.u32 %v6651_v58, %v6650_v62  ;;  %v6752_v62 = vor.u32 %v6751_v48, %v6750_v33  ;;  %v6570_v58 = vrot.slane %v14470_v22, 1  ;;  %v10778_v33 = vld [vmem:[%s15614_s4 + $0xa8] sm:$0xff]  }
 0x662   : > { %6532 = vrot.lane.b32.xlu1 %v6512_v13, %s15634_s17  ;;  %6712 = vrot.lane.b32.xlu0 %v6692_v56, %s15634_s17  ;;  %v7149_v53 = vsel %vm2933_vm0, %v7129_v38, %v6515_v12  ;;  %v6571_v38 = vrot.slane %v14465_v18, 2 }
 0x663   : > { %v6653_v18 = vsel %vm6614_vm10, %v14562_v61, %v6652_v45  ;;  %v6753_v61 = vsel %vm6714_vm12, %v14580_v1, %v6752_v62  ;;  %v6598_v1 = vrot.slane %v13965_v34, 2 }
 0x664   : > { %v14598_v2 = vpop.permute.xlu1 %6874  ;;  %v6655_v7 = vpop.permute.xlu0 %6654 }
 0x665   : > { %v7201_v29 = vsel %vm7127_vm5, %v6597_v41, %v6655_v7  ;;  %v6460_v7 = vsel %vm6384_vm8, %v6455_v55, %v6459_v8 }
 0x666   : > { %6530 = vrot.lane.b32.xlu1 %v6513_v6, %s15634_s17  ;;  %6710 = vrot.lane.b32.xlu0 %v6693_v54, %s15634_s17  ;;  %v7230_v41 = vsel %vm2933_vm0, %v7201_v29, %v6695_v36  ;;  %v10776_v29 = vld [vmem:[%s15614_s4 + $0xb0] sm:$0xff]   ;;  %v10777_v54 = vld [vmem:[%s15614_s4 + $0xe8] sm:$0xff]  }
 0x668   : > { %v6575_v13 = vpop.permute.xlu1 %6574  ;;  %v6755_v59 = vpop.permute.xlu0 %6754 }
 0x669   : > { %v7170_v56 = vsel %vm7168_vm13, %v7149_v53, %v6575_v13  ;;  %v7250_v6 = vsel %vm7168_vm13, %v7230_v41, %v6755_v59  ;;  %v6463_v59 = vor.u32 %v14470_v22, %v6459_v8  ;;  %v6572_v22 = vor.u32 %v6571_v38, %v6570_v58  ;;  %v10779_v13 = vld [vmem:[%s15614_s4 + $0xe0] sm:$0xff]  }
 0x66a   : > { %6480 = vrot.lane.b32.xlu1 %v6460_v7, %s15636_s30  ;;  %6672 = vrot.lane.b32.xlu0 %v6652_v45, %s15636_s30  ;;  %v10780_v45 = vld [vmem:[%s15614_s4 + $0xa0] sm:$0xff]   ;;  %v15865_v58 = vrot.slane %v13917_v24, 2 }
 0x66b   : > { %7734 = vmatprep.mubr.bf16.mxu1 %v7250_v6  ;;  %v6573_v48 = vsel %vm6534_vm11, %v14578_v39, %v6572_v22  ;;  %v6860_v6 = vrot.slane %v14006_v52, 5 }
 0x66c   : > { %7735 = vmatmul.mubr.bf16.vlgmr.msra.gmra.mxu1 %v7170_v56  ;;  %v14629_v36 = vpop.permute.xlu1 %6834  ;;  %v14631_v12 = vpop.permute.xlu0 %7014  ;;  %v10781_v56 = vld [vmem:[%s15614_s4 + $0xd8] sm:$0xff]   ;;  %v6599_v38 = vsel %vm6594_vm4, %v15865_v58, %v6598_v1 }
 0x66d   : > { %9840 = vmatpush3.bf16.msra.mxu1 %v10774_v23  ;;  %v7040_v23 = vrot.slane %v14006_v52, 7 }
 0x66e   : > { %6482 = vrot.lane.b32.xlu1 %v6463_v59, %s15636_s30  ;;  %6772 = vrot.lane.b32.xlu0 %v6752_v62, %s15632_s22  ;;  %v10783_v59 = vld [vmem:[%s15614_s4 + $0xd0] sm:$0xff]  }
 0x66f   : > { %9841 = vmatprep.subr.bf16.mxu1 %v10775_v19  ;;  %v10782_v19 = vld [vmem:[%s15614_s4 + $0x98] sm:$0xff]  }
 0x670   : > { %v14644_v8 = vpop.permute.xlu1 %6934  ;;  %v14646_v55 = vpop.permute.xlu0 %7107 }
 0x671   : > { %9842 = vmatpush3.bf16.msra.mxu1 %v10776_v29 }
 0x672   : > { %6592 = vrot.lane.b32.xlu1 %v6572_v22, %s15632_s22  ;;  %6670 = vrot.lane.b32.xlu0 %v6653_v18, %s15636_s30  ;;  %v15867_v18 = vrot.slane %v13965_v34, 7 }
 0x673   : > { %9843 = vmatprep.subr.bf16.mxu1 %v10777_v54 }
 0x674   : > { %v6517_v53 = vpop.permute.xlu1 %6516  ;;  %v6697_v41 = vpop.permute.xlu0 %6696 }
 0x675   : > { %9844 = vmatpush3.bf16.msra.mxu1 %v10778_v33  ;;  %v7041_v33 = vsel %vm7034_vm6, %v15867_v18, %v7040_v23 }
 0x676   : > { %6590 = vrot.lane.b32.xlu1 %v6573_v48, %s15632_s22  ;;  %6770 = vrot.lane.b32.xlu0 %v6753_v61, %s15632_s22  ;;  %v10785_v48 = vld [vmem:[%s15614_s4 + $0xc8] sm:$0xff]  }
 0x677   : > { %9845 = vmatprep.subr.bf16.mxu1 %v10779_v13  ;;  %v10784_v13 = vld [vmem:[%s15614_s4 + $0x90] sm:$0xff]  }
 0x678   : > { %v14670_v7 = vpop.permute.xlu1 %6876  ;;  %v14672_v39 = vpop.permute.xlu0 %7056 }
 0x679   : > { %9846 = vmatpush3.bf16.msra.mxu1 %v10780_v45 }
 0x67a   : > { %6838 = vrot.lane.b32.xlu1 %v14191_v57, %s15636_s30  ;;  %7018 = vrot.lane.b32.xlu0 %v14244_v32, %s15636_s30  ;;  %v15866_v57 = vrot.slane %v13965_v34, 5 }
 0x67b   : > { %9847 = vmatprep.subr.bf16.mxu1 %v10781_v56 }
 0x67c   : > { %v6467_v62 = vpop.permute.xlu1 %6466  ;;  %v6657_v29 = vpop.permute.xlu0 %6656  ;;  %v6861_v32 = vsel %vm6854_vm9, %v15866_v57, %v6860_v6 }
 0x67d   : > { %v7131_v54 = vsel %vm7127_vm5, %v13917_v24, %v6467_v62  ;;  %v7204_v22 = vsel %vm7127_vm5, %v6599_v38, %v6657_v29  ;;  %9848 = vmatpush3.bf16.msra.mxu1 %v10782_v19  ;;  %v10786_v38 = vld [vmem:[%s15614_s4 + $0x88] sm:$0xff]   ;;  %v6862_v29 = vrot.slane %v14035_v15, 5 }
 0x67e   : > { %6878 = vrot.lane.b32.xlu1 %v6861_v32, %s15634_s17  ;;  %7058 = vrot.lane.b32.xlu0 %v7041_v33, %s15634_s17  ;;  %v7151_v61 = vsel %vm2933_vm0, %v7131_v54, %v6517_v53  ;;  %v7232_v62 = vsel %vm2933_vm0, %v7204_v22, %v6697_v41  ;;  %v10787_v53 = vld [vmem:[%s15614_s4 + $0xc0] sm:$0xff]   ;;  %v7042_v54 = vrot.slane %v14035_v15, 7 }
 0x67f   : > { %9849 = vmatprep.subr.bf16.mxu1 %v10783_v59  ;;  %v6863_v57 = vsel %vm6854_vm9, %v6860_v6, %v6862_v29 }
 0x680   : > { %v6577_v45 = vpop.permute.xlu1 %6576  ;;  %v6757_v56 = vpop.permute.xlu0 %6756  ;;  %v7043_v32 = vsel %vm7034_vm6, %v7040_v23, %v7042_v54 }
 0x681   : > { %v7173_v19 = vsel %vm7168_vm13, %v7151_v61, %v6577_v45  ;;  %v7253_v58 = vsel %vm7168_vm13, %v7232_v62, %v6757_v56  ;;  %9850 = vmatpush3.bf16.msra.mxu1 %v10784_v13  ;;  %v6864_v61 = vrot.slane %v14077_v40, 5  ;;  %v7044_v45 = vrot.slane %v14077_v40, 7 }
 0x682   : > { %6938 = vrot.lane.b32.xlu1 %v14293_v27, %s15632_s22  ;;  %7111 = vrot.lane.b32.xlu0 %v14310_v50, %s15632_s22  ;;  %v10788_v27 = vld [vmem:[%s15614_s4 + $0x80] sm:$0xff]  }
 0x683   : > { %7742 = vmatprep.mubr.bf16.mxu1 %v7253_v58  ;;  %9851 = vmatprep.subr.bf16.mxu1 %v10785_v48  ;;  %v7045_v58 = vsel %vm7034_vm6, %v7042_v54, %v7044_v45 }
 0x684   : > { %7743 = vmatmul.mubr.bf16.gmra.mxu1 %v7173_v19  ;;  %v14721_v41 = vpop.permute.xlu1 %6836  ;;  %v14723_v59 = vpop.permute.xlu0 %7016  ;;  %v6865_v19 = vsel %vm6854_vm9, %v6862_v29, %v6864_v61 }
 0x685   : > { %9852 = vmatpush3.bf16.msra.mxu1 %v10786_v38 }
 0x686   : > { %6840 = vrot.lane.b32.xlu1 %v14337_v9, %s15636_s30  ;;  %7020 = vrot.lane.b32.xlu0 %v14341_v46, %s15636_s30  ;;  %v6600_v9 = vrot.slane %v14006_v52, 2 }
 0x687   : > { %9853 = vmatprep.subr.bf16.mxu1 %v10787_v53  ;;  %v6602_v53 = vrot.slane %v14035_v15, 2 }
 0x688   : > { %v14734_v50 = vpop.permute.xlu1 %6936  ;;  %v14736_v22 = vpop.permute.xlu0 %7109  ;;  %v6601_v6 = vsel %vm6594_vm4, %v6598_v1, %v6600_v9 }
 0x689   : > { %9854 = vmatpush3.bf16.msra.mxu1 %v10788_v27  ;;  %v6603_v54 = vsel %vm6594_vm4, %v6600_v9, %v6602_v53 }
 0x68a   : > { %6880 = vrot.lane.b32.xlu1 %v6863_v57, %s15634_s17  ;;  %7060 = vrot.lane.b32.xlu0 %v7043_v32, %s15634_s17 }
 0x68c   : > { %v6519_v18 = vpop.permute.xlu1 %6518  ;;  %v6699_v33 = vpop.permute.xlu0 %6698 }
 0x68e   : > { %6940 = vrot.lane.b32.xlu1 %v14356_v21, %s15632_s22  ;;  %7113 = vrot.lane.b32.xlu0 %v14361_v31, %s15632_s22 }
 0x690   : > { %v6469_v46 = vpop.permute.xlu1 %6468  ;;  %v6659_v13 = vpop.permute.xlu0 %6658 }
 0x691   : > { %v7133_v23 = vsel %vm7127_vm5, %v13965_v34, %v6469_v46  ;;  %v7207_v48 = vsel %vm7127_vm5, %v6601_v6, %v6659_v13 }
 0x692   : > { %6842 = vrot.lane.b32.xlu1 %v14375_v37, %s15636_s30  ;;  %7022 = vrot.lane.b32.xlu0 %v14378_v47, %s15636_s30  ;;  %v7153_v21 = vsel %vm2933_vm0, %v7133_v23, %v6519_v18  ;;  %v7234_v56 = vsel %vm2933_vm0, %v7207_v48, %v6699_v33  ;;  %v6866_v18 = vrot.slane %v14109_v43, 5  ;;  %v7046_v33 = vrot.slane %v14109_v43, 7 }
 0x694   : > { %v6579_v31 = vpop.permute.xlu1 %6578  ;;  %v6759_v1 = vpop.permute.xlu0 %6758  ;;  %v6867_v13 = vsel %vm6854_vm9, %v6864_v61, %v6866_v18  ;;  %v7047_v23 = vsel %vm7034_vm6, %v7044_v45, %v7046_v33 }
 0x695   : > { %v7176_v62 = vsel %vm7168_vm13, %v7153_v21, %v6579_v31  ;;  %v7256_v38 = vsel %vm7168_vm13, %v7234_v56, %v6759_v1  ;;  %v6604_v21 = vrot.slane %v14077_v40, 2 }
 0x696   : > { %6882 = vrot.lane.b32.xlu1 %v6865_v19, %s15634_s17  ;;  %7062 = vrot.lane.b32.xlu0 %v7045_v58, %s15634_s17  ;;  %v7048_v19 = vrot.slane %v14149_v44, 7 }
 0x697   : > { %7750 = vmatprep.mubr.bf16.mxu1 %v7256_v38  ;;  %v6605_v45 = vsel %vm6594_vm4, %v6602_v53, %v6604_v21 }
 0x698   : > { %7751 = vmatmul.mubr.bf16.gmra.mxu1 %v7176_v62  ;;  %v6521_v37 = vpop.permute.xlu1 %6520  ;;  %v6701_v47 = vpop.permute.xlu0 %6700  ;;  %v6868_v62 = vrot.slane %v14149_v44, 5 }
 0x69a   : > { %6942 = vrot.lane.b32.xlu1 %v14394_v25, %s15632_s22  ;;  %7115 = vrot.lane.b32.xlu0 %v14398_v3, %s15632_s22  ;;  %v6869_v53 = vsel %vm6854_vm9, %v6866_v18, %v6868_v62 }
 0x69c   : > { %v6471_v29 = vpop.permute.xlu1 %6470  ;;  %v6661_v27 = vpop.permute.xlu0 %6660 }
 0x69d   : > { %v7135_v57 = vsel %vm7127_vm5, %v14006_v52, %v6471_v29  ;;  %v7210_v32 = vsel %vm7127_vm5, %v6603_v54, %v6661_v27  ;;  %v7049_v29 = vsel %vm7034_vm6, %v7046_v33, %v7048_v19 }
 0x69e   : > { %6844 = vrot.lane.b32.xlu1 %v14411_v5, %s15636_s30  ;;  %7024 = vrot.lane.b32.xlu0 %v14419_v30, %s15636_s30  ;;  %v7155_v25 = vsel %vm2933_vm0, %v7135_v57, %v6521_v37  ;;  %v7236_v46 = vsel %vm2933_vm0, %v7210_v32, %v6701_v47  ;;  %v6606_v57 = vrot.slane %v14109_v43, 2  ;;  %v15869_v32 = vld [vmem:[#allocation15_spill] sm:$0xff] }
 0x6a0   : > { %v6581_v3 = vpop.permute.xlu1 %6580  ;;  %v6761_v9 = vpop.permute.xlu0 %6760  ;;  %v6607_v33 = vsel %vm6594_vm4, %v6604_v21, %v6606_v57 }
 0x6a1   : > { %v7179_v6 = vsel %vm7168_vm13, %v7155_v25, %v6581_v3  ;;  %v7259_v48 = vsel %vm7168_vm13, %v7236_v46, %v6761_v9  ;;  %v15870_v25 = vld [vmem:[#allocation16_spill] sm:$0xff] }
 0x6a2   : > { %6884 = vrot.lane.b32.xlu1 %v6867_v13, %s15634_s17  ;;  %7064 = vrot.lane.b32.xlu0 %v7047_v23, %s15634_s17  ;;  %v7050_v13 = vrot.slane %v14194_v0, 7  ;;  %v15871_v23 = vld [vmem:[#allocation17_spill] sm:$0xff] }
 0x6a3   : > { %7758 = vmatprep.mubr.bf16.mxu1 %v7259_v48  ;;  %v15872_v48 = vld [vmem:[#allocation18_spill] sm:$0xff] }
 0x6a4   : > { %7759 = vmatmul.mubr.bf16.gmra.mxu1 %v7179_v6  ;;  %v6523_v5 = vpop.permute.xlu1 %6522  ;;  %v6703_v30 = vpop.permute.xlu0 %6702  ;;  %v6870_v6 = vrot.slane %v14194_v0, 5 }
 0x6a6   : > { %6944 = vrot.lane.b32.xlu1 %v14431_v63, %s15632_s22  ;;  %7117 = vrot.lane.b32.xlu0 %v14440_v26, %s15632_s22  ;;  %v15868_v63 = vld [vmem:[#allocation14_spill] sm:$0xff] }
 0x6a8   : > { %v6473_v61 = vpop.permute.xlu1 %6472  ;;  %v6663_v31 = vpop.permute.xlu0 %6662 }
 0x6a9   : > { %v7137_v1 = vsel %vm7127_vm5, %v14035_v15, %v6473_v61  ;;  %v7213_v56 = vsel %vm7127_vm5, %v6605_v45, %v6663_v31  ;;  %v6871_v31 = vsel %vm6854_vm9, %v6868_v62, %v6870_v6  ;;  %v15873_v62 = vld [vmem:[#allocation19_spill] sm:$0xff] }
 0x6aa   : > { %6846 = vrot.lane.b32.xlu1 %v14455_v51, %s15636_s30  ;;  %7026 = vrot.lane.b32.xlu0 %v15868_v63, %s15636_s30  ;;  %v7157_v26 = vsel %vm2933_vm0, %v7137_v1, %v6523_v5  ;;  %v7238_v37 = vsel %vm2933_vm0, %v7213_v56, %v6703_v30  ;;  %v7051_v1 = vsel %vm7034_vm6, %v7048_v19, %v7050_v13 }
 0x6ac   : > { %v6583_v58 = vpop.permute.xlu1 %6582  ;;  %v6763_v38 = vpop.permute.xlu0 %6762 }
 0x6ad   : > { %v7182_v47 = vsel %vm7168_vm13, %v7157_v26, %v6583_v58  ;;  %v7262_v54 = vsel %vm7168_vm13, %v7238_v37, %v6763_v38  ;;  %v6608_v58 = vrot.slane %v14149_v44, 2  ;;  %v6872_v38 = vrot.slane %v14238_v10, 5 }
 0x6ae   : > { %6886 = vrot.lane.b32.xlu1 %v6869_v53, %s15634_s17  ;;  %7066 = vrot.lane.b32.xlu0 %v7049_v29, %s15634_s17  ;;  %v7052_v37 = vrot.slane %v14238_v10, 7 }
 0x6af   : > { %7766 = vmatprep.mubr.bf16.mxu1 %v7262_v54 }
 0x6b0   : > { %7767 = vmatmul.mubr.bf16.gmra.mxu1 %v7182_v47  ;;  %v6525_v51 = vpop.permute.xlu1 %6524  ;;  %v6705_v27 = vpop.permute.xlu0 %6704  ;;  %v6609_v47 = vsel %vm6594_vm4, %v6606_v57, %v6608_v58 }
 0x6b2   : > { %6946 = vrot.lane.b32.xlu1 %v15869_v32, %s15632_s22  ;;  %7119 = vrot.lane.b32.xlu0 %v15870_v25, %s15632_s22 }
 0x6b4   : > { %v6475_v18 = vpop.permute.xlu1 %6474  ;;  %v6665_v3 = vpop.permute.xlu0 %6664 }
 0x6b5   : > { %v7139_v9 = vsel %vm7127_vm5, %v14077_v40, %v6475_v18  ;;  %v7216_v46 = vsel %vm7127_vm5, %v6607_v33, %v6665_v3 }
 0x6b6   : > { %6848 = vrot.lane.b32.xlu1 %v15871_v23, %s15636_s30  ;;  %7028 = vrot.lane.b32.xlu0 %v15872_v48, %s15636_s30  ;;  %v7159_v5 = vsel %vm2933_vm0, %v7139_v9, %v6525_v51  ;;  %v7240_v61 = vsel %vm2933_vm0, %v7216_v46, %v6705_v27  ;;  %v6873_v51 = vsel %vm6854_vm9, %v6870_v6, %v6872_v38  ;;  %v6610_v46 = vrot.slane %v14194_v0, 2 }
 0x6b7   : > { %v7053_v27 = vsel %vm7034_vm6, %v7050_v13, %v7052_v37 }
 0x6b8   : > { %v6585_v30 = vpop.permute.xlu1 %6584  ;;  %v6765_v21 = vpop.permute.xlu0 %6764  ;;  %v6611_v13 = vsel %vm6594_vm4, %v6608_v58, %v6610_v46 }
 0x6b9   : > { %v7185_v45 = vsel %vm7168_vm13, %v7159_v5, %v6585_v30  ;;  %v7265_v56 = vsel %vm7168_vm13, %v7240_v61, %v6765_v21 }
 0x6ba   : > { %6888 = vrot.lane.b32.xlu1 %v6871_v31, %s15634_s17  ;;  %7068 = vrot.lane.b32.xlu0 %v7051_v1, %s15634_s17 }
 0x6bb   : > { %7774 = vmatprep.mubr.bf16.mxu1 %v7265_v56  ;;  %v6612_v56 = vrot.slane %v14238_v10, 2 }
 0x6bc   : > { %7775 = vmatmul.mubr.bf16.gmra.mxu1 %v7185_v45  ;;  %v6527_v63 = vpop.permute.xlu1 %6526  ;;  %v6707_v26 = vpop.permute.xlu0 %6706 }
 0x6be   : > { %6948 = vrot.lane.b32.xlu1 %v15873_v62, %s15632_s22  ;;  %7121 = vrot.lane.b32.xlu0 %v14509_v28, %s15632_s22 }
 0x6c0   : > { %v6477_v19 = vpop.permute.xlu1 %6476  ;;  %v6667_v53 = vpop.permute.xlu0 %6666 }
 0x6c1   : > { %v7141_v29 = vsel %vm7127_vm5, %v14109_v43, %v6477_v19  ;;  %v7219_v54 = vsel %vm7127_vm5, %v6609_v47, %v6667_v53 }
 0x6c2   : > { %6890 = vrot.lane.b32.xlu1 %v6873_v51, %s15634_s17  ;;  %7070 = vrot.lane.b32.xlu0 %v7053_v27, %s15634_s17  ;;  %v7161_v32 = vsel %vm2933_vm0, %v7141_v29, %v6527_v63  ;;  %v7242_v57 = vsel %vm2933_vm0, %v7219_v54, %v6707_v26  ;;  %v6956_v27 = vrot.slane %v13917_v24, 6 }
 0x6c4   : > { %v6587_v28 = vpop.permute.xlu1 %6586  ;;  %v6767_v25 = vpop.permute.xlu0 %6766 }
 0x6c5   : > { %v7188_v18 = vsel %vm7168_vm13, %v7161_v32, %v6587_v28  ;;  %v7268_v33 = vsel %vm7168_vm13, %v7242_v57, %v6767_v25  ;;  %v6955_v25 = vrot.slane %v13898_v16, 6 }
 0x6c6   : > { %6852 = vrot.lane.b32.xlu1 %v14511_v20, %s15636_s30  ;;  %7032 = vrot.lane.b32.xlu0 %v14519_v17, %s15636_s30 }
 0x6c7   : > { %7782 = vmatprep.mubr.bf16.mxu1 %v7268_v33  ;;  %v6957_v33 = vsel %vm6954_vm2, %v6955_v25, %v6956_v27 }
 0x6c8   : > { %7783 = vmatmul.mubr.bf16.gmra.mxu1 %v7188_v18  ;;  %v6529_v3 = vpop.permute.xlu1 %6528  ;;  %v6709_v9 = vpop.permute.xlu0 %6708 }
 0x6ca   : > { %6850 = vrot.lane.b32.xlu1 %v14523_v49, %s15636_s30  ;;  %7030 = vrot.lane.b32.xlu0 %v14535_v42, %s15636_s30  ;;  %s11088_s30 = scalar_lea.vmem %s11087_s0, 32 }
 0x6cb   : > { %p11090_p1 = scmp.lt.s32.totalorder %s11088_s30, %s11082_s16 }
 0x6cc   : > { %v6479_v6 = vpop.permute.xlu1 %6478  ;;  %v6669_v23 = vpop.permute.xlu0 %6668 }
 0x6cd   : > { %v7143_v20 = vsel %vm7127_vm5, %v14149_v44, %v6479_v6  ;;  %v7222_v17 = vsel %vm7127_vm5, %v6611_v13, %v6669_v23  ;;  %v6776_v13 = vrot.slane %v13917_v24, 4  ;;  %p11091_p2 = por %p11090_p1, %p11089_p0 }
 0x6ce   : > { %6950 = vrot.lane.b32.xlu1 %v14541_v11, %s15632_s22  ;;  %7123 = vrot.lane.b32.xlu0 %v14544_v35, %s15632_s22  ;;  %v7163_v49 = vsel %vm2933_vm0, %v7143_v20, %v6529_v3  ;;  %v7244_v42 = vsel %vm2933_vm0, %v7222_v17, %v6709_v9  ;;  %v7361_v9 = vsel %vm7127_vm5, %v6957_v33, %v14631_v12  ;;  %v6958_v20 = vrot.slane %v13965_v34, 6 }
 0x6cf   : > { %p11092_p3 = pnand %p11091_p2, %p11085_p13 }
 0x6d0   : > { %v6589_v48 = vpop.permute.xlu1 %6588  ;;  %v6769_v5 = vpop.permute.xlu0 %6768 }
 0x6d1   : > { %v7191_v30 = vsel %vm7168_vm13, %v7163_v49, %v6589_v48  ;;  %v7271_v21 = vsel %vm7168_vm13, %v7244_v42, %v6769_v5  ;;  %v7390_v49 = vsel %vm2933_vm0, %v7361_v9, %v14584_v4  ;;  %v6775_v48 = vrot.slane %v13898_v16, 4 }
 0x6d2   : > { %6892 = vrot.lane.b32.xlu1 %v6872_v38, %s15634_s17  ;;  %7072 = vrot.lane.b32.xlu0 %v7052_v37, %s15634_s17  ;;  %v6613_v38 = vsel %vm6594_vm4, %v6610_v46, %v6612_v56  ;;  %v7410_v5 = vsel %vm7168_vm13, %v7390_v49, %v14646_v55  ;;  %v6778_v55 = vrot.slane %v13965_v34, 4  ;;  %s15875_s17 = smov 32  }
 0x6d3   : > { %7790 = vmatprep.mubr.bf16.mxu1 %v7271_v21  ;;  %v6777_v24 = vsel %vm5886_vm1, %v6775_v48, %v6776_v13  ;;  %v6959_v21 = vsel %vm6954_vm2, %v6956_v27, %v6958_v20 }
 0x6d4   : > { %7791 = vmatmul.mubr.bf16.gmra.mxu1 %v7191_v30  ;;  %v6533_v11 = vpop.permute.xlu1 %6532  ;;  %v6713_v61 = vpop.permute.xlu0 %6712  ;;  %v7281_v30 = vsel %vm7127_vm5, %v6777_v24, %v14629_v36 }
 0x6d5   : > { %v7310_v16 = vsel %vm2933_vm0, %v7281_v30, %v14598_v2 }
 0x6d6   : > { %6952 = vrot.lane.b32.xlu1 %v14527_v14, %s15632_s22  ;;  %7125 = vrot.lane.b32.xlu0 %v14531_v60, %s15632_s22  ;;  %s15876_s22 = smov 64  }
 0x6d8   : > { %v6531_v35 = vpop.permute.xlu1 %6530  ;;  %v6711_v45 = vpop.permute.xlu0 %6710 }
 0x6dc   : > { %v6481_v31 = vpop.permute.xlu1 %6480  ;;  %v6673_v1 = vpop.permute.xlu0 %6672 }
 0x6dd   : > { %v7145_v62 = vsel %vm7127_vm5, %v14194_v0, %v6481_v31  ;;  %v7228_v19 = vsel %vm7127_vm5, %v6612_v56, %v6673_v1  ;;  %v6960_v31 = vrot.slane %v14006_v52, 6  ;;  %v6779_v56 = vsel %vm5886_vm1, %v6776_v13, %v6778_v55 }
 0x6de   : > { %v7165_v60 = vsel %vm2933_vm0, %v7145_v62, %v6531_v35  ;;  %v7248_v32 = vsel %vm2933_vm0, %v7228_v19, %v6713_v61  ;;  %v7330_v35 = vsel %vm7168_vm13, %v7310_v16, %v14644_v8  ;;  %v7284_v34 = vsel %vm7127_vm5, %v6779_v56, %v14721_v41 }
 0x6df   : > { %v6961_v2 = vsel %vm6954_vm2, %v6958_v20, %v6960_v31  ;;  %v6962_v41 = vrot.slane %v14035_v15, 6 }
 0x6e0   : > { %v6483_v63 = vpop.permute.xlu1 %6482  ;;  %v6773_v26 = vpop.permute.xlu0 %6772 }
 0x6e1   : > { %v7277_v28 = vsel %vm7168_vm13, %v7248_v32, %v6773_v26  ;;  %v7147_v3 = vsel %vm7127_vm5, %v14238_v10, %v6483_v63  ;;  %v6964_v32 = vrot.slane %v14077_v40, 6 }
 0x6e2   : > { %v7167_v23 = vsel %vm2933_vm0, %v7147_v3, %v6533_v11  ;;  %v7364_v11 = vsel %vm7127_vm5, %v6959_v21, %v14723_v59 }
 0x6e3   : > { %v6965_v33 = vsel %vm6954_vm2, %v6962_v41, %v6964_v32 }
 0x6e4   : > { %v6593_v58 = vpop.permute.xlu1 %6592  ;;  %v6671_v37 = vpop.permute.xlu0 %6670 }
 0x6e5   : > { %v7225_v14 = vsel %vm7127_vm5, %v6613_v38, %v6671_v37  ;;  %v7197_v17 = vsel %vm7168_vm13, %v7167_v23, %v6593_v58  ;;  %v6780_v38 = vrot.slane %v14006_v52, 4  ;;  %v6784_v23 = vrot.slane %v14077_v40, 4 }
 0x6e6   : > { %v7246_v29 = vsel %vm2933_vm0, %v7225_v14, %v6711_v45  ;;  %v7392_v45 = vsel %vm2933_vm0, %v7364_v11, %v14672_v39  ;;  %v7312_v39 = vsel %vm2933_vm0, %v7284_v34, %v14670_v7 }
 0x6e7   : > { %v7413_v36 = vsel %vm7168_vm13, %v7392_v45, %v14736_v22  ;;  %v7333_v22 = vsel %vm7168_vm13, %v7312_v39, %v14734_v50  ;;  %v6781_v19 = vsel %vm5886_vm1, %v6778_v55, %v6780_v38  ;;  %v6968_v45 = vrot.slane %v14149_v44, 6 }
 0x6e8   : > { %v6591_v47 = vpop.permute.xlu1 %6590  ;;  %v6771_v53 = vpop.permute.xlu0 %6770 }
 0x6e9   : > { %v7194_v54 = vsel %vm7168_vm13, %v7165_v60, %v6591_v47  ;;  %v7274_v51 = vsel %vm7168_vm13, %v7246_v29, %v6771_v53  ;;  %v6963_v60 = vsel %vm6954_vm2, %v6960_v31, %v6962_v41 }
 0x6ea   : > { %7798 = vmatprep.mubr.bf16.mxu1 %v7274_v51  ;;  %v6782_v51 = vrot.slane %v14035_v15, 4 }
 0x6eb   : > { %7799 = vmatmul.mubr.bf16.gmra.mxu1 %v7194_v54 }
 0x6ec   : > { %v6839_v57 = vpop.permute.xlu1 %6838  ;;  %7806 = vmatprep.mubr.bf16.mxu1 %v7277_v28  ;;  %v7019_v18 = vpop.permute.xlu0 %7018 }
 0x6ed   : > { %v7367_v26 = vsel %vm7127_vm5, %v6961_v2, %v7019_v18  ;;  %v7287_v7 = vsel %vm7127_vm5, %v6781_v19, %v6839_v57  ;;  %v6783_v57 = vsel %vm5886_vm1, %v6780_v38, %v6782_v51  ;;  %v6788_v2 = vrot.slane %v14149_v44, 4 }
 0x6ee   : > { %v6970_v19 = vrot.slane %v14194_v0, 6 }
 0x6f0   : > { %v6879_v46 = vpop.permute.xlu1 %6878  ;;  %v7059_v6 = vpop.permute.xlu0 %7058 }
 0x6f1   : > { %v7394_v58 = vsel %vm2933_vm0, %v7367_v26, %v7059_v6  ;;  %v7314_v53 = vsel %vm2933_vm0, %v7287_v7, %v6879_v46 }
 0x6f3   : > { %7807 = vmatmul.mubr.bf16.gmra.mxu1 %v7197_v17  ;;  %v6966_v17 = vrot.slane %v14109_v43, 6 }
 0x6f4   : > { %v6939_v12 = vpop.permute.xlu1 %6938  ;;  %7846 = vmatprep.mubr.bf16.mxu1 %v7410_v5  ;;  %v7112_v42 = vpop.permute.xlu0 %7111  ;;  %v6785_v5 = vsel %vm5886_vm1, %v6782_v51, %v6784_v23 }
 0x6f5   : > { %v7416_v37 = vsel %vm7168_vm13, %v7394_v58, %v7112_v42  ;;  %v7336_v29 = vsel %vm7168_vm13, %v7314_v53, %v6939_v12  ;;  %v6967_v42 = vsel %vm6954_vm2, %v6964_v32, %v6966_v17 }
 0x6f8   : > { %v6841_v4 = vpop.permute.xlu1 %6840  ;;  %v7021_v61 = vpop.permute.xlu0 %7020 }
 0x6f9   : > { %v7370_v52 = vsel %vm7127_vm5, %v6963_v60, %v7021_v61  ;;  %v7290_v18 = vsel %vm7127_vm5, %v6783_v57, %v6841_v4  ;;  %v6786_v61 = vrot.slane %v14109_v43, 4  ;;  %v6969_v43 = vsel %vm6954_vm2, %v6966_v17, %v6968_v45 }
 0x6fb   : > { %7847 = vmatmul.mubr.bf16.vlgmr.msra.gmra.mxu1 %v7330_v35  ;;  %v6789_v58 = vsel %vm5886_vm1, %v6786_v61, %v6788_v2 }
 0x6fc   : > { %v6881_v59 = vpop.permute.xlu1 %6880  ;;  %7854 = vmatprep.mubr.bf16.mxu1 %v7413_v36  ;;  %v7061_v1 = vpop.permute.xlu0 %7060  ;;  %v6787_v36 = vsel %vm5886_vm1, %v6784_v23, %v6786_v61 }
 0x6fd   : > { %v7396_v54 = vsel %vm2933_vm0, %v7370_v52, %v7061_v1  ;;  %v7316_v46 = vsel %vm2933_vm0, %v7290_v18, %v6881_v59 }
 0x700   : > { %v6941_v8 = vpop.permute.xlu1 %6940  ;;  %v7114_v63 = vpop.permute.xlu0 %7113 }
 0x701   : > { %v7419_v27 = vsel %vm7168_vm13, %v7396_v54, %v7114_v63  ;;  %v7339_v6 = vsel %vm7168_vm13, %v7316_v46, %v6941_v8 }
 0x703   : > { %7855 = vmatmul.mubr.bf16.gmra.mxu1 %v7333_v22 }
 0x704   : > { %v6843_v62 = vpop.permute.xlu1 %6842  ;;  %7862 = vmatprep.mubr.bf16.mxu1 %v7416_v37  ;;  %v7023_v14 = vpop.permute.xlu0 %7022 }
 0x705   : > { %v7373_v15 = vsel %vm7127_vm5, %v6965_v33, %v7023_v14  ;;  %v7293_v12 = vsel %vm7127_vm5, %v6785_v5, %v6843_v62  ;;  %v6790_v14 = vrot.slane %v14194_v0, 4 }
 0x708   : > { %v6883_v47 = vpop.permute.xlu1 %6882  ;;  %v7063_v50 = vpop.permute.xlu0 %7062 }
 0x709   : > { %v7398_v13 = vsel %vm2933_vm0, %v7373_v15, %v7063_v50  ;;  %v7318_v21 = vsel %vm2933_vm0, %v7293_v12, %v6883_v47  ;;  %v6791_v50 = vsel %vm5886_vm1, %v6788_v2, %v6790_v14  ;;  %v6792_v15 = vrot.slane %v14238_v10, 4 }
 0x70b   : > { %7863 = vmatmul.mubr.bf16.gmra.mxu1 %v7336_v29  ;;  %v6971_v29 = vsel %vm6954_vm2, %v6968_v45, %v6970_v19 }
 0x70c   : > { %v6943_v28 = vpop.permute.xlu1 %6942  ;;  %7870 = vmatprep.mubr.bf16.mxu1 %v7419_v27  ;;  %v7116_v25 = vpop.permute.xlu0 %7115 }
 0x70d   : > { %v7422_v20 = vsel %vm7168_vm13, %v7398_v13, %v7116_v25  ;;  %v7342_v11 = vsel %vm7168_vm13, %v7318_v21, %v6943_v28  ;;  %v6972_v13 = vrot.slane %v14238_v10, 6 }
 0x710   : > { %v6845_v3 = vpop.permute.xlu1 %6844  ;;  %v7025_v9 = vpop.permute.xlu0 %7024 }
 0x711   : > { %v7376_v40 = vsel %vm7127_vm5, %v6967_v42, %v7025_v9  ;;  %v7296_v31 = vsel %vm7127_vm5, %v6787_v36, %v6845_v3 }
 0x713   : > { %7871 = vmatmul.mubr.bf16.gmra.mxu1 %v7339_v6 }
 0x714   : > { %v6885_v49 = vpop.permute.xlu1 %6884  ;;  %7878 = vmatprep.mubr.bf16.mxu1 %v7422_v20  ;;  %v7065_v48 = vpop.permute.xlu0 %7064  ;;  %v6793_v20 = vsel %vm5886_vm1, %v6790_v14, %v6792_v15  ;;  %vm8049_vm1 = vcmask 146432  }
 0x715   : > { %v7400_v4 = vsel %vm2933_vm0, %v7376_v40, %v7065_v48  ;;  %v7320_v56 = vsel %vm2933_vm0, %v7296_v31, %v6885_v49  ;;  %v6973_v48 = vsel %vm6954_vm2, %v6970_v19, %v6972_v13 }
 0x718   : > { %v6945_v24 = vpop.permute.xlu1 %6944  ;;  %v7118_v30 = vpop.permute.xlu0 %7117 }
 0x719   : > { %v7425_v16 = vsel %vm7168_vm13, %v7400_v4, %v7118_v30  ;;  %v7345_v34 = vsel %vm7168_vm13, %v7320_v56, %v6945_v24 }
 0x71b   : > { %7879 = vmatmul.mubr.bf16.gmra.mxu1 %v7342_v11 }
 0x71c   : > { %v6847_v55 = vpop.permute.xlu1 %6846  ;;  %7886 = vmatprep.mubr.bf16.mxu1 %v7425_v16  ;;  %v7027_v35 = vpop.permute.xlu0 %7026 }
 0x71d   : > { %v7379_v8 = vsel %vm7127_vm5, %v6969_v43, %v7027_v35  ;;  %v7299_v38 = vsel %vm7127_vm5, %v6789_v58, %v6847_v55 }
 0x720   : > { %v6887_v59 = vpop.permute.xlu1 %6886  ;;  %v7067_v1 = vpop.permute.xlu0 %7066 }
 0x721   : > { %v7402_v63 = vsel %vm2933_vm0, %v7379_v8, %v7067_v1  ;;  %v7322_v62 = vsel %vm2933_vm0, %v7299_v38, %v6887_v59 }
 0x723   : > { %7887 = vmatmul.mubr.bf16.gmra.mxu1 %v7345_v34 }
 0x724   : > { %v6947_v39 = vpop.permute.xlu1 %6946  ;;  %v7120_v26 = vpop.permute.xlu0 %7119 }
 0x725   : > { %v7428_v22 = vsel %vm7168_vm13, %v7402_v63, %v7120_v26  ;;  %v7348_v44 = vsel %vm7168_vm13, %v7322_v62, %v6947_v39 }
 0x726   : > { %7894 = vmatprep.mubr.bf16.mxu1 %v7428_v22 }
 0x728   : > { %v6849_v37 = vpop.permute.xlu1 %6848  ;;  %v7029_v41 = vpop.permute.xlu0 %7028 }
 0x729   : > { %v7302_v52 = vsel %vm7127_vm5, %v6791_v50, %v6849_v37  ;;  %v7382_v51 = vsel %vm7127_vm5, %v6971_v29, %v7029_v41 }
 0x72b   : > { %7895 = vmatmul.mubr.bf16.gmra.mxu1 %v7348_v44 }
 0x72c   : > { %v9779_v7 = vpop.f32.mrf.mxu1  ;;  %v6889_v60 = vpop.permute.xlu1 %6888 }
 0x72d   : > { %v7069_v47 = vpop.permute.xlu0 %7068  ;;  %v7324_v27 = vsel %vm2933_vm0, %v7302_v52, %v6889_v60 }
 0x72e   : > { %v9780_v53 = vpop.f32.mrf.mxu1  ;;  %v7404_v0 = vsel %vm2933_vm0, %v7382_v51, %v7069_v47 }
 0x72f   : > { %v14985_v54 = vadd.f32 %v9780_v53, %v9779_v7 }
 0x730   : > { %v9782_v32 = vpop.f32.mrf.mxu1  ;;  %v6949_v28 = vpop.permute.xlu1 %6948 }
 0x731   : > { %v7351_v25 = vsel %vm7168_vm13, %v7324_v27, %v6949_v28  ;;  %v7122_v57 = vpop.permute.xlu0 %7121 }
 0x732   : > { %v9783_v18 = vpop.f32.mrf.mxu1  ;;  %v7431_v33 = vsel %vm7168_vm13, %v7404_v0, %v7122_v57 }
 0x733   : > { %v14992_v3 = vadd.f32 %v9783_v18, %v9782_v32  ;;  %7902 = vmatprep.mubr.bf16.mxu1 %v7431_v33 }
 0x734   : > { %7903 = vmatmul.mubr.bf16.gmra.mxu1 %v7351_v25  ;;  %v6891_v9 = vpop.permute.xlu1 %6890 }
 0x735   : > { %v7071_v46 = vpop.permute.xlu0 %7070 }
 0x738   : > { %v6853_v6 = vpop.permute.xlu1 %6852 }
 0x739   : > { %v7033_v23 = vpop.permute.xlu0 %7032  ;;  %v7308_v55 = vsel %vm7127_vm5, %v6792_v15, %v6853_v6 }
 0x73a   : > { %v7388_v45 = vsel %vm7127_vm5, %v6972_v13, %v7033_v23 }
 0x73c   : > { %v6851_v17 = vpop.permute.xlu1 %6850 }
 0x73d   : > { %v7305_v49 = vsel %vm7127_vm5, %v6793_v20, %v6851_v17  ;;  %v7031_v5 = vpop.permute.xlu0 %7030 }
 0x73e   : > { %v7385_v12 = vsel %vm7127_vm5, %v6973_v48, %v7031_v5  ;;  %v7326_v42 = vsel %vm2933_vm0, %v7305_v49, %v6891_v9 }
 0x73f   : > { %v7406_v40 = vsel %vm2933_vm0, %v7385_v12, %v7071_v46 }
 0x740   : > { %v6951_v24 = vpop.permute.xlu1 %6950 }
 0x741   : > { %v7354_v30 = vsel %vm7168_vm13, %v7326_v42, %v6951_v24  ;;  %v7124_v21 = vpop.permute.xlu0 %7123 }
 0x742   : > { %v7434_v10 = vsel %vm7168_vm13, %v7406_v40, %v7124_v21 }
 0x743   : > { %7910 = vmatprep.mubr.bf16.mxu1 %v7434_v10 }
 0x744   : > { %v9785_v11 = vpop.f32.mrf.mxu1  ;;  %7911 = vmatmul.mubr.bf16.gmra.mxu1 %v7354_v30  ;;  %v6893_v4 = vpop.permute.xlu1 %6892 }
 0x745   : > { %v7073_v61 = vpop.permute.xlu0 %7072  ;;  %v7328_v36 = vsel %vm2933_vm0, %v7308_v55, %v6893_v4 }
 0x746   : > { %v9786_v16 = vpop.f32.mrf.mxu1  ;;  %v7408_v1 = vsel %vm2933_vm0, %v7388_v45, %v7073_v61  ;;  %v15051_v61 = vld [vmem:[%s15615_s5] ss:$0 sm:$0xff] }
 0x747   : > { %v15005_v35 = vadd.f32 %v9786_v16, %v9785_v11  ;;  %v10791_v11 = vld [vmem:[%s15616_s6 + $0x4] ss:$8 sps:$4 sm:$0xff]   ;;  %v7737_v45 = vadd.f32 %v14985_v54, %v15051_v61 }
 0x748   : > { %v9788_v31 = vpop.f32.mrf.mxu1  ;;  %v6953_v59 = vpop.permute.xlu1 %6952  ;;  %9508 = vmatprep.mubr.msk.bf16.mxu0 %vm8049_vm1, %v10791_v11 }
 0x749   : > { %v7357_v56 = vsel %vm7168_vm13, %v7328_v36, %v6953_v59  ;;  %v7126_v34 = vpop.permute.xlu0 %7125 }
 0x74a   : > { %v9789_v43 = vpop.f32.mrf.mxu1  ;;  %v7437_v2 = vsel %vm7168_vm13, %v7408_v1, %v7126_v34 }
 0x74b   : > { %v15012_v8 = vadd.f32 %v9789_v43, %v9788_v31  ;;  %7918 = vmatprep.mubr.bf16.mxu1 %v7437_v2 }
 0x74c   : > { %7919 = vmatmul.mubr.bf16.gmra.mxu1 %v7357_v56  ;;  %v7740_v56 = vadd.f32 %v14992_v3, %v15051_v61 }
 0x758   : > { %v9791_v63 = vpop.f32.mrf.mxu1 }
 0x75a   : > { %v9792_v39 = vpop.f32.mrf.mxu1 }
 0x75b   : > { %v15014_v26 = vadd.f32 %v9792_v39, %v9791_v63 }
 0x75c   : > { %v9794_v22 = vpop.f32.mrf.mxu1 }
 0x75e   : > { %v9795_v58 = vpop.f32.mrf.mxu1 }
 0x75f   : > { %v15016_v38 = vadd.f32 %v9795_v58, %v9794_v22  ;;  %v7745_v22 = vadd.f32 %v15005_v35, %v15051_v61 }
 0x764   : > { %v9797_v37 = vpop.f32.mrf.mxu1 }
 0x766   : > { %v9798_v41 = vpop.f32.mrf.mxu1 }
 0x767   : > { %v15018_v62 = vadd.f32 %v9798_v41, %v9797_v37 }
 0x768   : > { %v9800_v44 = vpop.f32.mrf.mxu1 }
 0x76a   : > { %v9801_v14 = vpop.f32.mrf.mxu1 }
 0x76b   : > { %v15020_v19 = vadd.f32 %v9801_v14, %v9800_v44  ;;  %v7748_v14 = vadd.f32 %v15012_v8, %v15051_v61  ;;  %v7756_v8 = vadd.f32 %v15016_v38, %v15051_v61 }
 0x770   : > { %v9803_v7 = vpop.f32.mrf.mxu1 }
 0x772   : > { %v9804_v60 = vpop.f32.mrf.mxu1 }
 0x773   : > { %v15022_v47 = vadd.f32 %v9804_v60, %v9803_v7 }
 0x774   : > { %v9806_v50 = vpop.f32.mrf.mxu1 }
 0x776   : > { %v9807_v53 = vpop.f32.mrf.mxu1 }
 0x777   : > { %v15024_v52 = vadd.f32 %v9807_v53, %v9806_v50 }
 0x77c   : > { %v9809_v29 = vpop.f32.mrf.mxu1 }
 0x77e   : > { %v9810_v51 = vpop.f32.mrf.mxu1 }
 0x77f   : > { %v15026_v27 = vadd.f32 %v9810_v51, %v9809_v29  ;;  %v7753_v29 = vadd.f32 %v15014_v26, %v15051_v61 }
 0x780   : > { %v9812_v32 = vpop.f32.mrf.mxu1 }
 0x782   : > { %v9813_v28 = vpop.f32.mrf.mxu1 }
 0x783   : > { %v15028_v0 = vadd.f32 %v9813_v28, %v9812_v32 }
 0x788   : > { %v9815_v25 = vpop.f32.mrf.mxu1 }
 0x78a   : > { %v9816_v57 = vpop.f32.mrf.mxu1 }
 0x78b   : > { %v15030_v18 = vadd.f32 %v9816_v57, %v9815_v25 }
 0x78c   : > { %v9818_v33 = vpop.f32.mrf.mxu1 }
 0x78e   : > { %v9819_v9 = vpop.f32.mrf.mxu1 }
 0x78f   : > { %v15032_v46 = vadd.f32 %v9819_v9, %v9818_v33 }
 0x794   : > { %v9821_v15 = vpop.f32.mrf.mxu1 }
 0x796   : > { %v9822_v6 = vpop.f32.mrf.mxu1 }
 0x797   : > { %v15034_v13 = vadd.f32 %v9822_v6, %v9821_v15 }
 0x798   : > { %v9824_v23 = vpop.f32.mrf.mxu1 }
 0x79a   : > { %v9825_v20 = vpop.f32.mrf.mxu1 }
 0x79b   : > { %v15036_v17 = vadd.f32 %v9825_v20, %v9824_v23 }
 0x7ab   : > { %v9827_v49 = vpop.f32.mrf.mxu1 }
 0x7ad   : > { %v9828_v48 = vpop.f32.mrf.mxu1 }
 0x7ae   : > { %v15038_v5 = vadd.f32 %v9828_v48, %v9827_v49  ;;  %v7761_v49 = vadd.f32 %v15018_v62, %v15051_v61  ;;  %v7764_v62 = vadd.f32 %v15020_v19, %v15051_v61 }
 0x7af   : > { %v9830_v12 = vpop.f32.mrf.mxu1 }
 0x7b1   : > { %v9831_v42 = vpop.f32.mrf.mxu1 }
 0x7b2   : > { %v15040_v24 = vadd.f32 %v9831_v42, %v9830_v12 }
 0x7b3   : > { %v9833_v30 = vpop.f32.mrf.mxu1 }
 0x7b5   : > { %v9834_v21 = vpop.f32.mrf.mxu1 }
 0x7b6   : > { %v15042_v40 = vadd.f32 %v9834_v21, %v9833_v30 }
 0x7b7   : > { %v9836_v10 = vpop.f32.mrf.mxu1 }
 0x7b9   : > { %v9837_v4 = vpop.f32.mrf.mxu1 }
 0x7bb   : > { %v9855_v16 = vpop.f32.mrf.mxu1 }
 0x7bd   : > { %v9856_v55 = vpop.f32.mrf.mxu1 }
 0x7be   : > { %v9857_v36 = vadd.f32 %v9856_v55, %v9855_v16 }
 0x7bf   : > { %v9858_v31 = vpop.f32.mrf.mxu1 }
 0x7c0   : > { %v7849_v59 = vadd.f32 %v9857_v36, %v7737_v45 }
 0x7c1   : > { %v9859_v1 = vpop.f32.mrf.mxu1 }
 0x7c2   : > { %v7945_v34 = vmul.f32 1.442695, %v7849_v59  ;;  %v9860_v43 = vadd.f32 %v9859_v1, %v9858_v31  ;;  %vm7926_vm7 = vcmp.gt.f32.partialorder %v7849_v59, 0.0 }
 0x7c3   : > { %v9861_v2 = vpop.f32.mrf.mxu1 }
 0x7c4   : > { %11038 = vpow2.f32 %v7945_v34  ;;  %v7852_v63 = vadd.f32 %v9860_v43, %v7740_v56  ;;  %v7769_v34 = vadd.f32 %v15022_v47, %v15051_v61  ;;  %v7772_v47 = vadd.f32 %v15024_v52, %v15051_v61 }
 0x7c5   : > { %v9862_v39 = vpop.f32.mrf.mxu1 }
 0x7c6   : > { %v7947_v58 = vmul.f32 1.442695, %v7852_v63  ;;  %v9863_v37 = vadd.f32 %v9862_v39, %v9861_v2  ;;  %vm7927_vm8 = vcmp.gt.f32.partialorder %v7852_v63, 0.0 }
 0x7c7   : > { %v9864_v41 = vpop.f32.mrf.mxu1 }
 0x7c8   : > { %11040 = vpow2.f32 %v7947_v58  ;;  %v7857_v54 = vadd.f32 %v9863_v37, %v7745_v22 }
 0x7c9   : > { %v9865_v44 = vpop.f32.mrf.mxu1 }
 0x7ca   : > { %v7949_v7 = vmul.f32 1.442695, %v7857_v54  ;;  %v9866_v3 = vadd.f32 %v9865_v44, %v9864_v41  ;;  %vm7928_vm9 = vcmp.gt.f32.partialorder %v7857_v54, 0.0 }
 0x7cb   : > { %v9867_v60 = vpop.f32.mrf.mxu1 }
 0x7cc   : > { %11042 = vpow2.f32 %v7949_v7  ;;  %v7860_v50 = vadd.f32 %v9866_v3, %v7748_v14 }
 0x7cd   : > { %v9868_v53 = vpop.f32.mrf.mxu1 }
 0x7ce   : > { %v7951_v51 = vmul.f32 1.442695, %v7860_v50  ;;  %v9869_v35 = vadd.f32 %v9868_v53, %v9867_v60  ;;  %vm7929_vm10 = vcmp.gt.f32.partialorder %v7860_v50, 0.0 }
 0x7cf   : > { %v9870_v32 = vpop.f32.mrf.mxu1 }
 0x7d0   : > { %11044 = vpow2.f32 %v7951_v51  ;;  %v15063_v28 = vadd.f32 %v9869_v35, %v7753_v29  ;;  %v7777_v29 = vadd.f32 %v15026_v27, %v15051_v61  ;;  %v7780_v27 = vadd.f32 %v15028_v0, %v15051_v61 }
 0x7d1   : > { %v11039_v25 = vpop.eup %11038  ;;  %v9871_v57 = vpop.f32.mrf.mxu1 }
 0x7d2   : > { %v7953_v33 = vmul.f32 1.442695, %v15063_v28  ;;  %v9872_v9 = vadd.f32 %v9871_v57, %v9870_v32  ;;  %v9485_v6 = vadd.f32 -1.0, %v11039_v25  ;;  %vm7930_vm11 = vcmp.gt.f32.partialorder %v15063_v28, 0.0 }
 0x7d3   : > { %v9873_v15 = vpop.f32.mrf.mxu1 }
 0x7d4   : > { %11046 = vpow2.f32 %v7953_v33  ;;  %v7868_v23 = vadd.f32 %v9872_v9, %v7756_v8  ;;  %v15070_v21 = vsel %vm7926_vm7, %v7849_v59, %v9485_v6 }
 0x7d5   : > { %v11041_v20 = vpop.eup %11040  ;;  %v9874_v26 = vpop.f32.mrf.mxu1 }
 0x7d6   : > { %v9486_v48 = vadd.f32 -1.0, %v11041_v20  ;;  %v7955_v12 = vmul.f32 1.442695, %v7868_v23  ;;  %v9875_v42 = vadd.f32 %v9874_v26, %v9873_v15  ;;  %vm7931_vm12 = vcmp.gt.f32.partialorder %v7868_v23, 0.0 }
 0x7d7   : > { %v9876_v30 = vpop.f32.mrf.mxu1 }
 0x7d8   : > { %v15072_v38 = vsel %vm7927_vm8, %v7852_v63, %v9486_v48  ;;  %11048 = vpow2.f32 %v7955_v12  ;;  %v15074_v10 = vadd.f32 %v9875_v42, %v7761_v49 }
 0x7d9   : > { %v11043_v11 = vpop.eup %11042  ;;  %v9877_v4 = vpop.f32.mrf.mxu1  ;;  %v8024_v16 = vpack.c.bf16 %v15072_v38, %v15070_v21  ;;  %v8238_v38 = vld [vmem:[%s15617_s7 + $0xf8] sm:$0xff] }
 0x7da   : > { %v7957_v55 = vmul.f32 1.442695, %v15074_v10  ;;  %v9878_v45 = vadd.f32 %v9877_v4, %v9876_v30  ;;  %v9487_v31 = vadd.f32 -1.0, %v11043_v11  ;;  %vm7932_vm14 = vcmp.gt.f32.partialorder %v15074_v10, 0.0  ;;  %9915 = vmatprep.subr.mxu1 %v8238_v38  ;;  %v8265_v38 = vld [vmem:[%s15617_s7 + $0x1d0] sm:$0xff] }
 0x7db   : > { %v9879_v36 = vpop.f32.mrf.mxu1 }
 0x7dc   : > { %11050 = vpow2.f32 %v7957_v55  ;;  %v7876_v59 = vadd.f32 %v9878_v45, %v7764_v62  ;;  %v15083_v22 = vsel %vm7928_vm9, %v7857_v54, %v9487_v31 }
 0x7dd   : > { %v11045_v1 = vpop.eup %11044  ;;  %v9880_v56 = vpop.f32.mrf.mxu1 }
 0x7de   : > { %v9488_v43 = vadd.f32 -1.0, %v11045_v1  ;;  %v7959_v2 = vmul.f32 1.442695, %v7876_v59  ;;  %v9881_v63 = vadd.f32 %v9880_v56, %v9879_v36  ;;  %vm7933_vm15 = vcmp.gt.f32.partialorder %v7876_v59, 0.0 }
 0x7df   : > { %v9882_v39 = vpop.f32.mrf.mxu1 }
 0x7e0   : > { %v15085_v19 = vsel %vm7929_vm10, %v7860_v50, %v9488_v43  ;;  %11052 = vpow2.f32 %v7959_v2  ;;  %v15087_v58 = vadd.f32 %v9881_v63, %v7769_v34 }
 0x7e1   : > { %v11047_v37 = vpop.eup %11046  ;;  %v9883_v41 = vpop.f32.mrf.mxu1  ;;  %v8025_v44 = vpack.c.bf16 %v15085_v19, %v15083_v22  ;;  %v8023_v22 = vld [vmem:[%s15616_s6 + $0x10] sm:$0xff]  ;;  %v10789_v19 = vld [vmem:[%s15616_s6] ss:$8 sps:$4 sm:$0xff]  }
 0x7e2   : > { %v7961_v14 = vmul.f32 1.442695, %v15087_v58  ;;  %v9884_v7 = vadd.f32 %v9883_v41, %v9882_v39  ;;  %v9489_v60 = vadd.f32 -1.0, %v11047_v37  ;;  %v7793_v37 = vadd.f32 %v15034_v13, %v15051_v61 }
 0x7e3   : > { %v9885_v3 = vpop.f32.mrf.mxu1  ;;  %vm7934_vm3 = vcmp.gt.f32.partialorder %v15087_v58, 0.0  ;;  %v7796_v13 = vadd.f32 %v15036_v17, %v15051_v61  ;;  %v9506_v21 = vcombine.low %v8023_v22, %v8023_v22 }
 0x7e4   : > { %11054 = vpow2.f32 %v7961_v14  ;;  %v7884_v54 = vadd.f32 %v9884_v7, %v7772_v47  ;;  %v15098_v52 = vsel %vm7930_vm11, %v15063_v28, %v9489_v60 }
 0x7e5   : > { %v11049_v50 = vpop.eup %11048  ;;  %v9886_v53 = vpop.f32.mrf.mxu1 }
 0x7e6   : > { %v9490_v51 = vadd.f32 -1.0, %v11049_v50  ;;  %v7963_v35 = vmul.f32 1.442695, %v7884_v54  ;;  %v9887_v32 = vadd.f32 %v9886_v53, %v9885_v3  ;;  %vm7935_vm4 = vcmp.gt.f32.partialorder %v7884_v54, 0.0 }
 0x7e7   : > { %v9888_v25 = vpop.f32.mrf.mxu1 }
 0x7e8   : > { %v15100_v57 = vsel %vm7931_vm12, %v7868_v23, %v9490_v51  ;;  %11056 = vpow2.f32 %v7963_v35  ;;  %v7889_v8 = vadd.f32 %v9887_v32, %v7777_v29  ;;  %v7785_v23 = vadd.f32 %v15030_v18, %v15051_v61 }
 0x7e9   : > { %v11051_v33 = vpop.eup %11050  ;;  %v9889_v9 = vpop.f32.mrf.mxu1  ;;  %v8026_v15 = vpack.c.bf16 %v15100_v57, %v15098_v52  ;;  %v7788_v18 = vadd.f32 %v15032_v46, %v15051_v61  ;;  %v8237_v57 = vld [vmem:[%s15617_s7 + $0xf0] sm:$0xff] }
 0x7ea   : > { %v7965_v6 = vmul.f32 1.442695, %v7889_v8  ;;  %v9890_v20 = vadd.f32 %v9889_v9, %v9888_v25  ;;  %v9491_v49 = vadd.f32 -1.0, %v11051_v33  ;;  %vm7936_vm2 = vcmp.gt.f32.partialorder %v7889_v8, 0.0 }
 0x7eb   : > { %v9891_v26 = vpop.f32.mrf.mxu1 }
 0x7ec   : > { %11058 = vpow2.f32 %v7965_v6  ;;  %v7892_v48 = vadd.f32 %v9890_v20, %v7780_v27  ;;  %v15110_v0 = vsel %vm7932_vm14, %v15074_v10, %v9491_v49 }
 0x7ed   : > { %v11053_v28 = vpop.eup %11052  ;;  %v9892_v12 = vpop.f32.mrf.mxu1 }
 0x7ee   : > { %v9492_v42 = vadd.f32 -1.0, %v11053_v28  ;;  %v7967_v30 = vmul.f32 1.442695, %v7892_v48  ;;  %v9893_v11 = vadd.f32 %v9892_v12, %v9891_v26  ;;  %vm7937_vm7 = vcmp.gt.f32.partialorder %v7892_v48, 0.0 }
 0x7ef   : > { %v9894_v4 = vpop.f32.mrf.mxu1  ;;  %v7801_v28 = vadd.f32 %v15038_v5, %v15051_v61 }
 0x7f0   : > { %v15112_v62 = vsel %vm7933_vm15, %v7876_v59, %v9492_v42  ;;  %11060 = vpow2.f32 %v7967_v30  ;;  %v7897_v55 = vadd.f32 %v9893_v11, %v7785_v23 }
 0x7f1   : > { %v11055_v45 = vpop.eup %11054  ;;  %v9895_v36 = vpop.f32.mrf.mxu1  ;;  %v8027_v31 = vpack.c.bf16 %v15112_v62, %v15110_v0  ;;  %v8236_v62 = vld [vmem:[%s15617_s7 + $0xe8] sm:$0xff] }
 0x7f2   : > { %v7969_v1 = vmul.f32 1.442695, %v7897_v55  ;;  %v9896_v56 = vadd.f32 %v9895_v36, %v9894_v4  ;;  %v9493_v34 = vadd.f32 -1.0, %v11055_v45  ;;  %vm7938_vm8 = vcmp.gt.f32.partialorder %v7897_v55, 0.0 }
 0x7f3   : > { %v7804_v45 = vadd.f32 %v15040_v24, %v15051_v61 }
 0x7f4   : > { %11062 = vpow2.f32 %v7969_v1  ;;  %v7900_v43 = vadd.f32 %v9896_v56, %v7788_v18  ;;  %v9897_v2 = vpop.f32.mrf.mxu1  ;;  %v15122_v47 = vsel %vm7934_vm3, %v15087_v58, %v9493_v34 }
 0x7f5   : > { %v11057_v10 = vpop.eup %11056 }
 0x7f6   : > { %v9494_v63 = vadd.f32 -1.0, %v11057_v10  ;;  %v7971_v59 = vmul.f32 1.442695, %v7900_v43  ;;  %v9898_v39 = vpop.f32.mrf.mxu1  ;;  %vm7939_vm9 = vcmp.gt.f32.partialorder %v7900_v43, 0.0 }
 0x7f7   : > { %v9899_v41 = vadd.f32 %v9898_v39, %v9897_v2 }
 0x7f8   : > { %v15124_v46 = vsel %vm7935_vm4, %v7884_v54, %v9494_v63  ;;  %11064 = vpow2.f32 %v7971_v59  ;;  %v9900_v14 = vpop.f32.mrf.mxu1 }
 0x7f9   : > { %v11059_v7 = vpop.eup %11058  ;;  %v7905_v3 = vadd.f32 %v9899_v41, %v7793_v37  ;;  %v8028_v60 = vpack.c.bf16 %v15124_v46, %v15122_v47  ;;  %v8235_v46 = vld [vmem:[%s15617_s7 + $0xe0] sm:$0xff] }
 0x7fa   : > { %v9901_v50 = vpop.f32.mrf.mxu1  ;;  %v9495_v51 = vadd.f32 -1.0, %v11059_v7 }
 0x7fb   : > { %v7973_v53 = vmul.f32 1.442695, %v7905_v3  ;;  %v9902_v29 = vadd.f32 %v9901_v50, %v9900_v14  ;;  %vm7940_vm10 = vcmp.gt.f32.partialorder %v7905_v3, 0.0  ;;  %v15874_v50 = vmov 0  }
 0x7fc   : > { %v8012_v25 = vsel %vm7936_vm2, %v7889_v8, %v9495_v51 }
 0x7fd   : > { %v11061_v35 = vpop.eup %11060  ;;  %11066 = vpow2.f32 %v7973_v53  ;;  %v7908_v58 = vadd.f32 %v9902_v29, %v7796_v13 }
 0x7fe   : > { %v9496_v32 = vadd.f32 -1.0, %v11061_v35 }
 0x7ff   : > { %v7975_v54 = vmul.f32 1.442695, %v7908_v58  ;;  %vm7941_vm11 = vcmp.gt.f32.partialorder %v7908_v58, 0.0 }
 0x800   : > { %v8013_v33 = vsel %vm7937_vm7, %v7892_v48, %v9496_v32  ;;  %v8234_v32 = vld [vmem:[%s15617_s7 + $0xd8] sm:$0xff] }
 0x801   : > { %v11063_v9 = vpop.eup %11062  ;;  %11068 = vpow2.f32 %v7975_v54  ;;  %v8029_v27 = vpack.c.bf16 %v8013_v33, %v8012_v25  ;;  %v8218_v54 = vld [vmem:[%s15617_s7 + $0x58] sm:$0xff]  ;;  %v8233_v25 = vld [vmem:[%s15617_s7 + $0xd0] sm:$0xff] }
 0x802   : > { %v9497_v6 = vadd.f32 -1.0, %v11063_v9  ;;  %v8217_v33 = vld [vmem:[%s15617_s7 + $0x50] sm:$0xff]  ;;  %v8232_v9 = vld [vmem:[%s15617_s7 + $0xc8] sm:$0xff] }
 0x804   : > { %v9903_v20 = vpop.f32.mrf.mxu1  ;;  %v8014_v23 = vsel %vm7938_vm8, %v7897_v55, %v9497_v6  ;;  %v7809_v55 = vadd.f32 %v15042_v40, %v15051_v61  ;;  %v8231_v6 = vld [vmem:[%s15617_s7 + $0xc0] sm:$0xff] }
 0x805   : > { %v11065_v26 = vpop.eup %11064 }
 0x806   : > { %v9498_v49 = vadd.f32 -1.0, %v11065_v26  ;;  %v9904_v17 = vpop.f32.mrf.mxu1  ;;  %v8230_v26 = vld [vmem:[%s15617_s7 + $0xb8] sm:$0xff] }
 0x807   : > { %v9905_v12 = vadd.f32 %v9904_v17, %v9903_v20  ;;  %v8215_v20 = vld [vmem:[%s15617_s7 + $0x40] sm:$0xff]  ;;  %v8229_v17 = vld [vmem:[%s15617_s7 + $0xb0] sm:$0xff] }
 0x808   : > { %v8015_v42 = vsel %vm7939_vm9, %v7900_v43, %v9498_v49  ;;  %v9906_v30 = vpop.f32.mrf.mxu1  ;;  %v8214_v49 = vld [vmem:[%s15617_s7 + $0x38] sm:$0xff] }
 0x809   : > { %v7913_v11 = vadd.f32 %v9905_v12, %v7801_v28  ;;  %v8030_v8 = vpack.c.bf16 %v8015_v42, %v8014_v23  ;;  %v8213_v28 = vld [vmem:[%s15617_s7 + $0x30] sm:$0xff]  ;;  %v8228_v12 = vld [vmem:[%s15617_s7 + $0xa8] sm:$0xff]  ;;  %v8227_v42 = vld [vmem:[%s15617_s7 + $0xa0] sm:$0xff] }
 0x80a   : > { %v11067_v48 = vpop.eup %11066  ;;  %v9907_v4 = vpop.f32.mrf.mxu1  ;;  %v8212_v23 = vld [vmem:[%s15617_s7 + $0x28] sm:$0xff] }
 0x80b   : > { %v7977_v36 = vmul.f32 1.442695, %v7913_v11  ;;  %v9908_v18 = vadd.f32 %v9907_v4, %v9906_v30  ;;  %v9499_v56 = vadd.f32 -1.0, %v11067_v48  ;;  %vm7942_vm12 = vcmp.gt.f32.partialorder %v7913_v11, 0.0  ;;  %v8211_v30 = vld [vmem:[%s15617_s7 + $0x20] sm:$0xff]  ;;  %v8225_v48 = vld [vmem:[%s15617_s7 + $0x90] sm:$0xff] }
 0x80c   : > { %v9909_v1 = vpop.f32.mrf.mxu1  ;;  %v8209_v4 = vld [vmem:[%s15617_s7 + $0x10] sm:$0xff] }
 0x80d   : > { %11070 = vpow2.f32 %v7977_v36  ;;  %v7916_v34 = vadd.f32 %v9908_v18, %v7804_v45  ;;  %v8016_v39 = vsel %vm7940_vm10, %v7905_v3, %v9499_v56  ;;  %v8224_v45 = vld [vmem:[%s15617_s7 + $0x88] sm:$0xff]  ;;  %v8223_v18 = vld [vmem:[%s15617_s7 + $0x80] sm:$0xff] }
 0x80e   : > { %v11069_v5 = vpop.eup %11068  ;;  %v9910_v2 = vpop.f32.mrf.mxu1  ;;  %v8208_v36 = vld [vmem:[%s15617_s7 + $0x8] sm:$0xff]  ;;  %v8207_v56 = vld [vmem:[%s15617_s7] sm:$0xff] }
 0x80f   : > { %v9500_v43 = vadd.f32 -1.0, %v11069_v5  ;;  %v7979_v10 = vmul.f32 1.442695, %v7916_v34  ;;  %v9911_v63 = vadd.f32 %v9910_v2, %v9909_v1  ;;  %vm7943_vm14 = vcmp.gt.f32.partialorder %v7916_v34, 0.0  ;;  %v8270_v1 = vld [vmem:[%s15617_s7 + $0x1f8] sm:$0xff]  ;;  %v8269_v5 = vld [vmem:[%s15617_s7 + $0x1f0] sm:$0xff] }
 0x810   : > { %v9912_v59 = vpop.f32.mrf.mxu1 }
 0x811   : > { %v8017_v37 = vsel %vm7941_vm11, %v7908_v58, %v9500_v43  ;;  %11072 = vpow2.f32 %v7979_v10  ;;  %v7921_v24 = vadd.f32 %v9911_v63, %v7809_v55  ;;  %v8302_v55 = vld [vmem:[%s15617_s7 + $0x2f8] sm:$0xff]  ;;  %v8253_v43 = vld [vmem:[%s15617_s7 + $0x170] sm:$0xff] }
 0x812   : > { %v9913_v41 = vpop.f32.mrf.mxu1  ;;  %v8031_v14 = vpack.c.bf16 %v8017_v37, %v8016_v39  ;;  %v8268_v37 = vld [vmem:[%s15617_s7 + $0x1e8] sm:$0xff] }
 0x813   : > { %v7981_v7 = vmul.f32 1.442695, %v7921_v24  ;;  %vm7944_vm15 = vcmp.gt.f32.partialorder %v7921_v24, 0.0 }
 0x814   : > { %8061 = vmatpush1.bf16.msra.mxu0 %v8031_v14 }
 0x815   : > { %8062 = vmatprep.subr.bf16.mxu0 %v15874_v50  ;;  %11074 = vpow2.f32 %v7981_v7  ;;  %v8252_v7 = vld [vmem:[%s15617_s7 + $0x168] sm:$0xff] }
 0x818   : > { %8063 = vmatpush1.bf16.msra.mxu0 %v8030_v8  ;;  %v8210_v8 = vld [vmem:[%s15617_s7 + $0x18] sm:$0xff] }
 0x819   : > { %8064 = vmatprep.subr.bf16.mxu0 %v15874_v50 }
 0x81a   : > { %v11071_v40 = vpop.eup %11070 }
 0x81b   : > { %v9501_v61 = vadd.f32 -1.0, %v11071_v40 }
 0x81c   : > { %8065 = vmatpush1.bf16.msra.mxu0 %v8029_v27  ;;  %v8216_v27 = vld [vmem:[%s15617_s7 + $0x48] sm:$0xff] }
 0x81d   : > { %8066 = vmatprep.subr.bf16.mxu0 %v15874_v50  ;;  %v8018_v53 = vsel %vm7942_vm12, %v7913_v11, %v9501_v61  ;;  %v8226_v11 = vld [vmem:[%s15617_s7 + $0x98] sm:$0xff]  ;;  %v8267_v61 = vld [vmem:[%s15617_s7 + $0x1e0] sm:$0xff] }
 0x81e   : > { %v11073_v13 = vpop.eup %11072 }
 0x81f   : > { %v9502_v3 = vadd.f32 -1.0, %v11073_v13 }
 0x820   : > { %8067 = vmatpush1.bf16.msra.mxu0 %v8028_v60  ;;  %v8219_v60 = vld [vmem:[%s15617_s7 + $0x60] sm:$0xff] }
 0x821   : > { %v8019_v29 = vsel %vm7943_vm14, %v7916_v34, %v9502_v3  ;;  %8068 = vmatprep.subr.bf16.mxu0 %v15874_v50  ;;  %v8254_v34 = vld [vmem:[%s15617_s7 + $0x178] sm:$0xff]  ;;  %v8251_v3 = vld [vmem:[%s15617_s7 + $0x160] sm:$0xff] }
 0x822   : > { %v8032_v51 = vpack.c.bf16 %v8019_v29, %v8018_v53  ;;  %v11075_v35 = vpop.eup %11074 }
 0x823   : > { %v9503_v58 = vadd.f32 -1.0, %v11075_v35 }
 0x824   : > { %8069 = vmatpush1.bf16.msra.mxu0 %v8027_v31  ;;  %v8220_v31 = vld [vmem:[%s15617_s7 + $0x68] sm:$0xff] }
 0x825   : > { %8070 = vmatprep.subr.bf16.mxu0 %v15874_v50  ;;  %v8020_v47 = vsel %vm7944_vm15, %v7921_v24, %v9503_v58 }
 0x826   : > { %v8033_v0 = vpack.c.bf16 %v8020_v47, %v8020_v47 }
 0x828   : > { %8071 = vmatpush1.bf16.msra.mxu0 %v8026_v15  ;;  %v8058_v52 = vsel %vm7034_vm6, %v8033_v0, 0  ;;  %v8221_v15 = vld [vmem:[%s15617_s7 + $0x70] sm:$0xff]  ;;  %vm11150_vm6 = vmmov 0  }
 0x829   : > { %8072 = vmatprep.subr.bf16.mxu0 %v15874_v50 }
 0x82c   : > { %8073 = vmatpush1.bf16.msra.mxu0 %v8025_v44  ;;  %v9507_v44 = vcombine.high %v8023_v22, %v8023_v22 }
 0x82d   : > { %8074 = vmatprep.subr.bf16.mxu0 %v15874_v50 }
 0x830   : > { %8075 = vmatpush1.bf16.msra.mxu0 %v8024_v16  ;;  %v8222_v16 = vld [vmem:[%s15617_s7 + $0x78] sm:$0xff] }
 0x831   : > { %8088 = vmatprep.subr.bf16.mxu0 %v15874_v50  ;;  %9916 = vmatpush3.msra.mxu1 %v8222_v16 }
 0x832   : > { %9917 = vmatprep.subr.mxu1 %v8237_v57 }
 0x833   : > { %9918 = vmatpush3.msra.mxu1 %v8221_v15 }
 0x834   : > { %8089 = vmatpush2.bf16.msra.mxu0 %v8058_v52  ;;  %9919 = vmatprep.subr.mxu1 %v8236_v62 }
 0x835   : > { %8090 = vmatprep.subr.bf16.mxu0 %v15874_v50  ;;  %9920 = vmatpush3.msra.mxu1 %v8220_v31  ;;  %v8249_v31 = vld [vmem:[%s15617_s7 + $0x150] sm:$0xff] }
 0x836   : > { %9921 = vmatprep.subr.mxu1 %v8235_v46 }
 0x837   : > { %9922 = vmatpush3.msra.mxu1 %v8219_v60 }
 0x838   : > { %8091 = vmatpush2.bf16.msra.mxu0 %v8032_v51  ;;  %9923 = vmatprep.subr.mxu1 %v8234_v32  ;;  %v8266_v51 = vld [vmem:[%s15617_s7 + $0x1d8] sm:$0xff] }
 0x839   : > { %9924 = vmatpush3.msra.mxu1 %v8218_v54  ;;  %9950 = vmatprep.subr.mxu0 %v8270_v1  ;;  %v8264_v54 = vld [vmem:[%s15617_s7 + $0x1c8] sm:$0xff]  ;;  %v8241_v1 = vld [vmem:[%s15617_s7 + $0x110] sm:$0xff] }
 0x83a   : > { %9925 = vmatprep.subr.mxu1 %v8233_v25  ;;  %v8248_v25 = vld [vmem:[%s15617_s7 + $0x148] sm:$0xff] }
 0x83b   : > { %8093 = vmatmul.mubr.bf16.vlgmr.msra.gmra.mxu0 %v10789_v19  ;;  %9926 = vmatpush3.msra.mxu1 %v8217_v33 }
 0x83c   : > { %9509 = vmatprep.mubr.msk.bf16.mxu0 %vm8049_vm1, %v9507_v44  ;;  %9927 = vmatprep.subr.mxu1 %v8232_v9  ;;  %v8250_v44 = vld [vmem:[%s15617_s7 + $0x158] sm:$0xff]  ;;  %vm8684_vm1 = vcmask 24576  }
 0x83d   : > { %9928 = vmatpush3.msra.mxu1 %v8216_v27  ;;  %9951 = vmatpush3.msra.mxu0 %v8254_v34  ;;  %v8240_v34 = vld [vmem:[%s15617_s7 + $0x108] sm:$0xff] }
 0x83e   : > { %9929 = vmatprep.subr.mxu1 %v8231_v6  ;;  %9952 = vmatprep.subr.mxu0 %v8269_v5  ;;  %v8255_v5 = vld [vmem:[%s15617_s7 + $0x180] sm:$0xff] }
 0x83f   : > { %9930 = vmatpush3.msra.mxu1 %v8215_v20  ;;  %9953 = vmatpush3.msra.mxu0 %v8253_v43 }
 0x840   : > { %9931 = vmatprep.subr.mxu1 %v8230_v26  ;;  %9954 = vmatprep.subr.mxu0 %v8268_v37  ;;  %v8263_v26 = vld [vmem:[%s15617_s7 + $0x1c0] sm:$0xff] }
 0x841   : > { %9932 = vmatpush3.msra.mxu1 %v8214_v49  ;;  %9955 = vmatpush3.msra.mxu0 %v8252_v7 }
 0x842   : > { %9933 = vmatprep.subr.mxu1 %v8229_v17  ;;  %9956 = vmatprep.subr.mxu0 %v8267_v61  ;;  %v8247_v17 = vld [vmem:[%s15617_s7 + $0x140] sm:$0xff] }
 0x843   : > { %8101 = vmatmul.mubr.bf16.gmra.mxu0 %v9506_v21  ;;  %9934 = vmatpush3.msra.mxu1 %v8213_v28  ;;  %v8262_v28 = vld [vmem:[%s15617_s7 + $0x1b8] sm:$0xff] }
 0x844   : > { %9935 = vmatprep.subr.mxu1 %v8228_v12  ;;  %9957 = vmatpush3.msra.mxu0 %v8251_v3 }
 0x845   : > { %9936 = vmatpush3.msra.mxu1 %v8212_v23  ;;  %9958 = vmatprep.subr.mxu0 %v8266_v51  ;;  %v8246_v23 = vld [vmem:[%s15617_s7 + $0x138] sm:$0xff] }
 0x846   : > { %9937 = vmatprep.subr.mxu1 %v8227_v42  ;;  %9959 = vmatpush3.msra.mxu0 %v8250_v44  ;;  %v8261_v42 = vld [vmem:[%s15617_s7 + $0x1b0] sm:$0xff] }
 0x847   : > { %9938 = vmatpush3.msra.mxu1 %v8211_v30  ;;  %9960 = vmatprep.subr.mxu0 %v8265_v38  ;;  %v8245_v30 = vld [vmem:[%s15617_s7 + $0x130] sm:$0xff] }
 0x848   : > { %9939 = vmatprep.subr.mxu1 %v8226_v11  ;;  %9961 = vmatpush3.msra.mxu0 %v8249_v31  ;;  %v8260_v11 = vld [vmem:[%s15617_s7 + $0x1a8] sm:$0xff] }
 0x849   : > { %9940 = vmatpush3.msra.mxu1 %v8210_v8  ;;  %9962 = vmatprep.subr.mxu0 %v8264_v54  ;;  %v8244_v8 = vld [vmem:[%s15617_s7 + $0x128] sm:$0xff]  ;;  %v8299_v54 = vld [vmem:[%s15617_s7 + $0x2e0] sm:$0xff] }
 0x84a   : > { %9941 = vmatprep.subr.mxu1 %v8225_v48  ;;  %9963 = vmatpush3.msra.mxu0 %v8248_v25  ;;  %v8259_v48 = vld [vmem:[%s15617_s7 + $0x1a0] sm:$0xff] }
 0x84b   : > { %9942 = vmatpush3.msra.mxu1 %v8209_v4  ;;  %9964 = vmatprep.subr.mxu0 %v8263_v26  ;;  %v8243_v4 = vld [vmem:[%s15617_s7 + $0x120] sm:$0xff]  ;;  %v8298_v26 = vld [vmem:[%s15617_s7 + $0x2d8] sm:$0xff] }
 0x84c   : > { %9943 = vmatprep.subr.mxu1 %v8224_v45  ;;  %9965 = vmatpush3.msra.mxu0 %v8247_v17  ;;  %v8258_v45 = vld [vmem:[%s15617_s7 + $0x198] sm:$0xff] }
 0x84d   : > { %9944 = vmatpush3.msra.mxu1 %v8208_v36  ;;  %9966 = vmatprep.subr.mxu0 %v8262_v28  ;;  %v8242_v36 = vld [vmem:[%s15617_s7 + $0x118] sm:$0xff] }
 0x84e   : > { %9945 = vmatprep.subr.mxu1 %v8223_v18  ;;  %9967 = vmatpush3.msra.mxu0 %v8246_v23  ;;  %v8257_v18 = vld [vmem:[%s15617_s7 + $0x190] sm:$0xff]  ;;  %v8282_v17 = vld [vmem:[%s15617_s7 + $0x258] sm:$0xff] }
 0x84f   : > { %9946 = vmatpush3.msra.mxu1 %v8207_v56  ;;  %9968 = vmatprep.subr.mxu0 %v8261_v42  ;;  %v8256_v56 = vld [vmem:[%s15617_s7 + $0x188] sm:$0xff]  ;;  %v8281_v42 = vld [vmem:[%s15617_s7 + $0x250] sm:$0xff] }
 0x850   : > { %9985 = vmatprep.subr.mxu1 %v8302_v55  ;;  %9969 = vmatpush3.msra.mxu0 %v8245_v30  ;;  %v8239_v55 = vld [vmem:[%s15617_s7 + $0x100] sm:$0xff] }
 0x851   : > { %9970 = vmatprep.subr.mxu0 %v8260_v11  ;;  %v8296_v11 = vld [vmem:[%s15617_s7 + $0x2c8] sm:$0xff] }
 0x852   : > { %9971 = vmatpush3.msra.mxu0 %v8244_v8 }
 0x853   : > { %9972 = vmatprep.subr.mxu0 %v8259_v48  ;;  %v8280_v48 = vld [vmem:[%s15617_s7 + $0x248] sm:$0xff] }
 0x854   : > { %9973 = vmatpush3.msra.mxu0 %v8243_v4 }
 0x855   : > { %9974 = vmatprep.subr.mxu0 %v8258_v45  ;;  %v8295_v45 = vld [vmem:[%s15617_s7 + $0x2c0] sm:$0xff] }
 0x856   : > { %9975 = vmatpush3.msra.mxu0 %v8242_v36  ;;  %v8279_v36 = vld [vmem:[%s15617_s7 + $0x240] sm:$0xff] }
 0x857   : > { %9976 = vmatprep.subr.mxu0 %v8257_v18  ;;  %v8294_v18 = vld [vmem:[%s15617_s7 + $0x2b8] sm:$0xff] }
 0x858   : > { %9977 = vmatpush3.msra.mxu0 %v8241_v1  ;;  %v8278_v1 = vld [vmem:[%s15617_s7 + $0x238] sm:$0xff] }
 0x859   : > { %9978 = vmatprep.subr.mxu0 %v8256_v56  ;;  %v8293_v56 = vld [vmem:[%s15617_s7 + $0x2b0] sm:$0xff] }
 0x85a   : > { %9979 = vmatpush3.msra.mxu0 %v8240_v34  ;;  %v8277_v34 = vld [vmem:[%s15617_s7 + $0x230] sm:$0xff] }
 0x85b   : > { %9980 = vmatprep.subr.mxu0 %v8255_v5  ;;  %v8292_v5 = vld [vmem:[%s15617_s7 + $0x2a8] sm:$0xff] }
 0x85c   : > { %9981 = vmatpush3.msra.mxu0 %v8239_v55  ;;  %v8276_v55 = vld [vmem:[%s15617_s7 + $0x228] sm:$0xff] }
 0x8fb   : > { %v15273_v2 = vpop.f32.mrf.mxu0 }
 0x8fc   : > { %v8109_v10 = vrot.slane %v15273_v2, 1  ;;  %v8123_v63 = vrot.slane %v15273_v2, 5  ;;  %v8113_v59 = vrot.slane %v15273_v2, 2  ;;  %v8127_v39 = vrot.slane %v15273_v2, 6 }
 0x8fd   : > { %v8117_v24 = vrot.slane %v15273_v2, 3  ;;  %v8131_v41 = vrot.slane %v15273_v2, 7  ;;  %v8096_v14 = vpop.f32.mrf.mxu0 }
 0x8fe   : > { %v10111_v50 = vpack.i.bf16 %v8109_v10, %v8123_v63  ;;  %v10116_v40 = vpack.i.bf16 %v8113_v59, %v8127_v39  ;;  %v8121_v39 = vrot.slane %v15273_v2, 4 }
 0x8ff   : > { %v15296_v13 = vpop.f32.mrf.mxu0  ;;  %v10121_v35 = vpack.i.bf16 %v8117_v24, %v8131_v41 }
 0x900   : > { %10112 = vrot.lane.b32.xlu0 %v10111_v50, %s15875_s17  ;;  %10117 = vrot.lane.b32.xlu1 %v10116_v40, %s15876_s22  ;;  %v8136_v53 = vrot.slane %v15296_v13, 1  ;;  %v8150_v29 = vrot.slane %v15296_v13, 5  ;;  %v8140_v47 = vrot.slane %v15296_v13, 2  ;;  %v8154_v52 = vrot.slane %v15296_v13, 6 }
 0x901   : > { %v8099_v58 = vpop.f32.mrf.mxu0  ;;  %v8144_v22 = vrot.slane %v15296_v13, 3  ;;  %v8158_v19 = vrot.slane %v15296_v13, 7 }
 0x902   : > { %v10126_v0 = vpack.i.bf16 %v8136_v53, %v8150_v29  ;;  %v10131_v60 = vpack.i.bf16 %v8140_v47, %v8154_v52  ;;  %v8301_v47 = vld [vmem:[%s15617_s7 + $0x2f0] sm:$0xff] }
 0x903   : > { %v15315_v21 = vpop.f32.mrf.mxu0  ;;  %v10136_v32 = vpack.i.bf16 %v8144_v22, %v8158_v19  ;;  %v8148_v22 = vrot.slane %v15296_v13, 4  ;;  %v8285_v19 = vld [vmem:[%s15617_s7 + $0x270] sm:$0xff] }
 0x904   : > { %10122 = vrot.lane.b32.xlu0 %v10121_v35, %s15877_s21  ;;  %10127 = vrot.lane.b32.xlu1 %v10126_v0, %s15875_s17  ;;  %v8175_v16 = vrot.slane %v15315_v21, 1  ;;  %v8189_v57 = vrot.slane %v15315_v21, 5  ;;  %v8179_v15 = vrot.slane %v15315_v21, 2  ;;  %v8193_v62 = vrot.slane %v15315_v21, 6 }
 0x905   : > { %v8104_v46 = vpop.f32.mrf.mxu0  ;;  %v8183_v6 = vrot.slane %v15315_v21, 3  ;;  %v8197_v20 = vrot.slane %v15315_v21, 7 }
 0x906   : > { %v10141_v9 = vpack.i.bf16 %v8175_v16, %v8189_v57  ;;  %v10146_v27 = vpack.i.bf16 %v8179_v15, %v8193_v62  ;;  %v8300_v15 = vld [vmem:[%s15617_s7 + $0x2e8] sm:$0xff] }
 0x907   : > { %v8105_v33 = vpop.f32.mrf.mxu0  ;;  %v10151_v12 = vpack.i.bf16 %v8183_v6, %v8197_v20  ;;  %v8284_v46 = vld [vmem:[%s15617_s7 + $0x268] sm:$0xff]  ;;  %v8187_v20 = vrot.slane %v15315_v21, 4 }
 0x908   : > { %10132 = vrot.lane.b32.xlu0 %v10131_v60, %s15876_s22  ;;  %10137 = vrot.lane.b32.xlu1 %v10136_v32, %s15877_s21 }
 0x909   : > { %v8106_v49 = vpop.f32.mrf.mxu0 }
 0x90c   : > { %10142 = vrot.lane.b32.xlu0 %v10141_v9, %s15875_s17  ;;  %10147 = vrot.lane.b32.xlu1 %v10146_v27, %s15876_s22  ;;  %v8283_v27 = vld [vmem:[%s15617_s7 + $0x260] sm:$0xff]  ;;  %s15575_s17 = scalar_lea.hbm %s15623_s13, %s9514_s24  ;;  %s8687_s22 = scalar_lea.sflag [#allocation3], %s431_s1 }
 0x910   : > { %10152 = vrot.lane.b32.xlu0 %v10151_v12, %s15877_s21  ;;  %v8297_v12 = vld [vmem:[%s15617_s7 + $0x2d0] sm:$0xff] }
 0x972   : > { %v10113_v43 = vpop.permute.xlu0 %10112  ;;  %v10118_v10 = vpop.permute.xlu1 %10117 }
 0x973   : > { %v10115_v63 = vunpack.i.h.bf16 %v10113_v43  ;;  %v10114_v59 = vunpack.i.l.bf16 %v10113_v43  ;;  %v10120_v37 = vunpack.i.h.bf16 %v10118_v10  ;;  %v10119_v24 = vunpack.i.l.bf16 %v10118_v10  ;;  %v8291_v43 = vld [vmem:[%s15617_s7 + $0x2a0] sm:$0xff] }
 0x974   : > { %v8275_v10 = vld [vmem:[%s15617_s7 + $0x220] sm:$0xff] }
 0x975   : > { %v8162_v41 = vsel %vm7127_vm5, %v15273_v2, %v10115_v63  ;;  %v8165_v14 = vsel %vm7127_vm5, %v8121_v39, %v10114_v59  ;;  %v8286_v2 = vld [vmem:[%s15617_s7 + $0x278] sm:$0xff] }
 0x976   : > { %v10123_v7 = vpop.permute.xlu0 %10122  ;;  %v10128_v50 = vpop.permute.xlu1 %10127  ;;  %v8163_v3 = vsel %vm2933_vm0, %v8162_v41, %v10120_v37  ;;  %v8166_v53 = vsel %vm2933_vm0, %v8165_v14, %v10119_v24  ;;  %v8290_v63 = vld [vmem:[%s15617_s7 + $0x298] sm:$0xff]  ;;  %v8289_v37 = vld [vmem:[%s15617_s7 + $0x290] sm:$0xff]  ;;  %v8288_v41 = vld [vmem:[%s15617_s7 + $0x288] sm:$0xff] }
 0x977   : > { %v10125_v40 = vunpack.i.h.bf16 %v10123_v7  ;;  %v10124_v61 = vunpack.i.l.bf16 %v10123_v7  ;;  %v10130_v29 = vunpack.i.h.bf16 %v10128_v50  ;;  %v10129_v51 = vunpack.i.l.bf16 %v10128_v50  ;;  %v8274_v59 = vld [vmem:[%s15617_s7 + $0x218] sm:$0xff]  ;;  %v8273_v24 = vld [vmem:[%s15617_s7 + $0x210] sm:$0xff]  ;;  %v8272_v7 = vld [vmem:[%s15617_s7 + $0x208] sm:$0xff] }
 0x979   : > { %v8164_v35 = vsel %vm7168_vm13, %v8163_v3, %v10125_v40  ;;  %v8167_v58 = vsel %vm7168_vm13, %v8166_v53, %v10124_v61  ;;  %v8168_v62 = vsel %vm7127_vm5, %v15296_v13, %v10130_v29  ;;  %v8171_v31 = vsel %vm7127_vm5, %v8148_v22, %v10129_v51  ;;  %v8287_v61 = vld [vmem:[%s15617_s7 + $0x280] sm:$0xff] }
 0x97a   : > { %8368 = vmatprep.mubr.f32.mxu1 %v8167_v58  ;;  %v10133_v0 = vpop.permute.xlu0 %10132  ;;  %v10138_v52 = vpop.permute.xlu1 %10137  ;;  %v8271_v3 = vld [vmem:[%s15617_s7 + $0x200] sm:$0xff]  ;;  %v11149_v51 = vmov 0.0   ;;  %v8524_v58 = vld [vmem:[%s15619_s9 + $0x28] sm:$0xff] }
 0x97b   : > { %8369 = vmatmul.mubr.f32.vlgmr.msra.gmra.mxu1 %v8164_v35  ;;  %v10135_v44 = vunpack.i.h.bf16 %v10133_v0  ;;  %v10134_v38 = vunpack.i.l.bf16 %v10133_v0  ;;  %v10140_v16 = vunpack.i.h.bf16 %v10138_v52  ;;  %v10139_v57 = vunpack.i.l.bf16 %v10138_v52  ;;  %10034 = vmatprep.subr.mxu0 %v11149_v51  ;;  %v8525_v35 = vld [vmem:[%s15619_s9 + $0x30] sm:$0xff]  ;;  %v8520_v52 = vld [vmem:[%s15619_s9 + $0x8] sm:$0xff]  ;;  %v8519_v22 = vld [vmem:[%s15619_s9] sm:$0xff] }
 0x97c   : > { %9986 = vmatpush3.msra.mxu1 %v8286_v2  ;;  %v8523_v2 = vld [vmem:[%s15619_s9 + $0x20] sm:$0xff]  ;;  %v8521_v0 = vld [vmem:[%s15619_s9 + $0x10] sm:$0xff] }
 0x97d   : > { %9987 = vmatprep.subr.mxu1 %v8301_v47  ;;  %v8169_v60 = vsel %vm2933_vm0, %v8168_v62, %v10135_v44  ;;  %v8172_v32 = vsel %vm2933_vm0, %v8171_v31, %v10134_v38  ;;  %v8522_v47 = vld [vmem:[%s15619_s9 + $0x18] sm:$0xff] }
 0x97e   : > { %9988 = vmatpush3.msra.mxu1 %v8285_v19  ;;  %v8170_v25 = vsel %vm7168_vm13, %v8169_v60, %v10140_v16  ;;  %v15429_v33 = vpop.permute.xlu0 %10142  ;;  %v15431_v13 = vpop.permute.xlu1 %10147  ;;  %v8173_v9 = vsel %vm7168_vm13, %v8172_v32, %v10139_v57 }
 0x97f   : > { %9989 = vmatprep.subr.mxu1 %v8300_v15  ;;  %v10144_v6 = vunpack.i.l.bf16 %v15429_v33  ;;  %8438 = vmatprep.mubr.f32.mxu0 %v8173_v9  ;;  %v10149_v49 = vunpack.i.l.bf16 %v15431_v13  ;;  %v10145_v39 = vunpack.i.h.bf16 %v15429_v33  ;;  %v10150_v14 = vunpack.i.h.bf16 %v15431_v13  ;;  %v8303_v15 = vld [vmem:[%s15618_s8] sm:$0x1] }
 0x980   : > { %9990 = vmatpush3.msra.mxu1 %v8284_v46  ;;  %8439 = vmatmul.mubr.f32.vlgmr.msra.gmra.mxu0 %v8170_v25 }
 0x981   : > { %9991 = vmatprep.subr.mxu1 %v8299_v54  ;;  %v8204_v28 = vsel %vm7127_vm5, %v8187_v20, %v10144_v6  ;;  %v8201_v50 = vsel %vm7127_vm5, %v15315_v21, %v10145_v39  ;;  %v8526_v21 = vld [vmem:[%s15619_s9 + $0x38] sm:$0xff]  ;;  %10050 = vmatprep.mubr.msk.f32.mxu0 %vm11150_vm6, %v11149_v51  ;;  %v8608_v20 = vld [vmem:[%s15621_s11 + $0x10] sm:$0xff] }
 0x982   : > { %9992 = vmatpush3.msra.mxu1 %v8283_v27  ;;  %v10153_v23 = vpop.permute.xlu0 %10152  ;;  %v8205_v8 = vsel %vm2933_vm0, %v8204_v28, %v10149_v49  ;;  %v8202_v53 = vsel %vm2933_vm0, %v8201_v50, %v10150_v14  ;;  %10035 = vmatpush3.msra.mxu0 %v8526_v21  ;;  %v8609_v6 = vld [vmem:[%s15621_s11 + $0x18] sm:$0xff]  ;;  %v8606_v49 = vld [vmem:[%s15621_s11] sm:$0xff] }
 0x983   : > { %9993 = vmatprep.subr.mxu1 %v8298_v26  ;;  %v10154_v30 = vunpack.i.l.bf16 %v10153_v23  ;;  %v10155_v40 = vunpack.i.h.bf16 %v10153_v23  ;;  %10036 = vmatprep.subr.mxu0 %v11149_v51  ;;  %v8607_v26 = vld [vmem:[%s15621_s11 + $0x8] sm:$0xff] }
 0x984   : > { %9994 = vmatpush3.msra.mxu1 %v8282_v17  ;;  %10037 = vmatpush3.msra.mxu0 %v8525_v35  ;;  %v8527_v17 = vld [vmem:[%s15620_s10] sm:$0x1] }
 0x985   : > { %9995 = vmatprep.subr.mxu1 %v8297_v12  ;;  %v8206_v4 = vsel %vm7168_vm13, %v8205_v8, %v10154_v30  ;;  %v8203_v29 = vsel %vm7168_vm13, %v8202_v53, %v10155_v40  ;;  %10038 = vmatprep.subr.mxu0 %v11149_v51 }
 0x986   : > { %9996 = vmatpush3.msra.mxu1 %v8281_v42  ;;  %8508 = vmatprep.mubr.f32.mxu1 %v8206_v4 }
 0x987   : > { %9997 = vmatprep.subr.mxu1 %v8296_v11  ;;  %10039 = vmatpush3.msra.mxu0 %v8524_v58 }
 0x988   : > { %9998 = vmatpush3.msra.mxu1 %v8280_v48  ;;  %10040 = vmatprep.subr.mxu0 %v11149_v51  ;;  %v8610_v48 = vld [vmem:[%s15622_s12] sm:$0x1] }
 0x989   : > { %9999 = vmatprep.subr.mxu1 %v8295_v45  ;;  %10041 = vmatpush3.msra.mxu0 %v8523_v2 }
 0x98a   : > { %10000 = vmatpush3.msra.mxu1 %v8279_v36  ;;  %10042 = vmatprep.subr.mxu0 %v11149_v51 }
 0x98b   : > { %10001 = vmatprep.subr.mxu1 %v8294_v18  ;;  %10043 = vmatpush3.msra.mxu0 %v8522_v47 }
 0x98c   : > { %10002 = vmatpush3.msra.mxu1 %v8278_v1  ;;  %10044 = vmatprep.subr.mxu0 %v11149_v51 }
 0x98d   : > { %10003 = vmatprep.subr.mxu1 %v8293_v56  ;;  %10045 = vmatpush3.msra.mxu0 %v8521_v0 }
 0x98e   : > { %10004 = vmatpush3.msra.mxu1 %v8277_v34  ;;  %10046 = vmatprep.subr.mxu0 %v11149_v51 }
 0x98f   : > { %10005 = vmatprep.subr.mxu1 %v8292_v5  ;;  %10047 = vmatpush3.msra.mxu0 %v8520_v52 }
 0x990   : > { %10006 = vmatpush3.msra.mxu1 %v8276_v55  ;;  %10048 = vmatprep.subr.mxu0 %v11149_v51 }
 0x991   : > { %10007 = vmatprep.subr.mxu1 %v8291_v43  ;;  %10049 = vmatpush3.msra.mxu0 %v8519_v22 }
 0x992   : > { %10008 = vmatpush3.msra.mxu1 %v8275_v10  ;;  %10053 = vmatprep.subr.mxu0 %v11149_v51 }
 0x993   : > { %10009 = vmatprep.subr.mxu1 %v8290_v63 }
 0x994   : > { %10010 = vmatpush3.msra.mxu1 %v8274_v59 }
 0x995   : > { %10011 = vmatprep.subr.mxu1 %v8289_v37 }
 0x996   : > { %10012 = vmatpush3.msra.mxu1 %v8273_v24 }
 0x997   : > { %10013 = vmatprep.subr.mxu1 %v8288_v41 }
 0x998   : > { %10014 = vmatpush3.msra.mxu1 %v8272_v7 }
 0x999   : > { %10015 = vmatprep.subr.mxu1 %v8287_v61 }
 0x99a   : > { %10016 = vmatpush3.msra.mxu1 %v8271_v3 }
 0x99b   : > { %8509 = vmatmul.mubr.f32.vlgmr.msra.gmra.mxu1 %v8203_v29 }
 0xa3b   : > { %v9947_v19 = vpop.f32.mrf.mxu1 }
 0xa3d   : > { %v9948_v38 = vpop.f32.mrf.mxu1 }
 0xa3e   : > { %v9949_v57 = vadd.f32 %v9948_v38, %v9947_v19 }
 0xa40   : > { %v9982_v44 = vpop.f32.mrf.mxu0  ;;  %v8371_v46 = vadd.f32 %v9949_v57, %v8303_v15 }
 0xa42   : > { %v9983_v16 = vpop.f32.mrf.mxu0 }
 0xa43   : > { %v9984_v62 = vadd.f32 %v9983_v16, %v9982_v44 }
 0xa45   : > { %v8441_v32 = vadd.f32 %v9984_v62, %v8371_v46 }
 0xa5b   : > { %v10017_v31 = vpop.f32.mrf.mxu1 }
 0xa5d   : > { %v10018_v60 = vpop.f32.mrf.mxu1 }
 0xa5e   : > { %v10019_v54 = vadd.f32 %v10018_v60, %v10017_v31 }
 0xa60   : > { %v8511_v25 = vadd.f32 %v10019_v54, %v8441_v32 }
 0xa62   : > { %v8515_v33 = vmul.f32 1.442695, %v8511_v25  ;;  %vm8514_vm13 = vcmp.gt.f32.partialorder %v8511_v25, 0.0 }
 0xa64   : > { %11076 = vpow2.f32 %v8515_v33 }
 0xa71   : > { %v11077_v13 = vpop.eup %11076 }
 0xa72   : > { %v9510_v9 = vadd.f32 -1.0, %v11077_v13 }
 0xa74   : > { %v8518_v27 = vsel %vm8514_vm13, %v8511_v25, %v9510_v9 }
 0xa75   : > { %10051 = vmatmul.mubr.msk.f32.vlgmr.msra.gmra.mxu0 %vm2933_vm0, %v8518_v27 }
 0xa76   : > { %10061 = vmatprep.mubr.msk.f32.mxu0 %vm11150_vm6, %v11149_v51  ;;  %10054 = vmatpush3.msra.mxu0 %v8609_v6 }
 0xa77   : > { %10055 = vmatprep.subr.mxu0 %v11149_v51 }
 0xa78   : > { %10056 = vmatpush3.msra.mxu0 %v8608_v20 }
 0xa79   : > { %10057 = vmatprep.subr.mxu0 %v11149_v51 }
 0xa7a   : > { %10058 = vmatpush3.msra.mxu0 %v8607_v26 }
 0xa7b   : > { %10059 = vmatprep.subr.mxu0 %v11149_v51 }
 0xa7c   : > { %10060 = vmatpush3.msra.mxu0 %v8606_v49 }
 0xb35   : > { %v8597_v28 = vpop.f32.mrf.mxu0 }
 0xb36   : > { %v8598_v12 = vadd.f32 %v8597_v28, %v8527_v17 }
 0xb37   : > { %v10052_v23 = vpop.f32.mrf.mxu0 }
 0xb38   : > { %v8602_v42 = vmul.f32 1.442695, %v8598_v12  ;;  %vm8601_vm0 = vcmp.gt.f32.partialorder %v8598_v12, 0.0 }
 0xb3a   : > { %11078 = vpow2.f32 %v8602_v42 }
 0xb47   : > { %v11079_v30 = vpop.eup %11078 }
 0xb48   : > { %v9512_v11 = vadd.f32 -1.0, %v11079_v30 }
 0xb4a   : > { %v8605_v8 = vsel %vm8601_vm0, %v8598_v12, %v9512_v11 }
 0xb4b   : > { %10062 = vmatmul.mubr.msk.f32.vlgmr.msra.gmra.mxu0 %vm7127_vm5, %v8605_v8 }
 0xc0b   : > { %v8680_v4 = vpop.f32.mrf.mxu0 }
 0xc0c   : > { %v8681_v45 = vadd.f32 %v8680_v4, %v8610_v48 }
 0xc0d   : > { %v10063_v36 = vpop.f32.mrf.mxu0 }
 0xc0e   : > { %8685 = vst.msk [vmem:[%s432_s23] sm:$0x1] %vm8684_vm1, %v8681_v45 }
 0xc0f   : > { %11095 = shalt.err (!%p11092_p3)
}
 0xc10   : > { %s11096_s24 = scalar_lea.hbm %s15575_s17, 16  ;;  %s11100_s21 = scalar_lea.hbm %s15623_s13, 32 }
 0xc11   : > { %p11097_p4 = scmp.ne.s32.totalorder %s15575_s17, %s11096_s24  ;;  %p11101_p9 = scmp.lt.s32.totalorder %s15575_s17, %s15623_s13 }
 0xc12   : > { %p11102_p10 = scmp.lt.s32.totalorder %s11100_s21, %s11096_s24 }
 0xc13   : > { %p11098_p7 = pnand %p11097_p4, %p11260_p5 }
 0xc14   : > { %p11103_p11 = por %p11102_p10, %p11101_p9 }
 0xc15   : > { %p11099_p8 = pneg %p11098_p7 }
 0xc17   : > { %p11104_p12 = pnand %p11103_p11, %p11099_p8 }
 0xc19   : > { %11107 = shalt.err (!%p11104_p12)
}
 0xc1a   : > { %10065 = dma.vmem_to_hbm [thread:$0]  (%p11260_p5), %s8700_s20, 16, %s15575_s17, %s8687_s22  }
 0xc1b PF: > { %p10071_p13 = scmp.ge.s32.totalorder %s11142_s28, 2  ;;  %s8711_s16 = sand.u32 1, %s11130_s25  }
 0xc1c   : > { %s8712_s0 = scalar_lea.sflag [#allocation3], %s8711_s16 }
 0xc1d   : > { %p10068_p0 = pnand %p10071_p13, %p11264_p6 }
 0xc1f   : > { %p10069_p1 = pneg %p10068_p0 }
 0xc21   : > { %11125 = dma.done.wait (%p10069_p1), %s8712_s0, 16  }
 0xc22   : > { %11127 = vsyncadd (%p10069_p1), %s8712_s0, 4294967280  ;;  %s15878_s30 = sld [smem:[#allocation5_spill]]  ;;  %p23_p2 = scmp.ge.s32.totalorder %s11247_s14, 4  }
 0xc23   : > { %s15879_s25 = smov %s11134_s26  ;;  %s15880_s26 = smov %s11138_s27 }
 0xc24   : > { %s15882_s28 = smov %s11247_s14  ;;  %25 = sbr.rel (!%p23_p2) target bundleno = 6 (0x6), region = 107 }
 0xc28   : > { %s15881_s27 = smov %s15878_s30 }
 0xc29   :  { %8716 = vsyncpa [#allocation3], 1 }
 0xc2a   :  { %8718 = vsyncpa [#allocation3 + $0x1], 1 }

</bundles_post_ra>
